<compile_context>
chip_gen: v7x
topology: tpu7x:2x2x1
jax: 0.10.0
libtpu: 0.0.40
codegen_flags: <defaults>
</compile_context>

<pallas_src>
import math

import jax
import jax.numpy as jnp
from jax.experimental import pallas as pl
from jax.experimental.pallas import tpu as pltpu

CFG = [32, "M", 64, "M", 128, "M", 512, "M"]
IN_CHANNELS = 3
NUM_CLASSES = 10
IMG = 16  # 16x16 input -> 1x1x512 after 4 pools -> flattened feature = 512

# Channels and input spatial side of each conv stage.
C1, C2, C3, C4 = 32, 64, 128, 512
S1, S2, S3, S4 = 16, 8, 4, 2
# Flat zero-padded layouts for stages 2..4: rows q = h*pitch + w over the
# (S+2)x(S+2) padded grid.
P2, P3, P4 = S2 + 2, S3 + 2, S4 + 2                 # pitches 10, 6, 4
N2, N3, N4 = P2 * P2, P3 * P3, P4 * P4               # padded rows/img 100, 36, 16
# Per-image row strides inside the batch-stacked buffers, rounded up to a
# sublane multiple (8) so image boundaries stay aligned.
ST1 = S1 * S1                                        # 256
ST2 = ((N2 + 7) // 8) * 8                            # 104
ST3 = ((N3 + 7) // 8) * 8                            # 40
ST4 = ((N4 + 7) // 8) * 8                            # 16
# Trailing zero rows so every im2col tap slice [off, off + BT*ST) stays in
# bounds (max tap offset = 2*pitch + 2), rounded to a sublane multiple.
TAIL2 = ((2 * P2 + 2 + 7) // 8) * 8                  # 24
TAIL3 = ((2 * P3 + 2 + 7) // 8) * 8                  # 16
TAIL4 = ((2 * P4 + 2 + 7) // 8) * 8                  # 16


# --------------------------------------------------------------------------
# In-kernel building blocks
# --------------------------------------------------------------------------
def _im2col_3x3(src_ref, dst_ref, *, cin, pitch, m):
    """Build a (m, 9*cin) im2col buffer from a flat zero-padded activation.

    src row q = b*stride + h*pitch + w (padded grid).  dst column block
    t = dy*3 + dx holds tap (dy, dx): dst[r, t*cin + c] = src[r + dy*pitch + dx, c].
    One K = 9*cin MXU dot then replaces 9 small-K tap dots + 8 accumulate adds.
    Rows whose local q is not a valid output position pick up harmless garbage
    (possibly from the next image's stripe); those output rows are discarded.
    """
    for dy in range(3):
        for dx in range(3):
            t = dy * 3 + dx
            off = dy * pitch + dx
            dst_ref[:, t * cin:(t + 1) * cin] = src_ref[pl.ds(off, m), :]


def _maxpool2x2_stacked(src_ref, dst_ref, *, bt, side, src_pitch, src_stride,
                        dst_pitch, dst_stride, dst_off):
    """Fused 2x2/stride-2 max pool over a batch-stacked flat activation.

    Reads conv-output rows b*src_stride + h*src_pitch + w (valid h, w < side)
    and writes pooled rows to b*dst_stride + (i+dst_off)*dst_pitch + dst_off,
    i.e. the interior of the next stage's zero-padded flat buffer.
    """
    half = side // 2
    for b in range(bt):
        for i in range(half):
            r0 = b * src_stride + 2 * i * src_pitch   # image row 2i
            r1 = r0 + src_pitch                       # image row 2i + 1
            if half == 1:
                e00 = src_ref[pl.ds(r0, 1), :]
                e01 = src_ref[pl.ds(r0 + 1, 1), :]
                e10 = src_ref[pl.ds(r1, 1), :]
                e11 = src_ref[pl.ds(r1 + 1, 1), :]
            else:
                e00 = src_ref[pl.ds(r0, half, stride=2), :]       # (2i,   even w)
                e01 = src_ref[pl.ds(r0 + 1, half, stride=2), :]   # (2i,   odd  w)
                e10 = src_ref[pl.ds(r1, half, stride=2), :]       # (2i+1, even w)
                e11 = src_ref[pl.ds(r1 + 1, half, stride=2), :]   # (2i+1, odd  w)
            pooled = jnp.maximum(jnp.maximum(e00, e01), jnp.maximum(e10, e11))
            row = b * dst_stride + (i + dst_off) * dst_pitch + dst_off
            dst_ref[pl.ds(row, half), :] = pooled.astype(dst_ref.dtype)


# --------------------------------------------------------------------------
# Fused forward kernel (BT batch elements per grid step)
# --------------------------------------------------------------------------
def _make_vgg_kernel(bt):
    m2, m3, m4 = bt * ST2, bt * ST3, bt * ST4

    def kernel(
        xcol_ref,
        w1_ref, b1_ref, w2_ref, b2_ref, w3_ref, b3_ref, w4_ref, b4_ref,
        wf1_ref, bf1_ref, wf2_ref, bf2_ref, wf3_ref, bf3_ref,
        o_ref,
        a1, p2, ic2, a2, p3, ic3, a3, p4, ic4, a4, feat,
    ):
        # Zero the padded activation buffers each step: the 3x3 halo must read
        # zeros.  (A pl.when(program_id==0) zero-once guard would be wrong on
        # v7x when the "parallel" axis is sharded across the two TensorCores.)
        p2[...] = jnp.zeros_like(p2)
        p3[...] = jnp.zeros_like(p3)
        p4[...] = jnp.zeros_like(p4)

        # --- stage 1: conv1 as one im2col dot (M = bt*256, K = 27) ---
        c = jnp.dot(xcol_ref[...], w1_ref[...], preferred_element_type=jnp.float32)
        a1[...] = jnp.maximum(c + b1_ref[...], 0.0)
        _maxpool2x2_stacked(a1, p2, bt=bt, side=S1, src_pitch=S1, src_stride=ST1,
                            dst_pitch=P2, dst_stride=ST2, dst_off=1)

        # --- stage 2: conv2 as one im2col dot (K = 288) ---
        _im2col_3x3(p2, ic2, cin=C1, pitch=P2, m=m2)
        c = jnp.dot(ic2[...], w2_ref[...], preferred_element_type=jnp.float32)
        a2[...] = jnp.maximum(c + b2_ref[...], 0.0)
        _maxpool2x2_stacked(a2, p3, bt=bt, side=S2, src_pitch=P2, src_stride=ST2,
                            dst_pitch=P3, dst_stride=ST3, dst_off=1)

        # --- stage 3: conv3 (K = 576) ---
        _im2col_3x3(p3, ic3, cin=C2, pitch=P3, m=m3)
        c = jnp.dot(ic3[...], w3_ref[...], preferred_element_type=jnp.float32)
        a3[...] = jnp.maximum(c + b3_ref[...], 0.0)
        _maxpool2x2_stacked(a3, p4, bt=bt, side=S3, src_pitch=P3, src_stride=ST3,
                            dst_pitch=P4, dst_stride=ST4, dst_off=1)

        # --- stage 4: conv4 (K = 1152; ~63% of conv FLOPs) ---
        _im2col_3x3(p4, ic4, cin=C3, pitch=P4, m=m4)
        c = jnp.dot(ic4[...], w4_ref[...], preferred_element_type=jnp.float32)
        a4[...] = jnp.maximum(c + b4_ref[...], 0.0)
        _maxpool2x2_stacked(a4, feat, bt=bt, side=S4, src_pitch=P4, src_stride=ST4,
                            dst_pitch=1, dst_stride=1, dst_off=0)

        # --- classifier head, batched over bt images: (bt,512)x(512,512) ---
        # (Dropout->Linear->ReLU) x2 + last Linear; dropout is identity at eval.
        h = jnp.dot(feat[...], wf1_ref[...], preferred_element_type=jnp.float32)
        h = jnp.maximum(h + bf1_ref[...], 0.0).astype(jnp.bfloat16)
        h = jnp.dot(h, wf2_ref[...], preferred_element_type=jnp.float32)
        h = jnp.maximum(h + bf2_ref[...], 0.0).astype(jnp.bfloat16)
        logits = (
            jnp.dot(h, wf3_ref[...], preferred_element_type=jnp.float32) + bf3_ref[...]
        )
        o_ref[0] = logits

    return kernel


# --------------------------------------------------------------------------
# Wrapper
# --------------------------------------------------------------------------
def _pick_bt(batch):
    """Images per grid step: big enough to amortize MXU weight pushes and
    per-step overhead, while keeping >= 2 grid steps (v7x megacore) when the
    batch is big enough to afford it."""
    if batch >= 16:
        return 8
    if batch >= 8:
        return 4
    return max(batch, 1)            # tiny batch: a single grid step


@jax.jit
def vgg_forward(x_nchw, conv_params, fc_params):
    B = x_nchw.shape[0]
    BT = _pick_bt(B)
    G = -(-B // BT)                  # number of grid steps
    Bp = G * BT                      # padded batch

    # NCHW -> NHWC, pad batch to a multiple of BT, zero-pad the halo and build
    # the conv1 im2col (K = 9*3 = 27) once in the wrapper.
    x = jnp.transpose(x_nchw, (0, 2, 3, 1)).astype(jnp.float32)   # (B, 16, 16, 3)
    if Bp != B:
        x = jnp.pad(x, ((0, Bp - B), (0, 0), (0, 0), (0, 0)))
    xp = jnp.pad(x, ((0, 0), (1, 1), (1, 1), (0, 0)))
    cols = [xp[:, dy:dy + S1, dx:dx + S1, :] for dy in range(3) for dx in range(3)]
    xcol = jnp.concatenate(cols, axis=-1).reshape(Bp * ST1, 9 * IN_CHANNELS)
    xcol = xcol.astype(jnp.bfloat16)

    def w2d(w):  # HWIO (3,3,cin,cout) -> (9*cin, cout), bf16 for the MXU
        return w.reshape(-1, w.shape[-1]).astype(jnp.bfloat16)

    def b2d(b):  # bias -> (1, cout) f32
        return b.reshape(1, -1).astype(jnp.float32)

    (w1, b1), (w2, b2), (w3, b3), (w4, b4) = conv_params
    (wf1, bf1), (wf2, bf2), (wf3, bf3) = fc_params

    args = (
        xcol,
        w2d(w1), b2d(b1), w2d(w2), b2d(b2), w2d(w3), b2d(b3), w2d(w4), b2d(b4),
        wf1.astype(jnp.bfloat16), b2d(bf1),
        wf2.astype(jnp.bfloat16), b2d(bf2),
        wf3.astype(jnp.bfloat16), b2d(bf3),
    )

    in_specs = [pl.BlockSpec((BT * ST1, 9 * IN_CHANNELS), lambda g: (g, 0))]
    # Weights / biases: whole array VMEM-resident, constant index map.
    in_specs += [pl.BlockSpec(a.shape, lambda g: (0, 0)) for a in args[1:]]

    out = pl.pallas_call(
        _make_vgg_kernel(BT),
        out_shape=jax.ShapeDtypeStruct((G, BT, NUM_CLASSES), jnp.float32),
        grid=(G,),
        in_specs=in_specs,
        out_specs=pl.BlockSpec((1, BT, NUM_CLASSES), lambda g: (g, 0, 0)),
        scratch_shapes=[
            pltpu.VMEM((BT * ST1, C1), jnp.float32),           # a1: conv1+ReLU
            pltpu.VMEM((BT * ST2 + TAIL2, C1), jnp.bfloat16),  # p2: padded conv2 input
            pltpu.VMEM((BT * ST2, 9 * C1), jnp.bfloat16),      # ic2: conv2 im2col
            pltpu.VMEM((BT * ST2, C2), jnp.float32),           # a2: conv2+ReLU
            pltpu.VMEM((BT * ST3 + TAIL3, C2), jnp.bfloat16),  # p3: padded conv3 input
            pltpu.VMEM((BT * ST3, 9 * C2), jnp.bfloat16),      # ic3: conv3 im2col
            pltpu.VMEM((BT * ST3, C3), jnp.float32),           # a3: conv3+ReLU
            pltpu.VMEM((BT * ST4 + TAIL4, C3), jnp.bfloat16),  # p4: padded conv4 input
            pltpu.VMEM((BT * ST4, 9 * C3), jnp.bfloat16),      # ic4: conv4 im2col
            pltpu.VMEM((BT * ST4, C4), jnp.float32),           # a4: conv4+ReLU
            pltpu.VMEM((BT, C4), jnp.bfloat16),                # feat: pooled 1x1x512
        ],
        compiler_params=pltpu.CompilerParams(dimension_semantics=("parallel",)),
    )(*args)
    return out.reshape(Bp, NUM_CLASSES)[:B]


# --------------------------------------------------------------------------
# Parameter init (deterministic, matching the PyTorch __init__ recipe)
# --------------------------------------------------------------------------
def init_conv_params(key):
    params = []
    cin = IN_CHANNELS
    for v in CFG:
        if v == "M":
            continue
        key, k = jax.random.split(key)
        n = 3 * 3 * v  # kernel_size[0] * kernel_size[1] * out_channels
        w = jax.random.normal(k, (3, 3, cin, v), jnp.float32) * math.sqrt(2.0 / n)
        b = jnp.zeros((v,), jnp.float32)
        params.append((w, b))
        cin = v
    return params, key


def init_linear(key, fin, fout):
    k1, k2 = jax.random.split(key)
    bound = 1.0 / math.sqrt(fin)  # PyTorch nn.Linear default init range
    w = jax.random.uniform(k1, (fin, fout), jnp.float32, -bound, bound)
    b = jax.random.uniform(k2, (fout,), jnp.float32, -bound, bound)
    return w, b


if __name__ == "__main__":
    key = jax.random.PRNGKey(0)
    key, kx = jax.random.split(key)
    x = jax.random.normal(kx, (2, IN_CHANNELS, IMG, IMG), jnp.float32)

    conv_params, key = init_conv_params(key)
    key, k1, k2, k3 = jax.random.split(key, 4)
    fc_params = [
        init_linear(k1, 512, 512),          # classifier Linear(512, 512)
        init_linear(k2, 512, 512),          # classifier Linear(512, 512)
        init_linear(k3, 512, NUM_CLASSES),  # last_layer Linear(512, 10)
    ]

    out = vgg_forward(x, conv_params, fc_params)
    out = jax.block_until_ready(out)
    assert out.shape == (2, NUM_CLASSES) and out.dtype == jnp.float32
    assert bool(jnp.all(jnp.isfinite(out)))
    print("KERNEL_OK")
</pallas_src>

<mosaic_0001>
module attributes {stable_mosaic.version = 11 : i64} {
  func.func @kernel(%arg0: i32, %arg1: memref<512x27xbf16, #tpu.memory_space<vmem>>, %arg2: memref<27x32xbf16, #tpu.memory_space<vmem>>, %arg3: memref<1x32xf32, #tpu.memory_space<vmem>>, %arg4: memref<288x64xbf16, #tpu.memory_space<vmem>>, %arg5: memref<1x64xf32, #tpu.memory_space<vmem>>, %arg6: memref<576x128xbf16, #tpu.memory_space<vmem>>, %arg7: memref<1x128xf32, #tpu.memory_space<vmem>>, %arg8: memref<1152x512xbf16, #tpu.memory_space<vmem>>, %arg9: memref<1x512xf32, #tpu.memory_space<vmem>>, %arg10: memref<512x512xbf16, #tpu.memory_space<vmem>>, %arg11: memref<1x512xf32, #tpu.memory_space<vmem>>, %arg12: memref<512x512xbf16, #tpu.memory_space<vmem>>, %arg13: memref<1x512xf32, #tpu.memory_space<vmem>>, %arg14: memref<512x10xbf16, #tpu.memory_space<vmem>>, %arg15: memref<1x10xf32, #tpu.memory_space<vmem>>, %arg16: memref<1x2x10xf32, #tpu.memory_space<vmem>>, %arg17: memref<512x32xf32, #tpu.memory_space<vmem>>, %arg18: memref<232x32xbf16, #tpu.memory_space<vmem>>, %arg19: memref<208x288xbf16, #tpu.memory_space<vmem>>, %arg20: memref<208x64xf32, #tpu.memory_space<vmem>>, %arg21: memref<96x64xbf16, #tpu.memory_space<vmem>>, %arg22: memref<80x576xbf16, #tpu.memory_space<vmem>>, %arg23: memref<80x128xf32, #tpu.memory_space<vmem>>, %arg24: memref<48x128xbf16, #tpu.memory_space<vmem>>, %arg25: memref<32x1152xbf16, #tpu.memory_space<vmem>>, %arg26: memref<32x512xf32, #tpu.memory_space<vmem>>, %arg27: memref<2x512xbf16, #tpu.memory_space<vmem>>) attributes {dimension_semantics = [#tpu.dimension_semantics<parallel>], iteration_bounds = array<i64: 1>, scalar_prefetch = 0 : i64, scratch_operands = 11 : i64, tpu.core_type = #tpu.core_type<tc>, window_params = [{transform_indices = @transform_0, window_bounds = array<i64: 512, 27>}, {pipeline_mode = #tpu.pipeline_mode<synchronous>, transform_indices = @transform_1, window_bounds = array<i64: 27, 32>}, {pipeline_mode = #tpu.pipeline_mode<synchronous>, transform_indices = @transform_2, window_bounds = array<i64: 1, 32>}, {pipeline_mode = #tpu.pipeline_mode<synchronous>, transform_indices = @transform_3, window_bounds = array<i64: 288, 64>}, {pipeline_mode = #tpu.pipeline_mode<synchronous>, transform_indices = @transform_4, window_bounds = array<i64: 1, 64>}, {pipeline_mode = #tpu.pipeline_mode<synchronous>, transform_indices = @transform_5, window_bounds = array<i64: 576, 128>}, {pipeline_mode = #tpu.pipeline_mode<synchronous>, transform_indices = @transform_6, window_bounds = array<i64: 1, 128>}, {pipeline_mode = #tpu.pipeline_mode<synchronous>, transform_indices = @transform_7, window_bounds = array<i64: 1152, 512>}, {pipeline_mode = #tpu.pipeline_mode<synchronous>, transform_indices = @transform_8, window_bounds = array<i64: 1, 512>}, {pipeline_mode = #tpu.pipeline_mode<synchronous>, transform_indices = @transform_9, window_bounds = array<i64: 512, 512>}, {pipeline_mode = #tpu.pipeline_mode<synchronous>, transform_indices = @transform_10, window_bounds = array<i64: 1, 512>}, {pipeline_mode = #tpu.pipeline_mode<synchronous>, transform_indices = @transform_11, window_bounds = array<i64: 512, 512>}, {pipeline_mode = #tpu.pipeline_mode<synchronous>, transform_indices = @transform_12, window_bounds = array<i64: 1, 512>}, {pipeline_mode = #tpu.pipeline_mode<synchronous>, transform_indices = @transform_13, window_bounds = array<i64: 512, 10>}, {pipeline_mode = #tpu.pipeline_mode<synchronous>, transform_indices = @transform_14, window_bounds = array<i64: 1, 10>}, {transform_indices = @transform_15, window_bounds = array<i64: 1, 2, 10>}]} {
    %cst = arith.constant 0.000000e+00 : bf16
    %0 = vector.broadcast %cst : bf16 to vector<232x32xbf16>
    %c0 = arith.constant 0 : index
    %c0_0 = arith.constant 0 : index
    %1 = vector.load %arg18[%c0, %c0_0] : memref<232x32xbf16, #tpu.memory_space<vmem>>, vector<232x32xbf16>
    tpu.vector_store %arg18[%c0, %c0_0], %0 {strides = array<i32>} : memref<232x32xbf16, #tpu.memory_space<vmem>>, vector<232x32xbf16>,
    %cst_1 = arith.constant 0.000000e+00 : bf16
    %2 = vector.broadcast %cst_1 : bf16 to vector<96x64xbf16>
    %c0_2 = arith.constant 0 : index
    %c0_3 = arith.constant 0 : index
    %3 = vector.load %arg21[%c0_2, %c0_3] : memref<96x64xbf16, #tpu.memory_space<vmem>>, vector<96x64xbf16>
    tpu.vector_store %arg21[%c0_2, %c0_3], %2 {strides = array<i32>} : memref<96x64xbf16, #tpu.memory_space<vmem>>, vector<96x64xbf16>,
    %cst_4 = arith.constant 0.000000e+00 : bf16
    %4 = vector.broadcast %cst_4 : bf16 to vector<48x128xbf16>
    %c0_5 = arith.constant 0 : index
    %c0_6 = arith.constant 0 : index
    %5 = vector.load %arg24[%c0_5, %c0_6] : memref<48x128xbf16, #tpu.memory_space<vmem>>, vector<48x128xbf16>
    tpu.vector_store %arg24[%c0_5, %c0_6], %4 {strides = array<i32>} : memref<48x128xbf16, #tpu.memory_space<vmem>>, vector<48x128xbf16>,
    %c0_7 = arith.constant 0 : index
    %c0_8 = arith.constant 0 : index
    %6 = vector.load %arg1[%c0_7, %c0_8] : memref<512x27xbf16, #tpu.memory_space<vmem>>, vector<512x27xbf16>
    %c0_9 = arith.constant 0 : index
    %c0_10 = arith.constant 0 : index
    %7 = vector.load %arg2[%c0_9, %c0_10] : memref<27x32xbf16, #tpu.memory_space<vmem>>, vector<27x32xbf16>
    %cst_11 = arith.constant dense<0.000000e+00> : vector<512x32xf32>
    %8 = tpu.matmul %6, %7, %cst_11 {dimension_numbers = #tpu.dot_dimension_numbers<[1], [0], [0], [1], [0, 0, 1, 1], [], []>} : vector<512x27xbf16>, vector<27x32xbf16>, vector<512x32xf32> -> vector<512x32xf32>
    %c0_12 = arith.constant 0 : index
    %c0_13 = arith.constant 0 : index
    %9 = vector.load %arg3[%c0_12, %c0_13] : memref<1x32xf32, #tpu.memory_space<vmem>>, vector<1x32xf32>
    %10 = vector.broadcast %9 : vector<1x32xf32> to vector<512x32xf32>
    %11 = arith.addf %8, %10 : vector<512x32xf32>
    %cst_14 = arith.constant 0.000000e+00 : f32
    %12 = vector.broadcast %cst_14 : f32 to vector<512x32xf32>
    %13 = arith.maximumf %11, %12 : vector<512x32xf32>
    %c0_15 = arith.constant 0 : index
    %c0_16 = arith.constant 0 : index
    %14 = vector.load %arg17[%c0_15, %c0_16] : memref<512x32xf32, #tpu.memory_space<vmem>>, vector<512x32xf32>
    tpu.vector_store %arg17[%c0_15, %c0_16], %13 {strides = array<i32>} : memref<512x32xf32, #tpu.memory_space<vmem>>, vector<512x32xf32>,
    %c0_17 = arith.constant 0 : index
    %c0_18 = arith.constant 0 : index
    %15 = tpu.strided_load %arg17[%c0_17, %c0_18] {strides = array<i32: 2, 1>} : memref<512x32xf32, #tpu.memory_space<vmem>>, vector<8x32xf32>
    %c1 = arith.constant 1 : index
    %c0_19 = arith.constant 0 : index
    %16 = tpu.strided_load %arg17[%c1, %c0_19] {strides = array<i32: 2, 1>} : memref<512x32xf32, #tpu.memory_space<vmem>>, vector<8x32xf32>
    %c16 = arith.constant 16 : index
    %c0_20 = arith.constant 0 : index
    %17 = tpu.strided_load %arg17[%c16, %c0_20] {strides = array<i32: 2, 1>} : memref<512x32xf32, #tpu.memory_space<vmem>>, vector<8x32xf32>
    %c17 = arith.constant 17 : index
    %c0_21 = arith.constant 0 : index
    %18 = tpu.strided_load %arg17[%c17, %c0_21] {strides = array<i32: 2, 1>} : memref<512x32xf32, #tpu.memory_space<vmem>>, vector<8x32xf32>
    %19 = arith.maximumf %15, %16 : vector<8x32xf32>
    %20 = arith.maximumf %17, %18 : vector<8x32xf32>
    %21 = arith.maximumf %19, %20 : vector<8x32xf32>
    %22 = arith.truncf %21 : vector<8x32xf32> to vector<8x32xbf16>
    %c11 = arith.constant 11 : index
    %c0_22 = arith.constant 0 : index
    %23 = vector.load %arg18[%c11, %c0_22] : memref<232x32xbf16, #tpu.memory_space<vmem>>, vector<8x32xbf16>
    tpu.vector_store %arg18[%c11, %c0_22], %22 {strides = array<i32>} : memref<232x32xbf16, #tpu.memory_space<vmem>>, vector<8x32xbf16>,
    %c32 = arith.constant 32 : index
    %c0_23 = arith.constant 0 : index
    %24 = tpu.strided_load %arg17[%c32, %c0_23] {strides = array<i32: 2, 1>} : memref<512x32xf32, #tpu.memory_space<vmem>>, vector<8x32xf32>
    %c33 = arith.constant 33 : index
    %c0_24 = arith.constant 0 : index
    %25 = tpu.strided_load %arg17[%c33, %c0_24] {strides = array<i32: 2, 1>} : memref<512x32xf32, #tpu.memory_space<vmem>>, vector<8x32xf32>
    %c48 = arith.constant 48 : index
    %c0_25 = arith.constant 0 : index
    %26 = tpu.strided_load %arg17[%c48, %c0_25] {strides = array<i32: 2, 1>} : memref<512x32xf32, #tpu.memory_space<vmem>>, vector<8x32xf32>
    %c49 = arith.constant 49 : index
    %c0_26 = arith.constant 0 : index
    %27 = tpu.strided_load %arg17[%c49, %c0_26] {strides = array<i32: 2, 1>} : memref<512x32xf32, #tpu.memory_space<vmem>>, vector<8x32xf32>
    %28 = arith.maximumf %24, %25 : vector<8x32xf32>
    %29 = arith.maximumf %26, %27 : vector<8x32xf32>
    %30 = arith.maximumf %28, %29 : vector<8x32xf32>
    %31 = arith.truncf %30 : vector<8x32xf32> to vector<8x32xbf16>
    %c21 = arith.constant 21 : index
    %c0_27 = arith.constant 0 : index
    %32 = vector.load %arg18[%c21, %c0_27] : memref<232x32xbf16, #tpu.memory_space<vmem>>, vector<8x32xbf16>
    tpu.vector_store %arg18[%c21, %c0_27], %31 {strides = array<i32>} : memref<232x32xbf16, #tpu.memory_space<vmem>>, vector<8x32xbf16>,
    %c64 = arith.constant 64 : index
    %c0_28 = arith.constant 0 : index
    %33 = tpu.strided_load %arg17[%c64, %c0_28] {strides = array<i32: 2, 1>} : memref<512x32xf32, #tpu.memory_space<vmem>>, vector<8x32xf32>
    %c65 = arith.constant 65 : index
    %c0_29 = arith.constant 0 : index
    %34 = tpu.strided_load %arg17[%c65, %c0_29] {strides = array<i32: 2, 1>} : memref<512x32xf32, #tpu.memory_space<vmem>>, vector<8x32xf32>
    %c80 = arith.constant 80 : index
    %c0_30 = arith.constant 0 : index
    %35 = tpu.strided_load %arg17[%c80, %c0_30] {strides = array<i32: 2, 1>} : memref<512x32xf32, #tpu.memory_space<vmem>>, vector<8x32xf32>
    %c81 = arith.constant 81 : index
    %c0_31 = arith.constant 0 : index
    %36 = tpu.strided_load %arg17[%c81, %c0_31] {strides = array<i32: 2, 1>} : memref<512x32xf32, #tpu.memory_space<vmem>>, vector<8x32xf32>
    %37 = arith.maximumf %33, %34 : vector<8x32xf32>
    %38 = arith.maximumf %35, %36 : vector<8x32xf32>
    %39 = arith.maximumf %37, %38 : vector<8x32xf32>
    %40 = arith.truncf %39 : vector<8x32xf32> to vector<8x32xbf16>
    %c31 = arith.constant 31 : index
    %c0_32 = arith.constant 0 : index
    %41 = vector.load %arg18[%c31, %c0_32] : memref<232x32xbf16, #tpu.memory_space<vmem>>, vector<8x32xbf16>
    tpu.vector_store %arg18[%c31, %c0_32], %40 {strides = array<i32>} : memref<232x32xbf16, #tpu.memory_space<vmem>>, vector<8x32xbf16>,
    %c96 = arith.constant 96 : index
    %c0_33 = arith.constant 0 : index
    %42 = tpu.strided_load %arg17[%c96, %c0_33] {strides = array<i32: 2, 1>} : memref<512x32xf32, #tpu.memory_space<vmem>>, vector<8x32xf32>
    %c97 = arith.constant 97 : index
    %c0_34 = arith.constant 0 : index
    %43 = tpu.strided_load %arg17[%c97, %c0_34] {strides = array<i32: 2, 1>} : memref<512x32xf32, #tpu.memory_space<vmem>>, vector<8x32xf32>
    %c112 = arith.constant 112 : index
    %c0_35 = arith.constant 0 : index
    %44 = tpu.strided_load %arg17[%c112, %c0_35] {strides = array<i32: 2, 1>} : memref<512x32xf32, #tpu.memory_space<vmem>>, vector<8x32xf32>
    %c113 = arith.constant 113 : index
    %c0_36 = arith.constant 0 : index
    %45 = tpu.strided_load %arg17[%c113, %c0_36] {strides = array<i32: 2, 1>} : memref<512x32xf32, #tpu.memory_space<vmem>>, vector<8x32xf32>
    %46 = arith.maximumf %42, %43 : vector<8x32xf32>
    %47 = arith.maximumf %44, %45 : vector<8x32xf32>
    %48 = arith.maximumf %46, %47 : vector<8x32xf32>
    %49 = arith.truncf %48 : vector<8x32xf32> to vector<8x32xbf16>
    %c41 = arith.constant 41 : index
    %c0_37 = arith.constant 0 : index
    %50 = vector.load %arg18[%c41, %c0_37] : memref<232x32xbf16, #tpu.memory_space<vmem>>, vector<8x32xbf16>
    tpu.vector_store %arg18[%c41, %c0_37], %49 {strides = array<i32>} : memref<232x32xbf16, #tpu.memory_space<vmem>>, vector<8x32xbf16>,
    %c128 = arith.constant 128 : index
    %c0_38 = arith.constant 0 : index
    %51 = tpu.strided_load %arg17[%c128, %c0_38] {strides = array<i32: 2, 1>} : memref<512x32xf32, #tpu.memory_space<vmem>>, vector<8x32xf32>
    %c129 = arith.constant 129 : index
    %c0_39 = arith.constant 0 : index
    %52 = tpu.strided_load %arg17[%c129, %c0_39] {strides = array<i32: 2, 1>} : memref<512x32xf32, #tpu.memory_space<vmem>>, vector<8x32xf32>
    %c144 = arith.constant 144 : index
    %c0_40 = arith.constant 0 : index
    %53 = tpu.strided_load %arg17[%c144, %c0_40] {strides = array<i32: 2, 1>} : memref<512x32xf32, #tpu.memory_space<vmem>>, vector<8x32xf32>
    %c145 = arith.constant 145 : index
    %c0_41 = arith.constant 0 : index
    %54 = tpu.strided_load %arg17[%c145, %c0_41] {strides = array<i32: 2, 1>} : memref<512x32xf32, #tpu.memory_space<vmem>>, vector<8x32xf32>
    %55 = arith.maximumf %51, %52 : vector<8x32xf32>
    %56 = arith.maximumf %53, %54 : vector<8x32xf32>
    %57 = arith.maximumf %55, %56 : vector<8x32xf32>
    %58 = arith.truncf %57 : vector<8x32xf32> to vector<8x32xbf16>
    %c51 = arith.constant 51 : index
    %c0_42 = arith.constant 0 : index
    %59 = vector.load %arg18[%c51, %c0_42] : memref<232x32xbf16, #tpu.memory_space<vmem>>, vector<8x32xbf16>
    tpu.vector_store %arg18[%c51, %c0_42], %58 {strides = array<i32>} : memref<232x32xbf16, #tpu.memory_space<vmem>>, vector<8x32xbf16>,
    %c160 = arith.constant 160 : index
    %c0_43 = arith.constant 0 : index
    %60 = tpu.strided_load %arg17[%c160, %c0_43] {strides = array<i32: 2, 1>} : memref<512x32xf32, #tpu.memory_space<vmem>>, vector<8x32xf32>
    %c161 = arith.constant 161 : index
    %c0_44 = arith.constant 0 : index
    %61 = tpu.strided_load %arg17[%c161, %c0_44] {strides = array<i32: 2, 1>} : memref<512x32xf32, #tpu.memory_space<vmem>>, vector<8x32xf32>
    %c176 = arith.constant 176 : index
    %c0_45 = arith.constant 0 : index
    %62 = tpu.strided_load %arg17[%c176, %c0_45] {strides = array<i32: 2, 1>} : memref<512x32xf32, #tpu.memory_space<vmem>>, vector<8x32xf32>
    %c177 = arith.constant 177 : index
    %c0_46 = arith.constant 0 : index
    %63 = tpu.strided_load %arg17[%c177, %c0_46] {strides = array<i32: 2, 1>} : memref<512x32xf32, #tpu.memory_space<vmem>>, vector<8x32xf32>
    %64 = arith.maximumf %60, %61 : vector<8x32xf32>
    %65 = arith.maximumf %62, %63 : vector<8x32xf32>
    %66 = arith.maximumf %64, %65 : vector<8x32xf32>
    %67 = arith.truncf %66 : vector<8x32xf32> to vector<8x32xbf16>
    %c61 = arith.constant 61 : index
    %c0_47 = arith.constant 0 : index
    %68 = vector.load %arg18[%c61, %c0_47] : memref<232x32xbf16, #tpu.memory_space<vmem>>, vector<8x32xbf16>
    tpu.vector_store %arg18[%c61, %c0_47], %67 {strides = array<i32>} : memref<232x32xbf16, #tpu.memory_space<vmem>>, vector<8x32xbf16>,
    %c192 = arith.constant 192 : index
    %c0_48 = arith.constant 0 : index
    %69 = tpu.strided_load %arg17[%c192, %c0_48] {strides = array<i32: 2, 1>} : memref<512x32xf32, #tpu.memory_space<vmem>>, vector<8x32xf32>
    %c193 = arith.constant 193 : index
    %c0_49 = arith.constant 0 : index
    %70 = tpu.strided_load %arg17[%c193, %c0_49] {strides = array<i32: 2, 1>} : memref<512x32xf32, #tpu.memory_space<vmem>>, vector<8x32xf32>
    %c208 = arith.constant 208 : index
    %c0_50 = arith.constant 0 : index
    %71 = tpu.strided_load %arg17[%c208, %c0_50] {strides = array<i32: 2, 1>} : memref<512x32xf32, #tpu.memory_space<vmem>>, vector<8x32xf32>
    %c209 = arith.constant 209 : index
    %c0_51 = arith.constant 0 : index
    %72 = tpu.strided_load %arg17[%c209, %c0_51] {strides = array<i32: 2, 1>} : memref<512x32xf32, #tpu.memory_space<vmem>>, vector<8x32xf32>
    %73 = arith.maximumf %69, %70 : vector<8x32xf32>
    %74 = arith.maximumf %71, %72 : vector<8x32xf32>
    %75 = arith.maximumf %73, %74 : vector<8x32xf32>
    %76 = arith.truncf %75 : vector<8x32xf32> to vector<8x32xbf16>
    %c71 = arith.constant 71 : index
    %c0_52 = arith.constant 0 : index
    %77 = vector.load %arg18[%c71, %c0_52] : memref<232x32xbf16, #tpu.memory_space<vmem>>, vector<8x32xbf16>
    tpu.vector_store %arg18[%c71, %c0_52], %76 {strides = array<i32>} : memref<232x32xbf16, #tpu.memory_space<vmem>>, vector<8x32xbf16>,
    %c224 = arith.constant 224 : index
    %c0_53 = arith.constant 0 : index
    %78 = tpu.strided_load %arg17[%c224, %c0_53] {strides = array<i32: 2, 1>} : memref<512x32xf32, #tpu.memory_space<vmem>>, vector<8x32xf32>
    %c225 = arith.constant 225 : index
    %c0_54 = arith.constant 0 : index
    %79 = tpu.strided_load %arg17[%c225, %c0_54] {strides = array<i32: 2, 1>} : memref<512x32xf32, #tpu.memory_space<vmem>>, vector<8x32xf32>
    %c240 = arith.constant 240 : index
    %c0_55 = arith.constant 0 : index
    %80 = tpu.strided_load %arg17[%c240, %c0_55] {strides = array<i32: 2, 1>} : memref<512x32xf32, #tpu.memory_space<vmem>>, vector<8x32xf32>
    %c241 = arith.constant 241 : index
    %c0_56 = arith.constant 0 : index
    %81 = tpu.strided_load %arg17[%c241, %c0_56] {strides = array<i32: 2, 1>} : memref<512x32xf32, #tpu.memory_space<vmem>>, vector<8x32xf32>
    %82 = arith.maximumf %78, %79 : vector<8x32xf32>
    %83 = arith.maximumf %80, %81 : vector<8x32xf32>
    %84 = arith.maximumf %82, %83 : vector<8x32xf32>
    %85 = arith.truncf %84 : vector<8x32xf32> to vector<8x32xbf16>
    %c81_57 = arith.constant 81 : index
    %c0_58 = arith.constant 0 : index
    %86 = vector.load %arg18[%c81_57, %c0_58] : memref<232x32xbf16, #tpu.memory_space<vmem>>, vector<8x32xbf16>
    tpu.vector_store %arg18[%c81_57, %c0_58], %85 {strides = array<i32>} : memref<232x32xbf16, #tpu.memory_space<vmem>>, vector<8x32xbf16>,
    %c256 = arith.constant 256 : index
    %c0_59 = arith.constant 0 : index
    %87 = tpu.strided_load %arg17[%c256, %c0_59] {strides = array<i32: 2, 1>} : memref<512x32xf32, #tpu.memory_space<vmem>>, vector<8x32xf32>
    %c257 = arith.constant 257 : index
    %c0_60 = arith.constant 0 : index
    %88 = tpu.strided_load %arg17[%c257, %c0_60] {strides = array<i32: 2, 1>} : memref<512x32xf32, #tpu.memory_space<vmem>>, vector<8x32xf32>
    %c272 = arith.constant 272 : index
    %c0_61 = arith.constant 0 : index
    %89 = tpu.strided_load %arg17[%c272, %c0_61] {strides = array<i32: 2, 1>} : memref<512x32xf32, #tpu.memory_space<vmem>>, vector<8x32xf32>
    %c273 = arith.constant 273 : index
    %c0_62 = arith.constant 0 : index
    %90 = tpu.strided_load %arg17[%c273, %c0_62] {strides = array<i32: 2, 1>} : memref<512x32xf32, #tpu.memory_space<vmem>>, vector<8x32xf32>
    %91 = arith.maximumf %87, %88 : vector<8x32xf32>
    %92 = arith.maximumf %89, %90 : vector<8x32xf32>
    %93 = arith.maximumf %91, %92 : vector<8x32xf32>
    %94 = arith.truncf %93 : vector<8x32xf32> to vector<8x32xbf16>
    %c115 = arith.constant 115 : index
    %c0_63 = arith.constant 0 : index
    %95 = vector.load %arg18[%c115, %c0_63] : memref<232x32xbf16, #tpu.memory_space<vmem>>, vector<8x32xbf16>
    tpu.vector_store %arg18[%c115, %c0_63], %94 {strides = array<i32>} : memref<232x32xbf16, #tpu.memory_space<vmem>>, vector<8x32xbf16>,
    %c288 = arith.constant 288 : index
    %c0_64 = arith.constant 0 : index
    %96 = tpu.strided_load %arg17[%c288, %c0_64] {strides = array<i32: 2, 1>} : memref<512x32xf32, #tpu.memory_space<vmem>>, vector<8x32xf32>
    %c289 = arith.constant 289 : index
    %c0_65 = arith.constant 0 : index
    %97 = tpu.strided_load %arg17[%c289, %c0_65] {strides = array<i32: 2, 1>} : memref<512x32xf32, #tpu.memory_space<vmem>>, vector<8x32xf32>
    %c304 = arith.constant 304 : index
    %c0_66 = arith.constant 0 : index
    %98 = tpu.strided_load %arg17[%c304, %c0_66] {strides = array<i32: 2, 1>} : memref<512x32xf32, #tpu.memory_space<vmem>>, vector<8x32xf32>
    %c305 = arith.constant 305 : index
    %c0_67 = arith.constant 0 : index
    %99 = tpu.strided_load %arg17[%c305, %c0_67] {strides = array<i32: 2, 1>} : memref<512x32xf32, #tpu.memory_space<vmem>>, vector<8x32xf32>
    %100 = arith.maximumf %96, %97 : vector<8x32xf32>
    %101 = arith.maximumf %98, %99 : vector<8x32xf32>
    %102 = arith.maximumf %100, %101 : vector<8x32xf32>
    %103 = arith.truncf %102 : vector<8x32xf32> to vector<8x32xbf16>
    %c125 = arith.constant 125 : index
    %c0_68 = arith.constant 0 : index
    %104 = vector.load %arg18[%c125, %c0_68] : memref<232x32xbf16, #tpu.memory_space<vmem>>, vector<8x32xbf16>
    tpu.vector_store %arg18[%c125, %c0_68], %103 {strides = array<i32>} : memref<232x32xbf16, #tpu.memory_space<vmem>>, vector<8x32xbf16>,
    %c320 = arith.constant 320 : index
    %c0_69 = arith.constant 0 : index
    %105 = tpu.strided_load %arg17[%c320, %c0_69] {strides = array<i32: 2, 1>} : memref<512x32xf32, #tpu.memory_space<vmem>>, vector<8x32xf32>
    %c321 = arith.constant 321 : index
    %c0_70 = arith.constant 0 : index
    %106 = tpu.strided_load %arg17[%c321, %c0_70] {strides = array<i32: 2, 1>} : memref<512x32xf32, #tpu.memory_space<vmem>>, vector<8x32xf32>
    %c336 = arith.constant 336 : index
    %c0_71 = arith.constant 0 : index
    %107 = tpu.strided_load %arg17[%c336, %c0_71] {strides = array<i32: 2, 1>} : memref<512x32xf32, #tpu.memory_space<vmem>>, vector<8x32xf32>
    %c337 = arith.constant 337 : index
    %c0_72 = arith.constant 0 : index
    %108 = tpu.strided_load %arg17[%c337, %c0_72] {strides = array<i32: 2, 1>} : memref<512x32xf32, #tpu.memory_space<vmem>>, vector<8x32xf32>
    %109 = arith.maximumf %105, %106 : vector<8x32xf32>
    %110 = arith.maximumf %107, %108 : vector<8x32xf32>
    %111 = arith.maximumf %109, %110 : vector<8x32xf32>
    %112 = arith.truncf %111 : vector<8x32xf32> to vector<8x32xbf16>
    %c135 = arith.constant 135 : index
    %c0_73 = arith.constant 0 : index
    %113 = vector.load %arg18[%c135, %c0_73] : memref<232x32xbf16, #tpu.memory_space<vmem>>, vector<8x32xbf16>
    tpu.vector_store %arg18[%c135, %c0_73], %112 {strides = array<i32>} : memref<232x32xbf16, #tpu.memory_space<vmem>>, vector<8x32xbf16>,
    %c352 = arith.constant 352 : index
    %c0_74 = arith.constant 0 : index
    %114 = tpu.strided_load %arg17[%c352, %c0_74] {strides = array<i32: 2, 1>} : memref<512x32xf32, #tpu.memory_space<vmem>>, vector<8x32xf32>
    %c353 = arith.constant 353 : index
    %c0_75 = arith.constant 0 : index
    %115 = tpu.strided_load %arg17[%c353, %c0_75] {strides = array<i32: 2, 1>} : memref<512x32xf32, #tpu.memory_space<vmem>>, vector<8x32xf32>
    %c368 = arith.constant 368 : index
    %c0_76 = arith.constant 0 : index
    %116 = tpu.strided_load %arg17[%c368, %c0_76] {strides = array<i32: 2, 1>} : memref<512x32xf32, #tpu.memory_space<vmem>>, vector<8x32xf32>
    %c369 = arith.constant 369 : index
    %c0_77 = arith.constant 0 : index
    %117 = tpu.strided_load %arg17[%c369, %c0_77] {strides = array<i32: 2, 1>} : memref<512x32xf32, #tpu.memory_space<vmem>>, vector<8x32xf32>
    %118 = arith.maximumf %114, %115 : vector<8x32xf32>
    %119 = arith.maximumf %116, %117 : vector<8x32xf32>
    %120 = arith.maximumf %118, %119 : vector<8x32xf32>
    %121 = arith.truncf %120 : vector<8x32xf32> to vector<8x32xbf16>
    %c145_78 = arith.constant 145 : index
    %c0_79 = arith.constant 0 : index
    %122 = vector.load %arg18[%c145_78, %c0_79] : memref<232x32xbf16, #tpu.memory_space<vmem>>, vector<8x32xbf16>
    tpu.vector_store %arg18[%c145_78, %c0_79], %121 {strides = array<i32>} : memref<232x32xbf16, #tpu.memory_space<vmem>>, vector<8x32xbf16>,
    %c384 = arith.constant 384 : index
    %c0_80 = arith.constant 0 : index
    %123 = tpu.strided_load %arg17[%c384, %c0_80] {strides = array<i32: 2, 1>} : memref<512x32xf32, #tpu.memory_space<vmem>>, vector<8x32xf32>
    %c385 = arith.constant 385 : index
    %c0_81 = arith.constant 0 : index
    %124 = tpu.strided_load %arg17[%c385, %c0_81] {strides = array<i32: 2, 1>} : memref<512x32xf32, #tpu.memory_space<vmem>>, vector<8x32xf32>
    %c400 = arith.constant 400 : index
    %c0_82 = arith.constant 0 : index
    %125 = tpu.strided_load %arg17[%c400, %c0_82] {strides = array<i32: 2, 1>} : memref<512x32xf32, #tpu.memory_space<vmem>>, vector<8x32xf32>
    %c401 = arith.constant 401 : index
    %c0_83 = arith.constant 0 : index
    %126 = tpu.strided_load %arg17[%c401, %c0_83] {strides = array<i32: 2, 1>} : memref<512x32xf32, #tpu.memory_space<vmem>>, vector<8x32xf32>
    %127 = arith.maximumf %123, %124 : vector<8x32xf32>
    %128 = arith.maximumf %125, %126 : vector<8x32xf32>
    %129 = arith.maximumf %127, %128 : vector<8x32xf32>
    %130 = arith.truncf %129 : vector<8x32xf32> to vector<8x32xbf16>
    %c155 = arith.constant 155 : index
    %c0_84 = arith.constant 0 : index
    %131 = vector.load %arg18[%c155, %c0_84] : memref<232x32xbf16, #tpu.memory_space<vmem>>, vector<8x32xbf16>
    tpu.vector_store %arg18[%c155, %c0_84], %130 {strides = array<i32>} : memref<232x32xbf16, #tpu.memory_space<vmem>>, vector<8x32xbf16>,
    %c416 = arith.constant 416 : index
    %c0_85 = arith.constant 0 : index
    %132 = tpu.strided_load %arg17[%c416, %c0_85] {strides = array<i32: 2, 1>} : memref<512x32xf32, #tpu.memory_space<vmem>>, vector<8x32xf32>
    %c417 = arith.constant 417 : index
    %c0_86 = arith.constant 0 : index
    %133 = tpu.strided_load %arg17[%c417, %c0_86] {strides = array<i32: 2, 1>} : memref<512x32xf32, #tpu.memory_space<vmem>>, vector<8x32xf32>
    %c432 = arith.constant 432 : index
    %c0_87 = arith.constant 0 : index
    %134 = tpu.strided_load %arg17[%c432, %c0_87] {strides = array<i32: 2, 1>} : memref<512x32xf32, #tpu.memory_space<vmem>>, vector<8x32xf32>
    %c433 = arith.constant 433 : index
    %c0_88 = arith.constant 0 : index
    %135 = tpu.strided_load %arg17[%c433, %c0_88] {strides = array<i32: 2, 1>} : memref<512x32xf32, #tpu.memory_space<vmem>>, vector<8x32xf32>
    %136 = arith.maximumf %132, %133 : vector<8x32xf32>
    %137 = arith.maximumf %134, %135 : vector<8x32xf32>
    %138 = arith.maximumf %136, %137 : vector<8x32xf32>
    %139 = arith.truncf %138 : vector<8x32xf32> to vector<8x32xbf16>
    %c165 = arith.constant 165 : index
    %c0_89 = arith.constant 0 : index
    %140 = vector.load %arg18[%c165, %c0_89] : memref<232x32xbf16, #tpu.memory_space<vmem>>, vector<8x32xbf16>
    tpu.vector_store %arg18[%c165, %c0_89], %139 {strides = array<i32>} : memref<232x32xbf16, #tpu.memory_space<vmem>>, vector<8x32xbf16>,
    %c448 = arith.constant 448 : index
    %c0_90 = arith.constant 0 : index
    %141 = tpu.strided_load %arg17[%c448, %c0_90] {strides = array<i32: 2, 1>} : memref<512x32xf32, #tpu.memory_space<vmem>>, vector<8x32xf32>
    %c449 = arith.constant 449 : index
    %c0_91 = arith.constant 0 : index
    %142 = tpu.strided_load %arg17[%c449, %c0_91] {strides = array<i32: 2, 1>} : memref<512x32xf32, #tpu.memory_space<vmem>>, vector<8x32xf32>
    %c464 = arith.constant 464 : index
    %c0_92 = arith.constant 0 : index
    %143 = tpu.strided_load %arg17[%c464, %c0_92] {strides = array<i32: 2, 1>} : memref<512x32xf32, #tpu.memory_space<vmem>>, vector<8x32xf32>
    %c465 = arith.constant 465 : index
    %c0_93 = arith.constant 0 : index
    %144 = tpu.strided_load %arg17[%c465, %c0_93] {strides = array<i32: 2, 1>} : memref<512x32xf32, #tpu.memory_space<vmem>>, vector<8x32xf32>
    %145 = arith.maximumf %141, %142 : vector<8x32xf32>
    %146 = arith.maximumf %143, %144 : vector<8x32xf32>
    %147 = arith.maximumf %145, %146 : vector<8x32xf32>
    %148 = arith.truncf %147 : vector<8x32xf32> to vector<8x32xbf16>
    %c175 = arith.constant 175 : index
    %c0_94 = arith.constant 0 : index
    %149 = vector.load %arg18[%c175, %c0_94] : memref<232x32xbf16, #tpu.memory_space<vmem>>, vector<8x32xbf16>
    tpu.vector_store %arg18[%c175, %c0_94], %148 {strides = array<i32>} : memref<232x32xbf16, #tpu.memory_space<vmem>>, vector<8x32xbf16>,
    %c480 = arith.constant 480 : index
    %c0_95 = arith.constant 0 : index
    %150 = tpu.strided_load %arg17[%c480, %c0_95] {strides = array<i32: 2, 1>} : memref<512x32xf32, #tpu.memory_space<vmem>>, vector<8x32xf32>
    %c481 = arith.constant 481 : index
    %c0_96 = arith.constant 0 : index
    %151 = tpu.strided_load %arg17[%c481, %c0_96] {strides = array<i32: 2, 1>} : memref<512x32xf32, #tpu.memory_space<vmem>>, vector<8x32xf32>
    %c496 = arith.constant 496 : index
    %c0_97 = arith.constant 0 : index
    %152 = tpu.strided_load %arg17[%c496, %c0_97] {strides = array<i32: 2, 1>} : memref<512x32xf32, #tpu.memory_space<vmem>>, vector<8x32xf32>
    %c497 = arith.constant 497 : index
    %c0_98 = arith.constant 0 : index
    %153 = tpu.strided_load %arg17[%c497, %c0_98] {strides = array<i32: 2, 1>} : memref<512x32xf32, #tpu.memory_space<vmem>>, vector<8x32xf32>
    %154 = arith.maximumf %150, %151 : vector<8x32xf32>
    %155 = arith.maximumf %152, %153 : vector<8x32xf32>
    %156 = arith.maximumf %154, %155 : vector<8x32xf32>
    %157 = arith.truncf %156 : vector<8x32xf32> to vector<8x32xbf16>
    %c185 = arith.constant 185 : index
    %c0_99 = arith.constant 0 : index
    %158 = vector.load %arg18[%c185, %c0_99] : memref<232x32xbf16, #tpu.memory_space<vmem>>, vector<8x32xbf16>
    tpu.vector_store %arg18[%c185, %c0_99], %157 {strides = array<i32>} : memref<232x32xbf16, #tpu.memory_space<vmem>>, vector<8x32xbf16>,
    %c0_100 = arith.constant 0 : index
    %c0_101 = arith.constant 0 : index
    %159 = vector.load %arg18[%c0_100, %c0_101] : memref<232x32xbf16, #tpu.memory_space<vmem>>, vector<208x32xbf16>
    %c0_102 = arith.constant 0 : index
    %c0_103 = arith.constant 0 : index
    %160 = vector.load %arg19[%c0_102, %c0_103] : memref<208x288xbf16, #tpu.memory_space<vmem>>, vector<208x32xbf16>
    tpu.vector_store %arg19[%c0_102, %c0_103], %159 {strides = array<i32>} : memref<208x288xbf16, #tpu.memory_space<vmem>>, vector<208x32xbf16>,
    %c1_104 = arith.constant 1 : index
    %c0_105 = arith.constant 0 : index
    %161 = vector.load %arg18[%c1_104, %c0_105] : memref<232x32xbf16, #tpu.memory_space<vmem>>, vector<208x32xbf16>
    %c0_106 = arith.constant 0 : index
    %c32_107 = arith.constant 32 : index
    %162 = vector.load %arg19[%c0_106, %c32_107] : memref<208x288xbf16, #tpu.memory_space<vmem>>, vector<208x32xbf16>
    tpu.vector_store %arg19[%c0_106, %c32_107], %161 {strides = array<i32>} : memref<208x288xbf16, #tpu.memory_space<vmem>>, vector<208x32xbf16>,
    %c2 = arith.constant 2 : index
    %c0_108 = arith.constant 0 : index
    %163 = vector.load %arg18[%c2, %c0_108] : memref<232x32xbf16, #tpu.memory_space<vmem>>, vector<208x32xbf16>
    %c0_109 = arith.constant 0 : index
    %c64_110 = arith.constant 64 : index
    %164 = vector.load %arg19[%c0_109, %c64_110] : memref<208x288xbf16, #tpu.memory_space<vmem>>, vector<208x32xbf16>
    tpu.vector_store %arg19[%c0_109, %c64_110], %163 {strides = array<i32>} : memref<208x288xbf16, #tpu.memory_space<vmem>>, vector<208x32xbf16>,
    %c10 = arith.constant 10 : index
    %c0_111 = arith.constant 0 : index
    %165 = vector.load %arg18[%c10, %c0_111] : memref<232x32xbf16, #tpu.memory_space<vmem>>, vector<208x32xbf16>
    %c0_112 = arith.constant 0 : index
    %c96_113 = arith.constant 96 : index
    %166 = vector.load %arg19[%c0_112, %c96_113] : memref<208x288xbf16, #tpu.memory_space<vmem>>, vector<208x32xbf16>
    tpu.vector_store %arg19[%c0_112, %c96_113], %165 {strides = array<i32>} : memref<208x288xbf16, #tpu.memory_space<vmem>>, vector<208x32xbf16>,
    %c11_114 = arith.constant 11 : index
    %c0_115 = arith.constant 0 : index
    %167 = vector.load %arg18[%c11_114, %c0_115] : memref<232x32xbf16, #tpu.memory_space<vmem>>, vector<208x32xbf16>
    %c0_116 = arith.constant 0 : index
    %c128_117 = arith.constant 128 : index
    %168 = vector.load %arg19[%c0_116, %c128_117] : memref<208x288xbf16, #tpu.memory_space<vmem>>, vector<208x32xbf16>
    tpu.vector_store %arg19[%c0_116, %c128_117], %167 {strides = array<i32>} : memref<208x288xbf16, #tpu.memory_space<vmem>>, vector<208x32xbf16>,
    %c12 = arith.constant 12 : index
    %c0_118 = arith.constant 0 : index
    %169 = vector.load %arg18[%c12, %c0_118] : memref<232x32xbf16, #tpu.memory_space<vmem>>, vector<208x32xbf16>
    %c0_119 = arith.constant 0 : index
    %c160_120 = arith.constant 160 : index
    %170 = vector.load %arg19[%c0_119, %c160_120] : memref<208x288xbf16, #tpu.memory_space<vmem>>, vector<208x32xbf16>
    tpu.vector_store %arg19[%c0_119, %c160_120], %169 {strides = array<i32>} : memref<208x288xbf16, #tpu.memory_space<vmem>>, vector<208x32xbf16>,
    %c20 = arith.constant 20 : index
    %c0_121 = arith.constant 0 : index
    %171 = vector.load %arg18[%c20, %c0_121] : memref<232x32xbf16, #tpu.memory_space<vmem>>, vector<208x32xbf16>
    %c0_122 = arith.constant 0 : index
    %c192_123 = arith.constant 192 : index
    %172 = vector.load %arg19[%c0_122, %c192_123] : memref<208x288xbf16, #tpu.memory_space<vmem>>, vector<208x32xbf16>
    tpu.vector_store %arg19[%c0_122, %c192_123], %171 {strides = array<i32>} : memref<208x288xbf16, #tpu.memory_space<vmem>>, vector<208x32xbf16>,
    %c21_124 = arith.constant 21 : index
    %c0_125 = arith.constant 0 : index
    %173 = vector.load %arg18[%c21_124, %c0_125] : memref<232x32xbf16, #tpu.memory_space<vmem>>, vector<208x32xbf16>
    %c0_126 = arith.constant 0 : index
    %c224_127 = arith.constant 224 : index
    %174 = vector.load %arg19[%c0_126, %c224_127] : memref<208x288xbf16, #tpu.memory_space<vmem>>, vector<208x32xbf16>
    tpu.vector_store %arg19[%c0_126, %c224_127], %173 {strides = array<i32>} : memref<208x288xbf16, #tpu.memory_space<vmem>>, vector<208x32xbf16>,
    %c22 = arith.constant 22 : index
    %c0_128 = arith.constant 0 : index
    %175 = vector.load %arg18[%c22, %c0_128] : memref<232x32xbf16, #tpu.memory_space<vmem>>, vector<208x32xbf16>
    %c0_129 = arith.constant 0 : index
    %c256_130 = arith.constant 256 : index
    %176 = vector.load %arg19[%c0_129, %c256_130] : memref<208x288xbf16, #tpu.memory_space<vmem>>, vector<208x32xbf16>
    tpu.vector_store %arg19[%c0_129, %c256_130], %175 {strides = array<i32>} : memref<208x288xbf16, #tpu.memory_space<vmem>>, vector<208x32xbf16>,
    %c0_131 = arith.constant 0 : index
    %c0_132 = arith.constant 0 : index
    %177 = vector.load %arg19[%c0_131, %c0_132] : memref<208x288xbf16, #tpu.memory_space<vmem>>, vector<208x288xbf16>
    %c0_133 = arith.constant 0 : index
    %c0_134 = arith.constant 0 : index
    %178 = vector.load %arg4[%c0_133, %c0_134] : memref<288x64xbf16, #tpu.memory_space<vmem>>, vector<288x64xbf16>
    %cst_135 = arith.constant dense<0.000000e+00> : vector<208x64xf32>
    %179 = tpu.matmul %177, %178, %cst_135 {dimension_numbers = #tpu.dot_dimension_numbers<[1], [0], [0], [1], [0, 0, 1, 1], [], []>} : vector<208x288xbf16>, vector<288x64xbf16>, vector<208x64xf32> -> vector<208x64xf32>
    %c0_136 = arith.constant 0 : index
    %c0_137 = arith.constant 0 : index
    %180 = vector.load %arg5[%c0_136, %c0_137] : memref<1x64xf32, #tpu.memory_space<vmem>>, vector<1x64xf32>
    %181 = vector.broadcast %180 : vector<1x64xf32> to vector<208x64xf32>
    %182 = arith.addf %179, %181 : vector<208x64xf32>
    %cst_138 = arith.constant 0.000000e+00 : f32
    %183 = vector.broadcast %cst_138 : f32 to vector<208x64xf32>
    %184 = arith.maximumf %182, %183 : vector<208x64xf32>
    %c0_139 = arith.constant 0 : index
    %c0_140 = arith.constant 0 : index
    %185 = vector.load %arg20[%c0_139, %c0_140] : memref<208x64xf32, #tpu.memory_space<vmem>>, vector<208x64xf32>
    tpu.vector_store %arg20[%c0_139, %c0_140], %184 {strides = array<i32>} : memref<208x64xf32, #tpu.memory_space<vmem>>, vector<208x64xf32>,
    %c0_141 = arith.constant 0 : index
    %c0_142 = arith.constant 0 : index
    %186 = tpu.strided_load %arg20[%c0_141, %c0_142] {strides = array<i32: 2, 1>} : memref<208x64xf32, #tpu.memory_space<vmem>>, vector<4x64xf32>
    %c1_143 = arith.constant 1 : index
    %c0_144 = arith.constant 0 : index
    %187 = tpu.strided_load %arg20[%c1_143, %c0_144] {strides = array<i32: 2, 1>} : memref<208x64xf32, #tpu.memory_space<vmem>>, vector<4x64xf32>
    %c10_145 = arith.constant 10 : index
    %c0_146 = arith.constant 0 : index
    %188 = tpu.strided_load %arg20[%c10_145, %c0_146] {strides = array<i32: 2, 1>} : memref<208x64xf32, #tpu.memory_space<vmem>>, vector<4x64xf32>
    %c11_147 = arith.constant 11 : index
    %c0_148 = arith.constant 0 : index
    %189 = tpu.strided_load %arg20[%c11_147, %c0_148] {strides = array<i32: 2, 1>} : memref<208x64xf32, #tpu.memory_space<vmem>>, vector<4x64xf32>
    %190 = arith.maximumf %186, %187 : vector<4x64xf32>
    %191 = arith.maximumf %188, %189 : vector<4x64xf32>
    %192 = arith.maximumf %190, %191 : vector<4x64xf32>
    %193 = arith.truncf %192 : vector<4x64xf32> to vector<4x64xbf16>
    %c7 = arith.constant 7 : index
    %c0_149 = arith.constant 0 : index
    %194 = vector.load %arg21[%c7, %c0_149] : memref<96x64xbf16, #tpu.memory_space<vmem>>, vector<4x64xbf16>
    tpu.vector_store %arg21[%c7, %c0_149], %193 {strides = array<i32>} : memref<96x64xbf16, #tpu.memory_space<vmem>>, vector<4x64xbf16>,
    %c20_150 = arith.constant 20 : index
    %c0_151 = arith.constant 0 : index
    %195 = tpu.strided_load %arg20[%c20_150, %c0_151] {strides = array<i32: 2, 1>} : memref<208x64xf32, #tpu.memory_space<vmem>>, vector<4x64xf32>
    %c21_152 = arith.constant 21 : index
    %c0_153 = arith.constant 0 : index
    %196 = tpu.strided_load %arg20[%c21_152, %c0_153] {strides = array<i32: 2, 1>} : memref<208x64xf32, #tpu.memory_space<vmem>>, vector<4x64xf32>
    %c30 = arith.constant 30 : index
    %c0_154 = arith.constant 0 : index
    %197 = tpu.strided_load %arg20[%c30, %c0_154] {strides = array<i32: 2, 1>} : memref<208x64xf32, #tpu.memory_space<vmem>>, vector<4x64xf32>
    %c31_155 = arith.constant 31 : index
    %c0_156 = arith.constant 0 : index
    %198 = tpu.strided_load %arg20[%c31_155, %c0_156] {strides = array<i32: 2, 1>} : memref<208x64xf32, #tpu.memory_space<vmem>>, vector<4x64xf32>
    %199 = arith.maximumf %195, %196 : vector<4x64xf32>
    %200 = arith.maximumf %197, %198 : vector<4x64xf32>
    %201 = arith.maximumf %199, %200 : vector<4x64xf32>
    %202 = arith.truncf %201 : vector<4x64xf32> to vector<4x64xbf16>
    %c13 = arith.constant 13 : index
    %c0_157 = arith.constant 0 : index
    %203 = vector.load %arg21[%c13, %c0_157] : memref<96x64xbf16, #tpu.memory_space<vmem>>, vector<4x64xbf16>
    tpu.vector_store %arg21[%c13, %c0_157], %202 {strides = array<i32>} : memref<96x64xbf16, #tpu.memory_space<vmem>>, vector<4x64xbf16>,
    %c40 = arith.constant 40 : index
    %c0_158 = arith.constant 0 : index
    %204 = tpu.strided_load %arg20[%c40, %c0_158] {strides = array<i32: 2, 1>} : memref<208x64xf32, #tpu.memory_space<vmem>>, vector<4x64xf32>
    %c41_159 = arith.constant 41 : index
    %c0_160 = arith.constant 0 : index
    %205 = tpu.strided_load %arg20[%c41_159, %c0_160] {strides = array<i32: 2, 1>} : memref<208x64xf32, #tpu.memory_space<vmem>>, vector<4x64xf32>
    %c50 = arith.constant 50 : index
    %c0_161 = arith.constant 0 : index
    %206 = tpu.strided_load %arg20[%c50, %c0_161] {strides = array<i32: 2, 1>} : memref<208x64xf32, #tpu.memory_space<vmem>>, vector<4x64xf32>
    %c51_162 = arith.constant 51 : index
    %c0_163 = arith.constant 0 : index
    %207 = tpu.strided_load %arg20[%c51_162, %c0_163] {strides = array<i32: 2, 1>} : memref<208x64xf32, #tpu.memory_space<vmem>>, vector<4x64xf32>
    %208 = arith.maximumf %204, %205 : vector<4x64xf32>
    %209 = arith.maximumf %206, %207 : vector<4x64xf32>
    %210 = arith.maximumf %208, %209 : vector<4x64xf32>
    %211 = arith.truncf %210 : vector<4x64xf32> to vector<4x64xbf16>
    %c19 = arith.constant 19 : index
    %c0_164 = arith.constant 0 : index
    %212 = vector.load %arg21[%c19, %c0_164] : memref<96x64xbf16, #tpu.memory_space<vmem>>, vector<4x64xbf16>
    tpu.vector_store %arg21[%c19, %c0_164], %211 {strides = array<i32>} : memref<96x64xbf16, #tpu.memory_space<vmem>>, vector<4x64xbf16>,
    %c60 = arith.constant 60 : index
    %c0_165 = arith.constant 0 : index
    %213 = tpu.strided_load %arg20[%c60, %c0_165] {strides = array<i32: 2, 1>} : memref<208x64xf32, #tpu.memory_space<vmem>>, vector<4x64xf32>
    %c61_166 = arith.constant 61 : index
    %c0_167 = arith.constant 0 : index
    %214 = tpu.strided_load %arg20[%c61_166, %c0_167] {strides = array<i32: 2, 1>} : memref<208x64xf32, #tpu.memory_space<vmem>>, vector<4x64xf32>
    %c70 = arith.constant 70 : index
    %c0_168 = arith.constant 0 : index
    %215 = tpu.strided_load %arg20[%c70, %c0_168] {strides = array<i32: 2, 1>} : memref<208x64xf32, #tpu.memory_space<vmem>>, vector<4x64xf32>
    %c71_169 = arith.constant 71 : index
    %c0_170 = arith.constant 0 : index
    %216 = tpu.strided_load %arg20[%c71_169, %c0_170] {strides = array<i32: 2, 1>} : memref<208x64xf32, #tpu.memory_space<vmem>>, vector<4x64xf32>
    %217 = arith.maximumf %213, %214 : vector<4x64xf32>
    %218 = arith.maximumf %215, %216 : vector<4x64xf32>
    %219 = arith.maximumf %217, %218 : vector<4x64xf32>
    %220 = arith.truncf %219 : vector<4x64xf32> to vector<4x64xbf16>
    %c25 = arith.constant 25 : index
    %c0_171 = arith.constant 0 : index
    %221 = vector.load %arg21[%c25, %c0_171] : memref<96x64xbf16, #tpu.memory_space<vmem>>, vector<4x64xbf16>
    tpu.vector_store %arg21[%c25, %c0_171], %220 {strides = array<i32>} : memref<96x64xbf16, #tpu.memory_space<vmem>>, vector<4x64xbf16>,
    %c104 = arith.constant 104 : index
    %c0_172 = arith.constant 0 : index
    %222 = tpu.strided_load %arg20[%c104, %c0_172] {strides = array<i32: 2, 1>} : memref<208x64xf32, #tpu.memory_space<vmem>>, vector<4x64xf32>
    %c105 = arith.constant 105 : index
    %c0_173 = arith.constant 0 : index
    %223 = tpu.strided_load %arg20[%c105, %c0_173] {strides = array<i32: 2, 1>} : memref<208x64xf32, #tpu.memory_space<vmem>>, vector<4x64xf32>
    %c114 = arith.constant 114 : index
    %c0_174 = arith.constant 0 : index
    %224 = tpu.strided_load %arg20[%c114, %c0_174] {strides = array<i32: 2, 1>} : memref<208x64xf32, #tpu.memory_space<vmem>>, vector<4x64xf32>
    %c115_175 = arith.constant 115 : index
    %c0_176 = arith.constant 0 : index
    %225 = tpu.strided_load %arg20[%c115_175, %c0_176] {strides = array<i32: 2, 1>} : memref<208x64xf32, #tpu.memory_space<vmem>>, vector<4x64xf32>
    %226 = arith.maximumf %222, %223 : vector<4x64xf32>
    %227 = arith.maximumf %224, %225 : vector<4x64xf32>
    %228 = arith.maximumf %226, %227 : vector<4x64xf32>
    %229 = arith.truncf %228 : vector<4x64xf32> to vector<4x64xbf16>
    %c47 = arith.constant 47 : index
    %c0_177 = arith.constant 0 : index
    %230 = vector.load %arg21[%c47, %c0_177] : memref<96x64xbf16, #tpu.memory_space<vmem>>, vector<4x64xbf16>
    tpu.vector_store %arg21[%c47, %c0_177], %229 {strides = array<i32>} : memref<96x64xbf16, #tpu.memory_space<vmem>>, vector<4x64xbf16>,
    %c124 = arith.constant 124 : index
    %c0_178 = arith.constant 0 : index
    %231 = tpu.strided_load %arg20[%c124, %c0_178] {strides = array<i32: 2, 1>} : memref<208x64xf32, #tpu.memory_space<vmem>>, vector<4x64xf32>
    %c125_179 = arith.constant 125 : index
    %c0_180 = arith.constant 0 : index
    %232 = tpu.strided_load %arg20[%c125_179, %c0_180] {strides = array<i32: 2, 1>} : memref<208x64xf32, #tpu.memory_space<vmem>>, vector<4x64xf32>
    %c134 = arith.constant 134 : index
    %c0_181 = arith.constant 0 : index
    %233 = tpu.strided_load %arg20[%c134, %c0_181] {strides = array<i32: 2, 1>} : memref<208x64xf32, #tpu.memory_space<vmem>>, vector<4x64xf32>
    %c135_182 = arith.constant 135 : index
    %c0_183 = arith.constant 0 : index
    %234 = tpu.strided_load %arg20[%c135_182, %c0_183] {strides = array<i32: 2, 1>} : memref<208x64xf32, #tpu.memory_space<vmem>>, vector<4x64xf32>
    %235 = arith.maximumf %231, %232 : vector<4x64xf32>
    %236 = arith.maximumf %233, %234 : vector<4x64xf32>
    %237 = arith.maximumf %235, %236 : vector<4x64xf32>
    %238 = arith.truncf %237 : vector<4x64xf32> to vector<4x64xbf16>
    %c53 = arith.constant 53 : index
    %c0_184 = arith.constant 0 : index
    %239 = vector.load %arg21[%c53, %c0_184] : memref<96x64xbf16, #tpu.memory_space<vmem>>, vector<4x64xbf16>
    tpu.vector_store %arg21[%c53, %c0_184], %238 {strides = array<i32>} : memref<96x64xbf16, #tpu.memory_space<vmem>>, vector<4x64xbf16>,
    %c144_185 = arith.constant 144 : index
    %c0_186 = arith.constant 0 : index
    %240 = tpu.strided_load %arg20[%c144_185, %c0_186] {strides = array<i32: 2, 1>} : memref<208x64xf32, #tpu.memory_space<vmem>>, vector<4x64xf32>
    %c145_187 = arith.constant 145 : index
    %c0_188 = arith.constant 0 : index
    %241 = tpu.strided_load %arg20[%c145_187, %c0_188] {strides = array<i32: 2, 1>} : memref<208x64xf32, #tpu.memory_space<vmem>>, vector<4x64xf32>
    %c154 = arith.constant 154 : index
    %c0_189 = arith.constant 0 : index
    %242 = tpu.strided_load %arg20[%c154, %c0_189] {strides = array<i32: 2, 1>} : memref<208x64xf32, #tpu.memory_space<vmem>>, vector<4x64xf32>
    %c155_190 = arith.constant 155 : index
    %c0_191 = arith.constant 0 : index
    %243 = tpu.strided_load %arg20[%c155_190, %c0_191] {strides = array<i32: 2, 1>} : memref<208x64xf32, #tpu.memory_space<vmem>>, vector<4x64xf32>
    %244 = arith.maximumf %240, %241 : vector<4x64xf32>
    %245 = arith.maximumf %242, %243 : vector<4x64xf32>
    %246 = arith.maximumf %244, %245 : vector<4x64xf32>
    %247 = arith.truncf %246 : vector<4x64xf32> to vector<4x64xbf16>
    %c59 = arith.constant 59 : index
    %c0_192 = arith.constant 0 : index
    %248 = vector.load %arg21[%c59, %c0_192] : memref<96x64xbf16, #tpu.memory_space<vmem>>, vector<4x64xbf16>
    tpu.vector_store %arg21[%c59, %c0_192], %247 {strides = array<i32>} : memref<96x64xbf16, #tpu.memory_space<vmem>>, vector<4x64xbf16>,
    %c164 = arith.constant 164 : index
    %c0_193 = arith.constant 0 : index
    %249 = tpu.strided_load %arg20[%c164, %c0_193] {strides = array<i32: 2, 1>} : memref<208x64xf32, #tpu.memory_space<vmem>>, vector<4x64xf32>
    %c165_194 = arith.constant 165 : index
    %c0_195 = arith.constant 0 : index
    %250 = tpu.strided_load %arg20[%c165_194, %c0_195] {strides = array<i32: 2, 1>} : memref<208x64xf32, #tpu.memory_space<vmem>>, vector<4x64xf32>
    %c174 = arith.constant 174 : index
    %c0_196 = arith.constant 0 : index
    %251 = tpu.strided_load %arg20[%c174, %c0_196] {strides = array<i32: 2, 1>} : memref<208x64xf32, #tpu.memory_space<vmem>>, vector<4x64xf32>
    %c175_197 = arith.constant 175 : index
    %c0_198 = arith.constant 0 : index
    %252 = tpu.strided_load %arg20[%c175_197, %c0_198] {strides = array<i32: 2, 1>} : memref<208x64xf32, #tpu.memory_space<vmem>>, vector<4x64xf32>
    %253 = arith.maximumf %249, %250 : vector<4x64xf32>
    %254 = arith.maximumf %251, %252 : vector<4x64xf32>
    %255 = arith.maximumf %253, %254 : vector<4x64xf32>
    %256 = arith.truncf %255 : vector<4x64xf32> to vector<4x64xbf16>
    %c65_199 = arith.constant 65 : index
    %c0_200 = arith.constant 0 : index
    %257 = vector.load %arg21[%c65_199, %c0_200] : memref<96x64xbf16, #tpu.memory_space<vmem>>, vector<4x64xbf16>
    tpu.vector_store %arg21[%c65_199, %c0_200], %256 {strides = array<i32>} : memref<96x64xbf16, #tpu.memory_space<vmem>>, vector<4x64xbf16>,
    %c0_201 = arith.constant 0 : index
    %c0_202 = arith.constant 0 : index
    %258 = vector.load %arg21[%c0_201, %c0_202] : memref<96x64xbf16, #tpu.memory_space<vmem>>, vector<80x64xbf16>
    %c0_203 = arith.constant 0 : index
    %c0_204 = arith.constant 0 : index
    %259 = vector.load %arg22[%c0_203, %c0_204] : memref<80x576xbf16, #tpu.memory_space<vmem>>, vector<80x64xbf16>
    tpu.vector_store %arg22[%c0_203, %c0_204], %258 {strides = array<i32>} : memref<80x576xbf16, #tpu.memory_space<vmem>>, vector<80x64xbf16>,
    %c1_205 = arith.constant 1 : index
    %c0_206 = arith.constant 0 : index
    %260 = vector.load %arg21[%c1_205, %c0_206] : memref<96x64xbf16, #tpu.memory_space<vmem>>, vector<80x64xbf16>
    %c0_207 = arith.constant 0 : index
    %c64_208 = arith.constant 64 : index
    %261 = vector.load %arg22[%c0_207, %c64_208] : memref<80x576xbf16, #tpu.memory_space<vmem>>, vector<80x64xbf16>
    tpu.vector_store %arg22[%c0_207, %c64_208], %260 {strides = array<i32>} : memref<80x576xbf16, #tpu.memory_space<vmem>>, vector<80x64xbf16>,
    %c2_209 = arith.constant 2 : index
    %c0_210 = arith.constant 0 : index
    %262 = vector.load %arg21[%c2_209, %c0_210] : memref<96x64xbf16, #tpu.memory_space<vmem>>, vector<80x64xbf16>
    %c0_211 = arith.constant 0 : index
    %c128_212 = arith.constant 128 : index
    %263 = vector.load %arg22[%c0_211, %c128_212] : memref<80x576xbf16, #tpu.memory_space<vmem>>, vector<80x64xbf16>
    tpu.vector_store %arg22[%c0_211, %c128_212], %262 {strides = array<i32>} : memref<80x576xbf16, #tpu.memory_space<vmem>>, vector<80x64xbf16>,
    %c6 = arith.constant 6 : index
    %c0_213 = arith.constant 0 : index
    %264 = vector.load %arg21[%c6, %c0_213] : memref<96x64xbf16, #tpu.memory_space<vmem>>, vector<80x64xbf16>
    %c0_214 = arith.constant 0 : index
    %c192_215 = arith.constant 192 : index
    %265 = vector.load %arg22[%c0_214, %c192_215] : memref<80x576xbf16, #tpu.memory_space<vmem>>, vector<80x64xbf16>
    tpu.vector_store %arg22[%c0_214, %c192_215], %264 {strides = array<i32>} : memref<80x576xbf16, #tpu.memory_space<vmem>>, vector<80x64xbf16>,
    %c7_216 = arith.constant 7 : index
    %c0_217 = arith.constant 0 : index
    %266 = vector.load %arg21[%c7_216, %c0_217] : memref<96x64xbf16, #tpu.memory_space<vmem>>, vector<80x64xbf16>
    %c0_218 = arith.constant 0 : index
    %c256_219 = arith.constant 256 : index
    %267 = vector.load %arg22[%c0_218, %c256_219] : memref<80x576xbf16, #tpu.memory_space<vmem>>, vector<80x64xbf16>
    tpu.vector_store %arg22[%c0_218, %c256_219], %266 {strides = array<i32>} : memref<80x576xbf16, #tpu.memory_space<vmem>>, vector<80x64xbf16>,
    %c8 = arith.constant 8 : index
    %c0_220 = arith.constant 0 : index
    %268 = vector.load %arg21[%c8, %c0_220] : memref<96x64xbf16, #tpu.memory_space<vmem>>, vector<80x64xbf16>
    %c0_221 = arith.constant 0 : index
    %c320_222 = arith.constant 320 : index
    %269 = vector.load %arg22[%c0_221, %c320_222] : memref<80x576xbf16, #tpu.memory_space<vmem>>, vector<80x64xbf16>
    tpu.vector_store %arg22[%c0_221, %c320_222], %268 {strides = array<i32>} : memref<80x576xbf16, #tpu.memory_space<vmem>>, vector<80x64xbf16>,
    %c12_223 = arith.constant 12 : index
    %c0_224 = arith.constant 0 : index
    %270 = vector.load %arg21[%c12_223, %c0_224] : memref<96x64xbf16, #tpu.memory_space<vmem>>, vector<80x64xbf16>
    %c0_225 = arith.constant 0 : index
    %c384_226 = arith.constant 384 : index
    %271 = vector.load %arg22[%c0_225, %c384_226] : memref<80x576xbf16, #tpu.memory_space<vmem>>, vector<80x64xbf16>
    tpu.vector_store %arg22[%c0_225, %c384_226], %270 {strides = array<i32>} : memref<80x576xbf16, #tpu.memory_space<vmem>>, vector<80x64xbf16>,
    %c13_227 = arith.constant 13 : index
    %c0_228 = arith.constant 0 : index
    %272 = vector.load %arg21[%c13_227, %c0_228] : memref<96x64xbf16, #tpu.memory_space<vmem>>, vector<80x64xbf16>
    %c0_229 = arith.constant 0 : index
    %c448_230 = arith.constant 448 : index
    %273 = vector.load %arg22[%c0_229, %c448_230] : memref<80x576xbf16, #tpu.memory_space<vmem>>, vector<80x64xbf16>
    tpu.vector_store %arg22[%c0_229, %c448_230], %272 {strides = array<i32>} : memref<80x576xbf16, #tpu.memory_space<vmem>>, vector<80x64xbf16>,
    %c14 = arith.constant 14 : index
    %c0_231 = arith.constant 0 : index
    %274 = vector.load %arg21[%c14, %c0_231] : memref<96x64xbf16, #tpu.memory_space<vmem>>, vector<80x64xbf16>
    %c0_232 = arith.constant 0 : index
    %c512 = arith.constant 512 : index
    %275 = vector.load %arg22[%c0_232, %c512] : memref<80x576xbf16, #tpu.memory_space<vmem>>, vector<80x64xbf16>
    tpu.vector_store %arg22[%c0_232, %c512], %274 {strides = array<i32>} : memref<80x576xbf16, #tpu.memory_space<vmem>>, vector<80x64xbf16>,
    %c0_233 = arith.constant 0 : index
    %c0_234 = arith.constant 0 : index
    %276 = vector.load %arg22[%c0_233, %c0_234] : memref<80x576xbf16, #tpu.memory_space<vmem>>, vector<80x576xbf16>
    %c0_235 = arith.constant 0 : index
    %c0_236 = arith.constant 0 : index
    %277 = vector.load %arg6[%c0_235, %c0_236] : memref<576x128xbf16, #tpu.memory_space<vmem>>, vector<576x128xbf16>
    %cst_237 = arith.constant dense<0.000000e+00> : vector<80x128xf32>
    %278 = tpu.matmul %276, %277, %cst_237 {dimension_numbers = #tpu.dot_dimension_numbers<[1], [0], [0], [1], [0, 0, 1, 1], [], []>} : vector<80x576xbf16>, vector<576x128xbf16>, vector<80x128xf32> -> vector<80x128xf32>
    %c0_238 = arith.constant 0 : index
    %c0_239 = arith.constant 0 : index
    %279 = vector.load %arg7[%c0_238, %c0_239] : memref<1x128xf32, #tpu.memory_space<vmem>>, vector<1x128xf32>
    %280 = vector.broadcast %279 : vector<1x128xf32> to vector<80x128xf32>
    %281 = arith.addf %278, %280 : vector<80x128xf32>
    %cst_240 = arith.constant 0.000000e+00 : f32
    %282 = vector.broadcast %cst_240 : f32 to vector<80x128xf32>
    %283 = arith.maximumf %281, %282 : vector<80x128xf32>
    %c0_241 = arith.constant 0 : index
    %c0_242 = arith.constant 0 : index
    %284 = vector.load %arg23[%c0_241, %c0_242] : memref<80x128xf32, #tpu.memory_space<vmem>>, vector<80x128xf32>
    tpu.vector_store %arg23[%c0_241, %c0_242], %283 {strides = array<i32>} : memref<80x128xf32, #tpu.memory_space<vmem>>, vector<80x128xf32>,
    %c0_243 = arith.constant 0 : index
    %c0_244 = arith.constant 0 : index
    %285 = tpu.strided_load %arg23[%c0_243, %c0_244] {strides = array<i32: 2, 1>} : memref<80x128xf32, #tpu.memory_space<vmem>>, vector<2x128xf32>
    %c1_245 = arith.constant 1 : index
    %c0_246 = arith.constant 0 : index
    %286 = tpu.strided_load %arg23[%c1_245, %c0_246] {strides = array<i32: 2, 1>} : memref<80x128xf32, #tpu.memory_space<vmem>>, vector<2x128xf32>
    %c6_247 = arith.constant 6 : index
    %c0_248 = arith.constant 0 : index
    %287 = tpu.strided_load %arg23[%c6_247, %c0_248] {strides = array<i32: 2, 1>} : memref<80x128xf32, #tpu.memory_space<vmem>>, vector<2x128xf32>
    %c7_249 = arith.constant 7 : index
    %c0_250 = arith.constant 0 : index
    %288 = tpu.strided_load %arg23[%c7_249, %c0_250] {strides = array<i32: 2, 1>} : memref<80x128xf32, #tpu.memory_space<vmem>>, vector<2x128xf32>
    %289 = arith.maximumf %285, %286 : vector<2x128xf32>
    %290 = arith.maximumf %287, %288 : vector<2x128xf32>
    %291 = arith.maximumf %289, %290 : vector<2x128xf32>
    %292 = arith.truncf %291 : vector<2x128xf32> to vector<2x128xbf16>
    %c5 = arith.constant 5 : index
    %c0_251 = arith.constant 0 : index
    %293 = vector.load %arg24[%c5, %c0_251] : memref<48x128xbf16, #tpu.memory_space<vmem>>, vector<2x128xbf16>
    tpu.vector_store %arg24[%c5, %c0_251], %292 {strides = array<i32>} : memref<48x128xbf16, #tpu.memory_space<vmem>>, vector<2x128xbf16>,
    %c12_252 = arith.constant 12 : index
    %c0_253 = arith.constant 0 : index
    %294 = tpu.strided_load %arg23[%c12_252, %c0_253] {strides = array<i32: 2, 1>} : memref<80x128xf32, #tpu.memory_space<vmem>>, vector<2x128xf32>
    %c13_254 = arith.constant 13 : index
    %c0_255 = arith.constant 0 : index
    %295 = tpu.strided_load %arg23[%c13_254, %c0_255] {strides = array<i32: 2, 1>} : memref<80x128xf32, #tpu.memory_space<vmem>>, vector<2x128xf32>
    %c18 = arith.constant 18 : index
    %c0_256 = arith.constant 0 : index
    %296 = tpu.strided_load %arg23[%c18, %c0_256] {strides = array<i32: 2, 1>} : memref<80x128xf32, #tpu.memory_space<vmem>>, vector<2x128xf32>
    %c19_257 = arith.constant 19 : index
    %c0_258 = arith.constant 0 : index
    %297 = tpu.strided_load %arg23[%c19_257, %c0_258] {strides = array<i32: 2, 1>} : memref<80x128xf32, #tpu.memory_space<vmem>>, vector<2x128xf32>
    %298 = arith.maximumf %294, %295 : vector<2x128xf32>
    %299 = arith.maximumf %296, %297 : vector<2x128xf32>
    %300 = arith.maximumf %298, %299 : vector<2x128xf32>
    %301 = arith.truncf %300 : vector<2x128xf32> to vector<2x128xbf16>
    %c9 = arith.constant 9 : index
    %c0_259 = arith.constant 0 : index
    %302 = vector.load %arg24[%c9, %c0_259] : memref<48x128xbf16, #tpu.memory_space<vmem>>, vector<2x128xbf16>
    tpu.vector_store %arg24[%c9, %c0_259], %301 {strides = array<i32>} : memref<48x128xbf16, #tpu.memory_space<vmem>>, vector<2x128xbf16>,
    %c40_260 = arith.constant 40 : index
    %c0_261 = arith.constant 0 : index
    %303 = tpu.strided_load %arg23[%c40_260, %c0_261] {strides = array<i32: 2, 1>} : memref<80x128xf32, #tpu.memory_space<vmem>>, vector<2x128xf32>
    %c41_262 = arith.constant 41 : index
    %c0_263 = arith.constant 0 : index
    %304 = tpu.strided_load %arg23[%c41_262, %c0_263] {strides = array<i32: 2, 1>} : memref<80x128xf32, #tpu.memory_space<vmem>>, vector<2x128xf32>
    %c46 = arith.constant 46 : index
    %c0_264 = arith.constant 0 : index
    %305 = tpu.strided_load %arg23[%c46, %c0_264] {strides = array<i32: 2, 1>} : memref<80x128xf32, #tpu.memory_space<vmem>>, vector<2x128xf32>
    %c47_265 = arith.constant 47 : index
    %c0_266 = arith.constant 0 : index
    %306 = tpu.strided_load %arg23[%c47_265, %c0_266] {strides = array<i32: 2, 1>} : memref<80x128xf32, #tpu.memory_space<vmem>>, vector<2x128xf32>
    %307 = arith.maximumf %303, %304 : vector<2x128xf32>
    %308 = arith.maximumf %305, %306 : vector<2x128xf32>
    %309 = arith.maximumf %307, %308 : vector<2x128xf32>
    %310 = arith.truncf %309 : vector<2x128xf32> to vector<2x128xbf16>
    %c21_267 = arith.constant 21 : index
    %c0_268 = arith.constant 0 : index
    %311 = vector.load %arg24[%c21_267, %c0_268] : memref<48x128xbf16, #tpu.memory_space<vmem>>, vector<2x128xbf16>
    tpu.vector_store %arg24[%c21_267, %c0_268], %310 {strides = array<i32>} : memref<48x128xbf16, #tpu.memory_space<vmem>>, vector<2x128xbf16>,
    %c52 = arith.constant 52 : index
    %c0_269 = arith.constant 0 : index
    %312 = tpu.strided_load %arg23[%c52, %c0_269] {strides = array<i32: 2, 1>} : memref<80x128xf32, #tpu.memory_space<vmem>>, vector<2x128xf32>
    %c53_270 = arith.constant 53 : index
    %c0_271 = arith.constant 0 : index
    %313 = tpu.strided_load %arg23[%c53_270, %c0_271] {strides = array<i32: 2, 1>} : memref<80x128xf32, #tpu.memory_space<vmem>>, vector<2x128xf32>
    %c58 = arith.constant 58 : index
    %c0_272 = arith.constant 0 : index
    %314 = tpu.strided_load %arg23[%c58, %c0_272] {strides = array<i32: 2, 1>} : memref<80x128xf32, #tpu.memory_space<vmem>>, vector<2x128xf32>
    %c59_273 = arith.constant 59 : index
    %c0_274 = arith.constant 0 : index
    %315 = tpu.strided_load %arg23[%c59_273, %c0_274] {strides = array<i32: 2, 1>} : memref<80x128xf32, #tpu.memory_space<vmem>>, vector<2x128xf32>
    %316 = arith.maximumf %312, %313 : vector<2x128xf32>
    %317 = arith.maximumf %314, %315 : vector<2x128xf32>
    %318 = arith.maximumf %316, %317 : vector<2x128xf32>
    %319 = arith.truncf %318 : vector<2x128xf32> to vector<2x128xbf16>
    %c25_275 = arith.constant 25 : index
    %c0_276 = arith.constant 0 : index
    %320 = vector.load %arg24[%c25_275, %c0_276] : memref<48x128xbf16, #tpu.memory_space<vmem>>, vector<2x128xbf16>
    tpu.vector_store %arg24[%c25_275, %c0_276], %319 {strides = array<i32>} : memref<48x128xbf16, #tpu.memory_space<vmem>>, vector<2x128xbf16>,
    %c0_277 = arith.constant 0 : index
    %c0_278 = arith.constant 0 : index
    %321 = vector.load %arg24[%c0_277, %c0_278] : memref<48x128xbf16, #tpu.memory_space<vmem>>, vector<32x128xbf16>
    %c0_279 = arith.constant 0 : index
    %c0_280 = arith.constant 0 : index
    %322 = vector.load %arg25[%c0_279, %c0_280] : memref<32x1152xbf16, #tpu.memory_space<vmem>>, vector<32x128xbf16>
    tpu.vector_store %arg25[%c0_279, %c0_280], %321 {strides = array<i32>} : memref<32x1152xbf16, #tpu.memory_space<vmem>>, vector<32x128xbf16>,
    %c1_281 = arith.constant 1 : index
    %c0_282 = arith.constant 0 : index
    %323 = vector.load %arg24[%c1_281, %c0_282] : memref<48x128xbf16, #tpu.memory_space<vmem>>, vector<32x128xbf16>
    %c0_283 = arith.constant 0 : index
    %c128_284 = arith.constant 128 : index
    %324 = vector.load %arg25[%c0_283, %c128_284] : memref<32x1152xbf16, #tpu.memory_space<vmem>>, vector<32x128xbf16>
    tpu.vector_store %arg25[%c0_283, %c128_284], %323 {strides = array<i32>} : memref<32x1152xbf16, #tpu.memory_space<vmem>>, vector<32x128xbf16>,
    %c2_285 = arith.constant 2 : index
    %c0_286 = arith.constant 0 : index
    %325 = vector.load %arg24[%c2_285, %c0_286] : memref<48x128xbf16, #tpu.memory_space<vmem>>, vector<32x128xbf16>
    %c0_287 = arith.constant 0 : index
    %c256_288 = arith.constant 256 : index
    %326 = vector.load %arg25[%c0_287, %c256_288] : memref<32x1152xbf16, #tpu.memory_space<vmem>>, vector<32x128xbf16>
    tpu.vector_store %arg25[%c0_287, %c256_288], %325 {strides = array<i32>} : memref<32x1152xbf16, #tpu.memory_space<vmem>>, vector<32x128xbf16>,
    %c4 = arith.constant 4 : index
    %c0_289 = arith.constant 0 : index
    %327 = vector.load %arg24[%c4, %c0_289] : memref<48x128xbf16, #tpu.memory_space<vmem>>, vector<32x128xbf16>
    %c0_290 = arith.constant 0 : index
    %c384_291 = arith.constant 384 : index
    %328 = vector.load %arg25[%c0_290, %c384_291] : memref<32x1152xbf16, #tpu.memory_space<vmem>>, vector<32x128xbf16>
    tpu.vector_store %arg25[%c0_290, %c384_291], %327 {strides = array<i32>} : memref<32x1152xbf16, #tpu.memory_space<vmem>>, vector<32x128xbf16>,
    %c5_292 = arith.constant 5 : index
    %c0_293 = arith.constant 0 : index
    %329 = vector.load %arg24[%c5_292, %c0_293] : memref<48x128xbf16, #tpu.memory_space<vmem>>, vector<32x128xbf16>
    %c0_294 = arith.constant 0 : index
    %c512_295 = arith.constant 512 : index
    %330 = vector.load %arg25[%c0_294, %c512_295] : memref<32x1152xbf16, #tpu.memory_space<vmem>>, vector<32x128xbf16>
    tpu.vector_store %arg25[%c0_294, %c512_295], %329 {strides = array<i32>} : memref<32x1152xbf16, #tpu.memory_space<vmem>>, vector<32x128xbf16>,
    %c6_296 = arith.constant 6 : index
    %c0_297 = arith.constant 0 : index
    %331 = vector.load %arg24[%c6_296, %c0_297] : memref<48x128xbf16, #tpu.memory_space<vmem>>, vector<32x128xbf16>
    %c0_298 = arith.constant 0 : index
    %c640 = arith.constant 640 : index
    %332 = vector.load %arg25[%c0_298, %c640] : memref<32x1152xbf16, #tpu.memory_space<vmem>>, vector<32x128xbf16>
    tpu.vector_store %arg25[%c0_298, %c640], %331 {strides = array<i32>} : memref<32x1152xbf16, #tpu.memory_space<vmem>>, vector<32x128xbf16>,
    %c8_299 = arith.constant 8 : index
    %c0_300 = arith.constant 0 : index
    %333 = vector.load %arg24[%c8_299, %c0_300] : memref<48x128xbf16, #tpu.memory_space<vmem>>, vector<32x128xbf16>
    %c0_301 = arith.constant 0 : index
    %c768 = arith.constant 768 : index
    %334 = vector.load %arg25[%c0_301, %c768] : memref<32x1152xbf16, #tpu.memory_space<vmem>>, vector<32x128xbf16>
    tpu.vector_store %arg25[%c0_301, %c768], %333 {strides = array<i32>} : memref<32x1152xbf16, #tpu.memory_space<vmem>>, vector<32x128xbf16>,
    %c9_302 = arith.constant 9 : index
    %c0_303 = arith.constant 0 : index
    %335 = vector.load %arg24[%c9_302, %c0_303] : memref<48x128xbf16, #tpu.memory_space<vmem>>, vector<32x128xbf16>
    %c0_304 = arith.constant 0 : index
    %c896 = arith.constant 896 : index
    %336 = vector.load %arg25[%c0_304, %c896] : memref<32x1152xbf16, #tpu.memory_space<vmem>>, vector<32x128xbf16>
    tpu.vector_store %arg25[%c0_304, %c896], %335 {strides = array<i32>} : memref<32x1152xbf16, #tpu.memory_space<vmem>>, vector<32x128xbf16>,
    %c10_305 = arith.constant 10 : index
    %c0_306 = arith.constant 0 : index
    %337 = vector.load %arg24[%c10_305, %c0_306] : memref<48x128xbf16, #tpu.memory_space<vmem>>, vector<32x128xbf16>
    %c0_307 = arith.constant 0 : index
    %c1024 = arith.constant 1024 : index
    %338 = vector.load %arg25[%c0_307, %c1024] : memref<32x1152xbf16, #tpu.memory_space<vmem>>, vector<32x128xbf16>
    tpu.vector_store %arg25[%c0_307, %c1024], %337 {strides = array<i32>} : memref<32x1152xbf16, #tpu.memory_space<vmem>>, vector<32x128xbf16>,
    %c0_308 = arith.constant 0 : index
    %c0_309 = arith.constant 0 : index
    %339 = vector.load %arg25[%c0_308, %c0_309] : memref<32x1152xbf16, #tpu.memory_space<vmem>>, vector<32x1152xbf16>
    %c0_310 = arith.constant 0 : index
    %c0_311 = arith.constant 0 : index
    %340 = vector.load %arg8[%c0_310, %c0_311] : memref<1152x512xbf16, #tpu.memory_space<vmem>>, vector<1152x512xbf16>
    %cst_312 = arith.constant dense<0.000000e+00> : vector<32x512xf32>
    %341 = tpu.matmul %339, %340, %cst_312 {dimension_numbers = #tpu.dot_dimension_numbers<[1], [0], [0], [1], [0, 0, 1, 1], [], []>} : vector<32x1152xbf16>, vector<1152x512xbf16>, vector<32x512xf32> -> vector<32x512xf32>
    %c0_313 = arith.constant 0 : index
    %c0_314 = arith.constant 0 : index
    %342 = vector.load %arg9[%c0_313, %c0_314] : memref<1x512xf32, #tpu.memory_space<vmem>>, vector<1x512xf32>
    %343 = vector.broadcast %342 : vector<1x512xf32> to vector<32x512xf32>
    %344 = arith.addf %341, %343 : vector<32x512xf32>
    %cst_315 = arith.constant 0.000000e+00 : f32
    %345 = vector.broadcast %cst_315 : f32 to vector<32x512xf32>
    %346 = arith.maximumf %344, %345 : vector<32x512xf32>
    %c0_316 = arith.constant 0 : index
    %c0_317 = arith.constant 0 : index
    %347 = vector.load %arg26[%c0_316, %c0_317] : memref<32x512xf32, #tpu.memory_space<vmem>>, vector<32x512xf32>
    tpu.vector_store %arg26[%c0_316, %c0_317], %346 {strides = array<i32>} : memref<32x512xf32, #tpu.memory_space<vmem>>, vector<32x512xf32>,
    %c0_318 = arith.constant 0 : index
    %c0_319 = arith.constant 0 : index
    %348 = vector.load %arg26[%c0_318, %c0_319] : memref<32x512xf32, #tpu.memory_space<vmem>>, vector<1x512xf32>
    %c1_320 = arith.constant 1 : index
    %c0_321 = arith.constant 0 : index
    %349 = vector.load %arg26[%c1_320, %c0_321] : memref<32x512xf32, #tpu.memory_space<vmem>>, vector<1x512xf32>
    %c4_322 = arith.constant 4 : index
    %c0_323 = arith.constant 0 : index
    %350 = vector.load %arg26[%c4_322, %c0_323] : memref<32x512xf32, #tpu.memory_space<vmem>>, vector<1x512xf32>
    %c5_324 = arith.constant 5 : index
    %c0_325 = arith.constant 0 : index
    %351 = vector.load %arg26[%c5_324, %c0_325] : memref<32x512xf32, #tpu.memory_space<vmem>>, vector<1x512xf32>
    %352 = arith.maximumf %348, %349 : vector<1x512xf32>
    %353 = arith.maximumf %350, %351 : vector<1x512xf32>
    %354 = arith.maximumf %352, %353 : vector<1x512xf32>
    %355 = arith.truncf %354 : vector<1x512xf32> to vector<1x512xbf16>
    %c0_326 = arith.constant 0 : index
    %c0_327 = arith.constant 0 : index
    %356 = vector.load %arg27[%c0_326, %c0_327] : memref<2x512xbf16, #tpu.memory_space<vmem>>, vector<1x512xbf16>
    tpu.vector_store %arg27[%c0_326, %c0_327], %355 {strides = array<i32>} : memref<2x512xbf16, #tpu.memory_space<vmem>>, vector<1x512xbf16>,
    %c16_328 = arith.constant 16 : index
    %c0_329 = arith.constant 0 : index
    %357 = vector.load %arg26[%c16_328, %c0_329] : memref<32x512xf32, #tpu.memory_space<vmem>>, vector<1x512xf32>
    %c17_330 = arith.constant 17 : index
    %c0_331 = arith.constant 0 : index
    %358 = vector.load %arg26[%c17_330, %c0_331] : memref<32x512xf32, #tpu.memory_space<vmem>>, vector<1x512xf32>
    %c20_332 = arith.constant 20 : index
    %c0_333 = arith.constant 0 : index
    %359 = vector.load %arg26[%c20_332, %c0_333] : memref<32x512xf32, #tpu.memory_space<vmem>>, vector<1x512xf32>
    %c21_334 = arith.constant 21 : index
    %c0_335 = arith.constant 0 : index
    %360 = vector.load %arg26[%c21_334, %c0_335] : memref<32x512xf32, #tpu.memory_space<vmem>>, vector<1x512xf32>
    %361 = arith.maximumf %357, %358 : vector<1x512xf32>
    %362 = arith.maximumf %359, %360 : vector<1x512xf32>
    %363 = arith.maximumf %361, %362 : vector<1x512xf32>
    %364 = arith.truncf %363 : vector<1x512xf32> to vector<1x512xbf16>
    %c1_336 = arith.constant 1 : index
    %c0_337 = arith.constant 0 : index
    %365 = vector.load %arg27[%c1_336, %c0_337] : memref<2x512xbf16, #tpu.memory_space<vmem>>, vector<1x512xbf16>
    tpu.vector_store %arg27[%c1_336, %c0_337], %364 {strides = array<i32>} : memref<2x512xbf16, #tpu.memory_space<vmem>>, vector<1x512xbf16>,
    %c0_338 = arith.constant 0 : index
    %c0_339 = arith.constant 0 : index
    %366 = vector.load %arg27[%c0_338, %c0_339] : memref<2x512xbf16, #tpu.memory_space<vmem>>, vector<2x512xbf16>
    %c0_340 = arith.constant 0 : index
    %c0_341 = arith.constant 0 : index
    %367 = vector.load %arg10[%c0_340, %c0_341] : memref<512x512xbf16, #tpu.memory_space<vmem>>, vector<512x512xbf16>
    %cst_342 = arith.constant dense<0.000000e+00> : vector<2x512xf32>
    %368 = tpu.matmul %366, %367, %cst_342 {dimension_numbers = #tpu.dot_dimension_numbers<[1], [0], [0], [1], [0, 0, 1, 1], [], []>} : vector<2x512xbf16>, vector<512x512xbf16>, vector<2x512xf32> -> vector<2x512xf32>
    %c0_343 = arith.constant 0 : index
    %c0_344 = arith.constant 0 : index
    %369 = vector.load %arg11[%c0_343, %c0_344] : memref<1x512xf32, #tpu.memory_space<vmem>>, vector<1x512xf32>
    %370 = vector.broadcast %369 : vector<1x512xf32> to vector<2x512xf32>
    %371 = arith.addf %368, %370 : vector<2x512xf32>
    %cst_345 = arith.constant 0.000000e+00 : f32
    %372 = vector.broadcast %cst_345 : f32 to vector<2x512xf32>
    %373 = arith.maximumf %371, %372 : vector<2x512xf32>
    %374 = arith.truncf %373 : vector<2x512xf32> to vector<2x512xbf16>
    %c0_346 = arith.constant 0 : index
    %c0_347 = arith.constant 0 : index
    %375 = vector.load %arg12[%c0_346, %c0_347] : memref<512x512xbf16, #tpu.memory_space<vmem>>, vector<512x512xbf16>
    %cst_348 = arith.constant dense<0.000000e+00> : vector<2x512xf32>
    %376 = tpu.matmul %374, %375, %cst_348 {dimension_numbers = #tpu.dot_dimension_numbers<[1], [0], [0], [1], [0, 0, 1, 1], [], []>} : vector<2x512xbf16>, vector<512x512xbf16>, vector<2x512xf32> -> vector<2x512xf32>
    %c0_349 = arith.constant 0 : index
    %c0_350 = arith.constant 0 : index
    %377 = vector.load %arg13[%c0_349, %c0_350] : memref<1x512xf32, #tpu.memory_space<vmem>>, vector<1x512xf32>
    %378 = vector.broadcast %377 : vector<1x512xf32> to vector<2x512xf32>
    %379 = arith.addf %376, %378 : vector<2x512xf32>
    %cst_351 = arith.constant 0.000000e+00 : f32
    %380 = vector.broadcast %cst_351 : f32 to vector<2x512xf32>
    %381 = arith.maximumf %379, %380 : vector<2x512xf32>
    %382 = arith.truncf %381 : vector<2x512xf32> to vector<2x512xbf16>
    %c0_352 = arith.constant 0 : index
    %c0_353 = arith.constant 0 : index
    %383 = vector.load %arg14[%c0_352, %c0_353] : memref<512x10xbf16, #tpu.memory_space<vmem>>, vector<512x10xbf16>
    %cst_354 = arith.constant dense<0.000000e+00> : vector<2x10xf32>
    %384 = tpu.matmul %382, %383, %cst_354 {dimension_numbers = #tpu.dot_dimension_numbers<[1], [0], [0], [1], [0, 0, 1, 1], [], []>} : vector<2x512xbf16>, vector<512x10xbf16>, vector<2x10xf32> -> vector<2x10xf32>
    %c0_355 = arith.constant 0 : index
    %c0_356 = arith.constant 0 : index
    %385 = vector.load %arg15[%c0_355, %c0_356] : memref<1x10xf32, #tpu.memory_space<vmem>>, vector<1x10xf32>
    %386 = vector.broadcast %385 : vector<1x10xf32> to vector<2x10xf32>
    %387 = arith.addf %384, %386 : vector<2x10xf32>
    %c0_357 = arith.constant 0 : index
    %c0_358 = arith.constant 0 : index
    %c0_359 = arith.constant 0 : index
    %388 = vector.load %arg16[%c0_357, %c0_358, %c0_359] : memref<1x2x10xf32, #tpu.memory_space<vmem>>, vector<1x2x10xf32>
    %389 = vector.shape_cast %388 : vector<1x2x10xf32> to vector<2x10xf32>
    %390 = vector.shape_cast %387 : vector<2x10xf32> to vector<1x2x10xf32>
    tpu.vector_store %arg16[%c0_357, %c0_358, %c0_359], %390 {strides = array<i32>} : memref<1x2x10xf32, #tpu.memory_space<vmem>>, vector<1x2x10xf32>,
    return
  }
  func.func @transform_0(%arg0: i32) -> (i32, i32) {
    %c0_i32 = arith.constant 0 : i32
    %c0_i32_0 = arith.constant 0 : i32
    return %arg0, %c0_i32 : i32, i32
  }
  func.func @transform_1(%arg0: i32) -> (i32, i32) {
    %c0_i32 = arith.constant 0 : i32
    %c0_i32_0 = arith.constant 0 : i32
    %c0_i32_1 = arith.constant 0 : i32
    return %c0_i32, %c0_i32_0 : i32, i32
  }
  func.func @transform_2(%arg0: i32) -> (i32, i32) {
    %c0_i32 = arith.constant 0 : i32
    %c0_i32_0 = arith.constant 0 : i32
    %c0_i32_1 = arith.constant 0 : i32
    return %c0_i32, %c0_i32_0 : i32, i32
  }
  func.func @transform_3(%arg0: i32) -> (i32, i32) {
    %c0_i32 = arith.constant 0 : i32
    %c0_i32_0 = arith.constant 0 : i32
    %c0_i32_1 = arith.constant 0 : i32
    return %c0_i32, %c0_i32_0 : i32, i32
  }
  func.func @transform_4(%arg0: i32) -> (i32, i32) {
    %c0_i32 = arith.constant 0 : i32
    %c0_i32_0 = arith.constant 0 : i32
    %c0_i32_1 = arith.constant 0 : i32
    return %c0_i32, %c0_i32_0 : i32, i32
  }
  func.func @transform_5(%arg0: i32) -> (i32, i32) {
    %c0_i32 = arith.constant 0 : i32
    %c0_i32_0 = arith.constant 0 : i32
    %c0_i32_1 = arith.constant 0 : i32
    return %c0_i32, %c0_i32_0 : i32, i32
  }
  func.func @transform_6(%arg0: i32) -> (i32, i32) {
    %c0_i32 = arith.constant 0 : i32
    %c0_i32_0 = arith.constant 0 : i32
    %c0_i32_1 = arith.constant 0 : i32
    return %c0_i32, %c0_i32_0 : i32, i32
  }
  func.func @transform_7(%arg0: i32) -> (i32, i32) {
    %c0_i32 = arith.constant 0 : i32
    %c0_i32_0 = arith.constant 0 : i32
    %c0_i32_1 = arith.constant 0 : i32
    return %c0_i32, %c0_i32_0 : i32, i32
  }
  func.func @transform_8(%arg0: i32) -> (i32, i32) {
    %c0_i32 = arith.constant 0 : i32
    %c0_i32_0 = arith.constant 0 : i32
    %c0_i32_1 = arith.constant 0 : i32
    return %c0_i32, %c0_i32_0 : i32, i32
  }
  func.func @transform_9(%arg0: i32) -> (i32, i32) {
    %c0_i32 = arith.constant 0 : i32
    %c0_i32_0 = arith.constant 0 : i32
    %c0_i32_1 = arith.constant 0 : i32
    return %c0_i32, %c0_i32_0 : i32, i32
  }
  func.func @transform_10(%arg0: i32) -> (i32, i32) {
    %c0_i32 = arith.constant 0 : i32
    %c0_i32_0 = arith.constant 0 : i32
    %c0_i32_1 = arith.constant 0 : i32
    return %c0_i32, %c0_i32_0 : i32, i32
  }
  func.func @transform_11(%arg0: i32) -> (i32, i32) {
    %c0_i32 = arith.constant 0 : i32
    %c0_i32_0 = arith.constant 0 : i32
    %c0_i32_1 = arith.constant 0 : i32
    return %c0_i32, %c0_i32_0 : i32, i32
  }
  func.func @transform_12(%arg0: i32) -> (i32, i32) {
    %c0_i32 = arith.constant 0 : i32
    %c0_i32_0 = arith.constant 0 : i32
    %c0_i32_1 = arith.constant 0 : i32
    return %c0_i32, %c0_i32_0 : i32, i32
  }
  func.func @transform_13(%arg0: i32) -> (i32, i32) {
    %c0_i32 = arith.constant 0 : i32
    %c0_i32_0 = arith.constant 0 : i32
    %c0_i32_1 = arith.constant 0 : i32
    return %c0_i32, %c0_i32_0 : i32, i32
  }
  func.func @transform_14(%arg0: i32) -> (i32, i32) {
    %c0_i32 = arith.constant 0 : i32
    %c0_i32_0 = arith.constant 0 : i32
    %c0_i32_1 = arith.constant 0 : i32
    return %c0_i32, %c0_i32_0 : i32, i32
  }
  func.func @transform_15(%arg0: i32) -> (i32, i32, i32) {
    %c0_i32 = arith.constant 0 : i32
    %c0_i32_0 = arith.constant 0 : i32
    %c0_i32_1 = arith.constant 0 : i32
    return %arg0, %c0_i32, %c0_i32_0 : i32, i32, i32
  }
}

</mosaic_0001>

<bundles_post_ra>
// kernel: vgg_forward.1
= control target key start
LH: loop header
LB: loop body
LE: loop exit
PB: predicated region body
PF: predicated region fallthrough
CT: control target
= control target key end

     0   :  { %vm16445_vm0 = vcmask 1044480   ;;  %vm436_vm1 = vcmask 1045504   ;;  %v12500_v2 = vmov 65535   ;;  %vm338_vm2 = vcmask 220160   ;;  %s12504_s17 = smov 64   ;;  %s12505_s22 = smov 32   ;;  %s16421_s0 = inlined_call_operand.vmem [shape: bf16[512,27], index: 0, kind: input, shape index: {}]   ;;  %s16422_s1 = inlined_call_operand.vmem [shape: bf16[27,32], index: 1, kind: input, shape index: {}]   ;;  %s16423_s2 = inlined_call_operand.vmem [shape: f32[1,32], index: 2, kind: input, shape index: {}]   ;;  %s16424_s3 = inlined_call_operand.vmem [shape: bf16[288,64], index: 3, kind: input, shape index: {}]   ;;  %s16425_s4 = inlined_call_operand.vmem [shape: f32[1,64], index: 4, kind: input, shape index: {}]   ;;  %s16426_s5 = inlined_call_operand.vmem [shape: bf16[576,128], index: 5, kind: input, shape index: {}]   ;;  %s16427_s6 = inlined_call_operand.vmem [shape: f32[1,128], index: 6, kind: input, shape index: {}]   ;;  %s16428_s7 = inlined_call_operand.vmem [shape: bf16[1152,512], index: 7, kind: input, shape index: {}]   ;;  %s16429_s8 = inlined_call_operand.vmem [shape: f32[1,512], index: 8, kind: input, shape index: {}]   ;;  %s16430_s9 = inlined_call_operand.vmem [shape: bf16[512,512], index: 9, kind: input, shape index: {}]   ;;  %s16431_s10 = inlined_call_operand.vmem [shape: f32[1,512], index: 10, kind: input, shape index: {}]   ;;  %s16432_s11 = inlined_call_operand.vmem [shape: bf16[512,512], index: 11, kind: input, shape index: {}]   ;;  %s16433_s12 = inlined_call_operand.vmem [shape: f32[1,512], index: 12, kind: input, shape index: {}]   ;;  %s16434_s13 = inlined_call_operand.vmem [shape: bf16[512,10], index: 13, kind: input, shape index: {}]   ;;  %s16435_s14 = inlined_call_operand.vmem [shape: f32[1,10], index: 14, kind: input, shape index: {}]   ;;  %s16436_s15 = inlined_call_operand.hbm [shape: f32[1,2,10], index: 15, kind: output, shape index: {}]  }
   0x1   :  { %v11410_v0 = vld [vmem:[%s16422_s1] sm:$0xff]   ;;  %v11411_v1 = vld [vmem:[%s16422_s1 + $0x8] sm:$0x3f]   ;;  %v437_v3 = vsel %vm16445_vm0, 4294967295, %v12500_v2  ;;  %v11414_v8 = vld [vmem:[%s16421_s0 + $0x10] sm:$0xff]   ;;  %vm52_vm3 = vcmask 257024  }
   0x2   :  { %11145 = vmatprep.subr.bf16.mxu0 %v11410_v0  ;;  %v11412_v4 = vld [vmem:[%s16421_s0] sm:$0xff]   ;;  %v438_v5 = vsel %vm436_vm1, %v437_v3, 0  ;;  %v11413_v7 = vld [vmem:[%s16421_s0 + $0x8] sm:$0xff]   ;;  %v11415_v9 = vld [vmem:[%s16421_s0 + $0x18] sm:$0xff]   ;;  %v12501_v35 = vmov 0   ;;  %v12502_v39 = vmov 0.0  }
   0x3   :  { %11146 = vmatpush3.bf16.msra.mxu0 %v11410_v0  ;;  %v440_v6 = vand.u32 %v11411_v1, %v438_v5  ;;  %11149 = vmatprep.mubr.msk.bf16.mxu0 %vm338_vm2, %v11412_v4  ;;  %v11416_v10 = vld [vmem:[%s16421_s0 + $0x20] sm:$0xff]   ;;  %v11417_v11 = vld [vmem:[%s16421_s0 + $0x28] sm:$0xff]   ;;  %v11418_v12 = vld [vmem:[%s16421_s0 + $0x30] sm:$0xff]   ;;  %53 = vst.msk [vmem:[#allocation3] sm:$0xf] %vm52_vm3, %v12501_v35  ;;  %vm16443_vm4 = vmmov 0  }
   0x4   :  { %v11419_v13 = vld [vmem:[%s16421_s0 + $0x38] sm:$0xff]   ;;  %v11420_v14 = vld [vmem:[%s16421_s0 + $0x40] sm:$0xff]   ;;  %v11421_v15 = vld [vmem:[%s16421_s0 + $0x48] sm:$0xff]   ;;  %54 = vst.msk [vmem:[#allocation3 + $0x4] sm:$0xf] %vm52_vm3, %v12501_v35  ;;  %vm795_vm5 = vcmask 261120  }
   0x5   :  { %11147 = vmatprep.subr.bf16.mxu0 %v440_v6  ;;  %v11422_v16 = vld [vmem:[%s16421_s0 + $0x50] sm:$0xff]   ;;  %v11423_v17 = vld [vmem:[%s16421_s0 + $0x58] sm:$0xff]   ;;  %v11424_v18 = vld [vmem:[%s16421_s0 + $0x60] sm:$0xff]   ;;  %55 = vst.msk [vmem:[#allocation3 + $0x8] sm:$0xf] %vm52_vm3, %v12501_v35  ;;  %vm885_vm7 = vcmask 257025  }
   0x6   :  { %v11425_v19 = vld [vmem:[%s16421_s0 + $0x68] sm:$0xff]   ;;  %v11426_v20 = vld [vmem:[%s16421_s0 + $0x70] sm:$0xff]   ;;  %v11427_v21 = vld [vmem:[%s16421_s0 + $0x78] sm:$0xff]   ;;  %56 = vst.msk [vmem:[#allocation3 + $0xc] sm:$0xf] %vm52_vm3, %v12501_v35  ;;  %vm891_vm8 = vcmask 254976  }
   0x7   :  { %11148 = vmatpush3.bf16.msra.mxu0 %v440_v6  ;;  %v11428_v22 = vld [vmem:[%s16421_s0 + $0x80] sm:$0xff]   ;;  %v11429_v23 = vld [vmem:[%s16421_s0 + $0x88] sm:$0xff]   ;;  %v11430_v24 = vld [vmem:[%s16421_s0 + $0x90] sm:$0xff]   ;;  %57 = vst.msk [vmem:[#allocation3 + $0x10] sm:$0xf] %vm52_vm3, %v12501_v35  ;;  %vm923_vm12 = vcmask 257026  }
   0x8   :  { %v11431_v25 = vld [vmem:[%s16421_s0 + $0x98] sm:$0xff]   ;;  %v11432_v26 = vld [vmem:[%s16421_s0 + $0xa0] sm:$0xff]   ;;  %v11433_v27 = vld [vmem:[%s16421_s0 + $0xa8] sm:$0xff]   ;;  %58 = vst.msk [vmem:[#allocation3 + $0x14] sm:$0xf] %vm52_vm3, %v12501_v35  ;;  %11213 = vmatprep.subr.bf16.mxu0 %v12502_v39  ;;  %vm929_vm14 = vcmask 256000  }
   0x9   :  { %v11434_v28 = vld [vmem:[%s16421_s0 + $0xb0] sm:$0xff]   ;;  %v11435_v29 = vld [vmem:[%s16421_s0 + $0xb8] sm:$0xff]   ;;  %v11436_v30 = vld [vmem:[%s16421_s0 + $0xc0] sm:$0xff]   ;;  %59 = vst.msk [vmem:[#allocation3 + $0x18] sm:$0xf] %vm52_vm3, %v12501_v35  ;;  %s12506_s23 = smov 96  }
   0xa   :  { %11150 = vmatmul.mubr.msk.bf16.vlgmr.msra.gmra.mrb[0].mxu0 %vm338_vm2, %v11413_v7  ;;  %v11437_v31 = vld [vmem:[%s16421_s0 + $0xc8] sm:$0xff]   ;;  %v11438_v32 = vld [vmem:[%s16421_s0 + $0xd0] sm:$0xff]   ;;  %v11439_v33 = vld [vmem:[%s16421_s0 + $0xd8] sm:$0xff]   ;;  %60 = vst.msk [vmem:[#allocation3 + $0x1c] sm:$0xf] %vm52_vm3, %v12501_v35 }
   0xb   :  { %11153 = vmatprep.mubr.msk.bf16.mxu0 %vm338_vm2, %v11414_v8  ;;  %v11440_v34 = vld [vmem:[%s16421_s0 + $0xe0] sm:$0xff]   ;;  %61 = vst.msk [vmem:[#allocation3 + $0x20] sm:$0xf] %vm52_vm3, %v12501_v35  ;;  %62 = vst.msk [vmem:[#allocation3 + $0x24] sm:$0xf] %vm52_vm3, %v12501_v35  ;;  %v11441_v36 = vld [vmem:[%s16421_s0 + $0xe8] sm:$0xff]  }
   0xc   :  { %63 = vst.msk [vmem:[#allocation3 + $0x28] sm:$0xf] %vm52_vm3, %v12501_v35  ;;  %64 = vst.msk [vmem:[#allocation3 + $0x2c] sm:$0xf] %vm52_vm3, %v12501_v35  ;;  %v11442_v37 = vld [vmem:[%s16421_s0 + $0xf0] sm:$0xff]   ;;  %v11443_v38 = vld [vmem:[%s16421_s0 + $0xf8] sm:$0xff]  }
   0xd   :  { %65 = vst.msk [vmem:[#allocation3 + $0x30] sm:$0xf] %vm52_vm3, %v12501_v35  ;;  %66 = vst.msk [vmem:[#allocation3 + $0x34] sm:$0xf] %vm52_vm3, %v12501_v35  ;;  %v11454_v40 = vld [vmem:[%s16424_s3 + $0x80] sm:$0xff]   ;;  %v11458_v41 = vld [vmem:[%s16424_s3 + $0x88] sm:$0xff]  }
   0xe   :  { %67 = vst.msk [vmem:[#allocation3 + $0x38] sm:$0xf] %vm52_vm3, %v12501_v35  ;;  %68 = vst.msk [vmem:[#allocation3 + $0x3c] sm:$0xf] %vm52_vm3, %v12501_v35  ;;  %11214 = vmatpush3.bf16.msra.mxu0 %v11454_v40  ;;  %v12767_v42 = vld [vmem:[%s16423_s2] ss:$0 sm:$0xff] }
   0xf   :  { %69 = vst.msk [vmem:[#allocation3 + $0x40] sm:$0xf] %vm52_vm3, %v12501_v35  ;;  %70 = vst.msk [vmem:[#allocation3 + $0x44] sm:$0xf] %vm52_vm3, %v12501_v35  ;;  %11215 = vmatprep.subr.bf16.mxu0 %v12502_v39  ;;  %vm16439_vm6 = vsmask.f32 7942 }
  0x10   :  { %71 = vst.msk [vmem:[#allocation3 + $0x48] sm:$0xf] %vm52_vm3, %v12501_v35  ;;  %72 = vst.msk [vmem:[#allocation3 + $0x4c] sm:$0xf] %vm52_vm3, %v12501_v35  ;;  %vm16440_vm9 = vsmask.f32 1280 }
  0x11   :  { %73 = vst.msk [vmem:[#allocation3 + $0x50] sm:$0xf] %vm52_vm3, %v12501_v35  ;;  %74 = vst.msk [vmem:[#allocation3 + $0x54] sm:$0xf] %vm52_vm3, %v12501_v35  ;;  %v894_v40 = vld [vmem:[#allocation3 + $0x8] sm:$0x3] }
  0x12   :  { %11154 = vmatmul.mubr.msk.bf16.gmra.mrb[4].mxu0 %vm338_vm2, %v11415_v9  ;;  %75 = vst.msk [vmem:[#allocation3 + $0x58] sm:$0xf] %vm52_vm3, %v12501_v35  ;;  %76 = vst.msk [vmem:[#allocation3 + $0x5c] sm:$0xf] %vm52_vm3, %v12501_v35  ;;  %vm16437_vm13 = vsmask.f32 7946 }
  0x13   :  { %11157 = vmatprep.mubr.msk.bf16.mxu0 %vm338_vm2, %v11416_v10  ;;  %77 = vst.msk [vmem:[#allocation3 + $0x60] sm:$0xf] %vm52_vm3, %v12501_v35  ;;  %78 = vst.msk [vmem:[#allocation3 + $0x64] sm:$0xf] %vm52_vm3, %v12501_v35  ;;  %11216 = vmatpush3.bf16.msra.mxu0 %v11458_v41  ;;  %vm16438_vm15 = vsmask.f32 2304 }
  0x14   :  { %79 = vst.msk [vmem:[#allocation3 + $0x68] sm:$0xf] %vm52_vm3, %v12501_v35  ;;  %80 = vst.msk [vmem:[#allocation3 + $0x6c] sm:$0xf] %vm52_vm3, %v12501_v35 }
  0x15   :  { %81 = vst.msk [vmem:[#allocation3 + $0x70] sm:$0xf] %vm52_vm3, %v12501_v35  ;;  %89 = vst [vmem:[#allocation9] sm:$0xff] %v12501_v35 }
  0x16   :  { %90 = vst [vmem:[#allocation9 + $0x8] sm:$0xff] %v12501_v35  ;;  %91 = vst [vmem:[#allocation9 + $0x10] sm:$0xff] %v12501_v35  ;;  %v888_v35 = vld [vmem:[#allocation3 + $0x4] sm:$0xe] }
  0x17   :  { %vm12792_vm10 = vmand %vm885_vm7, %vm16439_vm6  ;;  %vm961_vm7 = vcmask 257027   ;;  %vm16448_vm6 = vsmask.f32 256 }
  0x18   :  { %vm12799_vm11 = vmand %vm891_vm8, %vm16440_vm9  ;;  %vm16441_vm8 = vsmask.f32 7950 }
  0x19   :  { %vm12863_vm9 = vmand %vm961_vm7, %vm16441_vm8  ;;  %vm1859_vm8 = vcmask 1046528  }
  0x1a   :  { %11158 = vmatmul.mubr.msk.bf16.gmra.mrb[8].mxu0 %vm338_vm2, %v11417_v11 }
  0x1b   :  { %11161 = vmatprep.mubr.msk.bf16.mxu0 %vm338_vm2, %v11418_v12 }
  0x22   :  { %11162 = vmatmul.mubr.msk.bf16.gmra.mrb[12].mxu0 %vm338_vm2, %v11419_v13 }
  0x23   :  { %11165 = vmatprep.mubr.msk.bf16.mxu0 %vm338_vm2, %v11420_v14 }
  0x2a   :  { %11166 = vmatmul.mubr.msk.bf16.gmra.mrb[16].mxu0 %vm338_vm2, %v11421_v15 }
  0x2b   :  { %11169 = vmatprep.mubr.msk.bf16.mxu0 %vm338_vm2, %v11422_v16 }
  0x32   :  { %11170 = vmatmul.mubr.msk.bf16.gmra.mrb[20].mxu0 %vm338_vm2, %v11423_v17 }
  0x33   :  { %11173 = vmatprep.mubr.msk.bf16.mxu0 %vm338_vm2, %v11424_v18 }
  0x3a   :  { %11174 = vmatmul.mubr.msk.bf16.gmra.mrb[24].mxu0 %vm338_vm2, %v11425_v19 }
  0x3b   :  { %11177 = vmatprep.mubr.msk.bf16.mxu0 %vm338_vm2, %v11426_v20 }
  0x42   :  { %11178 = vmatmul.mubr.msk.bf16.gmra.mrb[28].mxu0 %vm338_vm2, %v11427_v21 }
  0x43   :  { %11181 = vmatprep.mubr.msk.bf16.mxu0 %vm338_vm2, %v11428_v22 }
  0x4a   :  { %11182 = vmatmul.mubr.msk.bf16.gmra.mrb[32].mxu0 %vm338_vm2, %v11429_v23 }
  0x4b   :  { %11185 = vmatprep.mubr.msk.bf16.mxu0 %vm338_vm2, %v11430_v24 }
  0x52   :  { %11186 = vmatmul.mubr.msk.bf16.gmra.mrb[36].mxu0 %vm338_vm2, %v11431_v25 }
  0x53   :  { %11189 = vmatprep.mubr.msk.bf16.mxu0 %vm338_vm2, %v11432_v26 }
  0x5a   :  { %11190 = vmatmul.mubr.msk.bf16.gmra.mrb[40].mxu0 %vm338_vm2, %v11433_v27 }
  0x5b   :  { %11193 = vmatprep.mubr.msk.bf16.mxu0 %vm338_vm2, %v11434_v28 }
  0x62   :  { %11194 = vmatmul.mubr.msk.bf16.gmra.mrb[44].mxu0 %vm338_vm2, %v11435_v29 }
  0x63   :  { %11197 = vmatprep.mubr.msk.bf16.mxu0 %vm338_vm2, %v11436_v30 }
  0x6a   :  { %11198 = vmatmul.mubr.msk.bf16.gmra.mrb[48].mxu0 %vm338_vm2, %v11437_v31 }
  0x6b   :  { %11201 = vmatprep.mubr.msk.bf16.mxu0 %vm338_vm2, %v11438_v32 }
  0x72   :  { %11202 = vmatmul.mubr.msk.bf16.gmra.mrb[52].mxu0 %vm338_vm2, %v11439_v33 }
  0x73   :  { %11205 = vmatprep.mubr.msk.bf16.mxu0 %vm338_vm2, %v11440_v34 }
  0x7a   :  { %11206 = vmatmul.mubr.msk.bf16.gmra.mrb[56].mxu0 %vm338_vm2, %v11441_v36 }
  0x7b   :  { %11209 = vmatprep.mubr.msk.bf16.mxu0 %vm338_vm2, %v11442_v37 }
  0x82   :  { %11210 = vmatmul.mubr.msk.bf16.gmra.mrb[60].mxu0 %vm338_vm2, %v11443_v38  ;;  %vm12822_vm2 = vmand %vm923_vm12, %vm16437_vm13  ;;  %vm16442_vm13 = vsmask.f32 3328 }
  0x83   :  { %11217 = vmatprep.mubr.msk.bf16.mxu0 %vm16443_vm4, %v12502_v39  ;;  %vm12831_vm12 = vmand %vm929_vm14, %vm16438_vm15  ;;  %vm16446_vm14 = vsmask.f32 7938  ;;  %vm1003_vm15 = vcmask 253952   ;;  %vm1602_vm4 = vsmask.f32 7424 }
  0x84   :  { %vm12876_vm7 = vmand %vm52_vm3, %vm16442_vm13 }
  0x85   :  { %vm12901_vm13 = vmand %vm52_vm3, %vm16446_vm14  ;;  %vm16447_vm3 = vsmask.f32 5376  ;;  %vm16467_vm14 = vcmask 1044480  }
  0x86   :  { %vm12909_vm0 = vmand %vm1003_vm15, %vm16448_vm6  ;;  %vm16465_vm15 = vcmask 1044480  }
  0xdd   :  { %v11151_v43 = vpop.f32.mrb[0].mxu0 }
  0xde   :  { %v485_v44 = vadd.f32 %v11151_v43, %v12767_v42  ;;  %v476_v45 = vpop.f32.mrb[1].mxu0 }
  0xdf   :  { %v477_v46 = vadd.f32 %v12767_v42, %v476_v45  ;;  %v11152_v47 = vpop.f32.mrb[2].mxu0 }
  0xe0   :  { %v733_v48 = vmax.f32 %v485_v44, 0.0  ;;  %v488_v49 = vadd.f32 %v11152_v47, %v12767_v42  ;;  %v479_v50 = vpop.f32.mrb[3].mxu0 }
  0xe1   :  { %v731_v51 = vmax.f32 %v477_v46, 0.0  ;;  %v480_v52 = vadd.f32 %v12767_v42, %v479_v50 }
  0xe2   :  { %798 = vst.msk [vmem:[#allocation2 + $0x10] sm:$0xff] %vm795_vm5, %v733_v48  ;;  %v734_v53 = vmax.f32 %v488_v49, 0.0 }
  0xe3   :  { %796 = vst.msk [vmem:[#allocation2] sm:$0xff] %vm795_vm5, %v731_v51  ;;  %v732_v54 = vmax.f32 %v480_v52, 0.0 }
  0xe4   :  { %799 = vst.msk [vmem:[#allocation2 + $0x18] sm:$0xff] %vm795_vm5, %v734_v53  ;;  %v12808_v53 = vld [vmem:[#allocation3 + $0x30] sm:$0xff]  }
  0xe5   :  { %797 = vst.msk [vmem:[#allocation2 + $0x8] sm:$0xff] %vm795_vm5, %v732_v54  ;;  %v11155_v55 = vpop.f32.mrb[4].mxu0 }
  0xe6   :  { %v501_v56 = vadd.f32 %v11155_v55, %v12767_v42  ;;  %v492_v57 = vpop.f32.mrb[5].mxu0 }
  0xe7   :  { %v493_v58 = vadd.f32 %v12767_v42, %v492_v57  ;;  %v11156_v59 = vpop.f32.mrb[6].mxu0  ;;  %v12815_v57 = vld [vmem:[#allocation3 + $0x30] sm:$0xff]  }
  0xe8   :  { %v737_v60 = vmax.f32 %v501_v56, 0.0  ;;  %v504_v61 = vadd.f32 %v11156_v59, %v12767_v42  ;;  %v495_v62 = vpop.f32.mrb[7].mxu0  ;;  %v12813_v56 = vld [vmem:[#allocation3 + $0x30] sm:$0xff]  }
  0xe9   :  { %v735_v63 = vmax.f32 %v493_v58, 0.0  ;;  %v496_v0 = vadd.f32 %v12767_v42, %v495_v62 }
  0xea   :  { %802 = vst.msk [vmem:[#allocation2 + $0x30] sm:$0xff] %vm795_vm5, %v737_v60  ;;  %v738_v1 = vmax.f32 %v504_v61, 0.0 }
  0xeb   :  { %v864_v2 = vld [vmem:[#allocation2 + $0x10] ss:$2 sm:$0xff]  ;;  %v866_v3 = vld [vmem:[#allocation2 + $0x11] ss:$2 sm:$0xff]  ;;  %800 = vst.msk [vmem:[#allocation2 + $0x20] sm:$0xff] %vm795_vm5, %v735_v63  ;;  %v736_v4 = vmax.f32 %v496_v0, 0.0 }
  0xec   :  { %v868_v5 = vmax.f32 %v864_v2, %v866_v3  ;;  %v860_v6 = vld [vmem:[#allocation2] ss:$2 sm:$0xff]  ;;  %v862_v7 = vld [vmem:[#allocation2 + $0x1] ss:$2 sm:$0xff]  ;;  %803 = vst.msk [vmem:[#allocation2 + $0x38] sm:$0xff] %vm795_vm5, %v738_v1  ;;  %v12827_v3 = vld [vmem:[#allocation3 + $0x30] sm:$0xff]  }
  0xed   :  { %v867_v8 = vmax.f32 %v860_v6, %v862_v7  ;;  %801 = vst.msk [vmem:[#allocation2 + $0x28] sm:$0xff] %vm795_vm5, %v736_v4  ;;  %v11159_v9 = vpop.f32.mrb[8].mxu0  ;;  %v926_v2 = vld [vmem:[#allocation3 + $0x8] sm:$0xc] }
  0xee   :  { %v517_v10 = vadd.f32 %v11159_v9, %v12767_v42  ;;  %v508_v11 = vpop.f32.mrb[9].mxu0 }
  0xef   :  { %v869_v12 = vmax.f32 %v867_v8, %v868_v5  ;;  %v509_v13 = vadd.f32 %v12767_v42, %v508_v11  ;;  %v11160_v14 = vpop.f32.mrb[10].mxu0  ;;  %v932_v11 = vld [vmem:[#allocation3 + $0xc] sm:$0x7] }
  0xf0   :  { %v741_v15 = vmax.f32 %v517_v10, 0.0  ;;  %v520_v16 = vadd.f32 %v11160_v14, %v12767_v42  ;;  %v511_v17 = vpop.f32.mrb[11].mxu0 }
  0xf1   :  { %v10841_v18 = vpack.c.bf16 %v869_v12, %v869_v12  ;;  %v739_v19 = vmax.f32 %v509_v13, 0.0  ;;  %v512_v20 = vadd.f32 %v12767_v42, %v511_v17 }
  0xf2   :  { %806 = vst.msk [vmem:[#allocation2 + $0x50] sm:$0xff] %vm795_vm5, %v741_v15  ;;  %v742_v21 = vmax.f32 %v520_v16, 0.0  ;;  %v1871_v15 = vrot.slane %v12808_v53, 1 }
  0xf3   :  { %v875_v22 = vshrl.u32 %v10841_v18, 16  ;;  %v878_v23 = vshll.u32 %v10841_v18, 16  ;;  %v902_v24 = vld [vmem:[#allocation2 + $0x30] ss:$2 sm:$0xff]  ;;  %v904_v25 = vld [vmem:[#allocation2 + $0x31] ss:$2 sm:$0xff] }
  0xf4   :  { %804 = vst.msk [vmem:[#allocation2 + $0x40] sm:$0xff] %vm795_vm5, %v739_v19  ;;  %v906_v27 = vmax.f32 %v902_v24, %v904_v25  ;;  %v898_v28 = vld [vmem:[#allocation2 + $0x20] ss:$2 sm:$0xff]  ;;  %v900_v29 = vld [vmem:[#allocation2 + $0x21] ss:$2 sm:$0xff]  ;;  %807 = vst.msk [vmem:[#allocation2 + $0x58] sm:$0xff] %vm795_vm5, %v742_v21 }
  0xf5   :  { %v740_v30 = vmax.f32 %v512_v20, 0.0  ;;  %v877_v31 = vrot.slane %v875_v22, 6  ;;  %v880_v32 = vrot.slane %v878_v23, 7  ;;  %v905_v33 = vmax.f32 %v898_v28, %v900_v29  ;;  %v11163_v34 = vpop.f32.mrb[12].mxu0 }
  0xf6   :  { %v533_v37 = vadd.f32 %v11163_v34, %v12767_v42  ;;  %v524_v38 = vpop.f32.mrb[13].mxu0  ;;  %v2641_v19 = vrot.slane %v12813_v56, 2 }
  0xf7   :  { %805 = vst.msk [vmem:[#allocation2 + $0x48] sm:$0xff] %vm795_vm5, %v740_v30  ;;  %v881_v41 = vor.u32 %v880_v32, %v877_v31  ;;  %v907_v43 = vmax.f32 %v905_v33, %v906_v27  ;;  %v525_v44 = vadd.f32 %v12767_v42, %v524_v38  ;;  %v11164_v45 = vpop.f32.mrb[14].mxu0  ;;  %v12847_v31 = vld [vmem:[#allocation3 + $0x30] sm:$0xff]   ;;  %v2852_v32 = vshrl.u32 %v12827_v3, 16 }
  0xf8   :  { %v745_v46 = vmax.f32 %v533_v37, 0.0  ;;  %v536_v47 = vadd.f32 %v11164_v45, %v12767_v42  ;;  %v527_v48 = vpop.f32.mrb[15].mxu0  ;;  %v964_v45 = vld [vmem:[#allocation3 + $0xc] sm:$0x8] }
  0xf9   :  { %v882_v49 = vrot.slane %v881_v41, 4  ;;  %v10842_v50 = vpack.c.bf16 %v907_v43, %v907_v43  ;;  %v743_v51 = vmax.f32 %v525_v44, 0.0  ;;  %v528_v52 = vadd.f32 %v12767_v42, %v527_v48 }
  0xfa   :  { %810 = vst.msk [vmem:[#allocation2 + $0x70] sm:$0xff] %vm795_vm5, %v745_v46  ;;  %v746_v54 = vmax.f32 %v536_v47, 0.0  ;;  %v889_v55 = vsel %vm12792_vm10, %v881_v41, %v888_v35 }
  0xfb   :  { %v913_v58 = vshrl.u32 %v10842_v50, 16  ;;  %v916_v59 = vshll.u32 %v10842_v50, 16  ;;  %v940_v60 = vld [vmem:[#allocation2 + $0x50] ss:$2 sm:$0xff]  ;;  %v942_v61 = vld [vmem:[#allocation2 + $0x51] ss:$2 sm:$0xff]  ;;  %v895_v62 = vsel %vm12799_vm11, %v882_v49, %v894_v40 }
  0xfc   :  { %808 = vst.msk [vmem:[#allocation2 + $0x60] sm:$0xff] %vm795_vm5, %v743_v51  ;;  %890 = vst [vmem:[#allocation3 + $0x4] sm:$0xe] %v889_v55  ;;  %v944_v0 = vmax.f32 %v940_v60, %v942_v61  ;;  %v744_v1 = vmax.f32 %v528_v52, 0.0  ;;  %v2855_v50 = vshll.u32 %v12827_v3, 16 }
  0xfd   :  { %811 = vst.msk [vmem:[#allocation2 + $0x78] sm:$0xff] %vm795_vm5, %v746_v54  ;;  %896 = vst [vmem:[#allocation3 + $0x8] sm:$0x3] %v895_v62  ;;  %v915_v4 = vrot.slane %v913_v58, 5  ;;  %v918_v5 = vrot.slane %v916_v59, 6  ;;  %v11167_v10 = vpop.f32.mrb[16].mxu0 }
  0xfe   :  { %v936_v6 = vld [vmem:[#allocation2 + $0x40] ss:$2 sm:$0xff]  ;;  %v938_v7 = vld [vmem:[#allocation2 + $0x41] ss:$2 sm:$0xff]  ;;  %809 = vst.msk [vmem:[#allocation2 + $0x68] sm:$0xff] %vm795_vm5, %v744_v1  ;;  %v549_v13 = vadd.f32 %v11167_v10, %v12767_v42  ;;  %v540_v14 = vpop.f32.mrb[17].mxu0 }
  0xff   :  { %v943_v9 = vmax.f32 %v936_v6, %v938_v7  ;;  %v919_v12 = vor.u32 %v918_v5, %v915_v4  ;;  %v541_v17 = vadd.f32 %v12767_v42, %v540_v14  ;;  %v11168_v18 = vpop.f32.mrb[18].mxu0  ;;  %v1651_v1 = vshll.u32 %v12847_v31, 16 }
 0x100   :  { %v749_v22 = vmax.f32 %v549_v13, 0.0  ;;  %v552_v23 = vadd.f32 %v11168_v18, %v12767_v42  ;;  %v543_v24 = vpop.f32.mrb[19].mxu0  ;;  %v12880_v13 = vrot.slane %v2852_v32, 2 }
 0x101   :  { %v945_v16 = vmax.f32 %v943_v9, %v944_v0  ;;  %v920_v21 = vrot.slane %v919_v12, 4  ;;  %v927_v25 = vsel %vm12822_vm2, %v919_v12, %v926_v2  ;;  %v747_v28 = vmax.f32 %v541_v17, 0.0  ;;  %v970_v0 = vld [vmem:[#allocation3 + $0x10] sm:$0xf] }
 0x102   :  { %v544_v29 = vadd.f32 %v12767_v42, %v543_v24  ;;  %928 = vst [vmem:[#allocation3 + $0x8] sm:$0xc] %v927_v25  ;;  %814 = vst.msk [vmem:[#allocation2 + $0x90] sm:$0xff] %vm795_vm5, %v749_v22  ;;  %v750_v35 = vmax.f32 %v552_v23, 0.0  ;;  %v11512_v24 = vld [vmem:[%s16424_s3 + $0x40] sm:$0xff]  }
 0x103   :  { %v10843_v27 = vpack.c.bf16 %v945_v16, %v945_v16  ;;  %v12845_v30 = vld [vmem:[#allocation3] sm:$0xff]   ;;  %v933_v37 = vsel %vm12831_vm12, %v920_v21, %v932_v11  ;;  %812 = vst.msk [vmem:[#allocation2 + $0x80] sm:$0xff] %vm795_vm5, %v747_v28  ;;  %10891 = vmatprep.subr.bf16.mxu1 %v11512_v24 }
 0x104   :  { %v978_v33 = vld [vmem:[#allocation2 + $0x70] ss:$2 sm:$0xff]  ;;  %v980_v34 = vld [vmem:[#allocation2 + $0x71] ss:$2 sm:$0xff]  ;;  %v11525_v38 = vld [vmem:[#allocation3] sm:$0xff]   ;;  %v748_v44 = vmax.f32 %v544_v29, 0.0 }
 0x105   :  { %v951_v40 = vshll.u32 %v10843_v27, 16  ;;  %v954_v41 = vshrl.u32 %v10843_v27, 16  ;;  %v982_v43 = vmax.f32 %v978_v33, %v980_v34  ;;  %934 = vst [vmem:[#allocation3 + $0xc] sm:$0x7] %v933_v37  ;;  %v974_v46 = vld [vmem:[#allocation2 + $0x60] ss:$2 sm:$0xff] }
 0x106   :  { %v976_v47 = vld [vmem:[#allocation2 + $0x61] ss:$2 sm:$0xff]  ;;  %815 = vst.msk [vmem:[#allocation2 + $0x98] sm:$0xff] %vm795_vm5, %v750_v35  ;;  %v11171_v48 = vpop.f32.mrb[20].mxu0  ;;  %1494 = vst.msk [vmem:[#allocation4] sm:$0xff] %vm795_vm5, %v11525_v38  ;;  %v1606_v62 = vshll.u32 %v12845_v30, 16 }
 0x107   :  { %v12855_v49 = vld [vmem:[#allocation3] sm:$0xfe]   ;;  %v953_v51 = vrot.slane %v951_v40, 5  ;;  %v956_v52 = vrot.slane %v954_v41, 4  ;;  %v981_v54 = vmax.f32 %v974_v46, %v976_v47  ;;  %813 = vst.msk [vmem:[#allocation2 + $0x88] sm:$0xff] %vm795_vm5, %v748_v44  ;;  %v565_v55 = vadd.f32 %v11171_v48, %v12767_v42  ;;  %v556_v58 = vpop.f32.mrb[21].mxu0 }
 0x108   :  { %v557_v60 = vadd.f32 %v12767_v42, %v556_v58  ;;  %v11172_v61 = vpop.f32.mrb[22].mxu0  ;;  %v1860_v22 = vrot.slane %v12855_v49, 1  ;;  %v1604_v23 = vshrl.u32 %v12845_v30, 16  ;;  %v12892_v29 = vrot.slane %v1606_v62, 1  ;;  %v1006_v44 = vld [vmem:[#allocation3 + $0x18] sm:$0x1] }
 0x109   :  { %v957_v2 = vor.u32 %v956_v52, %v953_v51  ;;  %v983_v4 = vmax.f32 %v981_v54, %v982_v43  ;;  %v753_v5 = vmax.f32 %v565_v55, 0.0  ;;  %v568_v6 = vadd.f32 %v11172_v61, %v12767_v42  ;;  %v559_v7 = vpop.f32.mrb[23].mxu0  ;;  %v12883_v18 = vld [vmem:[#allocation3 + $0x4] sm:$0xfe]   ;;  %v1000_v43 = vld [vmem:[#allocation3 + $0x14] sm:$0xf] }
 0x10a   :  { %v751_v9 = vmax.f32 %v557_v60, 0.0  ;;  %v560_v10 = vadd.f32 %v12767_v42, %v559_v7  ;;  %v965_v11 = vsel %vm12863_vm9, %v953_v51, %v964_v45  ;;  %v12896_v33 = vld [vmem:[#allocation3 + $0x4] sm:$0xfc]   ;;  %v2035_v51 = vrot.slane %v12883_v18, 1 }
 0x10b   :  { %v958_v14 = vrot.slane %v957_v2, 4  ;;  %v10844_v16 = vpack.c.bf16 %v983_v4, %v983_v4  ;;  %818 = vst.msk [vmem:[#allocation2 + $0xb0] sm:$0xff] %vm795_vm5, %v753_v5  ;;  %v754_v17 = vmax.f32 %v568_v6, 0.0  ;;  %966 = vst [vmem:[#allocation3 + $0xc] sm:$0x8] %v965_v11  ;;  %v11515_v54 = vld [vmem:[%s16424_s3] sm:$0xff]  }
 0x10c   :  { %816 = vst.msk [vmem:[#allocation2 + $0xa0] sm:$0xff] %vm795_vm5, %v751_v9  ;;  %v752_v21 = vmax.f32 %v560_v10, 0.0  ;;  %v11516_v60 = vld [vmem:[%s16424_s3 + $0x48] sm:$0xff]   ;;  %10892 = vmatpush3.bf16.msra.mxu1 %v11515_v54 }
 0x10d   :  { %v989_v25 = vshrl.u32 %v10844_v16, 16  ;;  %v1014_v27 = vld [vmem:[#allocation2 + $0x90] ss:$2 sm:$0xff]  ;;  %v1016_v28 = vld [vmem:[#allocation2 + $0x91] ss:$2 sm:$0xff]  ;;  %819 = vst.msk [vmem:[#allocation2 + $0xb8] sm:$0xff] %vm795_vm5, %v754_v17  ;;  %v971_v32 = vsel %vm12876_vm7, %v958_v14, %v970_v0  ;;  %10893 = vmatprep.subr.bf16.mxu1 %v11516_v60 }
 0x10e   :  { %v992_v34 = vshll.u32 %v10844_v16, 16  ;;  %v1018_v35 = vmax.f32 %v1014_v27, %v1016_v28  ;;  %v1010_v37 = vld [vmem:[#allocation2 + $0x80] ss:$2 sm:$0xff]  ;;  %v1012_v38 = vld [vmem:[#allocation2 + $0x81] ss:$2 sm:$0xff]  ;;  %817 = vst.msk [vmem:[#allocation2 + $0xa8] sm:$0xff] %vm795_vm5, %v752_v21 }
 0x10f   :  { %v11175_v40 = vpop.f32.mrb[24].mxu0  ;;  %972 = vst [vmem:[#allocation3 + $0x10] sm:$0xf] %v971_v32  ;;  %v991_v45 = vrot.slane %v989_v25, 7  ;;  %v1017_v46 = vmax.f32 %v1010_v37, %v1012_v38  ;;  %v2458_v14 = vrot.slane %v12896_v33, 2 }
 0x110   :  { %v581_v47 = vadd.f32 %v11175_v40, %v12767_v42  ;;  %v572_v48 = vpop.f32.mrb[25].mxu0 }
 0x111   :  { %v573_v55 = vadd.f32 %v12767_v42, %v572_v48  ;;  %v11176_v58 = vpop.f32.mrb[26].mxu0  ;;  %v994_v61 = vor.u32 %v992_v34, %v991_v45  ;;  %v995_v62 = vrot.slane %v991_v45, 4  ;;  %v1019_v0 = vmax.f32 %v1017_v46, %v1018_v35 }
 0x112   :  { %v757_v2 = vmax.f32 %v581_v47, 0.0  ;;  %v575_v4 = vpop.f32.mrb[27].mxu0  ;;  %v584_v6 = vadd.f32 %v11176_v58, %v12767_v42  ;;  %v12922_v9 = vld [vmem:[#allocation3 + $0x8] sm:$0xff]  }
 0x113   :  { %v755_v5 = vmax.f32 %v573_v55, 0.0  ;;  %v576_v7 = vadd.f32 %v12767_v42, %v575_v4  ;;  %v10845_v10 = vpack.c.bf16 %v1019_v0, %v1019_v0  ;;  %v12925_v11 = vld [vmem:[#allocation3 + $0x8] sm:$0xff]   ;;  %v1001_v16 = vsel %vm12901_vm13, %v994_v61, %v1000_v43  ;;  %v1035_v4 = vld [vmem:[#allocation3 + $0x18] sm:$0xe] }
 0x114   :  { %822 = vst.msk [vmem:[#allocation2 + $0xd0] sm:$0xff] %vm795_vm5, %v757_v2  ;;  %v1007_v17 = vsel %vm12909_vm0, %v995_v62, %v1006_v44  ;;  %v1046_v21 = vld [vmem:[#allocation2 + $0xb0] ss:$2 sm:$0xff]  ;;  %v1048_v24 = vld [vmem:[#allocation2 + $0xb1] ss:$2 sm:$0xff]  ;;  %v758_v25 = vmax.f32 %v584_v6, 0.0  ;;  %v1609_v55 = vor.u32 %v12892_v29, %v1604_v23 }
 0x115   :  { %820 = vst.msk [vmem:[#allocation2 + $0xc0] sm:$0xff] %vm795_vm5, %v755_v5  ;;  %v756_v27 = vmax.f32 %v576_v7, 0.0  ;;  %1002 = vst [vmem:[#allocation3 + $0x14] sm:$0xf] %v1001_v16  ;;  %v1025_v28 = vshrl.u32 %v10845_v10, 16  ;;  %v1028_v32 = vshll.u32 %v10845_v10, 16  ;;  %v1050_v34 = vmax.f32 %v1046_v21, %v1048_v24 }
 0x116   :  { %1008 = vst [vmem:[#allocation3 + $0x18] sm:$0x1] %v1007_v17  ;;  %v1042_v35 = vld [vmem:[#allocation2 + $0xa0] ss:$2 sm:$0xff]  ;;  %v1044_v37 = vld [vmem:[#allocation2 + $0xa1] ss:$2 sm:$0xff] }
 0x117   :  { %v1049_v38 = vmax.f32 %v1042_v35, %v1044_v37  ;;  %823 = vst.msk [vmem:[#allocation2 + $0xd8] sm:$0xff] %vm795_vm5, %v758_v25  ;;  %821 = vst.msk [vmem:[#allocation2 + $0xc8] sm:$0xff] %vm795_vm5, %v756_v27  ;;  %v11179_v40 = vpop.f32.mrb[28].mxu0  ;;  %v1861_v43 = vrot.slane %v12922_v9, 1  ;;  %v1611_v44 = vshll.u32 %v12925_v11, 16  ;;  %v12937_v45 = vld [vmem:[#allocation3 + $0xc] sm:$0xff]  }
 0x118   :  { %v1027_v46 = vrot.slane %v1025_v28, 6  ;;  %v1030_v47 = vrot.slane %v1028_v32, 7  ;;  %v597_v48 = vadd.f32 %v11179_v40, %v12767_v42  ;;  %v588_v54 = vpop.f32.mrb[29].mxu0  ;;  %v12943_v58 = vld [vmem:[#allocation3 + $0xc] sm:$0xff]   ;;  %v1038_v5 = vld [vmem:[#allocation3 + $0x1c] sm:$0x3] }
 0x119   :  { %v1051_v60 = vmax.f32 %v1049_v38, %v1050_v34  ;;  %v1862_v61 = vsel %vm1859_vm8, %v1860_v22, %v1861_v43  ;;  %v589_v62 = vadd.f32 %v12767_v42, %v588_v54  ;;  %v11180_v0 = vpop.f32.mrb[30].mxu0  ;;  %v12951_v2 = vrot.slane %v1611_v44, 1  ;;  %v11452_v49 = vld [vmem:[#allocation3 + $0x8] sm:$0xfc]   ;;  %v11520_v24 = vld [vmem:[%s16424_s3 + $0x50] sm:$0xff]  }
 0x11a   :  { %v1031_v6 = vor.u32 %v1030_v47, %v1027_v46  ;;  %v761_v30 = vmax.f32 %v597_v48, 0.0  ;;  %1887 = vrot.lane.b32.xlu1 %v1862_v61, %s12504_s17  ;;  %v600_v23 = vadd.f32 %v11180_v0, %v12767_v42  ;;  %v591_v29 = vpop.f32.mrb[31].mxu0  ;;  %v2036_v7 = vrot.slane %v12937_v45, 1  ;;  %v11519_v22 = vld [vmem:[%s16424_s3 + $0x8] sm:$0xff]  }
 0x11b   :  { %v10846_v10 = vpack.c.bf16 %v1051_v60, %v1051_v60  ;;  %v759_v16 = vmax.f32 %v589_v62, 0.0  ;;  %v1614_v17 = vsel %vm1602_vm4, %v1609_v55, %v12951_v2  ;;  %v592_v21 = vadd.f32 %v12767_v42, %v591_v29  ;;  %10894 = vmatpush3.bf16.msra.mxu1 %v11519_v22 }
 0x11c   :  { %v1032_v25 = vrot.slane %v1031_v6, 4  ;;  %826 = vst.msk [vmem:[#allocation2 + $0xf0] sm:$0xff] %vm795_vm5, %v761_v30  ;;  %v762_v27 = vmax.f32 %v600_v23, 0.0  ;;  %1711 = vrot.lane.b32.xlu0 %v1614_v17, %s12505_s22  ;;  %v2037_v28 = vsel %vm1859_vm8, %v2035_v51, %v2036_v7  ;;  %v2459_v32 = vrot.slane %v12943_v58, 2  ;;  %v12973_v34 = vld [vmem:[#allocation3 + $0x10] sm:$0xff]   ;;  %10895 = vmatprep.subr.bf16.mxu1 %v11520_v24 }
 0x11d   :  { %v1057_v35 = vshrl.u32 %v10846_v10, 16  ;;  %v1060_v37 = vshll.u32 %v10846_v10, 16  ;;  %824 = vst.msk [vmem:[#allocation2 + $0xe0] sm:$0xff] %vm795_vm5, %v759_v16  ;;  %v760_v38 = vmax.f32 %v592_v21, 0.0  ;;  %v2632_v40 = vrot.slane %v11452_v49, 2  ;;  %v11183_v62 = vpop.f32.mrb[32].mxu0 }
 0x11e   :  { %v1078_v44 = vld [vmem:[#allocation2 + $0xd0] ss:$2 sm:$0xff]  ;;  %v1080_v46 = vld [vmem:[#allocation2 + $0xd1] ss:$2 sm:$0xff]  ;;  %v1074_v47 = vld [vmem:[#allocation2 + $0xc0] ss:$2 sm:$0xff]  ;;  %2062 = vrot.lane.b32.xlu1 %v2037_v28, %s12506_s23  ;;  %v2460_v18 = vsel %vm436_vm1, %v2458_v14, %v2459_v32  ;;  %v1036_v51 = vsel %vm12792_vm10, %v1031_v6, %v1035_v4  ;;  %v1039_v48 = vsel %vm12799_vm11, %v1032_v25, %v1038_v5  ;;  %v613_v14 = vadd.f32 %v11183_v62, %v12767_v42 }
 0x11f   :  { %827 = vst.msk [vmem:[#allocation2 + $0xf8] sm:$0xff] %vm795_vm5, %v762_v27  ;;  %v1059_v54 = vrot.slane %v1057_v35, 5  ;;  %v1062_v55 = vrot.slane %v1060_v37, 6  ;;  %v1082_v60 = vmax.f32 %v1078_v44, %v1080_v46  ;;  %v1076_v61 = vld [vmem:[#allocation2 + $0xc1] ss:$2 sm:$0xff]  ;;  %825 = vst.msk [vmem:[#allocation2 + $0xe8] sm:$0xff] %vm795_vm5, %v760_v38 }
 0x120   :  { %v2633_v0 = vrot.slane %v12973_v34, 2  ;;  %1037 = vst [vmem:[#allocation3 + $0x18] sm:$0xe] %v1036_v51  ;;  %1040 = vst [vmem:[#allocation3 + $0x1c] sm:$0x3] %v1039_v48  ;;  %v1081_v33 = vmax.f32 %v1074_v47, %v1076_v61  ;;  %2485 = vrot.lane.b32.xlu0 %v2460_v18, %s12505_s22  ;;  %v604_v4 = vpop.f32.mrb[33].mxu0 }
 0x121   :  { %v12991_v6 = vld [vmem:[#allocation3 + $0x10] sm:$0xff]   ;;  %v1067_v5 = vld [vmem:[#allocation3 + $0x1c] sm:$0xc]  ;;  %v1070_v30 = vld [vmem:[#allocation3 + $0x20] sm:$0x7]  ;;  %v1063_v23 = vor.u32 %v1062_v55, %v1059_v54  ;;  %v605_v29 = vadd.f32 %v12767_v42, %v604_v4  ;;  %v11184_v49 = vpop.f32.mrb[34].mxu0 }
 0x122   :  { %v2634_v22 = vsel %vm436_vm1, %v2632_v40, %v2633_v0  ;;  %v11456_v10 = vld [vmem:[#allocation3 + $0x8] sm:$0xfc]   ;;  %v12999_v16 = vrot.slane %v2855_v50, 3  ;;  %v1083_v17 = vmax.f32 %v1081_v33, %v1082_v60  ;;  %v765_v21 = vmax.f32 %v613_v14, 0.0  ;;  %v607_v25 = vpop.f32.mrb[35].mxu0  ;;  %v11457_v38 = vld [vmem:[#allocation3 + $0x10] sm:$0xff]  }
 0x123   :  { %v616_v24 = vadd.f32 %v11184_v49, %v12767_v42  ;;  %2659 = vrot.lane.b32.xlu1 %v2634_v22, %s12504_s17  ;;  %v1863_v27 = vrot.slane %v12991_v6, 1  ;;  %v1064_v28 = vrot.slane %v1063_v23, 4  ;;  %v763_v35 = vmax.f32 %v605_v29, 0.0  ;;  %v11459_v47 = vld [vmem:[#allocation3 + $0x8] sm:$0xf8]   ;;  %v13011_v18 = vld [vmem:[#allocation3 + $0x10] sm:$0xff]  }
 0x124   :  { %v608_v37 = vadd.f32 %v12767_v42, %v607_v25  ;;  %v2808_v40 = vshrl.u32 %v11456_v10, 16  ;;  %v10847_v44 = vpack.c.bf16 %v1083_v17, %v1083_v17  ;;  %830 = vst.msk [vmem:[#allocation2 + $0x110] sm:$0xff] %vm795_vm5, %v765_v21  ;;  %v2811_v46 = vshll.u32 %v11456_v10, 16  ;;  %v13014_v55 = vld [vmem:[#allocation3 + $0x10] sm:$0xff]   ;;  %v13028_v10 = vld [vmem:[%s16423_s2] ss:$0 sm:$0xff] }
 0x125   :  { %v766_v3 = vmax.f32 %v616_v24, 0.0  ;;  %v1864_v50 = vsel %vm1859_vm8, %v1861_v43, %v1863_v27  ;;  %828 = vst.msk [vmem:[#allocation2 + $0x100] sm:$0xff] %vm795_vm5, %v763_v35  ;;  %v1068_v60 = vsel %vm12822_vm2, %v1063_v23, %v1067_v5  ;;  %v1071_v9 = vsel %vm12831_vm12, %v1064_v28, %v1070_v30  ;;  %v11187_v23 = vpop.f32.mrb[36].mxu0 }
 0x126   :  { %v1110_v51 = vld [vmem:[#allocation2 + $0xf0] ss:$2 sm:$0xff]  ;;  %v1112_v48 = vld [vmem:[#allocation2 + $0xf1] ss:$2 sm:$0xff]  ;;  %v764_v42 = vmax.f32 %v608_v37, 0.0  ;;  %v2810_v54 = vrot.slane %v2808_v40, 2  ;;  %v629_v17 = vadd.f32 %v13028_v10, %v11187_v23 }
 0x127   :  { %v1089_v61 = vshll.u32 %v10847_v44, 16  ;;  %v1092_v43 = vshrl.u32 %v10847_v44, 16  ;;  %v1114_v62 = vmax.f32 %v1110_v51, %v1112_v48  ;;  %v1106_v33 = vld [vmem:[#allocation2 + $0xe0] ss:$2 sm:$0xff]  ;;  %v1108_v14 = vld [vmem:[#allocation2 + $0xe1] ss:$2 sm:$0xff]  ;;  %1889 = vrot.lane.b32.xlu1 %v1864_v50, %s12504_s17 }
 0x128   :  { %831 = vst.msk [vmem:[#allocation2 + $0x118] sm:$0xff] %vm795_vm5, %v766_v3  ;;  %1069 = vst [vmem:[#allocation3 + $0x1c] sm:$0xc] %v1068_v60  ;;  %v1113_v4 = vmax.f32 %v1106_v33, %v1108_v14  ;;  %v2813_v29 = vrot.slane %v2811_v46, 3  ;;  %v2816_v49 = vshrl.u32 %v11457_v38, 16  ;;  %v2819_v5 = vshll.u32 %v11457_v38, 16 }
 0x129   :  { %1072 = vst [vmem:[#allocation3 + $0x20] sm:$0x7] %v1071_v9  ;;  %829 = vst.msk [vmem:[#allocation2 + $0x108] sm:$0xff] %vm795_vm5, %v764_v42  ;;  %v13023_v22 = vrot.slane %v1089_v61, 5  ;;  %v1094_v30 = vrot.slane %v1092_v43, 4  ;;  %v620_v21 = vpop.f32.mrb[37].mxu0 }
 0x12a   :  { %v3080_v24 = vrot.slane %v11459_v47, 3  ;;  %v1115_v25 = vmax.f32 %v1113_v4, %v1114_v62  ;;  %v2814_v28 = vor.u32 %v2813_v29, %v2810_v54  ;;  %v2818_v35 = vrot.slane %v2816_v49, 2  ;;  %v13031_v40 = vld [vmem:[#allocation3 + $0x14] sm:$0xff]   ;;  %v11188_v38 = vpop.f32.mrb[38].mxu0 }
 0x12b   :  { %v2821_v37 = vrot.slane %v2819_v5, 3  ;;  %v1095_v44 = vor.u32 %v1094_v30, %v13023_v22  ;;  %v769_v3 = vmax.f32 %v629_v17, 0.0  ;;  %v621_v50 = vadd.f32 %v13028_v10, %v620_v21  ;;  %v623_v51 = vpop.f32.mrb[39].mxu0  ;;  %v13036_v48 = vld [vmem:[#allocation3 + $0x14] sm:$0xff]  }
 0x12c   :  { %v3081_v46 = vrot.slane %v13011_v18, 3  ;;  %v10848_v42 = vpack.c.bf16 %v1115_v25, %v1115_v25  ;;  %v1615_v47 = vshrl.u32 %v12925_v11, 16  ;;  %v1619_v54 = vshll.u32 %v13014_v55, 16  ;;  %v11524_v33 = vld [vmem:[%s16424_s3 + $0x10] sm:$0xff]  }
 0x12d   :  { %v13038_v60 = vor.u32 %v2821_v37, %v2818_v35  ;;  %v13042_v9 = vrot.slane %v1095_v44, 4  ;;  %834 = vst.msk [vmem:[#allocation2 + $0x130] sm:$0xff] %vm795_vm5, %v769_v3  ;;  %v767_v61 = vmax.f32 %v621_v50, 0.0  ;;  %v2461_v62 = vrot.slane %v13031_v40, 2  ;;  %10896 = vmatpush3.bf16.msra.mxu1 %v11524_v33  ;;  %v11191_v3 = vpop.f32.mrb[40].mxu0 }
 0x12e   :  { %v3082_v43 = vsel %vm16465_vm15, %v3080_v24, %v3081_v46  ;;  %v1121_v14 = vshrl.u32 %v10848_v42, 16  ;;  %v1124_v4 = vshll.u32 %v10848_v42, 16  ;;  %v1617_v5 = vor.u32 %v1615_v47, %v12951_v2 }
 0x12f   :  { %v1141_v11 = vld [vmem:[#allocation2 + $0x110] ss:$2 sm:$0xff]  ;;  %v1143_v29 = vld [vmem:[#allocation2 + $0x111] ss:$2 sm:$0xff]  ;;  %v2823_v49 = vsel %vm16447_vm3, %v2814_v28, %v13038_v60  ;;  %3120 = vst.msk [vmem:[#allocation4 + $0x10] sm:$0xff] %vm795_vm5, %v3082_v43  ;;  %832 = vst.msk [vmem:[#allocation2 + $0x120] sm:$0xff] %vm795_vm5, %v767_v61  ;;  %v2462_v24 = vsel %vm436_vm1, %v2459_v32, %v2461_v62  ;;  %v632_v25 = vadd.f32 %v13028_v10, %v11188_v38 }
 0x130   :  { %v1145_v23 = vmax.f32 %v1141_v11, %v1143_v29  ;;  %v1137_v30 = vld [vmem:[#allocation2 + $0x100] ss:$2 sm:$0xff]  ;;  %v1139_v17 = vld [vmem:[#allocation2 + $0x101] ss:$2 sm:$0xff]  ;;  %2932 = vrot.lane.b32.xlu0 %v2823_v49, %s12506_s23  ;;  %v13058_v21 = vrot.slane %v1619_v54, 1  ;;  %v13066_v28 = vld [vmem:[#allocation3 + $0x18] sm:$0xff]   ;;  %v624_v37 = vadd.f32 %v13028_v10, %v623_v51  ;;  %v645_v32 = vadd.f32 %v13028_v10, %v11191_v3 }
 0x131   :  { %v13068_v2 = vrot.slane %v1121_v14, 7  ;;  %v1144_v35 = vmax.f32 %v1137_v30, %v1139_v17  ;;  %v2038_v44 = vrot.slane %v13036_v48, 1  ;;  %v13072_v50 = vld [vmem:[#allocation3 + $0x18] sm:$0xff]   ;;  %v770_v42 = vmax.f32 %v632_v25, 0.0  ;;  %v636_v38 = vpop.f32.mrb[41].mxu0 }
 0x132   :  { %v1622_v58 = vsel %vm1602_vm4, %v1617_v5, %v13058_v21  ;;  %v1865_v47 = vrot.slane %v13066_v28, 1  ;;  %v13078_v54 = vld [vmem:[#allocation3 + $0x18] sm:$0xff]   ;;  %v768_v51 = vmax.f32 %v624_v37, 0.0  ;;  %v11192_v33 = vpop.f32.mrb[42].mxu0  ;;  %v773_v29 = vmax.f32 %v645_v32, 0.0 }
 0x133   :  { %v1127_v61 = vrot.slane %v13068_v2, 4  ;;  %v1146_v43 = vmax.f32 %v1144_v35, %v1145_v23  ;;  %1713 = vrot.lane.b32.xlu1 %v1622_v58, %s12505_s22  ;;  %v11467_v14 = vld [vmem:[#allocation3 + $0x18] sm:$0xff]   ;;  %v13083_v11 = vor.u32 %v1124_v4, %v13068_v2  ;;  %835 = vst.msk [vmem:[#allocation2 + $0x138] sm:$0xff] %vm795_vm5, %v770_v42  ;;  %v637_v49 = vadd.f32 %v13028_v10, %v636_v38  ;;  %v639_v30 = vpop.f32.mrb[43].mxu0  ;;  %v1099_v17 = vld [vmem:[#allocation3 + $0x20] sm:$0x8] }
 0x134   :  { %2487 = vrot.lane.b32.xlu0 %v2462_v24, %s12505_s22  ;;  %v648_v5 = vadd.f32 %v13028_v10, %v11192_v33  ;;  %833 = vst.msk [vmem:[#allocation2 + $0x128] sm:$0xff] %vm795_vm5, %v768_v51  ;;  %v2039_v4 = vsel %vm1859_vm8, %v2036_v7, %v2038_v44  ;;  %v2635_v24 = vrot.slane %v13072_v50, 2  ;;  %v640_v25 = vadd.f32 %v13028_v10, %v639_v30  ;;  %v13097_v35 = vld [vmem:[#allocation3 + $0x18] sm:$0xff]   ;;  %v1102_v7 = vld [vmem:[#allocation3 + $0x24] sm:$0xf] }
 0x135   :  { %v10849_v23 = vpack.c.bf16 %v1146_v43, %v1146_v43  ;;  %838 = vst.msk [vmem:[#allocation2 + $0x150] sm:$0xff] %vm795_vm5, %v773_v29  ;;  %v771_v3 = vmax.f32 %v637_v49, 0.0  ;;  %v1866_v42 = vsel %vm1859_vm8, %v1863_v27, %v1865_v47  ;;  %v1627_v45 = vshll.u32 %v13078_v54, 16  ;;  %v11526_v32 = vld [vmem:[%s16424_s3 + $0x58] sm:$0xff]  }
 0x136   :  { %v3135_v37 = vld [vmem:[#allocation4 + $0x10] sm:$0xff]  ;;  %v774_v58 = vmax.f32 %v648_v5, 0.0  ;;  %v2636_v6 = vsel %vm436_vm1, %v2633_v0, %v2635_v24  ;;  %v772_v27 = vmax.f32 %v640_v25, 0.0  ;;  %v11529_v51 = vld [vmem:[%s16424_s3 + $0x18] sm:$0xff]   ;;  %v1623_v29 = vshrl.u32 %v13014_v55, 16  ;;  %10897 = vmatprep.subr.bf16.mxu1 %v11526_v32 }
 0x137   :  { %v1152_v38 = vshrl.u32 %v10849_v23, 16  ;;  %v1155_v43 = vshll.u32 %v10849_v23, 16  ;;  %11218 = vmatmul.mubr.msk.bf16.vlgmr.msra.gmra.mrb[64].mxu0 %vm795_vm5, %v3135_v37  ;;  %2064 = vrot.lane.b32.xlu1 %v2039_v4, %s12506_s23  ;;  %v1162_v33 = vld [vmem:[#allocation3 + $0x38] sm:$0xe]  ;;  %836 = vst.msk [vmem:[#allocation2 + $0x140] sm:$0xff] %vm795_vm5, %v771_v3  ;;  %v13123_v49 = vrot.slane %v1627_v45, 1  ;;  %v1100_v25 = vsel %vm12863_vm9, %v13023_v22, %v1099_v17 }
 0x138   :  { %839 = vst.msk [vmem:[#allocation2 + $0x158] sm:$0xff] %vm795_vm5, %v774_v58  ;;  %2661 = vrot.lane.b32.xlu0 %v2636_v6, %s12504_s17  ;;  %v2825_v5 = vshrl.u32 %v11467_v14, 16  ;;  %v2828_v34 = vshll.u32 %v11467_v14, 16  ;;  %vm16466_vm15 = vmmov 0   ;;  %837 = vst.msk [vmem:[#allocation2 + $0x148] sm:$0xff] %vm795_vm5, %v772_v27  ;;  %v11195_v23 = vpop.f32.mrb[44].mxu0  ;;  %v1625_v37 = vor.u32 %v1623_v29, %v13058_v21  ;;  %10898 = vmatpush3.bf16.msra.mxu1 %v11529_v51 }
 0x139   :  { %11221 = vmatprep.mubr.msk.bf16.mxu0 %vm16466_vm15, %v12502_v39  ;;  %v1154_v0 = vrot.slane %v1152_v38, 6  ;;  %v1157_v30 = vrot.slane %v1155_v43, 7  ;;  %v3083_v4 = vrot.slane %v13097_v35, 3  ;;  %v1165_v55 = vld [vmem:[#allocation3 + $0x3c] sm:$0x3]  ;;  %v661_v58 = vadd.f32 %v13028_v10, %v11195_v23  ;;  %v652_v45 = vpop.f32.mrb[45].mxu0 }
 0x13a   :  { %v2827_v3 = vrot.slane %v2825_v5, 2  ;;  %v2830_v14 = vrot.slane %v2828_v34, 3  ;;  %1101 = vst [vmem:[#allocation3 + $0x20] sm:$0x8] %v1100_v25  ;;  %v1130_v38 = vld [vmem:[#allocation3 + $0x28] sm:$0xf]  ;;  %v653_v22 = vadd.f32 %v13028_v10, %v652_v45  ;;  %v1103_v32 = vsel %vm12876_vm7, %v13042_v9, %v1102_v7 }
 0x13b   :  { %v11532_v43 = vld [vmem:[%s16424_s3 + $0x60] sm:$0xff]   ;;  %v1158_v6 = vor.u32 %v1157_v30, %v1154_v0  ;;  %v1173_v27 = vld [vmem:[#allocation2 + $0x130] ss:$2 sm:$0xff]  ;;  %v1175_v20 = vld [vmem:[#allocation2 + $0x131] ss:$2 sm:$0xff]  ;;  %1891 = vrot.lane.b32.xlu1 %v1866_v42, %s12504_s17  ;;  %v11196_v21 = vpop.f32.mrb[46].mxu0  ;;  %v3084_v17 = vsel %vm16467_vm14, %v3081_v46, %v3083_v4 }
 0x13c   :  { %v11536_v51 = vld [vmem:[%s16424_s3 + $0x20] sm:$0xff]   ;;  %v1177_v29 = vmax.f32 %v1173_v27, %v1175_v20  ;;  %v13150_v34 = vor.u32 %v2830_v14, %v2827_v3  ;;  %v777_v0 = vmax.f32 %v661_v58, 0.0  ;;  %v664_v30 = vadd.f32 %v13028_v10, %v11196_v21  ;;  %3121 = vst.msk [vmem:[#allocation4 + $0x28] sm:$0xff] %vm795_vm5, %v3084_v17  ;;  %v655_v18 = vpop.f32.mrb[47].mxu0  ;;  %1104 = vst [vmem:[#allocation3 + $0x24] sm:$0xf] %v1103_v32 }
 0x13d   :  { %v1169_v5 = vld [vmem:[#allocation2 + $0x120] ss:$2 sm:$0xff]  ;;  %v1171_v42 = vld [vmem:[#allocation2 + $0x121] ss:$2 sm:$0xff]  ;;  %10899 = vmatprep.subr.bf16.mxu1 %v11532_v43  ;;  %v1159_v46 = vrot.slane %v1158_v6, 4  ;;  %v1163_v9 = vsel %vm12792_vm10, %v1158_v6, %v1162_v33  ;;  %v775_v23 = vmax.f32 %v653_v22, 0.0  ;;  %v1630_v20 = vsel %vm1602_vm4, %v1625_v37, %v13123_v49 }
 0x13e   :  { %v1176_v7 = vmax.f32 %v1169_v5, %v1171_v42  ;;  %v1133_v25 = vld [vmem:[#allocation3 + $0x2c] sm:$0x1]  ;;  %1164 = vst [vmem:[#allocation3 + $0x38] sm:$0xe] %v1163_v9  ;;  %v2832_v3 = vsel %vm16447_vm3, %v13038_v60, %v13150_v34  ;;  %842 = vst.msk [vmem:[#allocation2 + $0x170] sm:$0xff] %vm795_vm5, %v777_v0  ;;  %v778_v14 = vmax.f32 %v664_v30, 0.0  ;;  %v656_v58 = vadd.f32 %v13028_v10, %v655_v18 }
 0x13f   :  { %10900 = vmatpush3.bf16.msra.mxu1 %v11536_v51  ;;  %v11537_v33 = vld [vmem:[%s16424_s3 + $0x68] sm:$0xff]   ;;  %v1166_v37 = vsel %vm12799_vm11, %v1159_v46, %v1165_v55  ;;  %v1205_v6 = vld [vmem:[#allocation2 + $0x150] ss:$2 sm:$0xff]  ;;  %v1207_v60 = vld [vmem:[#allocation2 + $0x151] ss:$2 sm:$0xff]  ;;  %1715 = vrot.lane.b32.xlu1 %v1630_v20, %s12505_s22  ;;  %840 = vst.msk [vmem:[#allocation2 + $0x160] sm:$0xff] %vm795_vm5, %v775_v23  ;;  %v1131_v22 = vsel %vm12901_vm13, %v13083_v11, %v1130_v38 }
 0x140   :  { %v11540_v45 = vld [vmem:[%s16424_s3 + $0x28] sm:$0xff]   ;;  %v1178_v43 = vmax.f32 %v1176_v7, %v1177_v29  ;;  %2934 = vrot.lane.b32.xlu0 %v2832_v3, %s12506_s23  ;;  %v1631_v27 = vshrl.u32 %v13078_v54, 16  ;;  %v11541_v21 = vld [vmem:[%s16424_s3 + $0x70] sm:$0xff]   ;;  %1167 = vst [vmem:[#allocation3 + $0x3c] sm:$0x3] %v1166_v37  ;;  %v1209_v55 = vmax.f32 %v1205_v6, %v1207_v60  ;;  %843 = vst.msk [vmem:[#allocation2 + $0x178] sm:$0xff] %vm795_vm5, %v778_v14  ;;  %10901 = vmatprep.subr.bf16.mxu1 %v11537_v33 }
 0x141   :  { %v1201_v17 = vld [vmem:[#allocation2 + $0x140] ss:$2 sm:$0xff]  ;;  %v1203_v32 = vld [vmem:[#allocation2 + $0x141] ss:$2 sm:$0xff]  ;;  %v776_v51 = vmax.f32 %v656_v58, 0.0  ;;  %v1134_v54 = vsel %vm12909_vm0, %v1127_v61, %v1133_v25  ;;  %v11545_v11 = vld [vmem:[%s16424_s3 + $0x30] sm:$0xff]  }
 0x142   :  { %1132 = vst [vmem:[#allocation3 + $0x28] sm:$0xf] %v1131_v22  ;;  %v10850_v38 = vpack.c.bf16 %v1178_v43, %v1178_v43  ;;  %v1208_v29 = vmax.f32 %v1201_v17, %v1203_v32  ;;  %v13189_v5 = vld [vmem:[#allocation3 + $0x1c] sm:$0xff]   ;;  %v11199_v42 = vpop.f32.mrb[48].mxu0  ;;  %1135 = vst [vmem:[#allocation3 + $0x2c] sm:$0x1] %v1134_v54  ;;  %v1633_v33 = vor.u32 %v1631_v27, %v13123_v49 }
 0x143   :  { %v13191_v0 = vld [vmem:[#allocation3 + $0x1c] sm:$0xff]   ;;  %841 = vst.msk [vmem:[#allocation2 + $0x168] sm:$0xff] %vm795_vm5, %v776_v51  ;;  %v677_v2 = vadd.f32 %v13028_v10, %v11199_v42  ;;  %v668_v30 = vpop.f32.mrb[49].mxu0  ;;  %10902 = vmatpush3.bf16.msra.mxu1 %v11540_v45  ;;  %v2040_v7 = vrot.slane %v13189_v5, 1 }
 0x144   :  { %v1184_v61 = vshrl.u32 %v10850_v38, 16  ;;  %v1187_v18 = vshll.u32 %v10850_v38, 16  ;;  %v1210_v46 = vmax.f32 %v1208_v29, %v1209_v55  ;;  %v3138_v9 = vld [vmem:[#allocation4 + $0x28] sm:$0xff]  ;;  %10903 = vmatprep.subr.bf16.mxu1 %v11541_v21  ;;  %v2463_v25 = vrot.slane %v13191_v0, 2  ;;  %v11200_v60 = vpop.f32.mrb[50].mxu0 }
 0x145   :  { %v1194_v23 = vld [vmem:[#allocation3 + $0x3c] sm:$0xc]  ;;  %11222 = vmatmul.mubr.msk.bf16.gmra.mrb[68].mxu0 %vm795_vm5, %v3138_v9  ;;  %v13198_v20 = vld [vmem:[#allocation3 + $0x20] sm:$0xff]   ;;  %v781_v14 = vmax.f32 %v677_v2, 0.0  ;;  %v669_v58 = vadd.f32 %v13028_v10, %v668_v30  ;;  %v2041_v6 = vsel %vm1859_vm8, %v2038_v44, %v2040_v7  ;;  %v680_v40 = vadd.f32 %v13028_v10, %v11200_v60  ;;  %v671_v30 = vpop.f32.mrb[51].mxu0 }
 0x146   :  { %v13200_v3 = vld [vmem:[#allocation3 + $0x20] sm:$0xff]   ;;  %v1186_v45 = vrot.slane %v1184_v61, 5  ;;  %v1189_v37 = vrot.slane %v1187_v18, 6  ;;  %v10851_v43 = vpack.c.bf16 %v1210_v46, %v1210_v46  ;;  %11225 = vmatprep.mubr.msk.bf16.mxu0 %vm16466_vm15, %v12502_v39  ;;  %2066 = vrot.lane.b32.xlu1 %v2041_v6, %s12506_s23  ;;  %v2464_v49 = vsel %vm436_vm1, %v2461_v62, %v2463_v25 }
 0x147   :  { %v13209_v22 = vld [vmem:[#allocation3 + $0x20] sm:$0xff]   ;;  %v1867_v48 = vrot.slane %v13198_v20, 1  ;;  %v2637_v44 = vrot.slane %v13200_v3, 2  ;;  %846 = vst.msk [vmem:[#allocation2 + $0x190] sm:$0xff] %vm795_vm5, %v781_v14  ;;  %v779_v27 = vmax.f32 %v669_v58, 0.0  ;;  %10904 = vmatpush3.bf16.msra.mxu1 %v11545_v11  ;;  %2489 = vrot.lane.b32.xlu0 %v2464_v49, %s12505_s22  ;;  %v782_v50 = vmax.f32 %v680_v40, 0.0 }
 0x148   :  { %v1197_v21 = vld [vmem:[#allocation3 + $0x40] sm:$0x7]  ;;  %v1226_v55 = vld [vmem:[#allocation3 + $0x40] sm:$0x8]  ;;  %v1190_v32 = vor.u32 %v1189_v37, %v1186_v45  ;;  %v1216_v51 = vshll.u32 %v10851_v43, 16  ;;  %v1219_v54 = vshrl.u32 %v10851_v43, 16 }
 0x149   :  { %v11474_v17 = vld [vmem:[#allocation3 + $0x20] sm:$0xff]   ;;  %v1237_v38 = vld [vmem:[#allocation2 + $0x170] ss:$2 sm:$0xff]  ;;  %v1239_v29 = vld [vmem:[#allocation2 + $0x171] ss:$2 sm:$0xff]  ;;  %v1868_v62 = vsel %vm1859_vm8, %v1865_v47, %v1867_v48  ;;  %v2638_v11 = vsel %vm436_vm1, %v2635_v24, %v2637_v44  ;;  %844 = vst.msk [vmem:[#allocation2 + $0x180] sm:$0xff] %vm795_vm5, %v779_v27 }
 0x14a   :  { %v1241_v42 = vmax.f32 %v1237_v38, %v1239_v29  ;;  %v1635_v2 = vshll.u32 %v13209_v22, 16  ;;  %v1191_v61 = vrot.slane %v1190_v32, 4  ;;  %v1195_v18 = vsel %vm12822_vm2, %v1190_v32, %v1194_v23  ;;  %v1233_v28 = vld [vmem:[#allocation2 + $0x160] ss:$2 sm:$0xff]  ;;  %v1235_v58 = vld [vmem:[#allocation2 + $0x161] ss:$2 sm:$0xff]  ;;  %1893 = vrot.lane.b32.xlu1 %v1868_v62, %s12504_s17 }
 0x14b   :  { %v1218_v46 = vrot.slane %v1216_v51, 5  ;;  %v1221_v9 = vrot.slane %v1219_v54, 4  ;;  %v13238_v14 = vld [vmem:[#allocation3 + $0x20] sm:$0xff]   ;;  %1196 = vst [vmem:[#allocation3 + $0x3c] sm:$0xc] %v1195_v18  ;;  %v2834_v45 = vshrl.u32 %v11474_v17, 16  ;;  %v1240_v60 = vmax.f32 %v1233_v28, %v1235_v58  ;;  %2663 = vrot.lane.b32.xlu0 %v2638_v11, %s12504_s17 }
 0x14c   :  { %v1229_v47 = vld [vmem:[#allocation3 + $0x44] sm:$0xf]  ;;  %v13241_v24 = vrot.slane %v1635_v2, 1  ;;  %v2837_v37 = vshll.u32 %v11474_v17, 16  ;;  %v1198_v43 = vsel %vm12831_vm12, %v1191_v61, %v1197_v21  ;;  %847 = vst.msk [vmem:[#allocation2 + $0x198] sm:$0xff] %vm795_vm5, %v782_v50  ;;  %v672_v32 = vadd.f32 %v13028_v10, %v671_v30  ;;  %v11203_v2 = vpop.f32.mrb[52].mxu0 }
 0x14d   :  { %v1222_v6 = vor.u32 %v1221_v9, %v1218_v46  ;;  %v1227_v23 = vsel %vm12863_vm9, %v1218_v46, %v1226_v55  ;;  %1199 = vst [vmem:[#allocation3 + $0x40] sm:$0x7] %v1198_v43  ;;  %v2836_v49 = vrot.slane %v2834_v45, 2  ;;  %v13250_v51 = vld [vmem:[#allocation3 + $0x24] sm:$0xff]   ;;  %v1242_v54 = vmax.f32 %v1240_v60, %v1241_v42  ;;  %v684_v18 = vpop.f32.mrb[53].mxu0  ;;  %v13303_v0 = vld [vmem:[#allocation3 + $0x2c] sm:$0xff]  }
 0x14e   :  { %1228 = vst [vmem:[#allocation3 + $0x40] sm:$0x8] %v1227_v23  ;;  %v2839_v27 = vrot.slane %v2837_v37, 3  ;;  %v13252_v17 = vld [vmem:[#allocation3 + $0x24] sm:$0xff]   ;;  %v1638_v55 = vsel %vm1602_vm4, %v1633_v33, %v13241_v24  ;;  %v3085_v38 = vrot.slane %v13238_v14, 3  ;;  %v780_v40 = vmax.f32 %v672_v32, 0.0 }
 0x14f   :  { %v1223_v21 = vrot.slane %v1222_v6, 4  ;;  %1717 = vrot.lane.b32.xlu1 %v1638_v55, %s12505_s22  ;;  %v2042_v62 = vrot.slane %v13250_v51, 1  ;;  %v2465_v11 = vrot.slane %v13252_v17, 2  ;;  %v10852_v61 = vpack.c.bf16 %v1242_v54, %v1242_v54  ;;  %v11478_v46 = vld [vmem:[#allocation3 + $0x28] sm:$0xff]   ;;  %v11204_v28 = vpop.f32.mrb[54].mxu0 }
 0x150   :  { %v13258_v29 = vor.u32 %v2839_v27, %v2836_v49  ;;  %v3086_v33 = vsel %vm16467_vm14, %v3083_v4, %v3085_v38  ;;  %v693_v42 = vadd.f32 %v13028_v10, %v11203_v2  ;;  %845 = vst.msk [vmem:[#allocation2 + $0x188] sm:$0xff] %vm795_vm5, %v780_v40  ;;  %v685_v4 = vadd.f32 %v13028_v10, %v684_v18  ;;  %v687_v37 = vpop.f32.mrb[55].mxu0  ;;  %v1257_v43 = vld [vmem:[#allocation3 + $0x48] sm:$0xf]  ;;  %v1260_v6 = vld [vmem:[#allocation3 + $0x4c] sm:$0x1] }
 0x151   :  { %v1230_v30 = vsel %vm12876_vm7, %v1223_v21, %v1229_v47  ;;  %3122 = vst.msk [vmem:[#allocation4 + $0x40] sm:$0xff] %vm795_vm5, %v3086_v33  ;;  %v2043_v35 = vsel %vm1859_vm8, %v2040_v7, %v2042_v62  ;;  %v13281_v47 = vld [vmem:[#allocation3 + $0x28] sm:$0xff]   ;;  %v1248_v58 = vshrl.u32 %v10852_v61, 16  ;;  %v1251_v50 = vshll.u32 %v10852_v61, 16 }
 0x152   :  { %1231 = vst [vmem:[#allocation3 + $0x44] sm:$0xf] %v1230_v30  ;;  %v2841_v9 = vsel %vm16447_vm3, %v13150_v34, %v13258_v29  ;;  %v785_v34 = vmax.f32 %v693_v42, 0.0  ;;  %v696_v45 = vadd.f32 %v13028_v10, %v11204_v28  ;;  %v783_v5 = vmax.f32 %v685_v4, 0.0  ;;  %v11480_v49 = vld [vmem:[#allocation3 + $0x28] sm:$0xff]  }
 0x153   :  { %2936 = vrot.lane.b32.xlu0 %v2841_v9, %s12506_s23  ;;  %2068 = vrot.lane.b32.xlu1 %v2043_v35, %s12506_s23  ;;  %v1869_v23 = vrot.slane %v11478_v46, 1  ;;  %v2639_v7 = vrot.slane %v13281_v47, 2  ;;  %v688_v60 = vadd.f32 %v13028_v10, %v687_v37  ;;  %v1250_v27 = vrot.slane %v1248_v58, 7  ;;  %v1268_v32 = vld [vmem:[#allocation2 + $0x190] ss:$2 sm:$0xff]  ;;  %v13308_v9 = vld [vmem:[#allocation3 + $0x28] sm:$0xff]  }
 0x154   :  { %v1270_v21 = vld [vmem:[#allocation2 + $0x191] ss:$2 sm:$0xff]  ;;  %v2466_v54 = vsel %vm436_vm1, %v2463_v25, %v2465_v11  ;;  %850 = vst.msk [vmem:[#allocation2 + $0x1b0] sm:$0xff] %vm795_vm5, %v785_v34  ;;  %v786_v55 = vmax.f32 %v696_v45, 0.0  ;;  %848 = vst.msk [vmem:[#allocation2 + $0x1a0] sm:$0xff] %vm795_vm5, %v783_v5  ;;  %v11207_v25 = vpop.f32.mrb[56].mxu0 }
 0x155   :  { %v1272_v40 = vmax.f32 %v1268_v32, %v1270_v21  ;;  %v1870_v2 = vsel %vm1859_vm8, %v1867_v48, %v1869_v23  ;;  %v2640_v30 = vsel %vm436_vm1, %v2637_v44, %v2639_v7  ;;  %v784_v61 = vmax.f32 %v688_v60, 0.0  ;;  %v13301_v33 = vld [vmem:[#allocation3 + $0x2c] sm:$0xff]   ;;  %v700_v48 = vpop.f32.mrb[57].mxu0 }
 0x156   :  { %v1253_v42 = vor.u32 %v1251_v50, %v1250_v27  ;;  %v1254_v18 = vrot.slane %v1250_v27, 4  ;;  %851 = vst.msk [vmem:[#allocation2 + $0x1b8] sm:$0xff] %vm795_vm5, %v786_v55  ;;  %v3087_v46 = vrot.slane %v11480_v49, 3  ;;  %v709_v20 = vadd.f32 %v13028_v10, %v11207_v25  ;;  %v11208_v4 = vpop.f32.mrb[58].mxu0  ;;  %v11487_v47 = vld [vmem:[#allocation3 + $0x28] sm:$0xff]  }
 0x157   :  { %2491 = vrot.lane.b32.xlu0 %v2466_v54, %s12505_s22  ;;  %1895 = vrot.lane.b32.xlu1 %v1870_v2, %s12504_s17  ;;  %849 = vst.msk [vmem:[#allocation2 + $0x1a8] sm:$0xff] %vm795_vm5, %v784_v61  ;;  %v2044_v3 = vrot.slane %v13301_v33, 1  ;;  %v2467_v44 = vrot.slane %v13303_v0, 2  ;;  %v701_v35 = vadd.f32 %v13028_v10, %v700_v48  ;;  %v1872_v28 = vsel %vm1859_vm8, %v1869_v23, %v1871_v15  ;;  %v1264_v34 = vld [vmem:[#allocation2 + $0x180] ss:$2 sm:$0xff]  ;;  %v13358_v61 = vld [vmem:[#allocation3 + $0x38] sm:$0xff]  }
 0x158   :  { %v1258_v58 = vsel %vm12901_vm13, %v1253_v42, %v1257_v43  ;;  %v1261_v50 = vsel %vm12909_vm0, %v1254_v18, %v1260_v6  ;;  %v1266_v45 = vld [vmem:[#allocation2 + $0x181] ss:$2 sm:$0xff]  ;;  %v3141_v37 = vld [vmem:[#allocation4 + $0x40] sm:$0xff]  ;;  %v3088_v5 = vsel %vm16467_vm14, %v3085_v38, %v3087_v46  ;;  %v789_v60 = vmax.f32 %v709_v20, 0.0  ;;  %v703_v6 = vpop.f32.mrb[59].mxu0 }
 0x159   :  { %1259 = vst [vmem:[#allocation3 + $0x48] sm:$0xf] %v1258_v58  ;;  %1262 = vst [vmem:[#allocation3 + $0x4c] sm:$0x1] %v1261_v50  ;;  %v1271_v49 = vmax.f32 %v1264_v34, %v1266_v45  ;;  %11226 = vmatmul.mubr.msk.bf16.gmra.mrb[72].mxu0 %vm795_vm5, %v3141_v37  ;;  %v2045_v43 = vsel %vm1859_vm8, %v2042_v62, %v2044_v3  ;;  %v2468_v14 = vsel %vm436_vm1, %v2465_v11, %v2467_v44  ;;  %v11211_v17 = vpop.f32.mrb[60].mxu0  ;;  %v13366_v45 = vld [vmem:[#allocation3 + $0x34] sm:$0xff]  }
 0x15a   :  { %3123 = vst.msk [vmem:[#allocation4 + $0x58] sm:$0xff] %vm795_vm5, %v3088_v5  ;;  %v787_v38 = vmax.f32 %v701_v35, 0.0  ;;  %11229 = vmatprep.mubr.msk.bf16.mxu0 %vm16466_vm15, %v12502_v39  ;;  %854 = vst.msk [vmem:[#allocation2 + $0x1d0] sm:$0xff] %vm795_vm5, %v789_v60  ;;  %v712_v23 = vadd.f32 %v13028_v10, %v11208_v4  ;;  %v2642_v51 = vsel %vm436_vm1, %v2639_v7, %v2641_v19  ;;  %v13348_v11 = vrot.slane %v1651_v1, 1  ;;  %v716_v7 = vpop.f32.mrb[61].mxu0 }
 0x15b   :  { %2665 = vrot.lane.b32.xlu0 %v2640_v30, %s12504_s17  ;;  %v704_v62 = vadd.f32 %v13028_v10, %v703_v6  ;;  %v1273_v27 = vmax.f32 %v1271_v49, %v1272_v40  ;;  %2070 = vrot.lane.b32.xlu1 %v2045_v43, %s12506_s23  ;;  %v16468_v32 = vrot.slane %v12815_v57, 3  ;;  %v1643_v54 = vshll.u32 %v13308_v9, 16  ;;  %v11212_v40 = vpop.f32.mrb[62].mxu0  ;;  %v1289_v43 = vld [vmem:[#allocation3 + $0x4c] sm:$0xe] }
 0x15c   :  { %852 = vst.msk [vmem:[#allocation2 + $0x1c0] sm:$0xff] %vm795_vm5, %v787_v38  ;;  %v2843_v55 = vshrl.u32 %v11487_v47, 16  ;;  %v790_v2 = vmax.f32 %v712_v23, 0.0  ;;  %v1639_v31 = vshrl.u32 %v13209_v22, 16  ;;  %v2846_v1 = vshll.u32 %v11487_v47, 16  ;;  %v719_v34 = vpop.f32.mrb[63].mxu0 }
 0x15d   :  { %v3090_v21 = vsel %vm16467_vm14, %v3087_v46, %v16468_v32  ;;  %v788_v30 = vmax.f32 %v704_v62, 0.0  ;;  %v10853_v25 = vpack.c.bf16 %v1273_v27, %v1273_v27  ;;  %v1300_v42 = vld [vmem:[#allocation2 + $0x1b0] ss:$2 sm:$0xff]  ;;  %v1302_v18 = vld [vmem:[#allocation2 + $0x1b1] ss:$2 sm:$0xff]  ;;  %v1645_v20 = vrot.slane %v1643_v54, 1 }
 0x15e   :  { %3124 = vst.msk [vmem:[#allocation4 + $0x70] sm:$0xff] %vm795_vm5, %v3090_v21  ;;  %v2845_v48 = vrot.slane %v2843_v55, 2  ;;  %v725_v46 = vadd.f32 %v13028_v10, %v11211_v17  ;;  %v1304_v35 = vmax.f32 %v1300_v42, %v1302_v18  ;;  %v1296_v4 = vld [vmem:[#allocation2 + $0x1a0] ss:$2 sm:$0xff]  ;;  %v1298_v58 = vld [vmem:[#allocation2 + $0x1a1] ss:$2 sm:$0xff]  ;;  %v717_v47 = vadd.f32 %v13028_v10, %v716_v7 }
 0x15f   :  { %2493 = vrot.lane.b32.xlu0 %v2468_v14, %s12505_s22  ;;  %855 = vst.msk [vmem:[#allocation2 + $0x1d8] sm:$0xff] %vm795_vm5, %v790_v2  ;;  %853 = vst.msk [vmem:[#allocation2 + $0x1c8] sm:$0xff] %vm795_vm5, %v788_v30  ;;  %v2848_v22 = vrot.slane %v2846_v1, 3  ;;  %v728_v50 = vadd.f32 %v13028_v10, %v11212_v40  ;;  %v1279_v37 = vshrl.u32 %v10853_v25, 16  ;;  %v1282_v5 = vshll.u32 %v10853_v25, 16  ;;  %1897 = vrot.lane.b32.xlu1 %v1872_v28, %s12504_s17  ;;  %v13388_v30 = vld [vmem:[#allocation3 + $0x34] sm:$0xff]  }
 0x160   :  { %v1303_v60 = vmax.f32 %v1296_v4, %v1298_v58  ;;  %v1641_v49 = vor.u32 %v1639_v31, %v13241_v24  ;;  %v793_v6 = vmax.f32 %v725_v46, 0.0  ;;  %v791_v23 = vmax.f32 %v717_v47, 0.0  ;;  %v1292_v55 = vld [vmem:[#allocation3 + $0x50] sm:$0x3]  ;;  %v13400_v25 = vld [vmem:[#allocation3 + $0x38] sm:$0xff]   ;;  %v13402_v42 = vld [vmem:[#allocation3 + $0x40] sm:$0xff]  }
 0x161   :  { %v3144_v14 = vld [vmem:[#allocation4 + $0x58] sm:$0xff]  ;;  %v13370_v38 = vor.u32 %v2848_v22, %v2845_v48  ;;  %v794_v62 = vmax.f32 %v728_v50, 0.0  ;;  %v1281_v17 = vrot.slane %v1279_v37, 6  ;;  %v1284_v27 = vrot.slane %v1282_v5, 7 }
 0x162   :  { %v1305_v32 = vmax.f32 %v1303_v60, %v1304_v35  ;;  %11230 = vmatmul.mubr.msk.bf16.gmra.mrb[76].mxu0 %vm795_vm5, %v3144_v14  ;;  %v1647_v21 = vshrl.u32 %v13308_v9, 16  ;;  %v1646_v24 = vsel %vm1602_vm4, %v1641_v49, %v1645_v20  ;;  %858 = vst.msk [vmem:[#allocation2 + $0x1f0] sm:$0xff] %vm795_vm5, %v793_v6  ;;  %856 = vst.msk [vmem:[#allocation2 + $0x1e0] sm:$0xff] %vm795_vm5, %v791_v23  ;;  %v3091_v9 = vrot.slane %v13358_v61, 3  ;;  %v13390_v31 = vld [vmem:[#allocation3 + $0x30] sm:$0xff]   ;;  %v13417_v6 = vld [vmem:[#allocation3 + $0x38] sm:$0xff]  }
 0x163   :  { %2667 = vrot.lane.b32.xlu0 %v2642_v51, %s12504_s17  ;;  %11233 = vmatprep.mubr.msk.bf16.mxu0 %vm16466_vm15, %v12502_v39  ;;  %859 = vst.msk [vmem:[#allocation2 + $0x1f8] sm:$0xff] %vm795_vm5, %v794_v62  ;;  %v13383_v28 = vor.u32 %v12999_v16, %v12880_v13  ;;  %v720_v54 = vadd.f32 %v13028_v10, %v719_v34  ;;  %v1655_v1 = vshrl.u32 %v13390_v31, 16  ;;  %v16469_v10 = vrot.slane %v12815_v57, 3  ;;  %v11497_v57 = vld [vmem:[#allocation3 + $0x38] sm:$0xff]   ;;  %v1321_v4 = vld [vmem:[#allocation3 + $0x50] sm:$0xc] }
 0x164   :  { %v1285_v51 = vor.u32 %v1284_v27, %v1281_v17  ;;  %v10854_v7 = vpack.c.bf16 %v1305_v32, %v1305_v32  ;;  %1719 = vrot.lane.b32.xlu1 %v1646_v24, %s12505_s22  ;;  %v1649_v2 = vor.u32 %v1647_v21, %v1645_v20  ;;  %v2850_v13 = vsel %vm16447_vm3, %v13258_v29, %v13370_v38  ;;  %v13407_v29 = vld [vmem:[#allocation3 + $0x38] sm:$0xff]   ;;  %v1324_v60 = vld [vmem:[#allocation3 + $0x54] sm:$0x7] }
 0x165   :  { %v792_v16 = vmax.f32 %v720_v54, 0.0  ;;  %v3092_v40 = vsel %vm16467_vm14, %v16469_v10, %v3091_v9  ;;  %v2046_v61 = vrot.slane %v13366_v45, 1  ;;  %v2469_v14 = vrot.slane %v13388_v30, 2  ;;  %v13442_v10 = vld [vmem:[#allocation3 + $0x3c] sm:$0xff]  }
 0x166   :  { %v1286_v18 = vrot.slane %v1285_v51, 4  ;;  %v1290_v20 = vsel %vm12792_vm10, %v1285_v51, %v1289_v43  ;;  %v1311_v48 = vshrl.u32 %v10854_v7, 16  ;;  %v1314_v46 = vshll.u32 %v10854_v7, 16  ;;  %v1332_v35 = vld [vmem:[#allocation2 + $0x1d0] ss:$2 sm:$0xff]  ;;  %3125 = vst.msk [vmem:[#allocation4 + $0x88] sm:$0xff] %vm795_vm5, %v3092_v40  ;;  %vm16470_vm10 = vmmov %vm16467_vm14 }
 0x167   :  { %1291 = vst [vmem:[#allocation3 + $0x4c] sm:$0xe] %v1290_v20  ;;  %v1334_v58 = vld [vmem:[#allocation2 + $0x1d1] ss:$2 sm:$0xff]  ;;  %v1328_v22 = vld [vmem:[#allocation2 + $0x1c0] ss:$2 sm:$0xff]  ;;  %2938 = vrot.lane.b32.xlu0 %v2850_v13, %s12506_s23  ;;  %v1654_v50 = vsel %vm1602_vm4, %v1649_v2, %v13348_v11  ;;  %v2859_v27 = vsel %vm16447_vm3, %v13370_v38, %v13383_v28  ;;  %v2047_v54 = vsel %vm1859_vm8, %v2044_v3, %v2046_v61 }
 0x168   :  { %v1330_v47 = vld [vmem:[#allocation2 + $0x1c1] ss:$2 sm:$0xff]  ;;  %857 = vst.msk [vmem:[#allocation2 + $0x1e8] sm:$0xff] %vm795_vm5, %v792_v16  ;;  %v1293_v26 = vsel %vm12799_vm11, %v1286_v18, %v1292_v55  ;;  %v1313_v34 = vrot.slane %v1311_v48, 5  ;;  %v1316_v37 = vrot.slane %v1314_v46, 6  ;;  %v1336_v5 = vmax.f32 %v1332_v35, %v1334_v58  ;;  %1721 = vrot.lane.b32.xlu1 %v1654_v50, %s12505_s22 }
 0x169   :  { %1294 = vst [vmem:[#allocation3 + $0x50] sm:$0x3] %v1293_v26  ;;  %v1335_v49 = vmax.f32 %v1328_v22, %v1330_v47  ;;  %v3147_v43 = vld [vmem:[#allocation4 + $0x70] sm:$0xff]  ;;  %v3093_v23 = vrot.slane %v13402_v42, 3  ;;  %v2861_v32 = vshrl.u32 %v11497_v57, 16  ;;  %v2864_v21 = vshll.u32 %v11497_v57, 16 }
 0x16a   :  { %v1317_v62 = vor.u32 %v1316_v37, %v1313_v34  ;;  %11234 = vmatmul.mubr.msk.bf16.gmra.mrb[80].mxu0 %vm795_vm5, %v3147_v43  ;;  %v1364_v36 = vld [vmem:[#allocation2 + $0x1f0] ss:$2 sm:$0xff]  ;;  %v1366_v17 = vld [vmem:[#allocation2 + $0x1f1] ss:$2 sm:$0xff]  ;;  %v1873_v51 = vrot.slane %v13400_v25, 1  ;;  %v1659_v2 = vshll.u32 %v13407_v29, 16  ;;  %v1657_v46 = vor.u32 %v1655_v1, %v13348_v11 }
 0x16b   :  { %v1337_v24 = vmax.f32 %v1335_v49, %v1336_v5  ;;  %2940 = vrot.lane.b32.xlu0 %v2859_v27, %s12506_s23  ;;  %11237 = vmatprep.mubr.msk.bf16.mxu0 %vm16466_vm15, %v12502_v39  ;;  %v3094_v7 = vsel %vm16470_vm10, %v3091_v9, %v3093_v23  ;;  %v1368_v16 = vmax.f32 %v1364_v36, %v1366_v17  ;;  %v2643_v33 = vrot.slane %v13417_v6, 2  ;;  %v1353_v40 = vld [vmem:[#allocation3 + $0x54] sm:$0x8]  ;;  %v13465_v22 = vld [vmem:[#allocation3 + $0x40] sm:$0xff]   ;;  %v1356_v49 = vld [vmem:[#allocation3 + $0x58] sm:$0xf] }
 0x16c   :  { %v1318_v55 = vrot.slane %v1317_v62, 4  ;;  %v1322_v38 = vsel %vm12822_vm2, %v1317_v62, %v1321_v4  ;;  %2072 = vrot.lane.b32.xlu1 %v2047_v54, %s12506_s23  ;;  %3126 = vst.msk [vmem:[#allocation4 + $0xa0] sm:$0xff] %vm795_vm5, %v3094_v7  ;;  %v2863_v3 = vrot.slane %v2861_v32, 2  ;;  %v2470_v9 = vsel %vm436_vm1, %v2467_v44, %v2469_v14  ;;  %v13463_v44 = vld [vmem:[#allocation3 + $0x3c] sm:$0xff]  }
 0x16d   :  { %1323 = vst [vmem:[#allocation3 + $0x50] sm:$0xc] %v1322_v38  ;;  %v10855_v13 = vpack.c.bf16 %v1337_v24, %v1337_v24  ;;  %v3150_v48 = vld [vmem:[#allocation4 + $0x88] sm:$0xff]  ;;  %v2866_v35 = vrot.slane %v2864_v21, 3  ;;  %v1874_v58 = vsel %vm1859_vm8, %v1871_v15, %v1873_v51  ;;  %v13461_v0 = vrot.slane %v1659_v2, 1 }
 0x16e   :  { %v1325_v63 = vsel %vm12831_vm12, %v1318_v55, %v1324_v60  ;;  %v13467_v47 = vld [vmem:[#allocation3 + $0x48] sm:$0xff]   ;;  %v2644_v53 = vsel %vm436_vm1, %v2641_v19, %v2643_v33  ;;  %v2048_v26 = vrot.slane %v13442_v10, 1  ;;  %v11504_v34 = vld [vmem:[#allocation3 + $0x40] sm:$0xff]   ;;  %v2471_v43 = vrot.slane %v13463_v44, 2  ;;  %v1384_v32 = vld [vmem:[#allocation3 + $0x5c] sm:$0xf] }
 0x16f   :  { %v1360_v18 = vld [vmem:[#allocation2 + $0x1e0] ss:$2 sm:$0xff]  ;;  %v1362_v20 = vld [vmem:[#allocation2 + $0x1e1] ss:$2 sm:$0xff]  ;;  %1326 = vst [vmem:[#allocation3 + $0x54] sm:$0x7] %v1325_v63  ;;  %2495 = vrot.lane.b32.xlu0 %v2470_v9, %s12505_s22  ;;  %v1662_v15 = vsel %vm1602_vm4, %v1657_v46, %v13461_v0  ;;  %v13477_v50 = vor.u32 %v2866_v35, %v2863_v3 }
 0x170   :  { %v1343_v57 = vshll.u32 %v10855_v13, 16  ;;  %v1346_v4 = vshrl.u32 %v10855_v13, 16  ;;  %v1367_v8 = vmax.f32 %v1360_v18, %v1362_v20  ;;  %1899 = vrot.lane.b32.xlu1 %v1874_v58, %s12504_s17  ;;  %v3095_v56 = vrot.slane %v13467_v47, 3  ;;  %v13486_v19 = vld [vmem:[#allocation3 + $0x40] sm:$0xff]   ;;  %v11510_v9 = vld [vmem:[#allocation3 + $0x48] sm:$0xff]  }
 0x171   :  { %v13490_v62 = vld [vmem:[#allocation3 + $0x40] sm:$0xff]   ;;  %v2868_v54 = vsel %vm16447_vm3, %v13383_v28, %v13477_v50  ;;  %v1875_v55 = vrot.slane %v13465_v22, 1  ;;  %v2870_v38 = vshrl.u32 %v11504_v34, 16  ;;  %v2873_v7 = vshll.u32 %v11504_v34, 16  ;;  %v11531_v10 = vld [vmem:[#allocation3 + $0xc] sm:$0xff]  }
 0x172   :  { %v1345_v11 = vrot.slane %v1343_v57, 5  ;;  %v1348_v31 = vrot.slane %v1346_v4, 4  ;;  %v1369_v1 = vmax.f32 %v1367_v8, %v1368_v16  ;;  %11238 = vmatmul.mubr.msk.bf16.gmra.mrb[84].mxu0 %vm795_vm5, %v3150_v48  ;;  %v1387_v21 = vld [vmem:[#allocation3 + $0x60] sm:$0x1]  ;;  %v2049_v42 = vsel %vm1859_vm8, %v2046_v61, %v2048_v26  ;;  %v13512_v63 = vld [vmem:[#allocation3 + $0x44] sm:$0xff]  }
 0x173   :  { %2669 = vrot.lane.b32.xlu0 %v2644_v53, %s12504_s17  ;;  %11241 = vmatprep.mubr.msk.bf16.mxu0 %vm16466_vm15, %v12502_v39  ;;  %v3153_v24 = vld [vmem:[#allocation4 + $0xa0] sm:$0xff]  ;;  %v1667_v28 = vshll.u32 %v13486_v19, 16  ;;  %v1663_v16 = vshrl.u32 %v13407_v29, 16  ;;  %v2472_v45 = vsel %vm436_vm1, %v2469_v14, %v2471_v43  ;;  %v2872_v61 = vrot.slane %v2870_v38, 2  ;;  %v13532_v14 = vld [vmem:[#allocation3 + $0x44] sm:$0xff]  }
 0x174   :  { %v1349_v37 = vor.u32 %v1348_v31, %v1345_v11  ;;  %v1354_v5 = vsel %vm12863_vm9, %v1345_v11, %v1353_v40  ;;  %v10856_v60 = vpack.c.bf16 %v1369_v1, %v1369_v1  ;;  %1723 = vrot.lane.b32.xlu1 %v1662_v15, %s12505_s22  ;;  %vm16471_vm9 = vmmov %vm16470_vm10  ;;  %v2875_v40 = vrot.slane %v2873_v7, 3  ;;  %v13536_v48 = vld [vmem:[#allocation3 + $0x48] sm:$0xff]  }
 0x175   :  { %1355 = vst [vmem:[#allocation3 + $0x54] sm:$0x8] %v1354_v5  ;;  %v3096_v27 = vsel %vm16471_vm9, %v3093_v23, %v3095_v56  ;;  %v2645_v23 = vrot.slane %v13490_v62, 2  ;;  %v1876_v20 = vsel %vm1859_vm8, %v1873_v51, %v1875_v55  ;;  %v1669_v30 = vrot.slane %v1667_v28, 1  ;;  %v13548_v8 = vld [vmem:[#allocation3 + $0x48] sm:$0xff]  }
 0x176   :  { %v1350_v59 = vrot.slane %v1349_v37, 4  ;;  %v1375_v36 = vshrl.u32 %v10856_v60, 16  ;;  %v1378_v17 = vshll.u32 %v10856_v60, 16  ;;  %3127 = vst.msk [vmem:[#allocation4 + $0xb8] sm:$0xff] %vm795_vm5, %v3096_v27  ;;  %v1665_v52 = vor.u32 %v1663_v16, %v13461_v0  ;;  %v13554_v0 = vld [vmem:[#allocation3 + $0x48] sm:$0xff]  }
 0x177   :  { %2942 = vrot.lane.b32.xlu0 %v2868_v54, %s12506_s23  ;;  %v2646_v25 = vsel %vm436_vm1, %v2643_v33, %v2645_v23  ;;  %v13543_v51 = vor.u32 %v2875_v40, %v2872_v61  ;;  %v2050_v4 = vrot.slane %v13512_v63, 1  ;;  %v2473_v58 = vrot.slane %v13532_v14, 2  ;;  %v11530_v11 = vld [vmem:[#allocation3 + $0x4] sm:$0xfe]  }
 0x178   :  { %v1357_v2 = vsel %vm12876_vm7, %v1350_v59, %v1356_v49  ;;  %v1377_v13 = vrot.slane %v1375_v36, 7  ;;  %2074 = vrot.lane.b32.xlu1 %v2049_v42, %s12506_s23  ;;  %v1670_v57 = vsel %vm1602_vm4, %v1665_v52, %v1669_v30  ;;  %v1877_v33 = vrot.slane %v13536_v48, 1  ;;  %v13583_v59 = vld [vmem:[#allocation3 + $0x4c] sm:$0xff]  }
 0x179   :  { %1358 = vst [vmem:[#allocation3 + $0x58] sm:$0xf] %v1357_v2  ;;  %v2877_v31 = vsel %vm16447_vm3, %v13477_v50, %v13543_v51  ;;  %v2879_v1 = vshrl.u32 %v11510_v9, 16  ;;  %v2882_v47 = vshll.u32 %v11510_v9, 16  ;;  %v2051_v53 = vsel %vm1859_vm8, %v2048_v26, %v2050_v4 }
 0x17a   :  { %v1380_v12 = vor.u32 %v1378_v17, %v1377_v13  ;;  %v1381_v3 = vrot.slane %v1377_v13, 4  ;;  %11242 = vmatmul.mubr.msk.bf16.gmra.mrb[88].mxu0 %vm795_vm5, %v3153_v24  ;;  %v1675_v15 = vshll.u32 %v13548_v8, 16  ;;  %v2474_v50 = vsel %vm436_vm1, %v2471_v43, %v2473_v58  ;;  %v13593_v24 = vld [vmem:[#allocation3 + $0x4c] sm:$0xff]  }
 0x17b   :  { %2497 = vrot.lane.b32.xlu0 %v2472_v45, %s12505_s22  ;;  %11245 = vmatprep.mubr.msk.bf16.mxu0 %vm16466_vm15, %v12502_v39  ;;  %v1671_v37 = vshrl.u32 %v13486_v19, 16  ;;  %vm2210_vm11 = vsmask.f32 6400  ;;  %v1878_v26 = vsel %vm1859_vm8, %v1875_v55, %v1877_v33  ;;  %v2647_v60 = vrot.slane %v13554_v0, 2 }
 0x17c   :  { %v1385_v18 = vsel %vm12901_vm13, %v1380_v12, %v1384_v32  ;;  %v1388_v29 = vsel %vm12909_vm0, %v1381_v3, %v1387_v21  ;;  %1901 = vrot.lane.b32.xlu1 %v1876_v20, %s12504_s17  ;;  %v11511_v41 = vld [vmem:[#allocation3 + $0x50] sm:$0xff]   ;;  %vm16472_vm0 = vmmov %vm16471_vm9  ;;  %v2884_v49 = vrot.slane %v2882_v47, 3  ;;  %v13586_v44 = vrot.slane %v1675_v15, 1  ;;  %v13591_v32 = vld [vmem:[#allocation3 + $0x68] sm:$0xff]  }
 0x17d   :  { %1386 = vst [vmem:[#allocation3 + $0x5c] sm:$0xf] %v1385_v18  ;;  %1389 = vst [vmem:[#allocation3 + $0x60] sm:$0x1] %v1388_v29  ;;  %v3097_v46 = vrot.slane %v11511_v41, 3  ;;  %v3156_v35 = vld [vmem:[#allocation4 + $0xb8] sm:$0xff]  ;;  %v1673_v21 = vor.u32 %v1671_v37, %v1669_v30  ;;  %v2648_v7 = vsel %vm436_vm1, %v2645_v23, %v2647_v60 }
 0x17e   :  { %vm16473_vm13 = vmmov %vm16472_vm0  ;;  %v2212_v43 = vshrl.u32 %v11530_v11, 16  ;;  %v2215_v36 = vshll.u32 %v11530_v11, 16  ;;  %v11523_v27 = vld [vmem:[#allocation3 + $0x50] sm:$0xff]   ;;  %vm1750_vm2 = vcmask 523520   ;;  %v2220_v38 = vshrl.u32 %v11531_v10, 16 }
 0x17f   :  { %2671 = vrot.lane.b32.xlu0 %v2646_v25, %s12504_s17  ;;  %v3098_v6 = vsel %vm16472_vm0, %v3095_v56, %v3097_v46  ;;  %v2881_v56 = vrot.slane %v2879_v1, 2  ;;  %v2223_v13 = vshll.u32 %v11531_v10, 16  ;;  %v1678_v28 = vsel %vm1602_vm4, %v1673_v21, %v13586_v44  ;;  %v13607_v12 = vld [vmem:[#allocation3 + $0x50] sm:$0xff]   ;;  %vm16474_vm12 = vmmov %vm16472_vm0 }
 0x180   :  { %1725 = vrot.lane.b32.xlu1 %v1670_v57, %s12505_s22  ;;  %3128 = vst.msk [vmem:[#allocation4 + $0xd0] sm:$0xff] %vm795_vm5, %v3098_v6  ;;  %v2214_v54 = vrot.slane %v2212_v43, 1  ;;  %v2217_v55 = vrot.slane %v2215_v36, 2  ;;  %v2052_v16 = vrot.slane %v13583_v59, 1  ;;  %v13611_v62 = vld [vmem:[#allocation3 + $0x50] sm:$0xff]   ;;  %v2222_v23 = vrot.slane %v2220_v38, 1  ;;  %vm16475_vm14 = vmmov %vm16472_vm0 }
 0x181   :  { %v13600_v2 = vor.u32 %v2884_v49, %v2881_v56  ;;  %v2888_v3 = vshrl.u32 %v11523_v27, 16  ;;  %v2225_v45 = vrot.slane %v2223_v13, 2  ;;  %v2475_v40 = vrot.slane %v13593_v24, 2  ;;  %v13620_v20 = vld [vmem:[#allocation3 + $0x50] sm:$0xff]   ;;  %v11551_v56 = vld [vmem:[%s16424_s3 + $0x38] sm:$0xff]  }
 0x182   :  { %11246 = vmatmul.mubr.msk.bf16.gmra.mrb[92].mxu0 %vm795_vm5, %v3156_v35  ;;  %v2891_v18 = vshll.u32 %v11523_v27, 16  ;;  %v2218_v30 = vor.u32 %v2217_v55, %v2214_v54  ;;  %v3103_v52 = vrot.slane %v13591_v32, 3  ;;  %v2053_v25 = vsel %vm1859_vm8, %v2050_v4, %v2052_v16  ;;  %v13635_v11 = vld [vmem:[#allocation3 + $0x54] sm:$0xff]  }
 0x183   :  { %2944 = vrot.lane.b32.xlu0 %v2877_v31, %s12506_s23  ;;  %11249 = vmatprep.mubr.msk.bf16.mxu0 %vm16466_vm15, %v12502_v39  ;;  %v2886_v29 = vsel %vm16447_vm3, %v13543_v51, %v13600_v2  ;;  %v13622_v41 = vor.u32 %v2225_v45, %v2222_v23  ;;  %v1879_v9 = vrot.slane %v13607_v12, 1  ;;  %v1679_v51 = vshrl.u32 %v13548_v8, 16  ;;  %v13642_v1 = vld [vmem:[#allocation3 + $0x54] sm:$0xff]   ;;  %v11546_v8 = vld [vmem:[#allocation3 + $0x8] sm:$0xff]  }
 0x184   :  { %v11521_v34 = vld [vmem:[#allocation3 + $0x58] sm:$0xff]   ;;  %2076 = vrot.lane.b32.xlu1 %v2051_v53, %s12506_s23  ;;  %v11533_v17 = vld [vmem:[#allocation3 + $0x60] sm:$0xff]   ;;  %v1683_v35 = vshll.u32 %v13611_v62, 16  ;;  %v2890_v6 = vrot.slane %v2888_v3, 2  ;;  %vm1926_vm7 = vcmask 785920   ;;  %v2893_v4 = vrot.slane %v2891_v18, 3 }
 0x185   :  { %v3099_v5 = vrot.slane %v11521_v34, 3  ;;  %v3101_v42 = vrot.slane %v11533_v17, 3  ;;  %v2227_v31 = vsel %vm2210_vm11, %v2218_v30, %v13622_v41  ;;  %v2476_v47 = vsel %vm436_vm1, %v2473_v58, %v2475_v40  ;;  %v11547_v34 = vld [vmem:[#allocation3 + $0x14] sm:$0xff]   ;;  %1495 = vst.msk [vmem:[#allocation4 + $0x18] sm:$0xff] %vm795_vm5, %v11546_v8  ;;  %v13683_v43 = vld [vmem:[#allocation3 + $0x5c] sm:$0xff]  }
 0x186   :  { %2349 = vst.msk [vmem:[#allocation4 + $0x8] sm:$0xff] %vm795_vm5, %v2227_v31  ;;  %v2649_v53 = vrot.slane %v13620_v20, 2  ;;  %vm2101_vm10 = vcmask 1048320   ;;  %v1880_v14 = vsel %vm1859_vm8, %v1877_v33, %v1879_v9  ;;  %v13662_v58 = vrot.slane %v1683_v35, 1  ;;  %v13667_v37 = vld [vmem:[#allocation3 + $0x58] sm:$0xff]   ;;  %v13693_v54 = vld [vmem:[#allocation3 + $0x60] sm:$0xff]  }
 0x187   :  { %2499 = vrot.lane.b32.xlu0 %v2474_v50, %s12505_s22  ;;  %v3100_v19 = vsel %vm16473_vm13, %v3097_v46, %v3099_v5  ;;  %v3159_v22 = vld [vmem:[#allocation4 + $0xd0] sm:$0xff]  ;;  %v3102_v61 = vsel %vm16474_vm12, %v3099_v5, %v3101_v42  ;;  %v3104_v63 = vsel %vm16475_vm14, %v3101_v42, %v3103_v52  ;;  %v11548_v50 = vld [vmem:[%s16424_s3 + $0x78] sm:$0xff]   ;;  %v2229_v33 = vshrl.u32 %v11547_v34, 16 }
 0x188   :  { %1903 = vrot.lane.b32.xlu1 %v1878_v26, %s12504_s17  ;;  %3129 = vst.msk [vmem:[#allocation4 + $0xe8] sm:$0xff] %vm795_vm5, %v3100_v19  ;;  %3130 = vst.msk [vmem:[#allocation4 + $0x100] sm:$0xff] %vm795_vm5, %v3102_v61  ;;  %v13672_v10 = vld [vmem:[#allocation3 + $0x58] sm:$0xff]   ;;  %v2232_v26 = vshll.u32 %v11547_v34, 16  ;;  %10905 = vmatprep.subr.bf16.mxu1 %v11548_v50  ;;  %v1681_v49 = vor.u32 %v1679_v51, %v13586_v44  ;;  %v13680_v19 = vor.u32 %v2893_v4, %v2890_v6  ;;  %v13700_v0 = vld [vmem:[#allocation3 + $0x60] sm:$0xff]  }
 0x189   :  { %3131 = vst.msk [vmem:[#allocation4 + $0x118] sm:$0xff] %vm795_vm5, %v3104_v63  ;;  %v13674_v48 = vld [vmem:[#allocation3 + $0x58] sm:$0xff]   ;;  %v2650_v17 = vsel %vm436_vm1, %v2647_v60, %v2649_v53  ;;  %v2231_v44 = vrot.slane %v2229_v33, 1  ;;  %10906 = vmatpush3.bf16.msra.mxu1 %v11551_v56  ;;  %v13702_v60 = vld [vmem:[#allocation3 + $0x60] sm:$0xff]   ;;  %v1881_v42 = vrot.slane %v13667_v37, 1  ;;  %v2651_v18 = vrot.slane %v13672_v10, 2 }
 0x18a   :  { %11250 = vmatmul.mubr.msk.bf16.gmra.mrb[96].mxu0 %vm795_vm5, %v3159_v22  ;;  %v11550_v36 = vld [vmem:[#allocation3 + $0x58] sm:$0xff]   ;;  %v2054_v22 = vrot.slane %v13635_v11, 1  ;;  %v2234_v55 = vrot.slane %v2232_v26, 2  ;;  %v1686_v38 = vsel %vm1602_vm4, %v1681_v49, %v13662_v58  ;;  %v1691_v23 = vshll.u32 %v13674_v48, 16  ;;  %v11555_v45 = vld [vmem:[#allocation3 + $0x60] sm:$0xff]   ;;  %v11568_v11 = vld [vmem:[#allocation3 + $0x30] sm:$0xff]  }
 0x18b   :  { %2673 = vrot.lane.b32.xlu0 %v2648_v7, %s12504_s17  ;;  %11253 = vmatprep.mubr.msk.bf16.mxu0 %vm16466_vm15, %v12502_v39  ;;  %v13691_v21 = vld [vmem:[#allocation3 + $0x5c] sm:$0xff]   ;;  %v2477_v7 = vrot.slane %v13642_v1, 2  ;;  %v2895_v61 = vsel %vm16447_vm3, %v13600_v2, %v13680_v19  ;;  %v2897_v30 = vshrl.u32 %v11550_v36, 16  ;;  %v2900_v6 = vshll.u32 %v11550_v36, 16  ;;  %v13732_v4 = vld [vmem:[#allocation3 + $0x64] sm:$0xff]   ;;  %1500 = vst.msk [vmem:[#allocation4 + $0x90] sm:$0xff] %vm795_vm5, %v11568_v11 }
 0x18c   :  { %1727 = vrot.lane.b32.xlu1 %v1678_v28, %s12505_s22  ;;  %v1888_v57 = vpop.permute.xlu1 %1887  ;;  %v2235_v3 = vor.u32 %v2234_v55, %v2231_v44  ;;  %v11559_v51 = vld [vmem:[#allocation3 + $0x1c] sm:$0xff]   ;;  %v2479_v35 = vrot.slane %v13691_v21, 2  ;;  %v2055_v31 = vsel %vm1859_vm8, %v2052_v16, %v2054_v22  ;;  %v2653_v63 = vrot.slane %v13693_v54, 2  ;;  %v11563_v44 = vld [vmem:[#allocation3 + $0x24] sm:$0xff]  }
 0x18d   :  { %v13736_v59 = vrot.slane %v1691_v23, 1  ;;  %v2906_v16 = vshrl.u32 %v11555_v45, 16  ;;  %v2238_v8 = vshrl.u32 %v11559_v51, 16  ;;  %v13739_v34 = vrot.slane %v2897_v30, 2  ;;  %v11562_v49 = vld [vmem:[#allocation3 + $0x18] sm:$0xff]  }
 0x18e   :  { %v1712_v15 = vpop.permute.xlu0 %1711  ;;  %v2236_v2 = vsel %vm2210_vm11, %v13622_v41, %v2235_v3  ;;  %v1699_v41 = vshll.u32 %v13702_v60, 16  ;;  %v13747_v33 = vrot.slane %v2900_v6, 3  ;;  %v1882_v36 = vsel %vm1859_vm8, %v1879_v9, %v1881_v42  ;;  %1497 = vst.msk [vmem:[#allocation4 + $0x48] sm:$0xff] %vm795_vm5, %v11562_v49  ;;  %v13837_v11 = vld [vmem:[#allocation3 + $0x68] ss:$0 sps:$4 sm:$0x11]  }
 0x18f   :  { %2946 = vrot.lane.b32.xlu0 %v2886_v29, %s12506_s23  ;;  %v3162_v46 = vld [vmem:[#allocation4 + $0xe8] sm:$0xff]  ;;  %1751 = vst.msk [vmem:[#allocation4] sm:$0xff] %vm1750_vm2, %v1712_v15  ;;  %v3165_v13 = vld [vmem:[#allocation4 + $0x100] sm:$0xff]  ;;  %v2056_v29 = vrot.slane %v13683_v43, 1  ;;  %v1883_v15 = vrot.slane %v13700_v0, 1  ;;  %v2240_v26 = vrot.slane %v2238_v8, 1  ;;  %v2654_v1 = vsel %vm436_vm1, %v2651_v18, %v2653_v63 }
 0x190   :  { %2078 = vrot.lane.b32.xlu1 %v2053_v25, %s12506_s23  ;;  %v2063_v5 = vpop.permute.xlu1 %2062  ;;  %1927 = vst.msk [vmem:[#allocation4] sm:$0xff] %vm1926_vm7, %v1888_v57  ;;  %v13713_v25 = vld [vmem:[#allocation3 + $0x64] sm:$0xff]   ;;  %v1687_v57 = vshrl.u32 %v13611_v62, 16  ;;  %v1695_v62 = vshrl.u32 %v13674_v48, 16  ;;  %v2058_v24 = vrot.slane %v13732_v4, 1  ;;  %v13759_v55 = vrot.slane %v2906_v16, 2 }
 0x191   :  { %2102 = vst.msk [vmem:[#allocation4] sm:$0xff] %vm2101_vm10, %v2063_v5  ;;  %v2481_v50 = vrot.slane %v13713_v25, 2  ;;  %v2478_v5 = vsel %vm436_vm1, %v2475_v40, %v2477_v7  ;;  %v11564_v40 = vld [vmem:[#allocation3 + $0x2c] sm:$0xff]   ;;  %v2247_v12 = vshrl.u32 %v11563_v44, 16  ;;  %v2250_v9 = vshll.u32 %v11563_v44, 16  ;;  %v11580_v43 = vld [vmem:[#allocation3 + $0x60] sm:$0xff]  }
 0x192   :  { %11254 = vmatmul.mubr.msk.bf16.gmra.mrb[100].mxu0 %vm795_vm5, %v3162_v46  ;;  %v2486_v27 = vpop.permute.xlu0 %2485  ;;  %v11556_v46 = vld [vmem:[#allocation3 + $0x10] sm:$0xff]   ;;  %2350 = vst.msk [vmem:[#allocation4 + $0x20] sm:$0xff] %vm795_vm5, %v2236_v2  ;;  %v2057_v2 = vsel %vm1859_vm8, %v2054_v22, %v2056_v29  ;;  %1506 = vst.msk [vmem:[#allocation4 + $0x120] sm:$0xff] %vm795_vm5, %v11580_v43 }
 0x193   :  { %2501 = vrot.lane.b32.xlu0 %v2476_v47, %s12505_s22  ;;  %11257 = vmatprep.mubr.msk.bf16.mxu0 %vm16466_vm15, %v12502_v39  ;;  %2524 = vst.msk [vmem:[#allocation4 + $0x8] sm:$0xff] %vm1750_vm2, %v2486_v27  ;;  %v2241_v47 = vshll.u32 %v11559_v51, 16  ;;  %v13755_v27 = vrot.slane %v1699_v41, 1  ;;  %v11566_v51 = vld [vmem:[#allocation3 + $0x28] sm:$0xff]   ;;  %v2249_v20 = vrot.slane %v2247_v12, 1  ;;  %v1689_v41 = vor.u32 %v1687_v57, %v13662_v58  ;;  %v11572_v12 = vld [vmem:[#allocation3 + $0x40] sm:$0xff]  }
 0x194   :  { %1905 = vrot.lane.b32.xlu1 %v1880_v14, %s12504_s17  ;;  %1496 = vst.msk [vmem:[#allocation4 + $0x30] sm:$0xff] %vm795_vm5, %v11556_v46  ;;  %v2909_v14 = vshll.u32 %v11555_v45, 16  ;;  %v2256_v45 = vshrl.u32 %v11564_v40, 16  ;;  %v2259_v46 = vshll.u32 %v11564_v40, 16  ;;  %1499 = vst.msk [vmem:[#allocation4 + $0x78] sm:$0xff] %vm795_vm5, %v11566_v51  ;;  %v11571_v40 = vld [vmem:[#allocation3 + $0x44] sm:$0xff]  }
 0x195   :  { %v2660_v28 = vpop.permute.xlu1 %2659  ;;  %v2243_v56 = vrot.slane %v2241_v47, 2  ;;  %v1694_v58 = vsel %vm1602_vm4, %v1689_v41, %v13736_v59  ;;  %v2283_v10 = vshrl.u32 %v11571_v40, 16  ;;  %1502 = vst.msk [vmem:[#allocation4 + $0xc0] sm:$0xff] %vm795_vm5, %v11572_v12  ;;  %v11579_v12 = vld [vmem:[#allocation3 + $0x64] sm:$0xff]  }
 0x196   :  { %2698 = vst.msk [vmem:[#allocation4 + $0x8] sm:$0xff] %vm1926_vm7, %v2660_v28  ;;  %v13762_v23 = vrot.slane %v2909_v14, 3  ;;  %v2258_v6 = vrot.slane %v2256_v45, 1  ;;  %v2261_v16 = vrot.slane %v2259_v46, 2  ;;  %v11569_v14 = vld [vmem:[#allocation3 + $0x3c] sm:$0xff]   ;;  %v13815_v46 = vor.u32 %v13747_v33, %v13739_v34  ;;  %v11575_v33 = vld [vmem:[#allocation3 + $0x54] sm:$0xff]  }
 0x197   :  { %2675 = vrot.lane.b32.xlu0 %v2650_v17, %s12504_s17  ;;  %v3168_v17 = vld [vmem:[#allocation4 + $0x118] sm:$0xff]  ;;  %v2274_v44 = vshrl.u32 %v11569_v14, 16  ;;  %v2304_v21 = vshll.u32 %v11575_v33, 16 }
 0x198   :  { %1729 = vrot.lane.b32.xlu1 %v1686_v38, %s12505_s22  ;;  %v2244_v38 = vor.u32 %v2243_v56, %v2240_v26  ;;  %v2480_v26 = vsel %vm436_vm1, %v2477_v7, %v2479_v35  ;;  %v2262_v57 = vor.u32 %v2261_v16, %v2258_v6  ;;  %v13822_v6 = vld [vmem:[#allocation3 + $0x68] sm:$0xff]  }
 0x199   :  { %v1890_v28 = vpop.permute.xlu1 %1889  ;;  %v2276_v45 = vrot.slane %v2274_v44, 1  ;;  %v13835_v16 = vld [vmem:[#allocation3 + $0x68] ss:$0 sps:$4 sm:$0x11]   ;;  %v2306_v44 = vrot.slane %v2304_v21, 2 }
 0x19a   :  { %11258 = vmatmul.mubr.msk.bf16.gmra.mrb[104].mxu0 %vm795_vm5, %v3165_v13  ;;  %v11565_v13 = vld [vmem:[#allocation3 + $0x20] sm:$0xff]   ;;  %v2245_v30 = vsel %vm2210_vm11, %v2235_v3, %v2244_v38 }
 0x19b   :  { %2948 = vrot.lane.b32.xlu0 %v2895_v61, %s12506_s23  ;;  %11261 = vmatprep.mubr.msk.bf16.mxu0 %vm16466_vm15, %v12502_v39  ;;  %v2652_v61 = vsel %vm436_vm1, %v2649_v53, %v2651_v18  ;;  %1498 = vst.msk [vmem:[#allocation4 + $0x60] sm:$0xff] %vm795_vm5, %v11565_v13  ;;  %2351 = vst.msk [vmem:[#allocation4 + $0x38] sm:$0xff] %vm795_vm5, %v2245_v30  ;;  %v2252_v53 = vrot.slane %v2250_v9, 2  ;;  %v2277_v13 = vshll.u32 %v11569_v14, 16  ;;  %v11573_v18 = vld [vmem:[#allocation3 + $0x4c] sm:$0xff]   ;;  %v11576_v14 = vld [vmem:[#allocation3 + $0x5c] sm:$0xff]  }
 0x19c   :  { %2080 = vrot.lane.b32.xlu1 %v2055_v31, %s12506_s23  ;;  %v11567_v31 = vld [vmem:[#allocation3 + $0x34] sm:$0xff]   ;;  %v1884_v30 = vsel %vm1859_vm8, %v1881_v42, %v1883_v15  ;;  %v2285_v42 = vrot.slane %v2283_v10, 1  ;;  %v2292_v34 = vshrl.u32 %v11573_v18, 16  ;;  %v2295_v41 = vshll.u32 %v11573_v18, 16 }
 0x19d   :  { %v2253_v22 = vor.u32 %v2252_v53, %v2249_v20  ;;  %v2265_v8 = vshrl.u32 %v11567_v31, 16  ;;  %v2268_v47 = vshll.u32 %v11567_v31, 16  ;;  %v2279_v51 = vrot.slane %v2277_v13, 2  ;;  %v3133_v53 = vld [vmem:[#allocation4] sm:$0xff] }
 0x19e   :  { %v2313_v13 = vshll.u32 %v11576_v14, 16 }
 0x19f   :  { %2503 = vrot.lane.b32.xlu0 %v2478_v5, %s12505_s22  ;;  %v11570_v5 = vld [vmem:[#allocation3 + $0x38] sm:$0xff]   ;;  %v2254_v49 = vsel %vm2210_vm11, %v2244_v38, %v2253_v22  ;;  %v2263_v38 = vsel %vm2210_vm11, %v2253_v22, %v2262_v57 }
 0x1a0   :  { %1907 = vrot.lane.b32.xlu1 %v1882_v36, %s12504_s17  ;;  %v2267_v36 = vrot.slane %v2265_v8, 1  ;;  %1501 = vst.msk [vmem:[#allocation4 + $0xa8] sm:$0xff] %vm795_vm5, %v11570_v5  ;;  %2352 = vst.msk [vmem:[#allocation4 + $0x50] sm:$0xff] %vm795_vm5, %v2254_v49  ;;  %v2294_v8 = vrot.slane %v2292_v34, 1  ;;  %v13846_v49 = vld [vmem:[#allocation3 + $0x68] sm:$0xff]   ;;  %v2315_v18 = vrot.slane %v2313_v13, 2 }
 0x1a1   :  { %2353 = vst.msk [vmem:[#allocation4 + $0x68] sm:$0xff] %vm795_vm5, %v2263_v38 }
 0x1a2   :  { %11262 = vmatmul.mubr.msk.bf16.gmra.mrb[108].mxu0 %vm795_vm5, %v3168_v17  ;;  %v2933_v3 = vpop.permute.xlu0 %2932  ;;  %v2270_v17 = vrot.slane %v2268_v47, 2  ;;  %v2301_v47 = vshrl.u32 %v11575_v33, 16 }
 0x1a3   :  { %2677 = vrot.lane.b32.xlu0 %v2652_v61, %s12504_s17  ;;  %11265 = vmatprep.mubr.msk.bf16.mxu0 %vm16466_vm15, %v12502_v39  ;;  %2971 = vst.msk [vmem:[#allocation4 + $0x8] sm:$0xff] %vm2101_vm10, %v2933_v3  ;;  %v2286_v61 = vshll.u32 %v11571_v40, 16  ;;  %v2280_v3 = vor.u32 %v2279_v51, %v2276_v45  ;;  %v11578_v40 = vld [vmem:[#allocation3 + $0x58] sm:$0xff]   ;;  %v2918_v45 = vshll.u32 %v13822_v6, 16  ;;  %v1885_v51 = vrot.slane %v13835_v16, 1 }
 0x1a4   :  { %2082 = vrot.lane.b32.xlu1 %v2057_v2, %s12506_s23  ;;  %v2271_v9 = vor.u32 %v2270_v17, %v2267_v36  ;;  %v11574_v2 = vld [vmem:[#allocation3 + $0x48] sm:$0xff]   ;;  %v2303_v17 = vrot.slane %v2301_v47, 1  ;;  %1505 = vst.msk [vmem:[#allocation4 + $0x108] sm:$0xff] %vm795_vm5, %v11578_v40 }
 0x1a5   :  { %v1714_v56 = vpop.permute.xlu1 %1713  ;;  %v2288_v31 = vrot.slane %v2286_v61, 2  ;;  %1503 = vst.msk [vmem:[#allocation4 + $0xd8] sm:$0xff] %vm795_vm5, %v11574_v2  ;;  %v1703_v2 = vshrl.u32 %v13702_v60, 16  ;;  %v2920_v33 = vrot.slane %v2918_v45, 3 }
 0x1a6   :  { %1752 = vst.msk [vmem:[#allocation4 + $0x18] sm:$0xff] %vm1750_vm2, %v1714_v56  ;;  %v2488_v7 = vpop.permute.xlu0 %2487  ;;  %v2272_v37 = vsel %vm2210_vm11, %v2262_v57, %v2271_v9  ;;  %v11577_v57 = vld [vmem:[#allocation3 + $0x50] sm:$0xff]   ;;  %v2307_v10 = vor.u32 %v2306_v44, %v2303_v17 }
 0x1a7   :  { %2505 = vrot.lane.b32.xlu0 %v2480_v26, %s12505_s22  ;;  %1928 = vst.msk [vmem:[#allocation4 + $0x18] sm:$0xff] %vm1926_vm7, %v1890_v28  ;;  %v1697_v28 = vor.u32 %v1695_v62, %v13736_v59  ;;  %v2482_v62 = vsel %vm436_vm1, %v2479_v35, %v2481_v50  ;;  %v2289_v22 = vor.u32 %v2288_v31, %v2285_v42  ;;  %v2655_v31 = vrot.slane %v13846_v49, 2 }
 0x1a8   :  { %1731 = vrot.lane.b32.xlu1 %v1694_v58, %s12505_s22  ;;  %2525 = vst.msk [vmem:[#allocation4 + $0x20] sm:$0xff] %vm1750_vm2, %v2488_v7  ;;  %v2904_v35 = vsel %vm16447_vm3, %v13680_v19, %v13815_v46  ;;  %v2281_v26 = vsel %vm2210_vm11, %v2271_v9, %v2280_v3  ;;  %v2297_v58 = vrot.slane %v2295_v41, 2  ;;  %v2310_v19 = vshrl.u32 %v11576_v14, 16 }
 0x1a9   :  { %v2065_v20 = vpop.permute.xlu1 %2064  ;;  %2354 = vst.msk [vmem:[#allocation4 + $0x80] sm:$0xff] %vm795_vm5, %v2272_v37  ;;  %v1702_v5 = vsel %vm1602_vm4, %v1697_v28, %v13755_v27  ;;  %2355 = vst.msk [vmem:[#allocation4 + $0x98] sm:$0xff] %vm795_vm5, %v2281_v26  ;;  %v2290_v36 = vsel %vm2210_vm11, %v2280_v3, %v2289_v22  ;;  %v2912_v7 = vor.u32 %v13762_v23, %v13759_v55  ;;  %v2915_v9 = vshrl.u32 %v13822_v6, 16 }
 0x1aa   :  { %2103 = vst.msk [vmem:[#allocation4 + $0x18] sm:$0xff] %vm2101_vm10, %v2065_v20  ;;  %v3134_v48 = vld [vmem:[#allocation4 + $0x8] sm:$0xff]  ;;  %v2662_v59 = vpop.permute.xlu0 %2661  ;;  %v2298_v38 = vor.u32 %v2297_v58, %v2294_v8  ;;  %v2312_v61 = vrot.slane %v2310_v19, 1  ;;  %v2319_v55 = vshrl.u32 %v11579_v12, 16  ;;  %v2322_v23 = vshll.u32 %v11579_v12, 16 }
 0x1ab   :  { %2679 = vrot.lane.b32.xlu0 %v2654_v1, %s12504_s17  ;;  %3394 = vmatprep.mubr.bf16.mxu1 %v3134_v48  ;;  %2699 = vst.msk [vmem:[#allocation4 + $0x20] sm:$0xff] %vm1926_vm7, %v2662_v59  ;;  %v2059_v1 = vsel %vm1859_vm8, %v2056_v29, %v2058_v24  ;;  %v1707_v20 = vshll.u32 %v13837_v11, 16  ;;  %v2913_v60 = vsel %vm16447_vm3, %v13815_v46, %v2912_v7  ;;  %v2917_v34 = vrot.slane %v2915_v9, 2 }
 0x1ac   :  { %1909 = vrot.lane.b32.xlu1 %v1884_v30, %s12504_s17  ;;  %3395 = vmatmul.mubr.bf16.vlgmr.msra.gmra.mrb[0].mxu1 %v3133_v53  ;;  %2356 = vst.msk [vmem:[#allocation4 + $0xb0] sm:$0xff] %vm795_vm5, %v2290_v36  ;;  %1504 = vst.msk [vmem:[#allocation4 + $0xf0] sm:$0xff] %vm795_vm5, %v11577_v57  ;;  %v2299_v29 = vsel %vm2210_vm11, %v2289_v22, %v2298_v38  ;;  %v2308_v53 = vsel %vm2210_vm11, %v2298_v38, %v2307_v10  ;;  %v2321_v37 = vrot.slane %v2319_v55, 1 }
 0x1ad   :  { %v1892_v56 = vpop.permute.xlu1 %1891  ;;  %2357 = vst.msk [vmem:[#allocation4 + $0xc8] sm:$0xff] %vm795_vm5, %v2299_v29  ;;  %2358 = vst.msk [vmem:[#allocation4 + $0xe0] sm:$0xff] %vm795_vm5, %v2308_v53  ;;  %v2316_v6 = vor.u32 %v2315_v18, %v2312_v61  ;;  %v2324_v42 = vrot.slane %v2322_v23, 2  ;;  %v1886_v59 = vsel %vm1859_vm8, %v1883_v15, %v1885_v51  ;;  %v1705_v3 = vor.u32 %v1703_v2, %v13755_v27 }
 0x1ae   :  { %v1709_v41 = vrot.slane %v1707_v20, 1  ;;  %v2656_v0 = vsel %vm436_vm1, %v2653_v63, %v2655_v31  ;;  %v13897_v15 = vor.u32 %v2920_v33, %v2917_v34 }
 0x1af   :  { %2950 = vrot.lane.b32.xlu0 %v2904_v35, %s12506_s23  ;;  %v2317_v48 = vsel %vm2210_vm11, %v2307_v10, %v2316_v6 }
 0x1b0   :  { %1733 = vrot.lane.b32.xlu1 %v1702_v5, %s12505_s22  ;;  %2359 = vst.msk [vmem:[#allocation4 + $0xf8] sm:$0xff] %vm795_vm5, %v2317_v48  ;;  %v1710_v22 = vsel %vm1602_vm4, %v1705_v3, %v1709_v41  ;;  %v2922_v54 = vsel %vm16447_vm3, %v2912_v7, %v13897_v15 }
 0x1b1   :  { %v1716_v30 = vpop.permute.xlu1 %1715  ;;  %v3136_v27 = vld [vmem:[#allocation4 + $0x18] sm:$0xff] }
 0x1b2   :  { %v2935_v28 = vpop.permute.xlu0 %2934  ;;  %1753 = vst.msk [vmem:[#allocation4 + $0x30] sm:$0xff] %vm1750_vm2, %v1716_v30 }
 0x1b3   :  { %2507 = vrot.lane.b32.xlu0 %v2482_v62, %s12505_s22  ;;  %2972 = vst.msk [vmem:[#allocation4 + $0x20] sm:$0xff] %vm2101_vm10, %v2935_v28  ;;  %v13880_v62 = vor.u32 %v2324_v42, %v2321_v37 }
 0x1b4   :  { %2084 = vrot.lane.b32.xlu1 %v2059_v1, %s12506_s23  ;;  %1929 = vst.msk [vmem:[#allocation4 + $0x30] sm:$0xff] %vm1926_vm7, %v1892_v56 }
 0x1b5   :  { %v2326_v46 = vsel %vm2210_vm11, %v2316_v6, %v13880_v62 }
 0x1b6   :  { %2360 = vst.msk [vmem:[#allocation4 + $0x110] sm:$0xff] %vm795_vm5, %v2326_v46 }
 0x1b7   :  { %2952 = vrot.lane.b32.xlu0 %v2913_v60, %s12506_s23 }
 0x1b8   :  { %1911 = vrot.lane.b32.xlu1 %v1886_v59, %s12504_s17  ;;  %v2067_v16 = vpop.permute.xlu1 %2066 }
 0x1b9   :  { %2104 = vst.msk [vmem:[#allocation4 + $0x30] sm:$0xff] %vm2101_vm10, %v2067_v16  ;;  %v2490_v11 = vpop.permute.xlu0 %2489 }
 0x1ba   :  { %v3137_v8 = vld [vmem:[#allocation4 + $0x20] sm:$0xff]  ;;  %2526 = vst.msk [vmem:[#allocation4 + $0x38] sm:$0xff] %vm1750_vm2, %v2490_v11 }
 0x1bb   :  { %2681 = vrot.lane.b32.xlu0 %v2656_v0, %s12504_s17  ;;  %3402 = vmatprep.mubr.bf16.mxu1 %v3137_v8 }
 0x1bc   :  { %1735 = vrot.lane.b32.xlu1 %v1710_v22, %s12505_s22  ;;  %3403 = vmatmul.mubr.bf16.gmra.mrb[4].mxu1 %v3136_v27  ;;  %v1894_v63 = vpop.permute.xlu1 %1893 }
 0x1bd   :  { %v2664_v47 = vpop.permute.xlu0 %2663 }
 0x1be   :  { %2700 = vst.msk [vmem:[#allocation4 + $0x38] sm:$0xff] %vm1926_vm7, %v2664_v47 }
 0x1bf   :  { %2954 = vrot.lane.b32.xlu0 %v2922_v54, %s12506_s23 }
 0x1c0   :  { %v3139_v56 = vld [vmem:[#allocation4 + $0x30] sm:$0xff] }
 0x1c1   :  { %v1718_v21 = vpop.permute.xlu1 %1717 }
 0x1c2   :  { %1754 = vst.msk [vmem:[#allocation4 + $0x48] sm:$0xff] %vm1750_vm2, %v1718_v21 }
 0x1c3   :  { %1930 = vst.msk [vmem:[#allocation4 + $0x48] sm:$0xff] %vm1926_vm7, %v1894_v63 }
 0x1c5   :  { %v2937_v14 = vpop.permute.xlu0 %2936  ;;  %v2069_v35 = vpop.permute.xlu1 %2068 }
 0x1c6   :  { %2973 = vst.msk [vmem:[#allocation4 + $0x38] sm:$0xff] %vm2101_vm10, %v2937_v14  ;;  %2105 = vst.msk [vmem:[#allocation4 + $0x48] sm:$0xff] %vm2101_vm10, %v2069_v35 }
 0x1c9   :  { %v2492_v5 = vpop.permute.xlu0 %2491  ;;  %v1896_v26 = vpop.permute.xlu1 %1895 }
 0x1ca   :  { %2527 = vst.msk [vmem:[#allocation4 + $0x50] sm:$0xff] %vm1750_vm2, %v2492_v5 }
 0x1cd   :  { %v2666_v58 = vpop.permute.xlu0 %2665  ;;  %v3140_v57 = vld [vmem:[#allocation4 + $0x38] sm:$0xff]  ;;  %v2071_v36 = vpop.permute.xlu1 %2070  ;;  %v3142_v12 = vld [vmem:[#allocation4 + $0x48] sm:$0xff] }
 0x1ce   :  { %2701 = vst.msk [vmem:[#allocation4 + $0x50] sm:$0xff] %vm1926_vm7, %v2666_v58  ;;  %3410 = vmatprep.mubr.bf16.mxu1 %v3140_v57 }
 0x1cf   :  { %3411 = vmatmul.mubr.bf16.gmra.mrb[8].mxu1 %v3139_v56 }
 0x1d1   :  { %v2494_v17 = vpop.permute.xlu0 %2493  ;;  %v1898_v44 = vpop.permute.xlu1 %1897 }
 0x1d2   :  { %2528 = vst.msk [vmem:[#allocation4 + $0x68] sm:$0xff] %vm1750_vm2, %v2494_v17 }
 0x1d5   :  { %v2668_v19 = vpop.permute.xlu0 %2667 }
 0x1d6   :  { %2702 = vst.msk [vmem:[#allocation4 + $0x68] sm:$0xff] %vm1926_vm7, %v2668_v19  ;;  %v1720_v40 = vpop.permute.xlu1 %1719 }
 0x1d7   :  { %1755 = vst.msk [vmem:[#allocation4 + $0x60] sm:$0xff] %vm1750_vm2, %v1720_v40 }
 0x1d8   :  { %1931 = vst.msk [vmem:[#allocation4 + $0x60] sm:$0xff] %vm1926_vm7, %v1896_v26 }
 0x1d9   :  { %2106 = vst.msk [vmem:[#allocation4 + $0x60] sm:$0xff] %vm2101_vm10, %v2071_v36  ;;  %v2939_v1 = vpop.permute.xlu0 %2938 }
 0x1da   :  { %2974 = vst.msk [vmem:[#allocation4 + $0x50] sm:$0xff] %vm2101_vm10, %v2939_v1  ;;  %v1722_v7 = vpop.permute.xlu1 %1721 }
 0x1db   :  { %1756 = vst.msk [vmem:[#allocation4 + $0x78] sm:$0xff] %vm1750_vm2, %v1722_v7 }
 0x1dc   :  { %1932 = vst.msk [vmem:[#allocation4 + $0x78] sm:$0xff] %vm1926_vm7, %v1898_v44 }
 0x1dd   :  { %v2941_v38 = vpop.permute.xlu0 %2940 }
 0x1de   :  { %2975 = vst.msk [vmem:[#allocation4 + $0x68] sm:$0xff] %vm2101_vm10, %v2941_v38  ;;  %v2073_v13 = vpop.permute.xlu1 %2072 }
 0x1df   :  { %2107 = vst.msk [vmem:[#allocation4 + $0x78] sm:$0xff] %vm2101_vm10, %v2073_v13 }
 0x1e0   :  { %v3145_v55 = vld [vmem:[#allocation4 + $0x60] sm:$0xff] }
 0x1e1   :  { %v2496_v9 = vpop.permute.xlu0 %2495  ;;  %v3143_v45 = vld [vmem:[#allocation4 + $0x50] sm:$0xff] }
 0x1e2   :  { %2529 = vst.msk [vmem:[#allocation4 + $0x80] sm:$0xff] %vm1750_vm2, %v2496_v9  ;;  %3418 = vmatprep.mubr.bf16.mxu1 %v3143_v45  ;;  %v1900_v10 = vpop.permute.xlu1 %1899 }
 0x1e3   :  { %3419 = vmatmul.mubr.bf16.gmra.mrb[12].mxu1 %v3142_v12 }
 0x1e5   :  { %v2670_v61 = vpop.permute.xlu0 %2669  ;;  %v3146_v43 = vld [vmem:[#allocation4 + $0x68] sm:$0xff] }
 0x1e6   :  { %2703 = vst.msk [vmem:[#allocation4 + $0x80] sm:$0xff] %vm1926_vm7, %v2670_v61  ;;  %3426 = vmatprep.mubr.bf16.mxu1 %v3146_v43  ;;  %v1724_v29 = vpop.permute.xlu1 %1723 }
 0x1e7   :  { %1757 = vst.msk [vmem:[#allocation4 + $0x90] sm:$0xff] %vm1750_vm2, %v1724_v29 }
 0x1e8   :  { %1933 = vst.msk [vmem:[#allocation4 + $0x90] sm:$0xff] %vm1926_vm7, %v1900_v10 }
 0x1e9   :  { %v2943_v18 = vpop.permute.xlu0 %2942 }
 0x1ea   :  { %2976 = vst.msk [vmem:[#allocation4 + $0x80] sm:$0xff] %vm2101_vm10, %v2943_v18  ;;  %v2075_v23 = vpop.permute.xlu1 %2074 }
 0x1eb   :  { %20 = vsyncpa [#allocation14], 0  ;;  %3427 = vmatmul.mubr.bf16.gmra.mrb[16].mxu1 %v3145_v55  ;;  %2108 = vst.msk [vmem:[#allocation4 + $0x90] sm:$0xff] %vm2101_vm10, %v2075_v23  ;;  %v3148_v20 = vld [vmem:[#allocation4 + $0x78] sm:$0xff]  ;;  %vm82_vm9 = vcmask 523264   ;;  %v12473_v46 = vld [vmem:[#allocation9] sm:$0xff] }
 0x1ec   :  { %83 = vst.msk [vmem:[#allocation6] sm:$0xff] %vm82_vm9, %v12473_v46  ;;  %84 = vst.msk [vmem:[#allocation6 + $0x8] sm:$0xff] %vm82_vm9, %v12473_v46  ;;  %vm3708_vm0 = vcmask 521219   ;;  %vm3709_vm13 = vsmask.f32 5390  ;;  %vm3742_vm14 = vcmask 516096  }
 0x1ed   :  { %v2498_v30 = vpop.permute.xlu0 %2497  ;;  %85 = vst.msk [vmem:[#allocation6 + $0x10] sm:$0xff] %vm82_vm9, %v12473_v46  ;;  %86 = vst.msk [vmem:[#allocation6 + $0x18] sm:$0xff] %vm82_vm9, %v12473_v46 }
 0x1ee   :  { %2530 = vst.msk [vmem:[#allocation4 + $0x98] sm:$0xff] %vm1750_vm2, %v2498_v30  ;;  %v1902_v28 = vpop.permute.xlu1 %1901  ;;  %vm3710_vm12 = vmand %vm3708_vm0, %vm3709_vm13  ;;  %vm3736_vm0 = vcmask 523270   ;;  %vm3737_vm13 = vsmask.f32 7962 }
 0x1ef   :  { %87 = vst.msk [vmem:[#allocation6 + $0x20] sm:$0xff] %vm82_vm9, %v12473_v46  ;;  %88 = vst.msk [vmem:[#allocation6 + $0x28] sm:$0xff] %vm82_vm9, %v12473_v46 }
 0x1f1   :  { %v2672_v51 = vpop.permute.xlu0 %2671  ;;  %v3149_v2 = vld [vmem:[#allocation4 + $0x80] sm:$0xff] }
 0x1f2   :  { %2704 = vst.msk [vmem:[#allocation4 + $0x98] sm:$0xff] %vm1926_vm7, %v2672_v51  ;;  %3434 = vmatprep.mubr.bf16.mxu1 %v3149_v2  ;;  %v1726_v53 = vpop.permute.xlu1 %1725  ;;  %v3151_v48 = vld [vmem:[#allocation4 + $0x90] sm:$0xff] }
 0x1f3   :  { %3435 = vmatmul.mubr.bf16.gmra.mrb[20].mxu1 %v3148_v20  ;;  %1758 = vst.msk [vmem:[#allocation4 + $0xa8] sm:$0xff] %vm1750_vm2, %v1726_v53 }
 0x1f4   :  { %1934 = vst.msk [vmem:[#allocation4 + $0xa8] sm:$0xff] %vm1926_vm7, %v1902_v28 }
 0x1f5   :  { %v2945_v6 = vpop.permute.xlu0 %2944 }
 0x1f6   :  { %2977 = vst.msk [vmem:[#allocation4 + $0x98] sm:$0xff] %vm2101_vm10, %v2945_v6  ;;  %v2077_v37 = vpop.permute.xlu1 %2076 }
 0x1f7   :  { %2109 = vst.msk [vmem:[#allocation4 + $0xa8] sm:$0xff] %vm2101_vm10, %v2077_v37 }
 0x1f9   :  { %v2500_v42 = vpop.permute.xlu0 %2499 }
 0x1fa   :  { %2531 = vst.msk [vmem:[#allocation4 + $0xb0] sm:$0xff] %vm1750_vm2, %v2500_v42  ;;  %v1904_v60 = vpop.permute.xlu1 %1903 }
 0x1fd   :  { %v2674_v34 = vpop.permute.xlu0 %2673  ;;  %v3152_v33 = vld [vmem:[#allocation4 + $0x98] sm:$0xff] }
 0x1fe   :  { %2705 = vst.msk [vmem:[#allocation4 + $0xb0] sm:$0xff] %vm1926_vm7, %v2674_v34  ;;  %3442 = vmatprep.mubr.bf16.mxu1 %v3152_v33  ;;  %v1728_v59 = vpop.permute.xlu1 %1727  ;;  %v3154_v22 = vld [vmem:[#allocation4 + $0xa8] sm:$0xff] }
 0x1ff   :  { %3443 = vmatmul.mubr.bf16.gmra.mrb[24].mxu1 %v3151_v48  ;;  %1759 = vst.msk [vmem:[#allocation4 + $0xc0] sm:$0xff] %vm1750_vm2, %v1728_v59 }
 0x200   :  { %1935 = vst.msk [vmem:[#allocation4 + $0xc0] sm:$0xff] %vm1926_vm7, %v1904_v60 }
 0x201   :  { %v2947_v3 = vpop.permute.xlu0 %2946 }
 0x202   :  { %2978 = vst.msk [vmem:[#allocation4 + $0xb0] sm:$0xff] %vm2101_vm10, %v2947_v3  ;;  %v2079_v41 = vpop.permute.xlu1 %2078 }
 0x203   :  { %2110 = vst.msk [vmem:[#allocation4 + $0xc0] sm:$0xff] %vm2101_vm10, %v2079_v41 }
 0x205   :  { %v2502_v0 = vpop.permute.xlu0 %2501 }
 0x206   :  { %2532 = vst.msk [vmem:[#allocation4 + $0xc8] sm:$0xff] %vm1750_vm2, %v2502_v0  ;;  %v1906_v16 = vpop.permute.xlu1 %1905 }
 0x209   :  { %v2676_v27 = vpop.permute.xlu0 %2675  ;;  %v3155_v11 = vld [vmem:[#allocation4 + $0xb0] sm:$0xff] }
 0x20a   :  { %2706 = vst.msk [vmem:[#allocation4 + $0xc8] sm:$0xff] %vm1926_vm7, %v2676_v27  ;;  %3450 = vmatprep.mubr.bf16.mxu1 %v3155_v11  ;;  %v1730_v8 = vpop.permute.xlu1 %1729  ;;  %v13952_v54 = vpop.f32.mrb[64].mxu0  ;;  %v3157_v56 = vld [vmem:[#allocation4 + $0xc0] sm:$0xff] }
 0x20b   :  { %3451 = vmatmul.mubr.bf16.gmra.mrb[28].mxu1 %v3154_v22  ;;  %1760 = vst.msk [vmem:[#allocation4 + $0xd8] sm:$0xff] %vm1750_vm2, %v1730_v8  ;;  %v11219_v47 = vpop.f32.mrb[65].mxu0 }
 0x20c   :  { %1936 = vst.msk [vmem:[#allocation4 + $0xd8] sm:$0xff] %vm1926_vm7, %v1906_v16  ;;  %v13955_v21 = vpop.f32.mrb[66].mxu0 }
 0x20d   :  { %v2949_v63 = vpop.permute.xlu0 %2948  ;;  %v11220_v35 = vpop.f32.mrb[67].mxu0 }
 0x20e   :  { %2979 = vst.msk [vmem:[#allocation4 + $0xc8] sm:$0xff] %vm2101_vm10, %v2949_v63  ;;  %v2081_v14 = vpop.permute.xlu1 %2080 }
 0x20f   :  { %2111 = vst.msk [vmem:[#allocation4 + $0xd8] sm:$0xff] %vm2101_vm10, %v2081_v14 }
 0x211   :  { %v2504_v5 = vpop.permute.xlu0 %2503 }
 0x212   :  { %2533 = vst.msk [vmem:[#allocation4 + $0xe0] sm:$0xff] %vm1750_vm2, %v2504_v5  ;;  %v1908_v26 = vpop.permute.xlu1 %1907 }
 0x215   :  { %v2678_v58 = vpop.permute.xlu0 %2677  ;;  %v3158_v57 = vld [vmem:[#allocation4 + $0xc8] sm:$0xff] }
 0x216   :  { %2707 = vst.msk [vmem:[#allocation4 + $0xe0] sm:$0xff] %vm1926_vm7, %v2678_v58  ;;  %3458 = vmatprep.mubr.bf16.mxu1 %v3158_v57  ;;  %v2083_v36 = vpop.permute.xlu1 %2082  ;;  %v3160_v29 = vld [vmem:[#allocation4 + $0xd8] sm:$0xff] }
 0x217   :  { %3459 = vmatmul.mubr.bf16.gmra.mrb[32].mxu1 %v3157_v56 }
 0x218   :  { %v13960_v44 = vpop.f32.mrb[68].mxu0 }
 0x219   :  { %v2506_v17 = vpop.permute.xlu0 %2505  ;;  %v11223_v40 = vpop.f32.mrb[69].mxu0 }
 0x21a   :  { %2534 = vst.msk [vmem:[#allocation4 + $0xf8] sm:$0xff] %vm1750_vm2, %v2506_v17  ;;  %v1732_v19 = vpop.permute.xlu1 %1731  ;;  %v13964_v1 = vpop.f32.mrb[70].mxu0  ;;  %v11581_v40 = vld [vmem:[#allocation3 + $0x6c] ss:$0 sps:$4 sm:$0x33]  }
 0x21b   :  { %1761 = vst.msk [vmem:[#allocation4 + $0xf0] sm:$0xff] %vm1750_vm2, %v1732_v19  ;;  %v11224_v7 = vpop.f32.mrb[71].mxu0 }
 0x21c   :  { %1937 = vst.msk [vmem:[#allocation4 + $0xf0] sm:$0xff] %vm1926_vm7, %v1908_v26 }
 0x21d   :  { %2112 = vst.msk [vmem:[#allocation4 + $0xf0] sm:$0xff] %vm2101_vm10, %v2083_v36  ;;  %v2680_v38 = vpop.permute.xlu0 %2679 }
 0x21e   :  { %2708 = vst.msk [vmem:[#allocation4 + $0xf8] sm:$0xff] %vm1926_vm7, %v2680_v38  ;;  %v1910_v13 = vpop.permute.xlu1 %1909  ;;  %v11582_v38 = vld [vmem:[#allocation3 + $0x70] ss:$0 sps:$4 sm:$0x33]  }
 0x221   :  { %v2951_v12 = vpop.permute.xlu0 %2950 }
 0x222   :  { %2980 = vst.msk [vmem:[#allocation4 + $0xe0] sm:$0xff] %vm2101_vm10, %v2951_v12  ;;  %v1734_v9 = vpop.permute.xlu1 %1733  ;;  %v2483_v12 = vrot.slane %v11581_v40, 2 }
 0x223   :  { %1762 = vst.msk [vmem:[#allocation4 + $0x108] sm:$0xff] %vm1750_vm2, %v1734_v9  ;;  %v2657_v9 = vrot.slane %v11582_v38, 2 }
 0x224   :  { %1938 = vst.msk [vmem:[#allocation4 + $0x108] sm:$0xff] %vm1926_vm7, %v1910_v13  ;;  %v3163_v6 = vld [vmem:[#allocation4 + $0xf0] sm:$0xff] }
 0x225   :  { %v2508_v45 = vpop.permute.xlu0 %2507 }
 0x226   :  { %2535 = vst.msk [vmem:[#allocation4 + $0x110] sm:$0xff] %vm1750_vm2, %v2508_v45  ;;  %v2085_v10 = vpop.permute.xlu1 %2084  ;;  %v2484_v45 = vsel %vm436_vm1, %v2481_v50, %v2483_v12  ;;  %v11583_v50 = vld [vmem:[#allocation3 + $0x70] ss:$0 sps:$4 sm:$0x77]  }
 0x227   :  { %2113 = vst.msk [vmem:[#allocation4 + $0x108] sm:$0xff] %vm2101_vm10, %v2085_v10  ;;  %2509 = vrot.lane.b32.xlu0 %v2484_v45, %s12505_s22  ;;  %v2658_v10 = vsel %vm436_vm1, %v2655_v31, %v2657_v9 }
 0x229   :  { %v2953_v61 = vpop.permute.xlu0 %2952  ;;  %v3161_v43 = vld [vmem:[#allocation4 + $0xe0] sm:$0xff] }
 0x22a   :  { %2981 = vst.msk [vmem:[#allocation4 + $0xf8] sm:$0xff] %vm2101_vm10, %v2953_v61  ;;  %3466 = vmatprep.mubr.bf16.mxu1 %v3161_v43  ;;  %v1912_v18 = vpop.permute.xlu1 %1911 }
 0x22b   :  { %3467 = vmatmul.mubr.bf16.gmra.mrb[36].mxu1 %v3160_v29  ;;  %2683 = vrot.lane.b32.xlu0 %v2658_v10, %s12504_s17 }
 0x22c   :  { %v13975_v55 = vpop.f32.mrb[72].mxu0 }
 0x22d   :  { %v2682_v23 = vpop.permute.xlu0 %2681  ;;  %v11227_v30 = vpop.f32.mrb[73].mxu0 }
 0x22e   :  { %2709 = vst.msk [vmem:[#allocation4 + $0x110] sm:$0xff] %vm1926_vm7, %v2682_v23  ;;  %v1736_v28 = vpop.permute.xlu1 %1735  ;;  %v13978_v51 = vpop.f32.mrb[74].mxu0  ;;  %v3166_v48 = vld [vmem:[#allocation4 + $0x108] sm:$0xff] }
 0x22f   :  { %1763 = vst.msk [vmem:[#allocation4 + $0x120] sm:$0xff] %vm1750_vm2, %v1736_v28  ;;  %v11228_v2 = vpop.f32.mrb[75].mxu0 }
 0x230   :  { %1939 = vst.msk [vmem:[#allocation4 + $0x120] sm:$0xff] %vm1926_vm7, %v1912_v18  ;;  %v11584_v2 = vld [vmem:[#allocation3 + $0x6c] ss:$0 sps:$4 sm:$0x11]  }
 0x231   :  { %v2955_v20 = vpop.permute.xlu0 %2954  ;;  %v3164_v53 = vld [vmem:[#allocation4 + $0xf8] sm:$0xff]  ;;  %v2060_v49 = vrot.slane %v11584_v2, 1 }
 0x232   :  { %2982 = vst.msk [vmem:[#allocation4 + $0x110] sm:$0xff] %vm2101_vm10, %v2955_v20  ;;  %3474 = vmatprep.mubr.bf16.mxu1 %v3164_v53  ;;  %v2924_v20 = vshrl.u32 %v11583_v50, 16  ;;  %v2927_v53 = vshll.u32 %v11583_v50, 16 }
 0x233   :  { %3475 = vmatmul.mubr.bf16.gmra.mrb[40].mxu1 %v3163_v6 }
 0x234   :  { %v2926_v6 = vrot.slane %v2924_v20, 2  ;;  %v2929_v31 = vrot.slane %v2927_v53, 3 }
 0x235   :  { %v13983_v37 = vpop.f32.mrb[76].mxu0 }
 0x236   :  { %v11231_v42 = vpop.f32.mrb[77].mxu0 }
 0x237   :  { %v13985_v60 = vpop.f32.mrb[78].mxu0  ;;  %v2061_v42 = vsel %vm1859_vm8, %v2058_v24, %v2060_v49 }
 0x238   :  { %v11232_v34 = vpop.f32.mrb[79].mxu0  ;;  %2086 = vrot.lane.b32.xlu1 %v2061_v42, %s12506_s23 }
 0x239   :  { %v3167_v33 = vld [vmem:[#allocation4 + $0x110] sm:$0xff]  ;;  %v2930_v34 = vor.u32 %v2929_v31, %v2926_v6 }
 0x23a   :  { %3482 = vmatprep.mubr.bf16.mxu1 %v3167_v33 }
 0x23b   :  { %3483 = vmatmul.mubr.bf16.gmra.mrb[44].mxu1 %v3166_v48  ;;  %v14026_v48 = vld [vmem:[%s16425_s4] ss:$0 sm:$0xff] }
 0x23d   :  { %v13987_v59 = vpop.f32.mrb[80].mxu0 }
 0x23e   :  { %v11235_v3 = vpop.f32.mrb[81].mxu0 }
 0x23f   :  { %v13989_v41 = vpop.f32.mrb[82].mxu0 }
 0x240   :  { %v11236_v46 = vpop.f32.mrb[83].mxu0 }
 0x241   :  { %v2931_v46 = vsel %vm16447_vm3, %v13897_v15, %v2930_v34  ;;  %vm3738_vm3 = vmand %vm3736_vm0, %vm3737_vm13  ;;  %vm3796_vm13 = vsmask.f32 6418 }
 0x242   :  { %2956 = vrot.lane.b32.xlu0 %v2931_v46, %s12506_s23 }
 0x245   :  { %v3573_v0 = vpop.f32.mrb[84].mxu0 }
 0x246   :  { %v11239_v16 = vpop.f32.mrb[85].mxu0 }
 0x247   :  { %v3576_v27 = vpop.f32.mrb[86].mxu0 }
 0x248   :  { %v11240_v11 = vpop.f32.mrb[87].mxu0 }
 0x24d   :  { %v3581_v22 = vpop.f32.mrb[88].mxu0 }
 0x24e   :  { %v11243_v8 = vpop.f32.mrb[89].mxu0 }
 0x24f   :  { %v13991_v63 = vpop.f32.mrb[90].mxu0 }
 0x250   :  { %v11244_v47 = vpop.f32.mrb[91].mxu0 }
 0x255   :  { %v13993_v14 = vpop.f32.mrb[92].mxu0 }
 0x256   :  { %v11247_v35 = vpop.f32.mrb[93].mxu0 }
 0x257   :  { %v13995_v5 = vpop.f32.mrb[94].mxu0 }
 0x258   :  { %v11248_v26 = vpop.f32.mrb[95].mxu0 }
 0x25d   :  { %v13997_v58 = vpop.f32.mrb[96].mxu0 }
 0x25e   :  { %v11251_v57 = vpop.f32.mrb[97].mxu0 }
 0x25f   :  { %v13999_v56 = vpop.f32.mrb[98].mxu0 }
 0x260   :  { %v11252_v36 = vpop.f32.mrb[99].mxu0 }
 0x265   :  { %v14001_v17 = vpop.f32.mrb[100].mxu0 }
 0x266   :  { %v11255_v19 = vpop.f32.mrb[101].mxu0 }
 0x267   :  { %v14003_v7 = vpop.f32.mrb[102].mxu0 }
 0x268   :  { %v11256_v13 = vpop.f32.mrb[103].mxu0 }
 0x26d   :  { %v14012_v61 = vpop.f32.mrb[104].mxu0 }
 0x26e   :  { %v11259_v43 = vpop.f32.mrb[105].mxu0 }
 0x26f   :  { %v14014_v29 = vpop.f32.mrb[106].mxu0 }
 0x270   :  { %v11260_v18 = vpop.f32.mrb[107].mxu0 }
 0x275   :  { %v14017_v23 = vpop.f32.mrb[108].mxu0 }
 0x276   :  { %v11263_v30 = vpop.f32.mrb[109].mxu0 }
 0x277   :  { %v3624_v25 = vpop.f32.mrb[110].mxu0 }
 0x278   :  { %v11264_v28 = vpop.f32.mrb[111].mxu0 }
 0x27f   :  { %v10907_v33 = vpop.f32.mrb[0].mxu1 }
 0x280   :  { %v10908_v3 = vpop.f32.mrb[1].mxu1 }
 0x281   :  { %v10909_v0 = vadd.f32 %v10908_v3, %v10907_v33  ;;  %v10910_v16 = vpop.f32.mrb[2].mxu1 }
 0x282   :  { %v10911_v4 = vpop.f32.mrb[3].mxu1 }
 0x283   :  { %v3397_v24 = vadd.f32 %v10909_v0, %v14026_v48  ;;  %v10912_v27 = vadd.f32 %v10911_v4, %v10910_v16  ;;  %v3711_v4 = vld [vmem:[#allocation6] sm:$0x38] }
 0x285   :  { %v3534_v11 = vadd.f32 %v13952_v54, %v3397_v24  ;;  %v3400_v22 = vadd.f32 %v10912_v27, %v14026_v48 }
 0x287   :  { %v3636_v8 = vmax.f32 %v3534_v11, 0.0  ;;  %v3537_v47 = vadd.f32 %v13955_v21, %v3400_v22 }
 0x289   :  { %3662 = vst.msk [vmem:[#allocation5] sm:$0xff] %vm82_vm9, %v3636_v8  ;;  %v3637_v35 = vmax.f32 %v3537_v47, 0.0  ;;  %v11585_v8 = vld [vmem:[%s16426_s5 + $0x40] sm:$0xff]  }
 0x28a   :  { %11000 = vmatprep.subr.bf16.mxu1 %v11585_v8 }
 0x28b   :  { %3663 = vst.msk [vmem:[#allocation5 + $0x8] sm:$0xff] %vm82_vm9, %v3637_v35 }
 0x28f   :  { %v10913_v15 = vpop.f32.mrb[4].mxu1 }
 0x290   :  { %v10914_v26 = vpop.f32.mrb[5].mxu1  ;;  %v3688_v45 = vld [vmem:[#allocation5] ss:$2 sm:$0xf] }
 0x291   :  { %v10915_v57 = vadd.f32 %v10914_v26, %v10913_v15  ;;  %v10916_v36 = vpop.f32.mrb[6].mxu1  ;;  %v3690_v10 = vld [vmem:[#allocation5 + $0x1] ss:$2 sm:$0xf] }
 0x292   :  { %v10917_v40 = vpop.f32.mrb[7].mxu1  ;;  %v3695_v30 = vmax.f32 %v3688_v45, %v3690_v10  ;;  %v3744_v10 = vld [vmem:[#allocation6 + $0x8] sm:$0x1] }
 0x293   :  { %v3405_v19 = vadd.f32 %v10915_v57, %v14026_v48  ;;  %v10918_v38 = vadd.f32 %v10917_v40, %v10916_v36 }
 0x295   :  { %v3542_v54 = vadd.f32 %v13960_v44, %v3405_v19  ;;  %v3408_v13 = vadd.f32 %v10918_v38, %v14026_v48 }
 0x297   :  { %v3638_v12 = vmax.f32 %v3542_v54, 0.0  ;;  %v3545_v21 = vadd.f32 %v13964_v1, %v3408_v13 }
 0x299   :  { %3664 = vst.msk [vmem:[#allocation5 + $0x10] sm:$0xff] %vm82_vm9, %v3638_v12  ;;  %v3639_v9 = vmax.f32 %v3545_v21, 0.0 }
 0x29b   :  { %3665 = vst.msk [vmem:[#allocation5 + $0x18] sm:$0xff] %vm82_vm9, %v3639_v9 }
 0x2a0   :  { %v3692_v43 = vld [vmem:[#allocation5 + $0xa] ss:$2 sm:$0xf]  ;;  %v3694_v18 = vld [vmem:[#allocation5 + $0xb] ss:$2 sm:$0xf] }
 0x2a1   :  { %v3696_v25 = vmax.f32 %v3692_v43, %v3694_v18 }
 0x2a2   :  { %v10919_v28 = vpop.f32.mrb[8].mxu1  ;;  %v3715_v22 = vld [vmem:[#allocation5 + $0x14] ss:$2 sm:$0xf] }
 0x2a3   :  { %v10920_v50 = vpop.f32.mrb[9].mxu1  ;;  %v3697_v2 = vmax.f32 %v3695_v30, %v3696_v25 }
 0x2a4   :  { %v10921_v44 = vadd.f32 %v10920_v50, %v10919_v28  ;;  %v10922_v20 = vpop.f32.mrb[10].mxu1  ;;  %v3739_v28 = vld [vmem:[#allocation6] sm:$0xc0] }
 0x2a5   :  { %v3698_v53 = vpack.c.bf16 %v3697_v2, %v3697_v2  ;;  %v10923_v1 = vpop.f32.mrb[11].mxu1 }
 0x2a6   :  { %v3413_v49 = vadd.f32 %v10921_v44, %v14026_v48  ;;  %v10924_v6 = vadd.f32 %v10923_v1, %v10922_v20 }
 0x2a7   :  { %v3700_v31 = vshrl.u32 %v3698_v53, 16  ;;  %v3703_v42 = vshll.u32 %v3698_v53, 16 }
 0x2a8   :  { %v3550_v34 = vadd.f32 %v13975_v55, %v3413_v49  ;;  %v3416_v33 = vadd.f32 %v10924_v6, %v14026_v48  ;;  %v3717_v55 = vld [vmem:[#allocation5 + $0x15] ss:$2 sm:$0xf] }
 0x2a9   :  { %v3702_v3 = vrot.slane %v3700_v31, 4  ;;  %v3705_v46 = vrot.slane %v3703_v42, 5  ;;  %v3722_v15 = vmax.f32 %v3715_v22, %v3717_v55 }
 0x2aa   :  { %v3640_v0 = vmax.f32 %v3550_v34, 0.0  ;;  %v3553_v16 = vadd.f32 %v13978_v51, %v3416_v33  ;;  %v11586_v51 = vld [vmem:[%s16426_s5] sm:$0xff]  }
 0x2ab   :  { %v3706_v24 = vor.u32 %v3705_v46, %v3702_v3  ;;  %11001 = vmatpush3.bf16.msra.mxu1 %v11586_v51  ;;  %v11587_v3 = vld [vmem:[%s16426_s5 + $0x48] sm:$0xff]  }
 0x2ac   :  { %3666 = vst.msk [vmem:[#allocation5 + $0x20] sm:$0xff] %vm82_vm9, %v3640_v0  ;;  %v3641_v27 = vmax.f32 %v3553_v16, 0.0  ;;  %11002 = vmatprep.subr.bf16.mxu1 %v11587_v3 }
 0x2ad   :  { %v3712_v11 = vsel %vm3710_vm12, %v3706_v24, %v3711_v4  ;;  %vm3743_vm12 = vmand %vm3742_vm14, %vm16448_vm6  ;;  %vm3769_vm14 = vsmask.f32 3334 }
 0x2ae   :  { %3667 = vst.msk [vmem:[#allocation5 + $0x28] sm:$0xff] %vm82_vm9, %v3641_v27  ;;  %3713 = vst [vmem:[#allocation6] sm:$0x38] %v3712_v11 }
 0x2b3   :  { %v3719_v47 = vld [vmem:[#allocation5 + $0x1e] ss:$2 sm:$0xf]  ;;  %v3721_v35 = vld [vmem:[#allocation5 + $0x1f] ss:$2 sm:$0xf] }
 0x2b4   :  { %v3723_v26 = vmax.f32 %v3719_v47, %v3721_v35 }
 0x2b5   :  { %v3748_v27 = vld [vmem:[#allocation5 + $0x28] ss:$2 sm:$0xf]  ;;  %v3750_v22 = vld [vmem:[#allocation5 + $0x29] ss:$2 sm:$0xf] }
 0x2b6   :  { %v3724_v57 = vmax.f32 %v3722_v15, %v3723_v26  ;;  %v10925_v36 = vpop.f32.mrb[12].mxu1  ;;  %v3755_v15 = vmax.f32 %v3748_v27, %v3750_v22 }
 0x2b7   :  { %v10926_v40 = vpop.f32.mrb[13].mxu1 }
 0x2b8   :  { %v3725_v19 = vpack.c.bf16 %v3724_v57, %v3724_v57  ;;  %v10927_v38 = vadd.f32 %v10926_v40, %v10925_v36  ;;  %v10928_v54 = vpop.f32.mrb[14].mxu1  ;;  %v11589_v57 = vld [vmem:[#allocation3 + $0x6c] ss:$0 sps:$4 sm:$0x33]   ;;  %v11590_v36 = vld [vmem:[%s16426_s5 + $0x50] sm:$0xff]  }
 0x2b9   :  { %v10929_v21 = vpop.f32.mrb[15].mxu1 }
 0x2ba   :  { %v3727_v13 = vshrl.u32 %v3725_v19, 16  ;;  %v3730_v12 = vshll.u32 %v3725_v19, 16  ;;  %v3421_v9 = vadd.f32 %v10927_v38, %v14026_v48  ;;  %v10930_v45 = vadd.f32 %v10929_v21, %v10928_v54 }
 0x2bb   :  { %v2328_v54 = vshrl.u32 %v11589_v57, 16 }
 0x2bc   :  { %v3729_v43 = vrot.slane %v3727_v13, 1  ;;  %v3732_v18 = vrot.slane %v3730_v12, 2  ;;  %v3558_v30 = vadd.f32 %v13983_v37, %v3421_v9  ;;  %v3424_v25 = vadd.f32 %v10930_v45, %v14026_v48  ;;  %v11591_v12 = vld [vmem:[%s16426_s5 + $0x10] sm:$0xff]  }
 0x2bd   :  { %v2331_v13 = vshll.u32 %v11589_v57, 16 }
 0x2be   :  { %v10931_v50 = vpop.f32.mrb[16].mxu1  ;;  %v3733_v2 = vor.u32 %v3732_v18, %v3729_v43  ;;  %v3745_v44 = vsel %vm3743_vm12, %v3729_v43, %v3744_v10  ;;  %v3642_v20 = vmax.f32 %v3558_v30, 0.0  ;;  %v3561_v53 = vadd.f32 %v13985_v60, %v3424_v25  ;;  %v11588_v60 = vld [vmem:[%s16426_s5 + $0x8] sm:$0xff]  }
 0x2bf   :  { %v10932_v49 = vpop.f32.mrb[17].mxu1  ;;  %3746 = vst [vmem:[#allocation6 + $0x8] sm:$0x1] %v3745_v44  ;;  %11003 = vmatpush3.bf16.msra.mxu1 %v11588_v60  ;;  %v2330_v18 = vrot.slane %v2328_v54, 1  ;;  %v2333_v30 = vrot.slane %v2331_v13, 2 }
 0x2c0   :  { %v10933_v1 = vadd.f32 %v10932_v49, %v10931_v50  ;;  %v10934_v6 = vpop.f32.mrb[18].mxu1  ;;  %v3740_v31 = vsel %vm3738_vm3, %v3733_v2, %v3739_v28  ;;  %3668 = vst.msk [vmem:[#allocation5 + $0x30] sm:$0xff] %vm82_vm9, %v3642_v20  ;;  %v3643_v42 = vmax.f32 %v3561_v53, 0.0  ;;  %vm3768_vm3 = vcmask 519169   ;;  %11004 = vmatprep.subr.bf16.mxu1 %v11590_v36  ;;  %v3771_v20 = vld [vmem:[#allocation6 + $0x8] sm:$0xe] }
 0x2c1   :  { %v10935_v34 = vpop.f32.mrb[19].mxu1  ;;  %3741 = vst [vmem:[#allocation6] sm:$0xc0] %v3740_v31  ;;  %vm3770_vm0 = vmand %vm3768_vm3, %vm3769_vm14  ;;  %v2334_v49 = vor.u32 %v2333_v30, %v2330_v18  ;;  %v11594_v31 = vld [vmem:[%s16426_s5 + $0x60] sm:$0xff]   ;;  %v11601_v18 = vld [vmem:[%s16426_s5 + $0x38] sm:$0xff]   ;;  %vm16476_vm3 = vcmask 1044480  }
 0x2c2   :  { %v3429_v37 = vadd.f32 %v10933_v1, %v14026_v48  ;;  %v10936_v33 = vadd.f32 %v10935_v34, %v10934_v6  ;;  %3669 = vst.msk [vmem:[#allocation5 + $0x38] sm:$0xff] %vm82_vm9, %v3643_v42  ;;  %v11592_v1 = vld [vmem:[%s16426_s5 + $0x58] sm:$0xff]   ;;  %vm4076_vm14 = vsmask.f32 4352 }
 0x2c3   :  { %11005 = vmatpush3.bf16.msra.mxu1 %v11591_v12  ;;  %v11593_v6 = vld [vmem:[%s16426_s5 + $0x18] sm:$0xff]   ;;  %v2335_v3 = vsel %vm2210_vm11, %v13880_v62, %v2334_v49  ;;  %vm3795_vm11 = vcmask 522244  }
 0x2c4   :  { %v3566_v46 = vadd.f32 %v13987_v59, %v3429_v37  ;;  %v3432_v0 = vadd.f32 %v10936_v33, %v14026_v48  ;;  %11006 = vmatprep.subr.bf16.mxu1 %v11592_v1  ;;  %2361 = vst.msk [vmem:[#allocation4 + $0x128] sm:$0xff] %vm795_vm5, %v2335_v3  ;;  %vm3797_vm12 = vmand %vm3795_vm11, %vm3796_vm13  ;;  %vm3823_vm11 = vsmask.f32 7966  ;;  %vm3828_vm13 = vcmask 517120  }
 0x2c6   :  { %v3644_v16 = vmax.f32 %v3566_v46, 0.0  ;;  %v3569_v4 = vadd.f32 %v13989_v41, %v3432_v0  ;;  %v10937_v24 = vpop.f32.mrb[20].mxu1  ;;  %v11595_v0 = vld [vmem:[%s16426_s5 + $0x20] sm:$0xff]  }
 0x2c7   :  { %v10938_v11 = vpop.f32.mrb[21].mxu1  ;;  %11007 = vmatpush3.bf16.msra.mxu1 %v11593_v6 }
 0x2c8   :  { %3670 = vst.msk [vmem:[#allocation5 + $0x40] sm:$0xff] %vm82_vm9, %v3644_v16  ;;  %v3645_v55 = vmax.f32 %v3569_v4, 0.0  ;;  %v10940_v8 = vpop.f32.mrb[22].mxu1  ;;  %v14073_v51 = vld [vmem:[#allocation6] sm:$0xff]  ;;  %11008 = vmatprep.subr.bf16.mxu1 %v11594_v31  ;;  %v11596_v4 = vld [vmem:[%s16426_s5 + $0x68] sm:$0xff]  }
 0x2c9   :  { %v10941_v47 = vpop.f32.mrb[23].mxu1  ;;  %3918 = vst.msk [vmem:[#allocation7] sm:$0xff] %vm82_vm9, %v14073_v51  ;;  %v3752_v59 = vld [vmem:[#allocation5 + $0x32] ss:$2 sm:$0xf] }
 0x2ca   :  { %v3754_v35 = vld [vmem:[#allocation5 + $0x33] ss:$2 sm:$0xf]  ;;  %3671 = vst.msk [vmem:[#allocation5 + $0x48] sm:$0xff] %vm82_vm9, %v3645_v55  ;;  %v11597_v55 = vld [vmem:[%s16426_s5 + $0x28] sm:$0xff]  }
 0x2cb   :  { %v3756_v41 = vmax.f32 %v3752_v59, %v3754_v35  ;;  %11009 = vmatpush3.bf16.msra.mxu1 %v11595_v0  ;;  %v3798_v47 = vld [vmem:[#allocation6 + $0x8] sm:$0x70]  ;;  %v2510_v35 = vpop.permute.xlu0 %2509 }
 0x2cc   :  { %11010 = vmatprep.subr.bf16.mxu1 %v11596_v4  ;;  %2536 = vst.msk [vmem:[#allocation4 + $0x128] sm:$0xff] %vm1750_vm2, %v2510_v35  ;;  %vm4309_vm2 = vcmask 1040384  }
 0x2cd   :  { %v3757_v26 = vmax.f32 %v3755_v15, %v3756_v41  ;;  %v3932_v41 = vshll.u32 %v14073_v51, 16 }
 0x2cf   :  { %v3758_v19 = vpack.c.bf16 %v3757_v26, %v3757_v26  ;;  %v3775_v40 = vld [vmem:[#allocation5 + $0x3c] ss:$2 sm:$0xf]  ;;  %v3777_v38 = vld [vmem:[#allocation5 + $0x3d] ss:$2 sm:$0xf]  ;;  %11011 = vmatpush3.bf16.msra.mxu1 %v11597_v55  ;;  %v2684_v13 = vpop.permute.xlu0 %2683 }
 0x2d0   :  { %v3782_v50 = vmax.f32 %v3775_v40, %v3777_v38  ;;  %v11599_v40 = vld [vmem:[%s16426_s5 + $0x30] sm:$0xff]   ;;  %v11600_v38 = vld [vmem:[%s16426_s5 + $0x78] sm:$0xff]   ;;  %2710 = vst.msk [vmem:[#allocation4 + $0x128] sm:$0xff] %vm1926_vm7, %v2684_v13  ;;  %vm4196_vm7 = vcmask 1041408  }
 0x2d1   :  { %v3760_v21 = vshrl.u32 %v3758_v19, 16  ;;  %v3763_v9 = vshll.u32 %v3758_v19, 16  ;;  %v3779_v45 = vld [vmem:[#allocation5 + $0x46] ss:$2 sm:$0xf] }
 0x2d2   :  { %v3781_v10 = vld [vmem:[#allocation5 + $0x47] ss:$2 sm:$0xf]  ;;  %v10943_v43 = vpop.f32.mrb[24].mxu1 }
 0x2d3   :  { %v3762_v25 = vrot.slane %v3760_v21, 6  ;;  %v3765_v28 = vrot.slane %v3763_v9, 7  ;;  %v3783_v2 = vmax.f32 %v3779_v45, %v3781_v10  ;;  %v10944_v44 = vpop.f32.mrb[25].mxu1  ;;  %v11598_v19 = vld [vmem:[%s16426_s5 + $0x70] sm:$0xff]   ;;  %v4027_v9 = vld [vmem:[#allocation6] sm:$0xf8] }
 0x2d4   :  { %v10946_v53 = vpop.f32.mrb[26].mxu1  ;;  %v3934_v45 = vrot.slane %v3932_v41, 1  ;;  %11012 = vmatprep.subr.bf16.mxu1 %v11598_v19  ;;  %v4070_v10 = vld [vmem:[#allocation6] sm:$0xf8]  ;;  %v4039_v44 = vrot.slane %v4027_v9, 3 }
 0x2d5   :  { %v3784_v42 = vmax.f32 %v3782_v50, %v3783_v2  ;;  %v10947_v34 = vpop.f32.mrb[27].mxu1  ;;  %v3766_v37 = vor.u32 %v3765_v28, %v3762_v25  ;;  %v3994_v43 = vld [vmem:[#allocation6] sm:$0xfe]  ;;  %11013 = vmatpush3.bf16.msra.mxu1 %v11599_v40  ;;  %v3930_v28 = vshrl.u32 %v14073_v51, 16 }
 0x2d6   :  { %v10948_v33 = vadd.f32 %v10947_v34, %v10946_v53  ;;  %11014 = vmatprep.subr.bf16.mxu1 %v11600_v38  ;;  %v4184_v50 = vld [vmem:[#allocation6] sm:$0xc0]  ;;  %v4006_v6 = vrot.slane %v3994_v43, 1  ;;  %v2087_v43 = vpop.permute.xlu1 %2086 }
 0x2d7   :  { %v3785_v60 = vpack.c.bf16 %v3784_v42, %v3784_v42  ;;  %v3772_v46 = vsel %vm3770_vm0, %v3766_v37, %v3771_v20  ;;  %v4297_v2 = vld [vmem:[#allocation6] sm:$0x80]  ;;  %v4078_v20 = vshrl.u32 %v4070_v10, 16  ;;  %v3935_v1 = vor.u32 %v3934_v45, %v3930_v28  ;;  %2114 = vst.msk [vmem:[#allocation4 + $0x120] sm:$0xff] %vm2101_vm10, %v2087_v43 }
 0x2d8   :  { %v3448_v16 = vadd.f32 %v10948_v33, %v14026_v48  ;;  %3773 = vst [vmem:[#allocation6 + $0x8] sm:$0xe] %v3772_v46  ;;  %v4081_v42 = vshll.u32 %v4070_v10, 16  ;;  %v4310_v51 = vrot.slane %v4297_v2, 7  ;;  %vm3822_vm0 = vcmask 523271   ;;  %v11603_v43 = vld [vmem:[%s16426_s5 + $0xc0] sm:$0xff]  }
 0x2d9   :  { %v3787_v24 = vshrl.u32 %v3785_v60, 16  ;;  %v3790_v62 = vshll.u32 %v3785_v60, 16  ;;  %11015 = vmatpush3.bf16.msra.mxu1 %v11601_v18  ;;  %v4080_v0 = vrot.slane %v4078_v20, 3 }
 0x2da   :  { %v3585_v27 = vadd.f32 %v13991_v63, %v3448_v16  ;;  %11046 = vmatprep.subr.bf16.mxu1 %v11603_v43 }
 0x2db   :  { %v3789_v11 = vrot.slane %v3787_v24, 3  ;;  %v3792_v22 = vrot.slane %v3790_v62, 4 }
 0x2dc   :  { %v3649_v8 = vmax.f32 %v3585_v27, 0.0 }
 0x2dd   :  { %v3793_v59 = vor.u32 %v3792_v22, %v3789_v11 }
 0x2de   :  { %3675 = vst.msk [vmem:[#allocation5 + $0x68] sm:$0xff] %vm82_vm9, %v3649_v8  ;;  %v10949_v15 = vpop.f32.mrb[28].mxu1 }
 0x2df   :  { %v10950_v63 = vpop.f32.mrb[29].mxu1  ;;  %v3799_v26 = vsel %vm3797_vm12, %v3793_v59, %v3798_v47  ;;  %v4083_v47 = vrot.slane %v4081_v42, 4  ;;  %vm3824_vm12 = vmand %vm3822_vm0, %vm3823_vm11  ;;  %vm3855_vm0 = vsmask.f32 4362  ;;  %vm4152_vm11 = vcmask 1043456  }
 0x2e0   :  { %v10951_v57 = vadd.f32 %v10950_v63, %v10949_v15  ;;  %v10952_v36 = vpop.f32.mrb[30].mxu1  ;;  %3800 = vst [vmem:[#allocation6 + $0x8] sm:$0x70] %v3799_v26 }
 0x2e1   :  { %v10953_v54 = vpop.f32.mrb[31].mxu1  ;;  %v4084_v13 = vor.u32 %v4083_v47, %v4080_v0  ;;  %v3169_v0 = vld [vmem:[#allocation4 + $0x120] sm:$0xff] }
 0x2e2   :  { %v3453_v12 = vadd.f32 %v10951_v57, %v14026_v48  ;;  %v10954_v21 = vadd.f32 %v10953_v54, %v10952_v36 }
 0x2e4   :  { %v3590_v30 = vadd.f32 %v13993_v14, %v3453_v12  ;;  %v3456_v25 = vadd.f32 %v10954_v21, %v14026_v48  ;;  %v4197_v14 = vrot.slane %v4184_v50, 6 }
 0x2e5   :  { %v3802_v38 = vld [vmem:[#allocation5 + $0x68] ss:$2 sm:$0xf]  ;;  %v3804_v54 = vld [vmem:[#allocation5 + $0x69] ss:$2 sm:$0xf] }
 0x2e6   :  { %v3650_v53 = vmax.f32 %v3590_v30, 0.0  ;;  %v3593_v49 = vadd.f32 %v13995_v5, %v3456_v25  ;;  %v3809_v30 = vmax.f32 %v3802_v38, %v3804_v54 }
 0x2e7   :  { %v14130_v31 = vld [vmem:[#allocation6 + $0x8] sm:$0xff] }
 0x2e8   :  { %v14132_v34 = vld [vmem:[#allocation6 + $0x8] sm:$0xff]  ;;  %3676 = vst.msk [vmem:[#allocation5 + $0x70] sm:$0xff] %vm82_vm9, %v3650_v53  ;;  %v3651_v37 = vmax.f32 %v3593_v49, 0.0  ;;  %v4040_v33 = vrot.slane %v14130_v31, 3  ;;  %v14137_v3 = vshll.u32 %v14130_v31, 16  ;;  %v14140_v5 = vshrl.u32 %v14130_v31, 16 }
 0x2e9   :  { %3919 = vst.msk [vmem:[#allocation7 + $0x28] sm:$0xff] %vm82_vm9, %v14130_v31  ;;  %v4007_v60 = vrot.slane %v14130_v31, 1  ;;  %v4198_v46 = vrot.slane %v14130_v31, 6  ;;  %v4311_v16 = vrot.slane %v14132_v34, 7 }
 0x2ea   :  { %3677 = vst.msk [vmem:[#allocation5 + $0x78] sm:$0xff] %vm82_vm9, %v3651_v37  ;;  %v10955_v4 = vpop.f32.mrb[32].mxu1  ;;  %v4041_v24 = vsel %vm16476_vm3, %v4039_v44, %v4040_v33  ;;  %v3939_v62 = vrot.slane %v14137_v3, 1  ;;  %v4235_v27 = vrot.slane %v14140_v5, 6  ;;  %v4238_v11 = vrot.slane %v14137_v3, 7  ;;  %v2957_v44 = vpop.permute.xlu0 %2956 }
 0x2eb   :  { %4050 = vrot.lane.b32.xlu0 %v4041_v24, %s12504_s17  ;;  %v10956_v22 = vpop.f32.mrb[33].mxu1  ;;  %v4008_v55 = vsel %vm1859_vm8, %v4006_v6, %v4007_v60  ;;  %v4199_v8 = vsel %vm4196_vm7, %v4197_v14, %v4198_v46  ;;  %v4088_v59 = vrot.slane %v14140_v5, 3  ;;  %v4091_v57 = vrot.slane %v14137_v3, 4  ;;  %2983 = vst.msk [vmem:[#allocation4 + $0x128] sm:$0xff] %vm2101_vm10, %v2957_v44  ;;  %v3830_v6 = vld [vmem:[#allocation6 + $0x18] sm:$0x3] }
 0x2ec   :  { %v10957_v35 = vadd.f32 %v10956_v22, %v10955_v4  ;;  %v10958_v15 = vpop.f32.mrb[34].mxu1  ;;  %v3940_v41 = vsel %vm1602_vm4, %v3935_v1, %v3939_v62  ;;  %v14165_v63 = vor.u32 %v4238_v11, %v4235_v27  ;;  %4022 = vst.msk [vmem:[#allocation7 + $0x8] sm:$0xff] %vm82_vm9, %v4008_v55  ;;  %4213 = vst.msk [vmem:[#allocation7 + $0x18] sm:$0xff] %vm82_vm9, %v4199_v8  ;;  %vm16477_vm3 = vsmask.f32 1280 }
 0x2ed   :  { %3973 = vrot.lane.b32.xlu1 %v3940_v41, %s12504_s17  ;;  %v10959_v26 = vpop.f32.mrb[35].mxu1  ;;  %v4312_v36 = vsel %vm4309_vm2, %v4310_v51, %v4311_v16  ;;  %v14176_v12 = vor.u32 %v4091_v57, %v4088_v59  ;;  %vm3829_vm6 = vmand %vm3828_vm13, %vm16477_vm3  ;;  %vm3854_vm10 = vcmask 520194   ;;  %vm3881_vm3 = vcmask 523269  }
 0x2ee   :  { %v3461_v19 = vadd.f32 %v10957_v35, %v14026_v48  ;;  %v10960_v40 = vadd.f32 %v10959_v26, %v10958_v15  ;;  %4326 = vst.msk [vmem:[#allocation7 + $0x20] sm:$0xff] %vm82_vm9, %v4312_v36  ;;  %vm14217_vm13 = vmand %vm3854_vm10, %vm3855_vm0  ;;  %vm3882_vm10 = vsmask.f32 7446  ;;  %vm3907_vm0 = vcmask 518144  }
 0x2ef   :  { %v4093_v18 = vsel %vm4076_vm14, %v4084_v13, %v14176_v12 }
 0x2f0   :  { %v3598_v21 = vadd.f32 %v13997_v58, %v3461_v19  ;;  %v3464_v9 = vadd.f32 %v10960_v40, %v14026_v48  ;;  %4135 = vst.msk [vmem:[#allocation7 + $0x10] sm:$0xff] %vm82_vm9, %v4093_v18 }
 0x2f1   :  { %v3806_v45 = vld [vmem:[#allocation5 + $0x72] ss:$2 sm:$0xf]  ;;  %v3808_v10 = vld [vmem:[#allocation5 + $0x73] ss:$2 sm:$0xf] }
 0x2f2   :  { %v3810_v25 = vmax.f32 %v3806_v45, %v3808_v10  ;;  %v3652_v28 = vmax.f32 %v3598_v21, 0.0  ;;  %v3601_v50 = vadd.f32 %v13999_v56, %v3464_v9  ;;  %v3825_v56 = vld [vmem:[#allocation6 + $0x10] sm:$0x80]  ;;  %v3170_v8 = vld [vmem:[#allocation4 + $0x128] sm:$0xff]  ;;  %v4154_v45 = vrot.slane %v14130_v31, 4 }
 0x2f3   :  { %3490 = vmatprep.mubr.bf16.mxu1 %v3170_v8 }
 0x2f4   :  { %v3811_v2 = vmax.f32 %v3809_v30, %v3810_v25  ;;  %3678 = vst.msk [vmem:[#allocation5 + $0x80] sm:$0xff] %vm82_vm9, %v3652_v28  ;;  %v3653_v58 = vmax.f32 %v3601_v50, 0.0  ;;  %3491 = vmatmul.mubr.bf16.gmra.mrb[48].mxu1 %v3169_v0 }
 0x2f6   :  { %v3812_v20 = vpack.c.bf16 %v3811_v2, %v3811_v2  ;;  %3679 = vst.msk [vmem:[#allocation5 + $0x88] sm:$0xff] %vm82_vm9, %v3653_v58  ;;  %v3943_v58 = vor.u32 %v14140_v5, %v3939_v62 }
 0x2f8   :  { %v3814_v53 = vshll.u32 %v3812_v20, 16  ;;  %v3817_v1 = vshrl.u32 %v3812_v20, 16 }
 0x2fa   :  { %v3816_v49 = vrot.slane %v3814_v53, 1 }
 0x2fb   :  { %v3834_v14 = vld [vmem:[#allocation5 + $0x7c] ss:$2 sm:$0xf]  ;;  %v3836_v42 = vld [vmem:[#allocation5 + $0x7d] ss:$2 sm:$0xf] }
 0x2fc   :  { %v3826_v51 = vsel %vm3824_vm12, %v3816_v49, %v3825_v56  ;;  %v3819_v37 = vor.u32 %v3817_v1, %v3816_v49  ;;  %v3841_v27 = vmax.f32 %v3834_v14, %v3836_v42  ;;  %v11602_v49 = vld [vmem:[#allocation3 + $0x70] ss:$0 sps:$4 sm:$0x77]  }
 0x2fd   :  { %v3838_v4 = vld [vmem:[#allocation5 + $0x86] ss:$2 sm:$0xf]  ;;  %v3840_v24 = vld [vmem:[#allocation5 + $0x87] ss:$2 sm:$0xf] }
 0x2fe   :  { %3827 = vst [vmem:[#allocation6 + $0x10] sm:$0x80] %v3826_v51  ;;  %v3842_v11 = vmax.f32 %v3838_v4, %v3840_v24  ;;  %v10961_v22 = vpop.f32.mrb[36].mxu1  ;;  %v3831_v55 = vsel %vm3829_vm6, %v3819_v37, %v3830_v6  ;;  %vm16478_vm6 = vcmask 1044480   ;;  %v3105_v0 = vrot.slane %v11602_v49, 3 }
 0x2ff   :  { %v10962_v47 = vpop.f32.mrb[37].mxu1  ;;  %3832 = vst [vmem:[#allocation6 + $0x18] sm:$0x3] %v3831_v55  ;;  %vm16481_vm12 = vmmov %vm16478_vm6 }
 0x300   :  { %v3843_v59 = vmax.f32 %v3841_v27, %v3842_v11  ;;  %v10963_v35 = vadd.f32 %v10962_v47, %v10961_v22  ;;  %v10964_v15 = vpop.f32.mrb[38].mxu1  ;;  %v3106_v8 = vsel %vm16481_vm12, %v3103_v52, %v3105_v0 }
 0x301   :  { %v10965_v41 = vpop.f32.mrb[39].mxu1  ;;  %3132 = vst.msk [vmem:[#allocation4 + $0x130] sm:$0xff] %vm795_vm5, %v3106_v8 }
 0x302   :  { %v3844_v26 = vpack.c.bf16 %v3843_v59, %v3843_v59  ;;  %v3469_v57 = vadd.f32 %v10963_v35, %v14026_v48  ;;  %v10966_v36 = vadd.f32 %v10965_v41, %v10964_v15 }
 0x304   :  { %v3846_v19 = vshrl.u32 %v3844_v26, 16  ;;  %v3849_v40 = vshll.u32 %v3844_v26, 16  ;;  %v3606_v38 = vadd.f32 %v14001_v17, %v3469_v57  ;;  %v3472_v54 = vadd.f32 %v10966_v36, %v14026_v48 }
 0x305   :  { %v14192_v13 = vld [vmem:[#allocation6 + $0x10] sm:$0xff] }
 0x306   :  { %v4042_v21 = vrot.slane %v14192_v13, 3  ;;  %v14196_v9 = vshll.u32 %v14192_v13, 16  ;;  %v4156_v10 = vrot.slane %v14192_v13, 4  ;;  %3920 = vst.msk [vmem:[#allocation7 + $0x50] sm:$0xff] %vm82_vm9, %v14192_v13  ;;  %v3848_v17 = vrot.slane %v3846_v19, 5  ;;  %v10967_v28 = vpop.f32.mrb[40].mxu1 }
 0x307   :  { %v3851_v18 = vrot.slane %v3849_v40, 6  ;;  %v3654_v30 = vmax.f32 %v3606_v38, 0.0  ;;  %v3609_v25 = vadd.f32 %v14003_v7, %v3472_v54  ;;  %v10968_v50 = vpop.f32.mrb[41].mxu1  ;;  %v3857_v7 = vld [vmem:[#allocation6 + $0x18] sm:$0x1c]  ;;  %v14222_v53 = vshrl.u32 %v14192_v13, 16 }
 0x308   :  { %v4043_v2 = vsel %vm16478_vm6, %v4040_v33, %v4042_v21  ;;  %v3947_v44 = vrot.slane %v14196_v9, 1  ;;  %v10969_v56 = vadd.f32 %v10968_v50, %v10967_v28  ;;  %v10970_v3 = vpop.f32.mrb[42].mxu1  ;;  %v14231_v62 = vsel %vm4152_vm11, %v4154_v45, %v4156_v10  ;;  %v14242_v4 = vld [vmem:[#allocation6 + $0x10] sm:$0xff] }
 0x309   :  { %3680 = vst.msk [vmem:[#allocation5 + $0x90] sm:$0xff] %vm82_vm9, %v3654_v30  ;;  %v3655_v33 = vmax.f32 %v3609_v25, 0.0  ;;  %4052 = vrot.lane.b32.xlu0 %v4043_v2, %s12504_s17  ;;  %v3852_v5 = vor.u32 %v3851_v18, %v3848_v17  ;;  %v10971_v1 = vpop.f32.mrb[43].mxu1  ;;  %v4009_v14 = vrot.slane %v14192_v13, 1  ;;  %v4200_v27 = vrot.slane %v14192_v13, 6 }
 0x30a   :  { %v3948_v6 = vsel %vm1602_vm4, %v3943_v58, %v3947_v44  ;;  %v3477_v42 = vadd.f32 %v10969_v56, %v14026_v48  ;;  %v10972_v51 = vadd.f32 %v10971_v1, %v10970_v3  ;;  %v4097_v11 = vrot.slane %v14222_v53, 3 }
 0x30b   :  { %3681 = vst.msk [vmem:[#allocation5 + $0x98] sm:$0xff] %vm82_vm9, %v3655_v33  ;;  %3975 = vrot.lane.b32.xlu1 %v3948_v6, %s12504_s17  ;;  %v3858_v37 = vsel %vm14217_vm13, %v3852_v5, %v3857_v7  ;;  %v4010_v24 = vsel %vm1859_vm8, %v4007_v60, %v4009_v14  ;;  %v4100_v47 = vrot.slane %v14196_v9, 4  ;;  %v4201_v60 = vsel %vm4196_vm7, %v4198_v46, %v4200_v27 }
 0x30c   :  { %3859 = vst [vmem:[#allocation6 + $0x18] sm:$0x1c] %v3858_v37  ;;  %v3614_v22 = vadd.f32 %v14012_v61, %v3477_v42  ;;  %v3480_v55 = vadd.f32 %v10972_v51, %v14026_v48  ;;  %4023 = vst.msk [vmem:[#allocation7 + $0x30] sm:$0xff] %vm82_vm9, %v4010_v24  ;;  %v4313_v61 = vrot.slane %v14242_v4, 7  ;;  %vm3908_vm6 = vsmask.f32 2306 }
 0x30d   :  { %4214 = vst.msk [vmem:[#allocation7 + $0x40] sm:$0xff] %vm82_vm9, %v4201_v60  ;;  %v14267_v32 = vor.u32 %v4100_v47, %v4097_v11  ;;  %vm14285_vm13 = vmand %vm3907_vm0, %vm3908_vm6  ;;  %v3910_v24 = vld [vmem:[#allocation6 + $0x20] sm:$0x7] }
 0x30e   :  { %v3656_v59 = vmax.f32 %v3614_v22, 0.0  ;;  %v3617_v35 = vadd.f32 %v14014_v29, %v3480_v55  ;;  %v10973_v15 = vpop.f32.mrb[44].mxu1  ;;  %v4314_v52 = vsel %vm4309_vm2, %v4311_v16, %v4313_v61  ;;  %v3171_v16 = vld [vmem:[#allocation4 + $0x130] sm:$0xff] }
 0x30f   :  { %v10974_v46 = vpop.f32.mrb[45].mxu1  ;;  %v4102_v26 = vsel %vm4076_vm14, %v14176_v12, %v14267_v32  ;;  %4327 = vst.msk [vmem:[#allocation7 + $0x48] sm:$0xff] %vm82_vm9, %v4314_v52  ;;  %11266 = vmatmul.mubr.msk.bf16.gmra.mrb[112].mxu0 %vm795_vm5, %v3171_v16  ;;  %vm3883_vm5 = vmand %vm3881_vm3, %vm3882_vm10 }
 0x310   :  { %3682 = vst.msk [vmem:[#allocation5 + $0xa0] sm:$0xff] %vm82_vm9, %v3656_v59  ;;  %v3657_v41 = vmax.f32 %v3617_v35, 0.0  ;;  %v10975_v29 = vadd.f32 %v10974_v46, %v10973_v15  ;;  %v10976_v57 = vpop.f32.mrb[46].mxu1  ;;  %4136 = vst.msk [vmem:[#allocation7 + $0x38] sm:$0xff] %vm82_vm9, %v4102_v26  ;;  %v3928_v59 = vld [vmem:[#allocation6 + $0x28] sm:$0x1]  ;;  %v3951_v46 = vor.u32 %v14222_v53, %v3947_v44 }
 0x311   :  { %v10977_v36 = vpop.f32.mrb[47].mxu1  ;;  %v3861_v19 = vld [vmem:[#allocation5 + $0x90] ss:$2 sm:$0xf]  ;;  %v3969_v16 = vshll.u32 %v3928_v59, 16  ;;  %vm16484_vm3 = vmmov %vm16481_vm12 }
 0x312   :  { %3683 = vst.msk [vmem:[#allocation5 + $0xa8] sm:$0xff] %vm82_vm9, %v3657_v41  ;;  %v3485_v34 = vadd.f32 %v10975_v29, %v14026_v48  ;;  %v3863_v40 = vld [vmem:[#allocation5 + $0x91] ss:$2 sm:$0xf]  ;;  %vm16485_vm10 = vmmov %vm16484_vm3 }
 0x313   :  { %v3868_v43 = vmax.f32 %v3861_v19, %v3863_v40  ;;  %v4032_v19 = vld [vmem:[#allocation6 + $0x28] sm:$0x7] }
 0x314   :  { %v3622_v38 = vadd.f32 %v14017_v23, %v3485_v34  ;;  %v3884_v23 = vld [vmem:[#allocation6 + $0x18] sm:$0xe0]  ;;  %v3999_v40 = vld [vmem:[#allocation6 + $0x28] sm:$0x1] }
 0x315   :  { %v4015_v4 = vrot.slane %v3999_v40, 1 }
 0x316   :  { %v3658_v18 = vmax.f32 %v3622_v38, 0.0 }
 0x317   :  { %v3865_v54 = vld [vmem:[#allocation5 + $0x9a] ss:$2 sm:$0xf]  ;;  %v3867_v12 = vld [vmem:[#allocation5 + $0x9b] ss:$2 sm:$0xf] }
 0x318   :  { %v3869_v17 = vmax.f32 %v3865_v54, %v3867_v12  ;;  %3684 = vst.msk [vmem:[#allocation5 + $0xb0] sm:$0xff] %vm82_vm9, %v3658_v18  ;;  %v4189_v54 = vld [vmem:[#allocation6 + $0x28] sm:$0x3f]  ;;  %v4048_v18 = vrot.slane %v4032_v19, 3 }
 0x319   :  { %v3888_v48 = vld [vmem:[#allocation5 + $0xa4] ss:$2 sm:$0xf]  ;;  %v3890_v2 = vld [vmem:[#allocation5 + $0xa5] ss:$2 sm:$0xf] }
 0x31a   :  { %v3870_v30 = vmax.f32 %v3868_v43, %v3869_v17  ;;  %v3895_v56 = vmax.f32 %v3888_v48, %v3890_v2  ;;  %v4302_v17 = vld [vmem:[#allocation6 + $0x28] sm:$0x7f] }
 0x31c   :  { %v3871_v25 = vpack.c.bf16 %v3870_v30, %v3870_v30  ;;  %v3971_v30 = vrot.slane %v3969_v16, 1 }
 0x31e   :  { %v3873_v28 = vshrl.u32 %v3871_v25, 16  ;;  %v3876_v50 = vshll.u32 %v3871_v25, 16 }
 0x31f   :  { %v3892_v7 = vld [vmem:[#allocation5 + $0xae] ss:$2 sm:$0xf]  ;;  %v3894_v33 = vld [vmem:[#allocation5 + $0xaf] ss:$2 sm:$0xf] }
 0x320   :  { %v3875_v58 = vrot.slane %v3873_v28, 2  ;;  %v3878_v20 = vrot.slane %v3876_v50, 3  ;;  %v3896_v3 = vmax.f32 %v3892_v7, %v3894_v33 }
 0x322   :  { %v3879_v5 = vor.u32 %v3878_v20, %v3875_v58  ;;  %v3897_v49 = vmax.f32 %v3895_v56, %v3896_v3 }
 0x324   :  { %v3885_v1 = vsel %vm3883_vm5, %v3879_v5, %v3884_v23  ;;  %v3898_v6 = vpack.c.bf16 %v3897_v49, %v3897_v49  ;;  %v4319_v23 = vrot.slane %v4302_v17, 7 }
 0x325   :  { %3886 = vst [vmem:[#allocation6 + $0x18] sm:$0xe0] %v3885_v1 }
 0x326   :  { %v3900_v42 = vshrl.u32 %v3898_v6, 16  ;;  %v3903_v37 = vshll.u32 %v3898_v6, 16 }
 0x328   :  { %v3902_v51 = vrot.slane %v3900_v42, 7 }
 0x32a   :  { %v3905_v22 = vor.u32 %v3903_v37, %v3902_v51  ;;  %v4244_v51 = vrot.slane %v14222_v53, 6 }
 0x32c   :  { %v14289_v11 = vld [vmem:[#allocation6 + $0x18] sm:$0xff]  ;;  %v3911_v60 = vsel %vm14285_vm13, %v3905_v22, %v3910_v24  ;;  %vm3988_vm13 = vcmask 1048064  }
 0x32d   :  { %v4044_v55 = vrot.slane %v14289_v11, 3  ;;  %v14293_v8 = vshll.u32 %v14289_v11, 16  ;;  %v14296_v47 = vshrl.u32 %v14289_v11, 16  ;;  %3921 = vst.msk [vmem:[#allocation7 + $0x78] sm:$0xff] %vm82_vm9, %v14289_v11  ;;  %v4011_v35 = vrot.slane %v14289_v11, 1 }
 0x32e   :  { %v4202_v15 = vrot.slane %v14289_v11, 6  ;;  %v4315_v52 = vrot.slane %v14289_v11, 7  ;;  %3912 = vst [vmem:[#allocation6 + $0x20] sm:$0x7] %v3911_v60  ;;  %v4158_v17 = vrot.slane %v14289_v11, 4 }
 0x32f   :  { %v4045_v41 = vsel %vm16481_vm12, %v4042_v21, %v4044_v55  ;;  %v3955_v26 = vrot.slane %v14293_v8, 1  ;;  %v4012_v29 = vsel %vm1859_vm8, %v4009_v14, %v4011_v35  ;;  %v4106_v36 = vrot.slane %v14296_v47, 3  ;;  %v4075_v21 = vld [vmem:[#allocation6 + $0x28] sm:$0xf]  ;;  %v4218_v14 = vld [vmem:[#allocation6] sm:$0xc0] }
 0x330   :  { %4054 = vrot.lane.b32.xlu0 %v4045_v41, %s12504_s17  ;;  %v4203_v57 = vsel %vm4196_vm7, %v4200_v27, %v4202_v15  ;;  %4024 = vst.msk [vmem:[#allocation7 + $0x58] sm:$0xff] %vm82_vm9, %v4012_v29  ;;  %v4109_v44 = vrot.slane %v14293_v8, 4  ;;  %v4316_v27 = vsel %vm4309_vm2, %v4313_v61, %v4315_v52  ;;  %v4122_v12 = vshrl.u32 %v4075_v21, 16 }
 0x331   :  { %v3956_v34 = vsel %vm1602_vm4, %v3951_v46, %v3955_v26  ;;  %4215 = vst.msk [vmem:[#allocation7 + $0x68] sm:$0xff] %vm82_vm9, %v4203_v57  ;;  %4328 = vst.msk [vmem:[#allocation7 + $0x70] sm:$0xff] %vm82_vm9, %v4316_v27  ;;  %v4125_v43 = vshll.u32 %v4075_v21, 16  ;;  %v4225_v50 = vshrl.u32 %v4218_v14, 16  ;;  %v4228_v48 = vshll.u32 %v4218_v14, 16 }
 0x332   :  { %3977 = vrot.lane.b32.xlu1 %v3956_v34, %s12504_s17  ;;  %v4110_v38 = vor.u32 %v4109_v44, %v4106_v36  ;;  %v4206_v61 = vrot.slane %v4189_v54, 6  ;;  %v4124_v20 = vrot.slane %v4122_v12, 3  ;;  %v3959_v5 = vor.u32 %v14296_v47, %v3955_v26  ;;  %v4140_v46 = vld [vmem:[#allocation6] sm:$0xf0]  ;;  %v4223_v27 = vld [vmem:[#allocation6 + $0x28] sm:$0x7f] }
 0x333   :  { %v4127_v56 = vrot.slane %v4125_v43, 4  ;;  %v4227_v6 = vrot.slane %v4225_v50, 6  ;;  %v4230_v42 = vrot.slane %v4228_v48, 7  ;;  %v4247_v26 = vrot.slane %v14196_v9, 7  ;;  %v4145_v50 = vld [vmem:[#allocation6 + $0x28] sm:$0xf] }
 0x334   :  { %v4111_v25 = vsel %vm4076_vm14, %v14267_v32, %v4110_v38  ;;  %v4153_v9 = vrot.slane %v4140_v46, 4  ;;  %v4253_v19 = vrot.slane %v14296_v47, 6  ;;  %v4256_v14 = vrot.slane %v14293_v8, 7 }
 0x335   :  { %v14333_v28 = vld [vmem:[#allocation6 + $0x20] sm:$0xff]  ;;  %4137 = vst.msk [vmem:[#allocation7 + $0x60] sm:$0xff] %vm82_vm9, %v4111_v25  ;;  %v4231_v21 = vor.u32 %v4230_v42, %v4227_v6  ;;  %v4248_v44 = vor.u32 %v4247_v26, %v4244_v51  ;;  %v4272_v54 = vshll.u32 %v4223_v27, 16  ;;  %v11614_v6 = vld [vmem:[%s16426_s5 + $0xa8] sm:$0xff]   ;;  %v11615_v51 = vld [vmem:[%s16426_s5 + $0xf0] sm:$0xff]  }
 0x336   :  { %v4046_v2 = vrot.slane %v14333_v28, 3  ;;  %v14338_v58 = vshll.u32 %v14333_v28, 16  ;;  %3922 = vst.msk [vmem:[#allocation7 + $0xa0] sm:$0xff] %vm82_vm9, %v14333_v28  ;;  %v3965_v32 = vshrl.u32 %v14333_v28, 16  ;;  %v4013_v7 = vrot.slane %v14333_v28, 1 }
 0x337   :  { %v4204_v33 = vrot.slane %v14333_v28, 6  ;;  %v4317_v1 = vrot.slane %v14333_v28, 7  ;;  %v4155_v40 = vsel %vm4152_vm11, %v4153_v9, %v4154_v45  ;;  %v4257_v12 = vor.u32 %v4256_v14, %v4253_v19 }
 0x338   :  { %v4047_v3 = vsel %vm16484_vm3, %v4044_v55, %v4046_v2  ;;  %v3963_v49 = vrot.slane %v14338_v58, 1  ;;  %v4014_v37 = vsel %vm1859_vm8, %v4011_v35, %v4013_v7  ;;  %v4016_v22 = vsel %vm1859_vm8, %v4013_v7, %v4015_v4  ;;  %v11607_v7 = vld [vmem:[%s16426_s5 + $0xd0] sm:$0xff]  }
 0x339   :  { %4056 = vrot.lane.b32.xlu0 %v4047_v3, %s12504_s17  ;;  %4025 = vst.msk [vmem:[#allocation7 + $0x80] sm:$0xff] %vm82_vm9, %v4014_v37  ;;  %v4205_v55 = vsel %vm4196_vm7, %v4202_v15, %v4204_v33  ;;  %4026 = vst.msk [vmem:[#allocation7 + $0xa8] sm:$0xff] %vm82_vm9, %v4016_v22  ;;  %v4115_v60 = vrot.slane %v3965_v32, 3  ;;  %v4118_v53 = vrot.slane %v14338_v58, 4  ;;  %v4207_v59 = vsel %vm4196_vm7, %v4204_v33, %v4206_v61  ;;  %v11608_v33 = vld [vmem:[%s16426_s5 + $0x90] sm:$0xff]   ;;  %v11610_v3 = vld [vmem:[%s16426_s5 + $0x98] sm:$0xff]  }
 0x33a   :  { %v3964_v0 = vsel %vm1602_vm4, %v3959_v5, %v3963_v49  ;;  %v3967_v24 = vor.u32 %v3965_v32, %v3963_v49  ;;  %4216 = vst.msk [vmem:[#allocation7 + $0x90] sm:$0xff] %vm82_vm9, %v4205_v55  ;;  %v4128_v35 = vor.u32 %v4127_v56, %v4124_v20  ;;  %v4049_v41 = vsel %vm16485_vm10, %v4046_v2, %v4048_v18  ;;  %v11605_v20 = vld [vmem:[%s16426_s5 + $0xc8] sm:$0xff]   ;;  %v11609_v56 = vld [vmem:[%s16426_s5 + $0xd8] sm:$0xff]   ;;  %v11611_v5 = vld [vmem:[%s16426_s5 + $0xe0] sm:$0xff]  }
 0x33b   :  { %3979 = vrot.lane.b32.xlu1 %v3964_v0, %s12504_s17  ;;  %4217 = vst.msk [vmem:[#allocation7 + $0xb8] sm:$0xff] %vm82_vm9, %v4207_v59  ;;  %v4318_v15 = vsel %vm4309_vm2, %v4315_v52, %v4317_v1  ;;  %v4320_v29 = vsel %vm4309_vm2, %v4317_v1, %v4319_v23  ;;  %v4119_v57 = vor.u32 %v4118_v53, %v4115_v60  ;;  %vm16486_vm7 = vsmask.f32 1280  ;;  %v11612_v49 = vld [vmem:[%s16426_s5 + $0xa0] sm:$0xff]   ;;  %v11613_v1 = vld [vmem:[%s16426_s5 + $0xe8] sm:$0xff]   ;;  %v11616_v0 = vld [vmem:[%s16426_s5 + $0xb0] sm:$0xff]  }
 0x33c   :  { %4329 = vst.msk [vmem:[#allocation7 + $0x98] sm:$0xff] %vm82_vm9, %v4318_v15  ;;  %4330 = vst.msk [vmem:[#allocation7 + $0xc0] sm:$0xff] %vm82_vm9, %v4320_v29  ;;  %v3972_v36 = vsel %vm1602_vm4, %v3967_v24, %v3971_v30  ;;  %v4240_v52 = vsel %vm16486_vm7, %v4231_v21, %v14165_v63  ;;  %v4262_v8 = vrot.slane %v3965_v32, 6  ;;  %v4265_v43 = vrot.slane %v14338_v58, 7  ;;  %v11604_v58 = vld [vmem:[%s16426_s5 + $0x80] sm:$0xff]   ;;  %v11606_v32 = vld [vmem:[%s16426_s5 + $0x88] sm:$0xff]  }
 0x33d   :  { %4058 = vrot.lane.b32.xlu0 %v4049_v41, %s12504_s17  ;;  %v4120_v34 = vsel %vm4076_vm14, %v4110_v38, %v4119_v57  ;;  %v4129_v16 = vsel %vm4076_vm14, %v4119_v57, %v4128_v35  ;;  %v4269_v38 = vshrl.u32 %v4223_v27, 16  ;;  %vm16487_vm14 = vmmov %vm16486_vm7  ;;  %v4274_v30 = vrot.slane %v4272_v54, 7  ;;  %v11617_v24 = vld [vmem:[%s16426_s5 + $0xf8] sm:$0xff]  }
 0x33e   :  { %4138 = vst.msk [vmem:[#allocation7 + $0x88] sm:$0xff] %vm82_vm9, %v4120_v34  ;;  %4139 = vst.msk [vmem:[#allocation7 + $0xb0] sm:$0xff] %vm82_vm9, %v4129_v16  ;;  %v4249_v47 = vsel %vm16487_vm14, %v14165_v63, %v4248_v44  ;;  %v4266_v45 = vor.u32 %v4265_v43, %v4262_v8  ;;  %v4159_v63 = vsel %vm4152_vm11, %v4156_v10, %v4158_v17  ;;  %v4160_v25 = vrot.slane %v14333_v28, 4  ;;  %v11618_v55 = vld [vmem:[%s16426_s5 + $0xb8] sm:$0xff]  }
 0x33f   :  { %3981 = vrot.lane.b32.xlu1 %v3972_v36, %s12504_s17  ;;  %vm16488_vm5 = vmmov %vm16486_vm7  ;;  %v4271_v18 = vrot.slane %v4269_v38, 6  ;;  %v4162_v4 = vrot.slane %v4145_v50, 4  ;;  %vm4952_vm3 = vcmask 1045508   ;;  %vm4953_vm10 = vsmask.f32 5394 }
 0x340   :  { %v4258_v31 = vsel %vm16488_vm5, %v4248_v44, %v4257_v12  ;;  %vm16489_vm0 = vmmov %vm16488_vm5  ;;  %vm16499_vm5 = vsmask.f32 3328 }
 0x341   :  { %4277 = vrot.lane.b32.xlu0 %v4240_v52, %s12504_s17  ;;  %v4267_v11 = vsel %vm16489_vm0, %v4257_v12, %v4266_v45  ;;  %v4275_v48 = vor.u32 %v4274_v30, %v4271_v18  ;;  %vm16490_vm6 = vmmov %vm16489_vm0  ;;  %v4163_v13 = vsel %vm4152_vm11, %v4160_v25, %v4162_v4  ;;  %v11622_v30 = vld [vmem:[%s16426_s5 + $0x118] sm:$0xff]  }
 0x342   :  { %vm14723_vm7 = vmand %vm4952_vm3, %vm4953_vm10  ;;  %vm16505_vm10 = vsmask.f32 7946 }
 0x343   :  { %4164 = vrot.lane.b32.xlu1 %v4155_v40, %s12504_s17  ;;  %v4276_v61 = vsel %vm16490_vm6, %v4266_v45, %v4275_v48  ;;  %vm16500_vm0 = vmmov %vm16499_vm5  ;;  %vm7574_vm6 = vcmask 1041409  }
 0x345   :  { %4279 = vrot.lane.b32.xlu0 %v4249_v47, %s12504_s17  ;;  %v11619_v47 = vld [vmem:[%s16426_s5 + $0x100] sm:$0xff]  }
 0x347   :  { %4166 = vrot.lane.b32.xlu1 %v14231_v62, %s12504_s17  ;;  %v4161_v62 = vsel %vm4152_vm11, %v4158_v17, %v4160_v25  ;;  %v11620_v17 = vld [vmem:[%s16426_s5 + $0x108] sm:$0xff]  }
 0x349   :  { %4281 = vrot.lane.b32.xlu0 %v4258_v31, %s12504_s17  ;;  %v11621_v31 = vld [vmem:[%s16426_s5 + $0x110] sm:$0xff]   ;;  %s12508_s5 = smov [#allocation13]  }
 0x34a   :  { %s9969_s26 = sshll.u32 %s12508_s5, 4  ;;  %s9970_s26 = int_to_ptr.vmem [resolvable:$true] %s9969_s26 }
 0x34b   :  { %4168 = vrot.lane.b32.xlu1 %v4159_v63, %s12504_s17  ;;  %p12481_p1 = scmp.lt.s32.totalorder %s9970_s26, %s9970_s26 }
 0x34d   :  { %4283 = vrot.lane.b32.xlu0 %v4267_v11, %s12504_s17 }
 0x34f   :  { %4170 = vrot.lane.b32.xlu1 %v4161_v62, %s12504_s17 }
 0x351   :  { %4285 = vrot.lane.b32.xlu0 %v4276_v61, %s12504_s17 }
 0x353   :  { %4172 = vrot.lane.b32.xlu1 %v4163_v13, %s12504_s17 }
 0x35d   :  { %v4051_v10 = vpop.permute.xlu0 %4050 }
 0x35e   :  { %4065 = vst.msk [vmem:[#allocation7 + $0x8] sm:$0xff] %vm3988_vm13, %v4051_v10 }
 0x35f   :  { %v3974_v28 = vpop.permute.xlu1 %3973 }
 0x360   :  { %3989 = vst.msk [vmem:[#allocation7] sm:$0xff] %vm3988_vm13, %v3974_v28 }
 0x365   :  { %v4332_v2 = vld [vmem:[#allocation7 + $0x8] sm:$0xff] }
 0x366   :  { %4698 = vmatprep.mubr.bf16.mxu1 %v4332_v2 }
 0x367   :  { %v4331_v23 = vld [vmem:[#allocation7] sm:$0xff] }
 0x368   :  { %4699 = vmatmul.mubr.bf16.vlgmr.msra.gmra.mrb[52].mxu1 %v4331_v23  ;;  %v4340_v23 = vld [vmem:[#allocation7 + $0x48] sm:$0xff] }
 0x369   :  { %11047 = vmatpush3.bf16.msra.mxu1 %v11604_v58 }
 0x36a   :  { %11048 = vmatprep.subr.bf16.mxu1 %v11605_v20  ;;  %v4335_v20 = vld [vmem:[#allocation7 + $0x20] sm:$0xff] }
 0x36d   :  { %11049 = vmatpush3.bf16.msra.mxu1 %v11606_v32  ;;  %v4345_v32 = vld [vmem:[#allocation7 + $0x70] sm:$0xff] }
 0x36e   :  { %11050 = vmatprep.subr.bf16.mxu1 %v11607_v7  ;;  %v4350_v7 = vld [vmem:[#allocation7 + $0x98] sm:$0xff] }
 0x371   :  { %11051 = vmatpush3.bf16.msra.mxu1 %v11608_v33  ;;  %v4355_v33 = vld [vmem:[#allocation7 + $0xc0] sm:$0xff] }
 0x372   :  { %11052 = vmatprep.subr.bf16.mxu1 %v11609_v56  ;;  %v11623_v56 = vld [vmem:[%s16428_s7] ss:$16 sps:$4 sm:$0xff]  }
 0x375   :  { %11053 = vmatpush3.bf16.msra.mxu1 %v11610_v3  ;;  %v11625_v3 = vld [vmem:[%s16428_s7 + $0x4] ss:$16 sps:$4 sm:$0xff]  }
 0x376   :  { %11054 = vmatprep.subr.bf16.mxu1 %v11611_v5  ;;  %6947 = vmatprep.subr.bf16.mxu0 %v11625_v3  ;;  %v11626_v5 = vld [vmem:[%s16428_s7 + $0x20] ss:$16 sps:$4 sm:$0xff]  }
 0x377   :  { %6948 = vmatpush1.bf16.msra.mxu0 %v11623_v56  ;;  %v11697_v56 = vld [vmem:[%s16428_s7 + $0x16c] ss:$16 sps:$4 sm:$0xff]  }
 0x379   :  { %11055 = vmatpush3.bf16.msra.mxu1 %v11612_v49  ;;  %v11629_v49 = vld [vmem:[%s16428_s7 + $0x40] ss:$16 sps:$4 sm:$0xff]  }
 0x37a   :  { %11056 = vmatprep.subr.bf16.mxu1 %v11613_v1  ;;  %v11631_v1 = vld [vmem:[%s16428_s7 + $0x44] ss:$16 sps:$4 sm:$0xff]  }
 0x37b   :  { %v4053_v42 = vpop.permute.xlu0 %4052 }
 0x37c   :  { %4066 = vst.msk [vmem:[#allocation7 + $0x30] sm:$0xff] %vm3988_vm13, %v4053_v42  ;;  %v11634_v42 = vld [vmem:[%s16428_s7 + $0x64] ss:$16 sps:$4 sm:$0xff]  }
 0x37d   :  { %v3976_v37 = vpop.permute.xlu1 %3975  ;;  %11057 = vmatpush3.bf16.msra.mxu1 %v11614_v6  ;;  %v11632_v6 = vld [vmem:[%s16428_s7 + $0x60] ss:$16 sps:$4 sm:$0xff]  }
 0x37e   :  { %3990 = vst.msk [vmem:[#allocation7 + $0x28] sm:$0xff] %vm3988_vm13, %v3976_v37  ;;  %11058 = vmatprep.subr.bf16.mxu1 %v11615_v51  ;;  %v11635_v51 = vld [vmem:[%s16428_s7 + $0x80] ss:$16 sps:$4 sm:$0xff]   ;;  %v11637_v37 = vld [vmem:[%s16428_s7 + $0x84] ss:$16 sps:$4 sm:$0xff]  }
 0x381   :  { %11059 = vmatpush3.bf16.msra.mxu1 %v11616_v0 }
 0x382   :  { %11060 = vmatprep.subr.bf16.mxu1 %v11617_v24 }
 0x383   :  { %v4337_v22 = vld [vmem:[#allocation7 + $0x30] sm:$0xff] }
 0x384   :  { %4706 = vmatprep.mubr.bf16.mxu1 %v4337_v22  ;;  %v11638_v22 = vld [vmem:[%s16428_s7 + $0xa0] ss:$16 sps:$4 sm:$0xff]  }
 0x385   :  { %v4336_v60 = vld [vmem:[#allocation7 + $0x28] sm:$0xff]  ;;  %11061 = vmatpush3.bf16.msra.mxu1 %v11618_v55 }
 0x386   :  { %4707 = vmatmul.mubr.bf16.gmra.mrb[56].mxu1 %v4336_v60  ;;  %11269 = vmatprep.subr.bf16.mxu1 %v12502_v39  ;;  %v11640_v55 = vld [vmem:[%s16428_s7 + $0xa4] ss:$16 sps:$4 sm:$0xff]  }
 0x3a2   :  { %v4055_v53 = vpop.permute.xlu0 %4054 }
 0x3a3   :  { %4067 = vst.msk [vmem:[#allocation7 + $0x58] sm:$0xff] %vm3988_vm13, %v4055_v53 }
 0x3a4   :  { %v3978_v59 = vpop.permute.xlu1 %3977 }
 0x3a5   :  { %3991 = vst.msk [vmem:[#allocation7 + $0x50] sm:$0xff] %vm3988_vm13, %v3978_v59 }
 0x3aa   :  { %v4342_v35 = vld [vmem:[#allocation7 + $0x58] sm:$0xff] }
 0x3ab   :  { %4714 = vmatprep.mubr.bf16.mxu1 %v4342_v35  ;;  %v4057_v41 = vpop.permute.xlu0 %4056 }
 0x3ac   :  { %v4341_v46 = vld [vmem:[#allocation7 + $0x50] sm:$0xff]  ;;  %4068 = vst.msk [vmem:[#allocation7 + $0x80] sm:$0xff] %vm3988_vm13, %v4057_v41 }
 0x3ad   :  { %4715 = vmatmul.mubr.bf16.gmra.mrb[60].mxu1 %v4341_v46  ;;  %v3980_v26 = vpop.permute.xlu1 %3979  ;;  %v11641_v41 = vld [vmem:[%s16428_s7 + $0xc0] ss:$16 sps:$4 sm:$0xff]   ;;  %v11643_v46 = vld [vmem:[%s16428_s7 + $0xc4] ss:$16 sps:$4 sm:$0xff]  }
 0x3ae   :  { %3992 = vst.msk [vmem:[#allocation7 + $0x78] sm:$0xff] %vm3988_vm13, %v3980_v26  ;;  %v11644_v26 = vld [vmem:[%s16428_s7 + $0x8] ss:$16 sps:$4 sm:$0xff]  }
 0x3af   :  { %v4059_v15 = vpop.permute.xlu0 %4058 }
 0x3b0   :  { %4069 = vst.msk [vmem:[#allocation7 + $0xa8] sm:$0xff] %vm3988_vm13, %v4059_v15  ;;  %v11646_v15 = vld [vmem:[%s16428_s7 + $0xc] ss:$16 sps:$4 sm:$0xff]  }
 0x3b1   :  { %v3982_v29 = vpop.permute.xlu1 %3981 }
 0x3b2   :  { %3993 = vst.msk [vmem:[#allocation7 + $0xa0] sm:$0xff] %vm3988_vm13, %v3982_v29 }
 0x3b3   :  { %v4278_v57 = vpop.permute.xlu0 %4277  ;;  %v4347_v36 = vld [vmem:[#allocation7 + $0x80] sm:$0xff] }
 0x3b4   :  { %4292 = vst.msk [vmem:[#allocation7 + $0x18] sm:$0xff] %vm3988_vm13, %v4278_v57  ;;  %4722 = vmatprep.mubr.bf16.mxu1 %v4347_v36 }
 0x3b5   :  { %v4165_v21 = vpop.permute.xlu1 %4164  ;;  %v4346_v9 = vld [vmem:[#allocation7 + $0x78] sm:$0xff] }
 0x3b6   :  { %4179 = vst.msk [vmem:[#allocation7 + $0x10] sm:$0xff] %vm3988_vm13, %v4165_v21  ;;  %4723 = vmatmul.mubr.bf16.gmra.mrb[64].mxu1 %v4346_v9 }
 0x3b7   :  { %v4280_v34 = vpop.permute.xlu0 %4279  ;;  %v4352_v16 = vld [vmem:[#allocation7 + $0xa8] sm:$0xff] }
 0x3b8   :  { %4293 = vst.msk [vmem:[#allocation7 + $0x40] sm:$0xff] %vm3988_vm13, %v4280_v34  ;;  %4730 = vmatprep.mubr.bf16.mxu1 %v4352_v16  ;;  %v11647_v34 = vld [vmem:[%s16428_s7 + $0x28] ss:$16 sps:$4 sm:$0xff]   ;;  %v11649_v16 = vld [vmem:[%s16428_s7 + $0x2c] ss:$16 sps:$4 sm:$0xff]  }
 0x3b9   :  { %v4167_v52 = vpop.permute.xlu1 %4166  ;;  %v4351_v14 = vld [vmem:[#allocation7 + $0xa0] sm:$0xff] }
 0x3ba   :  { %4180 = vst.msk [vmem:[#allocation7 + $0x38] sm:$0xff] %vm3988_vm13, %v4167_v52  ;;  %v11650_v52 = vld [vmem:[%s16428_s7 + $0xe0] ss:$16 sps:$4 sm:$0xff]  }
 0x3bb   :  { %v4282_v44 = vpop.permute.xlu0 %4281  ;;  %v4334_v27 = vld [vmem:[#allocation7 + $0x18] sm:$0xff] }
 0x3bc   :  { %4294 = vst.msk [vmem:[#allocation7 + $0x68] sm:$0xff] %vm3988_vm13, %v4282_v44  ;;  %v11652_v44 = vld [vmem:[%s16428_s7 + $0xe4] ss:$16 sps:$4 sm:$0xff]  }
 0x3bd   :  { %v4169_v19 = vpop.permute.xlu1 %4168  ;;  %v4333_v8 = vld [vmem:[#allocation7 + $0x10] sm:$0xff] }
 0x3be   :  { %4181 = vst.msk [vmem:[#allocation7 + $0x60] sm:$0xff] %vm3988_vm13, %v4169_v19  ;;  %4731 = vmatmul.mubr.bf16.gmra.mrb[68].mxu1 %v4351_v14  ;;  %v11653_v19 = vld [vmem:[%s16428_s7 + $0x48] ss:$16 sps:$4 sm:$0xff]   ;;  %v11655_v14 = vld [vmem:[%s16428_s7 + $0x4c] ss:$16 sps:$4 sm:$0xff]  }
 0x3bf   :  { %v4284_v40 = vpop.permute.xlu0 %4283  ;;  %4771 = vmatprep.mubr.bf16.mxu1 %v4334_v27  ;;  %v4339_v43 = vld [vmem:[#allocation7 + $0x40] sm:$0xff] }
 0x3c0   :  { %4295 = vst.msk [vmem:[#allocation7 + $0x90] sm:$0xff] %vm3988_vm13, %v4284_v40  ;;  %v11656_v27 = vld [vmem:[%s16428_s7 + $0x100] ss:$16 sps:$4 sm:$0xff]   ;;  %v11658_v40 = vld [vmem:[%s16428_s7 + $0x104] ss:$16 sps:$4 sm:$0xff]  }
 0x3c1   :  { %v4171_v38 = vpop.permute.xlu1 %4170  ;;  %v4338_v45 = vld [vmem:[#allocation7 + $0x38] sm:$0xff] }
 0x3c2   :  { %4182 = vst.msk [vmem:[#allocation7 + $0x88] sm:$0xff] %vm3988_vm13, %v4171_v38  ;;  %v11661_v38 = vld [vmem:[%s16428_s7 + $0x6c] ss:$16 sps:$4 sm:$0xff]  }
 0x3c3   :  { %v4286_v54 = vpop.permute.xlu0 %4285  ;;  %v4344_v18 = vld [vmem:[#allocation7 + $0x68] sm:$0xff] }
 0x3c4   :  { %4296 = vst.msk [vmem:[#allocation7 + $0xb8] sm:$0xff] %vm3988_vm13, %v4286_v54  ;;  %v11659_v54 = vld [vmem:[%s16428_s7 + $0x68] ss:$16 sps:$4 sm:$0xff]  }
 0x3c5   :  { %v4173_v12 = vpop.permute.xlu1 %4172  ;;  %v4343_v11 = vld [vmem:[#allocation7 + $0x60] sm:$0xff] }
 0x3c6   :  { %4183 = vst.msk [vmem:[#allocation7 + $0xb0] sm:$0xff] %vm3988_vm13, %v4173_v12  ;;  %4772 = vmatmul.mubr.bf16.vlgmr.msra.gmra.mrb[72].mxu1 %v4333_v8  ;;  %v11664_v12 = vld [vmem:[%s16428_s7 + $0x8c] ss:$16 sps:$4 sm:$0xff]   ;;  %v11665_v8 = vld [vmem:[%s16428_s7 + $0x120] ss:$16 sps:$4 sm:$0xff]  }
 0x3c7   :  { %11270 = vmatpush3.bf16.msra.mxu1 %v11619_v47  ;;  %4779 = vmatprep.mubr.bf16.mxu1 %v4339_v43  ;;  %v10979_v63 = vpop.f32.mrb[48].mxu1  ;;  %v4349_v62 = vld [vmem:[#allocation7 + $0x90] sm:$0xff]  ;;  %v11667_v47 = vld [vmem:[%s16428_s7 + $0x124] ss:$16 sps:$4 sm:$0xff]   ;;  %v11662_v43 = vld [vmem:[%s16428_s7 + $0x88] ss:$16 sps:$4 sm:$0xff]  }
 0x3c8   :  { %11271 = vmatprep.subr.bf16.mxu1 %v12502_v39  ;;  %v10980_v25 = vpop.f32.mrb[49].mxu1  ;;  %v11676_v63 = vld [vmem:[%s16428_s7 + $0x144] ss:$16 sps:$4 sm:$0xff]   ;;  %vm16501_vm13 = vsmask.f32 7942 }
 0x3c9   :  { %v10982_v50 = vpop.f32.mrb[50].mxu1  ;;  %v4348_v4 = vld [vmem:[#allocation7 + $0x88] sm:$0xff] }
 0x3ca   :  { %v10983_v48 = vpop.f32.mrb[51].mxu1  ;;  %v11677_v25 = vld [vmem:[%s16428_s7 + $0xe8] ss:$16 sps:$4 sm:$0xff]   ;;  %v11679_v50 = vld [vmem:[%s16428_s7 + $0xec] ss:$16 sps:$4 sm:$0xff]  }
 0x3cb   :  { %11272 = vmatpush3.bf16.msra.mxu1 %v11620_v17  ;;  %v4354_v61 = vld [vmem:[#allocation7 + $0xb8] sm:$0xff]  ;;  %v11670_v17 = vld [vmem:[%s16428_s7 + $0xac] ss:$16 sps:$4 sm:$0xff]  }
 0x3cc   :  { %11273 = vmatprep.subr.bf16.mxu1 %v12502_v39  ;;  %v11685_v48 = vld [vmem:[%s16428_s7 + $0x10c] ss:$16 sps:$4 sm:$0xff]  }
 0x3cd   :  { %v4353_v13 = vld [vmem:[#allocation7 + $0xb0] sm:$0xff] }
 0x3ce   :  { %4780 = vmatmul.mubr.bf16.gmra.mrb[76].mxu1 %v4338_v45  ;;  %v11671_v45 = vld [vmem:[%s16428_s7 + $0xc8] ss:$16 sps:$4 sm:$0xff]  }
 0x3cf   :  { %4787 = vmatprep.mubr.bf16.mxu1 %v4344_v18  ;;  %11274 = vmatpush3.bf16.msra.mxu1 %v11621_v31  ;;  %v11668_v31 = vld [vmem:[%s16428_s7 + $0xa8] ss:$16 sps:$4 sm:$0xff]   ;;  %v11673_v18 = vld [vmem:[%s16428_s7 + $0xcc] ss:$16 sps:$4 sm:$0xff]  }
 0x3d0   :  { %11275 = vmatprep.subr.bf16.mxu1 %v12502_v39 }
 0x3d3   :  { %11276 = vmatpush3.bf16.msra.mxu1 %v11622_v30  ;;  %v11674_v30 = vld [vmem:[%s16428_s7 + $0x140] ss:$16 sps:$4 sm:$0xff]  }
 0x3d4   :  { %7212 = vmatprep.subr.bf16.mxu1 %v11646_v15 }
 0x3d6   :  { %4788 = vmatmul.mubr.bf16.gmra.mrb[80].mxu1 %v4343_v11  ;;  %v11682_v11 = vld [vmem:[%s16428_s7 + $0x164] ss:$16 sps:$4 sm:$0xff]  }
 0x3d7   :  { %4795 = vmatprep.mubr.bf16.mxu1 %v4349_v62  ;;  %v11680_v62 = vld [vmem:[%s16428_s7 + $0x160] ss:$16 sps:$4 sm:$0xff]  }
 0x3de   :  { %4796 = vmatmul.mubr.bf16.gmra.mrb[84].mxu1 %v4348_v4  ;;  %v11691_v4 = vld [vmem:[%s16428_s7 + $0x184] ss:$16 sps:$4 sm:$0xff]  }
 0x3df   :  { %4803 = vmatprep.mubr.bf16.mxu1 %v4354_v61  ;;  %v11683_v61 = vld [vmem:[%s16428_s7 + $0x108] ss:$16 sps:$4 sm:$0xff]  }
 0x3e2   :  { %v3629_v10 = vpop.f32.mrb[112].mxu0 }
 0x3e3   :  { %v11267_v28 = vpop.f32.mrb[113].mxu0  ;;  %v11689_v10 = vld [vmem:[%s16428_s7 + $0x180] ss:$16 sps:$4 sm:$0xff]  }
 0x3e4   :  { %v3632_v2 = vpop.f32.mrb[114].mxu0  ;;  %v11700_v28 = vld [vmem:[%s16428_s7 + $0x1a4] ss:$16 sps:$4 sm:$0xff]  }
 0x3e5   :  { %v11268_v58 = vpop.f32.mrb[115].mxu0  ;;  %v11686_v2 = vld [vmem:[%s16428_s7 + $0x128] ss:$16 sps:$4 sm:$0xff]  }
 0x3e6   :  { %4804 = vmatmul.mubr.bf16.gmra.mrb[88].mxu1 %v4353_v13  ;;  %v11688_v13 = vld [vmem:[%s16428_s7 + $0x12c] ss:$16 sps:$4 sm:$0xff]  }
 0x3e7   :  { %11277 = vmatprep.mubr.msk.bf16.mxu1 %vm16466_vm15, %v12502_v39  ;;  %v11694_v58 = vld [vmem:[%s16428_s7 + $0x14c] ss:$16 sps:$4 sm:$0xff]  }
 0x3ee   :  { %11278 = vmatmul.mubr.msk.bf16.vlgmr.msra.gmra.mrb[92].mxu1 %vm82_vm9, %v4335_v20  ;;  %v11698_v20 = vld [vmem:[%s16428_s7 + $0x1a0] ss:$16 sps:$4 sm:$0xff]  }
 0x3ef   :  { %11281 = vmatprep.mubr.msk.bf16.mxu1 %vm16466_vm15, %v12502_v39  ;;  %7213 = vmatpush1.bf16.msra.mxu1 %v11644_v26  ;;  %v11712_v26 = vld [vmem:[%s16428_s7 + $0x1cc] ss:$16 sps:$4 sm:$0xff]  }
 0x3f0   :  { %7214 = vmatprep.subr.bf16.mxu1 %v11649_v16  ;;  %v11716_v16 = vld [vmem:[%s16428_s7 + $0x1e8] ss:$16 sps:$4 sm:$0xff]  }
 0x3f3   :  { %7215 = vmatpush1.bf16.msra.mxu1 %v11647_v34 }
 0x3f4   :  { %7216 = vmatprep.subr.bf16.mxu1 %v11655_v14 }
 0x3f6   :  { %11282 = vmatmul.mubr.msk.bf16.gmra.mrb[96].mxu1 %vm82_vm9, %v4340_v23  ;;  %v11706_v23 = vld [vmem:[%s16428_s7 + $0x1c4] ss:$16 sps:$4 sm:$0xff]  }
 0x3f7   :  { %11285 = vmatprep.mubr.msk.bf16.mxu1 %vm16466_vm15, %v12502_v39  ;;  %7217 = vmatpush1.bf16.msra.mxu1 %v11653_v19  ;;  %v10217_v19 = vld [vmem:[%s16427_s6] ss:$0 sm:$0xff] }
 0x3f8   :  { %7218 = vmatprep.subr.bf16.mxu1 %v11661_v38 }
 0x3fb   :  { %7219 = vmatpush1.bf16.msra.mxu1 %v11659_v54 }
 0x3fc   :  { %7220 = vmatprep.subr.bf16.mxu1 %v11664_v12 }
 0x3fe   :  { %11286 = vmatmul.mubr.msk.bf16.gmra.mrb[100].mxu1 %vm82_vm9, %v4345_v32 }
 0x3ff   :  { %11289 = vmatprep.mubr.msk.bf16.mxu1 %vm16466_vm15, %v12502_v39  ;;  %7221 = vmatpush1.bf16.msra.mxu1 %v11662_v43 }
 0x400   :  { %7222 = vmatprep.subr.bf16.mxu1 %v11670_v17 }
 0x403   :  { %7223 = vmatpush1.bf16.msra.mxu1 %v11668_v31 }
 0x404   :  { %7224 = vmatprep.subr.bf16.mxu1 %v11673_v18 }
 0x406   :  { %11290 = vmatmul.mubr.msk.bf16.gmra.mrb[104].mxu1 %vm82_vm9, %v4350_v7  ;;  %v11692_v7 = vld [vmem:[%s16428_s7 + $0x148] ss:$16 sps:$4 sm:$0xff]  }
 0x407   :  { %11293 = vmatprep.mubr.msk.bf16.mxu1 %vm16466_vm15, %v12502_v39  ;;  %v11628_v39 = vld [vmem:[%s16428_s7 + $0x24] ss:$16 sps:$4 sm:$0xff]   ;;  %7225 = vmatpush1.bf16.msra.mxu1 %v11671_v45  ;;  %vm4925_vm15 = vcmask 1043458  }
 0x408   :  { %6949 = vmatprep.subr.bf16.mxu0 %v11628_v39  ;;  %7226 = vmatprep.subr.bf16.mxu1 %v11679_v50 }
 0x409   :  { %6950 = vmatpush1.bf16.msra.mxu0 %v11626_v5  ;;  %v11704_v5 = vld [vmem:[%s16428_s7 + $0x1c0] ss:$16 sps:$4 sm:$0xff]  }
 0x40a   :  { %6951 = vmatprep.subr.bf16.mxu0 %v11631_v1 }
 0x40b   :  { %7227 = vmatpush1.bf16.msra.mxu1 %v11677_v25 }
 0x40c   :  { %7228 = vmatprep.subr.bf16.mxu1 %v11685_v48 }
 0x40d   :  { %6952 = vmatpush1.bf16.msra.mxu0 %v11629_v49  ;;  %v11715_v49 = vld [vmem:[%s16428_s7 + $0x1e4] ss:$16 sps:$4 sm:$0xff]  }
 0x40e   :  { %11294 = vmatmul.mubr.msk.bf16.gmra.mrb[108].mxu1 %vm82_vm9, %v4355_v33  ;;  %6953 = vmatprep.subr.bf16.mxu0 %v11634_v42  ;;  %v11703_v42 = vld [vmem:[%s16428_s7 + $0x18c] ss:$16 sps:$4 sm:$0xff]   ;;  %vm4926_vm9 = vsmask.f32 3338 }
 0x40f   :  { %7229 = vmatpush1.bf16.msra.mxu1 %v11683_v61  ;;  %vm14716_vm12 = vmand %vm4925_vm15, %vm4926_vm9  ;;  %vm7577_vm9 = vcmask 1042434  }
 0x410   :  { %7230 = vmatprep.subr.bf16.mxu1 %v11688_v13  ;;  %vm15572_vm15 = vmand %vm7574_vm6, %vm16501_vm13 }
 0x411   :  { %6954 = vmatpush1.bf16.msra.mxu0 %v11632_v6  ;;  %v11695_v6 = vld [vmem:[%s16428_s7 + $0x168] ss:$16 sps:$4 sm:$0xff]  }
 0x412   :  { %6955 = vmatprep.subr.bf16.mxu0 %v11637_v37  ;;  %v11721_v37 = vld [vmem:[%s16428_s7 + $0x204] ss:$16 sps:$4 sm:$0xff]  }
 0x413   :  { %7231 = vmatpush1.bf16.msra.mxu1 %v11686_v2 }
 0x414   :  { %7232 = vmatprep.subr.bf16.mxu1 %v11694_v58 }
 0x415   :  { %6956 = vmatpush1.bf16.msra.mxu0 %v11635_v51  ;;  %v11713_v51 = vld [vmem:[%s16428_s7 + $0x1e0] ss:$16 sps:$4 sm:$0xff]  }
 0x416   :  { %6957 = vmatprep.subr.bf16.mxu0 %v11640_v55 }
 0x417   :  { %7233 = vmatpush1.bf16.msra.mxu1 %v11692_v7 }
 0x418   :  { %7234 = vmatprep.subr.bf16.mxu1 %v11697_v56 }
 0x419   :  { %6958 = vmatpush1.bf16.msra.mxu0 %v11638_v22 }
 0x41a   :  { %6959 = vmatprep.subr.bf16.mxu0 %v11643_v46 }
 0x41b   :  { %7235 = vmatpush1.bf16.msra.mxu1 %v11695_v6 }
 0x41c   :  { %7236 = vmatprep.subr.bf16.mxu1 %v11703_v42 }
 0x41d   :  { %6960 = vmatpush1.bf16.msra.mxu0 %v11641_v41  ;;  %v11707_v41 = vld [vmem:[%s16428_s7 + $0x1a8] ss:$16 sps:$4 sm:$0xff]  }
 0x41e   :  { %6961 = vmatprep.subr.bf16.mxu0 %v11652_v44  ;;  %v11724_v44 = vld [vmem:[%s16428_s7 + $0x20c] ss:$16 sps:$4 sm:$0xff]  }
 0x421   :  { %6962 = vmatpush1.bf16.msra.mxu0 %v11650_v52 }
 0x422   :  { %6963 = vmatprep.subr.bf16.mxu0 %v11658_v40 }
 0x425   :  { %6964 = vmatpush1.bf16.msra.mxu0 %v11656_v27 }
 0x426   :  { %6965 = vmatprep.subr.bf16.mxu0 %v11667_v47 }
 0x429   :  { %6966 = vmatpush1.bf16.msra.mxu0 %v11665_v8 }
 0x42a   :  { %6967 = vmatprep.subr.bf16.mxu0 %v11676_v63 }
 0x42d   :  { %6968 = vmatpush1.bf16.msra.mxu0 %v11674_v30 }
 0x42e   :  { %6969 = vmatprep.subr.bf16.mxu0 %v11682_v11 }
 0x431   :  { %6970 = vmatpush1.bf16.msra.mxu0 %v11680_v62 }
 0x432   :  { %6971 = vmatprep.subr.bf16.mxu0 %v11691_v4 }
 0x435   :  { %6972 = vmatpush1.bf16.msra.mxu0 %v11689_v10 }
 0x436   :  { %6973 = vmatprep.subr.bf16.mxu0 %v11700_v28 }
 0x439   :  { %6974 = vmatpush1.bf16.msra.mxu0 %v11698_v20 }
 0x43a   :  { %6975 = vmatprep.subr.bf16.mxu0 %v11706_v23 }
 0x43b   :  { %v11016_v0 = vpop.f32.mrb[52].mxu1 }
 0x43c   :  { %v11017_v24 = vpop.f32.mrb[53].mxu1 }
 0x43d   :  { %v14540_v60 = vadd.f32 %v11017_v24, %v11016_v0  ;;  %v11019_v53 = vpop.f32.mrb[54].mxu1  ;;  %6976 = vmatpush1.bf16.msra.mxu0 %v11704_v5  ;;  %v11701_v0 = vld [vmem:[%s16428_s7 + $0x188] ss:$16 sps:$4 sm:$0xff]   ;;  %v11709_v24 = vld [vmem:[%s16428_s7 + $0x1ac] ss:$16 sps:$4 sm:$0xff]  }
 0x43e   :  { %v11020_v59 = vpop.f32.mrb[55].mxu1  ;;  %6977 = vmatprep.subr.bf16.mxu0 %v11715_v49  ;;  %7237 = vmatpush1.bf16.msra.mxu1 %v11701_v0 }
 0x43f   :  { %v14542_v35 = vadd.f32 %v11020_v59, %v11019_v53  ;;  %7238 = vmatprep.subr.bf16.mxu1 %v11709_v24  ;;  %v4701_v40 = vadd.f32 %v14540_v60, %v10217_v19 }
 0x441   :  { %6978 = vmatpush1.bf16.msra.mxu0 %v11713_v51  ;;  %v4704_v12 = vadd.f32 %v14542_v35, %v10217_v19 }
 0x442   :  { %7000 = vmatprep.subr.bf16.mxu0 %v11721_v37  ;;  %7239 = vmatpush1.bf16.msra.mxu1 %v11707_v41 }
 0x443   :  { %7240 = vmatprep.subr.bf16.mxu1 %v11712_v26 }
 0x459   :  { %v11022_v29 = vpop.f32.mrb[56].mxu1 }
 0x45a   :  { %v11023_v57 = vpop.f32.mrb[57].mxu1 }
 0x45b   :  { %v14556_v36 = vadd.f32 %v11023_v57, %v11022_v29  ;;  %v11025_v21 = vpop.f32.mrb[58].mxu1  ;;  %v11710_v29 = vld [vmem:[%s16428_s7 + $0x1c8] ss:$16 sps:$4 sm:$0xff]   ;;  %v11718_v57 = vld [vmem:[%s16428_s7 + $0x1ec] ss:$16 sps:$4 sm:$0xff]  }
 0x45c   :  { %v11026_v9 = vpop.f32.mrb[59].mxu1  ;;  %7241 = vmatpush1.bf16.msra.mxu1 %v11710_v29 }
 0x45d   :  { %7242 = vmatprep.subr.bf16.mxu1 %v11718_v57  ;;  %v4709_v18 = vadd.f32 %v14556_v36, %v10217_v19 }
 0x460   :  { %7243 = vmatpush1.bf16.msra.mxu1 %v11716_v16 }
 0x461   :  { %7265 = vmatprep.subr.bf16.mxu1 %v11724_v44 }
 0x480   :  { %v11028_v32 = vpop.f32.mrb[60].mxu1 }
 0x481   :  { %v11029_v33 = vpop.f32.mrb[61].mxu1 }
 0x482   :  { %v11031_v3 = vpop.f32.mrb[62].mxu1 }
 0x483   :  { %v11032_v39 = vpop.f32.mrb[63].mxu1 }
 0x484   :  { %v11033_v1 = vadd.f32 %v11032_v39, %v11031_v3 }
 0x486   :  { %v4720_v4 = vadd.f32 %v11033_v1, %v10217_v19 }
 0x489   :  { %v11034_v22 = vpop.f32.mrb[64].mxu1 }
 0x48a   :  { %v11035_v55 = vpop.f32.mrb[65].mxu1 }
 0x48b   :  { %v11036_v53 = vadd.f32 %v11035_v55, %v11034_v22  ;;  %v11037_v59 = vpop.f32.mrb[66].mxu1 }
 0x48c   :  { %v11038_v46 = vpop.f32.mrb[67].mxu1 }
 0x48d   :  { %v11039_v15 = vadd.f32 %v11038_v46, %v11037_v59  ;;  %v4725_v28 = vadd.f32 %v11036_v53, %v10217_v19 }
 0x48f   :  { %v4728_v23 = vadd.f32 %v11039_v15, %v10217_v19 }
 0x491   :  { %v11040_v21 = vpop.f32.mrb[68].mxu1 }
 0x492   :  { %v11041_v9 = vpop.f32.mrb[69].mxu1 }
 0x493   :  { %v11043_v34 = vpop.f32.mrb[70].mxu1 }
 0x494   :  { %v11044_v52 = vpop.f32.mrb[71].mxu1 }
 0x499   :  { %v11062_v14 = vpop.f32.mrb[72].mxu1 }
 0x49a   :  { %v11063_v27 = vpop.f32.mrb[73].mxu1 }
 0x49b   :  { %v11064_v38 = vadd.f32 %v11063_v27, %v11062_v14  ;;  %v11065_v54 = vpop.f32.mrb[74].mxu1 }
 0x49c   :  { %v11066_v47 = vpop.f32.mrb[75].mxu1 }
 0x49d   :  { %v11067_v8 = vadd.f32 %v11066_v47, %v11065_v54  ;;  %v4774_v43 = vadd.f32 %v11064_v38, %v4701_v40 }
 0x49f   :  { %v4777_v17 = vadd.f32 %v11067_v8, %v4704_v12 }
 0x4a1   :  { %v11068_v31 = vpop.f32.mrb[76].mxu1 }
 0x4a2   :  { %v11069_v45 = vpop.f32.mrb[77].mxu1 }
 0x4a3   :  { %v11070_v30 = vadd.f32 %v11069_v45, %v11068_v31  ;;  %v11071_v63 = vpop.f32.mrb[78].mxu1 }
 0x4a4   :  { %v11072_v25 = vpop.f32.mrb[79].mxu1 }
 0x4a5   :  { %v4782_v50 = vadd.f32 %v11070_v30, %v4709_v18 }
 0x4a9   :  { %v11074_v11 = vpop.f32.mrb[80].mxu1 }
 0x4aa   :  { %v11075_v48 = vpop.f32.mrb[81].mxu1 }
 0x4ab   :  { %v11077_v62 = vpop.f32.mrb[82].mxu1 }
 0x4ac   :  { %v11078_v60 = vpop.f32.mrb[83].mxu1 }
 0x4ad   :  { %v11079_v61 = vadd.f32 %v11078_v60, %v11077_v62  ;;  %v4928_v62 = vld [vmem:[#allocation9] sm:$0xc] }
 0x4af   :  { %v4793_v13 = vadd.f32 %v11079_v61, %v4720_v4 }
 0x4b1   :  { %v11080_v10 = vpop.f32.mrb[84].mxu1 }
 0x4b2   :  { %v11081_v35 = vpop.f32.mrb[85].mxu1 }
 0x4b3   :  { %v11082_v2 = vadd.f32 %v11081_v35, %v11080_v10  ;;  %v11083_v58 = vpop.f32.mrb[86].mxu1 }
 0x4b4   :  { %v11084_v20 = vpop.f32.mrb[87].mxu1 }
 0x4b5   :  { %v11085_v32 = vadd.f32 %v11084_v20, %v11083_v58  ;;  %v4798_v36 = vadd.f32 %v11082_v2, %v4725_v28 }
 0x4b7   :  { %v14714_v7 = vadd.f32 %v11085_v32, %v4728_v23  ;;  %v4955_v32 = vld [vmem:[#allocation9] sm:$0x30] }
 0x4b9   :  { %v11086_v33 = vpop.f32.mrb[88].mxu1 }
 0x4ba   :  { %v11087_v56 = vpop.f32.mrb[89].mxu1 }
 0x4bb   :  { %v11089_v3 = vpop.f32.mrb[90].mxu1 }
 0x4bc   :  { %v11090_v5 = vpop.f32.mrb[91].mxu1 }
 0x4c1   :  { %v4846_v39 = vpop.f32.mrb[92].mxu1 }
 0x4c2   :  { %v4847_v49 = vadd.f32 %v4846_v39, %v4774_v43  ;;  %v11279_v1 = vpop.f32.mrb[93].mxu1 }
 0x4c3   :  { %v4849_v6 = vpop.f32.mrb[94].mxu1 }
 0x4c4   :  { %v4885_v42 = vmax.f32 %v4847_v49, 0.0  ;;  %v4850_v51 = vadd.f32 %v4849_v6, %v4777_v17  ;;  %v11280_v37 = vpop.f32.mrb[95].mxu1 }
 0x4c6   :  { %4895 = vst [vmem:[#allocation8] sm:$0xff] %v4885_v42  ;;  %v4886_v0 = vmax.f32 %v4850_v51, 0.0 }
 0x4c8   :  { %4896 = vst [vmem:[#allocation8 + $0x8] sm:$0xff] %v4886_v0 }
 0x4c9   :  { %v4854_v24 = vpop.f32.mrb[96].mxu1 }
 0x4ca   :  { %v4855_v22 = vadd.f32 %v4854_v24, %v4782_v50  ;;  %v11283_v55 = vpop.f32.mrb[97].mxu1 }
 0x4cb   :  { %v4857_v53 = vpop.f32.mrb[98].mxu1 }
 0x4cc   :  { %v4887_v59 = vmax.f32 %v4855_v22, 0.0  ;;  %v11284_v41 = vpop.f32.mrb[99].mxu1 }
 0x4cd   :  { %v4905_v46 = vld [vmem:[#allocation8] ss:$2 sm:$0x3]  ;;  %v4907_v26 = vld [vmem:[#allocation8 + $0x1] ss:$2 sm:$0x3] }
 0x4ce   :  { %4897 = vst [vmem:[#allocation8 + $0x10] sm:$0xff] %v4887_v59  ;;  %v4912_v57 = vmax.f32 %v4905_v46, %v4907_v26 }
 0x4cf   :  { %v4909_v15 = vld [vmem:[#allocation8 + $0x6] ss:$2 sm:$0x3]  ;;  %v4911_v29 = vld [vmem:[#allocation8 + $0x7] ss:$2 sm:$0x3] }
 0x4d0   :  { %v4913_v21 = vmax.f32 %v4909_v15, %v4911_v29  ;;  %v4932_v9 = vld [vmem:[#allocation8 + $0xc] ss:$2 sm:$0x3]  ;;  %v4934_v52 = vld [vmem:[#allocation8 + $0xd] ss:$2 sm:$0x3] }
 0x4d1   :  { %v4862_v34 = vpop.f32.mrb[100].mxu1  ;;  %v4939_v38 = vmax.f32 %v4932_v9, %v4934_v52 }
 0x4d2   :  { %v4914_v16 = vmax.f32 %v4912_v57, %v4913_v21  ;;  %v11287_v44 = vpop.f32.mrb[101].mxu1 }
 0x4d3   :  { %v4865_v19 = vpop.f32.mrb[102].mxu1 }
 0x4d4   :  { %v4915_v14 = vpack.c.bf16 %v4914_v16, %v4914_v16  ;;  %v4866_v27 = vadd.f32 %v4865_v19, %v4793_v13  ;;  %v11288_v40 = vpop.f32.mrb[103].mxu1  ;;  %v4979_v16 = vld [vmem:[#allocation9 + $0x8] sm:$0xc] }
 0x4d5   :  { %v4936_v54 = vld [vmem:[#allocation8 + $0x12] ss:$2 sm:$0x3]  ;;  %v4938_v47 = vld [vmem:[#allocation8 + $0x13] ss:$2 sm:$0x3] }
 0x4d6   :  { %v4917_v12 = vshrl.u32 %v4915_v14, 16  ;;  %v4920_v8 = vshll.u32 %v4915_v14, 16  ;;  %v4940_v43 = vmax.f32 %v4936_v54, %v4938_v47  ;;  %v4890_v17 = vmax.f32 %v4866_v27, 0.0  ;;  %v5003_v14 = vld [vmem:[#allocation9 + $0x8] sm:$0x30] }
 0x4d8   :  { %v4919_v31 = vrot.slane %v4917_v12, 5  ;;  %v4922_v45 = vrot.slane %v4920_v8, 6  ;;  %v4941_v18 = vmax.f32 %v4939_v38, %v4940_v43  ;;  %4900 = vst [vmem:[#allocation8 + $0x28] sm:$0xff] %v4890_v17  ;;  %v5012_v12 = vld [vmem:[#allocation9 + $0x10] sm:$0x1] }
 0x4d9   :  { %v4870_v30 = vpop.f32.mrb[104].mxu1  ;;  %v5029_v43 = vshll.u32 %v5012_v12, 16  ;;  %v11782_v12 = vld [vmem:[%s16428_s7 + $0x348] ss:$16 sps:$4 sm:$0xff]  }
 0x4da   :  { %v4923_v63 = vor.u32 %v4922_v45, %v4919_v31  ;;  %v4942_v25 = vpack.c.bf16 %v4941_v18, %v4941_v18  ;;  %v4871_v50 = vadd.f32 %v4870_v30, %v4798_v36  ;;  %v11291_v11 = vpop.f32.mrb[105].mxu1 }
 0x4db   :  { %v4873_v60 = vpop.f32.mrb[106].mxu1  ;;  %v11722_v11 = vld [vmem:[%s16428_s7 + $0x208] ss:$16 sps:$4 sm:$0xff]  }
 0x4dc   :  { %v4944_v4 = vshrl.u32 %v4942_v25, 16  ;;  %v4947_v61 = vshll.u32 %v4942_v25, 16  ;;  %v4891_v13 = vmax.f32 %v4871_v50, 0.0  ;;  %v4874_v10 = vadd.f32 %v4873_v60, %v14714_v7  ;;  %v11292_v35 = vpop.f32.mrb[107].mxu1  ;;  %v11719_v50 = vld [vmem:[%s16428_s7 + $0x200] ss:$16 sps:$4 sm:$0xff]  }
 0x4dd   :  { %v4929_v28 = vsel %vm14716_vm12, %v4923_v63, %v4928_v62  ;;  %v5031_v25 = vrot.slane %v5029_v43, 1  ;;  %v11790_v43 = vld [vmem:[%s16428_s7 + $0x36c] ss:$16 sps:$4 sm:$0xff]  }
 0x4de   :  { %v4946_v2 = vrot.slane %v4944_v4, 3  ;;  %v4949_v58 = vrot.slane %v4947_v61, 4  ;;  %4901 = vst [vmem:[#allocation8 + $0x30] sm:$0xff] %v4891_v13  ;;  %v4892_v20 = vmax.f32 %v4874_v10, 0.0  ;;  %4930 = vst [vmem:[#allocation9] sm:$0xc] %v4929_v28 }
 0x4df   :  { %v4959_v56 = vld [vmem:[#allocation8 + $0x28] ss:$2 sm:$0x3]  ;;  %v4961_v5 = vld [vmem:[#allocation8 + $0x29] ss:$2 sm:$0x3] }
 0x4e0   :  { %v4950_v36 = vor.u32 %v4949_v58, %v4946_v2  ;;  %4902 = vst [vmem:[#allocation8 + $0x38] sm:$0xff] %v4892_v20  ;;  %v4966_v42 = vmax.f32 %v4959_v56, %v4961_v5  ;;  %v11727_v13 = vld [vmem:[%s16428_s7 + $0x224] ss:$16 sps:$4 sm:$0xff]   ;;  %v11730_v10 = vld [vmem:[%s16428_s7 + $0x22c] ss:$16 sps:$4 sm:$0xff]  }
 0x4e1   :  { %v4878_v33 = vpop.f32.mrb[108].mxu1  ;;  %v11725_v58 = vld [vmem:[%s16428_s7 + $0x220] ss:$16 sps:$4 sm:$0xff]   ;;  %v11728_v20 = vld [vmem:[%s16428_s7 + $0x228] ss:$16 sps:$4 sm:$0xff]  }
 0x4e2   :  { %v11295_v3 = vpop.f32.mrb[109].mxu1  ;;  %v4956_v7 = vsel %vm14723_vm7, %v4950_v36, %v4955_v32  ;;  %v11733_v32 = vld [vmem:[%s16428_s7 + $0x244] ss:$16 sps:$4 sm:$0xff]   ;;  %v11736_v36 = vld [vmem:[%s16428_s7 + $0x24c] ss:$16 sps:$4 sm:$0xff]  }
 0x4e3   :  { %v4881_v39 = vpop.f32.mrb[110].mxu1  ;;  %4957 = vst [vmem:[#allocation9] sm:$0x30] %v4956_v7  ;;  %v11731_v56 = vld [vmem:[%s16428_s7 + $0x240] ss:$16 sps:$4 sm:$0xff]  }
 0x4e4   :  { %v11296_v49 = vpop.f32.mrb[111].mxu1  ;;  %v11734_v3 = vld [vmem:[%s16428_s7 + $0x248] ss:$16 sps:$4 sm:$0xff]   ;;  %v11739_v39 = vld [vmem:[%s16428_s7 + $0x264] ss:$16 sps:$4 sm:$0xff]  }
 0x4e5   :  { %v4963_v1 = vld [vmem:[#allocation8 + $0x2e] ss:$2 sm:$0x3]  ;;  %v4965_v6 = vld [vmem:[#allocation8 + $0x2f] ss:$2 sm:$0x3] }
 0x4e6   :  { %v4967_v51 = vmax.f32 %v4963_v1, %v4965_v6  ;;  %v4983_v37 = vld [vmem:[#allocation8 + $0x34] ss:$2 sm:$0x3]  ;;  %v4985_v0 = vld [vmem:[#allocation8 + $0x35] ss:$2 sm:$0x3] }
 0x4e7   :  { %v4987_v24 = vld [vmem:[#allocation8 + $0x3a] ss:$2 sm:$0x3]  ;;  %v4989_v22 = vld [vmem:[#allocation8 + $0x3b] ss:$2 sm:$0x3]  ;;  %v4990_v53 = vmax.f32 %v4983_v37, %v4985_v0 }
 0x4e8   :  { %v4968_v55 = vmax.f32 %v4966_v42, %v4967_v51  ;;  %v4991_v59 = vmax.f32 %v4987_v24, %v4989_v22  ;;  %v11742_v49 = vld [vmem:[%s16428_s7 + $0x26c] ss:$16 sps:$4 sm:$0xff]   ;;  %v11737_v6 = vld [vmem:[%s16428_s7 + $0x260] ss:$16 sps:$4 sm:$0xff]   ;;  %v11740_v42 = vld [vmem:[%s16428_s7 + $0x268] ss:$16 sps:$4 sm:$0xff]  }
 0x4e9   :  { %v11745_v51 = vld [vmem:[%s16428_s7 + $0x284] ss:$16 sps:$4 sm:$0xff]   ;;  %v11748_v37 = vld [vmem:[%s16428_s7 + $0x28c] ss:$16 sps:$4 sm:$0xff]   ;;  %v11743_v0 = vld [vmem:[%s16428_s7 + $0x280] ss:$16 sps:$4 sm:$0xff]  }
 0x4ea   :  { %v4969_v41 = vpack.c.bf16 %v4968_v55, %v4968_v55  ;;  %v4992_v46 = vmax.f32 %v4990_v53, %v4991_v59  ;;  %v5010_v54 = vld [vmem:[#allocation9] sm:$0xff]  ;;  %v11754_v55 = vld [vmem:[%s16428_s7 + $0x2ac] ss:$16 sps:$4 sm:$0xff]   ;;  %v11749_v53 = vld [vmem:[%s16428_s7 + $0x2a0] ss:$16 sps:$4 sm:$0xff]  }
 0x4eb   :  { %v5016_v47 = vshll.u32 %v5010_v54, 16  ;;  %v5014_v31 = vshrl.u32 %v5010_v54, 16  ;;  %v5052_v33 = vld [vmem:[#allocation9] sm:$0xfc] }
 0x4ec   :  { %v4971_v26 = vshrl.u32 %v4969_v41, 16  ;;  %v4974_v15 = vshll.u32 %v4969_v41, 16  ;;  %v4993_v29 = vpack.c.bf16 %v4992_v46, %v4992_v46  ;;  %v5058_v5 = vrot.slane %v5052_v33, 2  ;;  %v11746_v24 = vld [vmem:[%s16428_s7 + $0x288] ss:$16 sps:$4 sm:$0xff]  }
 0x4ed   :  { %v5018_v8 = vrot.slane %v5016_v47, 1  ;;  %v11751_v22 = vld [vmem:[%s16428_s7 + $0x2a4] ss:$16 sps:$4 sm:$0xff]   ;;  %v11752_v59 = vld [vmem:[%s16428_s7 + $0x2a8] ss:$16 sps:$4 sm:$0xff]  }
 0x4ee   :  { %v4973_v57 = vrot.slane %v4971_v26, 5  ;;  %v4976_v21 = vrot.slane %v4974_v15, 6  ;;  %v4995_v9 = vshrl.u32 %v4993_v29, 16  ;;  %v4998_v34 = vshll.u32 %v4993_v29, 16  ;;  %v11757_v41 = vld [vmem:[%s16428_s7 + $0x2c4] ss:$16 sps:$4 sm:$0xff]  }
 0x4ef   :  { %v5019_v30 = vor.u32 %v5018_v8, %v5014_v31  ;;  %v11760_v46 = vld [vmem:[%s16428_s7 + $0x2cc] ss:$16 sps:$4 sm:$0xff]   ;;  %v11755_v26 = vld [vmem:[%s16428_s7 + $0x2c0] ss:$16 sps:$4 sm:$0xff]   ;;  %v11758_v15 = vld [vmem:[%s16428_s7 + $0x2c8] ss:$16 sps:$4 sm:$0xff]  }
 0x4f0   :  { %v4977_v52 = vor.u32 %v4976_v21, %v4973_v57  ;;  %v4997_v44 = vrot.slane %v4995_v9, 3  ;;  %v5000_v19 = vrot.slane %v4998_v34, 4  ;;  %v11763_v29 = vld [vmem:[%s16428_s7 + $0x2e4] ss:$16 sps:$4 sm:$0xff]   ;;  %v11766_v57 = vld [vmem:[%s16428_s7 + $0x2ec] ss:$16 sps:$4 sm:$0xff]  }
 0x4f1   :  { %v11761_v21 = vld [vmem:[%s16428_s7 + $0x2e0] ss:$16 sps:$4 sm:$0xff]   ;;  %v11764_v9 = vld [vmem:[%s16428_s7 + $0x2e8] ss:$16 sps:$4 sm:$0xff]   ;;  %v11769_v34 = vld [vmem:[%s16428_s7 + $0x304] ss:$16 sps:$4 sm:$0xff]  }
 0x4f2   :  { %v5001_v27 = vor.u32 %v5000_v19, %v4997_v44  ;;  %v4980_v40 = vsel %vm14716_vm12, %v4977_v52, %v4979_v16  ;;  %v11772_v16 = vld [vmem:[%s16428_s7 + $0x30c] ss:$16 sps:$4 sm:$0xff]   ;;  %v11767_v52 = vld [vmem:[%s16428_s7 + $0x300] ss:$16 sps:$4 sm:$0xff]   ;;  %v11770_v44 = vld [vmem:[%s16428_s7 + $0x308] ss:$16 sps:$4 sm:$0xff]  }
 0x4f3   :  { %4981 = vst [vmem:[#allocation9 + $0x8] sm:$0xc] %v4980_v40  ;;  %v11775_v19 = vld [vmem:[%s16428_s7 + $0x324] ss:$16 sps:$4 sm:$0xff]   ;;  %v11776_v40 = vld [vmem:[%s16428_s7 + $0x328] ss:$16 sps:$4 sm:$0xff]  }
 0x4f4   :  { %v5004_v38 = vsel %vm14723_vm7, %v5001_v27, %v5003_v14  ;;  %v11778_v14 = vld [vmem:[%s16428_s7 + $0x32c] ss:$16 sps:$4 sm:$0xff]   ;;  %v11773_v27 = vld [vmem:[%s16428_s7 + $0x320] ss:$16 sps:$4 sm:$0xff]   ;;  %v11787_v8 = vld [vmem:[%s16428_s7 + $0x364] ss:$16 sps:$4 sm:$0xff]  }
 0x4f5   :  { %5005 = vst [vmem:[#allocation9 + $0x8] sm:$0x30] %v5004_v38  ;;  %v11781_v38 = vld [vmem:[%s16428_s7 + $0x344] ss:$16 sps:$4 sm:$0xff]   ;;  %v11779_v47 = vld [vmem:[%s16428_s7 + $0x340] ss:$16 sps:$4 sm:$0xff]   ;;  %vm7657_vm7 = vmand %vm7577_vm9, %vm16505_vm10 }
 0x4f6   :  { %v11785_v31 = vld [vmem:[%s16428_s7 + $0x360] ss:$16 sps:$4 sm:$0xff]   ;;  %v11820_v33 = vld [vmem:[%s16428_s7 + $0x40c] ss:$16 sps:$4 sm:$0xff]   ;;  %vm16504_vm12 = vsmask.f32 7938 }
 0x4f7   :  { %vm7654_vm3 = vmand %vm4309_vm2, %vm16504_vm12  ;;  %vm16518_vm10 = vsmask.f32 7950 }
 0x4fc   :  { %v14733_v17 = vld [vmem:[#allocation9 + $0x8] sm:$0xff] }
 0x4fd   :  { %v5021_v45 = vshll.u32 %v14733_v17, 16  ;;  %v5025_v18 = vshrl.u32 %v14733_v17, 16  ;;  %v5059_v7 = vrot.slane %v14733_v17, 2 }
 0x4ff   :  { %v5023_v63 = vrot.slane %v5021_v45, 1  ;;  %v5081_v48 = vrot.slane %v5025_v18, 2  ;;  %v5084_v62 = vrot.slane %v5021_v45, 3  ;;  %v5144_v61 = vrot.slane %v5025_v18, 4 }
 0x500   :  { %v5147_v28 = vrot.slane %v5021_v45, 5  ;;  %v5060_v1 = vsel %vm436_vm1, %v5058_v5, %v5059_v7  ;;  %v11788_v45 = vld [vmem:[%s16428_s7 + $0x368] ss:$16 sps:$4 sm:$0xff]  }
 0x501   :  { %v5024_v60 = vsel %vm1602_vm4, %v5019_v30, %v5023_v63  ;;  %v5027_v4 = vor.u32 %v5025_v18, %v5023_v63  ;;  %v14750_v35 = vor.u32 %v5084_v62, %v5081_v48  ;;  %v11793_v18 = vld [vmem:[%s16428_s7 + $0x384] ss:$16 sps:$4 sm:$0xff]   ;;  %v11796_v30 = vld [vmem:[%s16428_s7 + $0x38c] ss:$16 sps:$4 sm:$0xff]   ;;  %v11791_v63 = vld [vmem:[%s16428_s7 + $0x380] ss:$16 sps:$4 sm:$0xff]  }
 0x502   :  { %6979 = vmatprep.mubr.bf16.mxu0 %v5024_v60  ;;  %7244 = vmatprep.mubr.bf16.mxu1 %v5024_v60  ;;  %v14759_v23 = vor.u32 %v5147_v28, %v5144_v61  ;;  %v11797_v48 = vld [vmem:[%s16428_s7 + $0x3a0] ss:$16 sps:$4 sm:$0xff]   ;;  %v11800_v62 = vld [vmem:[%s16428_s7 + $0x3a8] ss:$16 sps:$4 sm:$0xff]   ;;  %v11805_v60 = vld [vmem:[%s16428_s7 + $0x3c4] ss:$16 sps:$4 sm:$0xff]  }
 0x503   :  { %6980 = vmatmul.mubr.bf16.vlgmr.msra.gmra.mrb[116].mxu0 %v5010_v54  ;;  %7245 = vmatmul.mubr.bf16.vlgmr.msra.gmra.mrb[112].mxu1 %v5010_v54  ;;  %v5032_v2 = vsel %vm1602_vm4, %v5027_v4, %v5031_v25  ;;  %v11784_v54 = vld [vmem:[%s16428_s7 + $0x34c] ss:$16 sps:$4 sm:$0xff]   ;;  %v11794_v25 = vld [vmem:[%s16428_s7 + $0x388] ss:$16 sps:$4 sm:$0xff]   ;;  %v11803_v61 = vld [vmem:[%s16428_s7 + $0x3c0] ss:$16 sps:$4 sm:$0xff]  }
 0x504   :  { %7001 = vmatpush1.bf16.msra.mxu0 %v11719_v50  ;;  %7266 = vmatpush1.bf16.msra.mxu1 %v11722_v11  ;;  %v11799_v50 = vld [vmem:[%s16428_s7 + $0x3a4] ss:$16 sps:$4 sm:$0xff]   ;;  %v11802_v11 = vld [vmem:[%s16428_s7 + $0x3ac] ss:$16 sps:$4 sm:$0xff]   ;;  %vm16496_vm4 = vsmask.f32 5376 }
 0x505   :  { %6989 = vmatprep.mubr.bf16.mxu0 %v5032_v2  ;;  %7254 = vmatprep.mubr.bf16.mxu1 %v5032_v2  ;;  %v11808_v4 = vld [vmem:[%s16428_s7 + $0x3cc] ss:$16 sps:$4 sm:$0xff]   ;;  %v11809_v2 = vld [vmem:[%s16428_s7 + $0x3e0] ss:$16 sps:$4 sm:$0xff]   ;;  %vm16498_vm14 = vmmov %vm16496_vm4 }
 0x506   :  { %7002 = vmatprep.subr.bf16.mxu0 %v11727_v13  ;;  %7267 = vmatprep.subr.bf16.mxu1 %v11730_v10  ;;  %v11806_v13 = vld [vmem:[%s16428_s7 + $0x3c8] ss:$16 sps:$4 sm:$0xff]   ;;  %v11811_v10 = vld [vmem:[%s16428_s7 + $0x3e4] ss:$16 sps:$4 sm:$0xff]   ;;  %v11814_v28 = vld [vmem:[%s16428_s7 + $0x3ec] ss:$16 sps:$4 sm:$0xff]  }
 0x508   :  { %7003 = vmatpush1.bf16.msra.mxu0 %v11725_v58  ;;  %7268 = vmatpush1.bf16.msra.mxu1 %v11728_v20  ;;  %v11812_v58 = vld [vmem:[%s16428_s7 + $0x3e8] ss:$16 sps:$4 sm:$0xff]   ;;  %v5054_v20 = vld [vmem:[#allocation9 + $0x10] sm:$0x3] }
 0x509   :  { %7004 = vmatprep.subr.bf16.mxu0 %v11733_v32  ;;  %7269 = vmatprep.subr.bf16.mxu1 %v11736_v36  ;;  %v5037_v32 = vld [vmem:[#allocation9] sm:$0xfe] }
 0x50a   :  { %v11817_v36 = vld [vmem:[%s16428_s7 + $0x404] ss:$16 sps:$4 sm:$0xff]   ;;  %v5043_v5 = vrot.slane %v5037_v32, 1 }
 0x50b   :  { %6990 = vmatmul.mubr.bf16.gmra.mrb[120].mxu0 %v14733_v17  ;;  %7255 = vmatmul.mubr.bf16.gmra.mrb[116].mxu1 %v14733_v17  ;;  %v11889_v32 = vld [vmem:[%s16428_s7 + $0x584] ss:$16 sps:$4 sm:$0xff]  }
 0x50c   :  { %7005 = vmatpush1.bf16.msra.mxu0 %v11731_v56  ;;  %7270 = vmatpush1.bf16.msra.mxu1 %v11734_v3  ;;  %v5044_v56 = vrot.slane %v14733_v17, 1  ;;  %v5061_v3 = vrot.slane %v5054_v20, 2  ;;  %v11884_v20 = vld [vmem:[%s16428_s7 + $0x568] ss:$16 sps:$4 sm:$0xff]  }
 0x50d   :  { %7032 = vmatprep.mubr.bf16.mxu0 %v5060_v1  ;;  %7297 = vmatprep.mubr.bf16.mxu1 %v5060_v1 }
 0x50e   :  { %7006 = vmatprep.subr.bf16.mxu0 %v11739_v39  ;;  %7271 = vmatprep.subr.bf16.mxu1 %v11742_v49  ;;  %v11815_v39 = vld [vmem:[%s16428_s7 + $0x400] ss:$16 sps:$4 sm:$0xff]   ;;  %v11818_v49 = vld [vmem:[%s16428_s7 + $0x408] ss:$16 sps:$4 sm:$0xff]   ;;  %v5045_v1 = vsel %vm1859_vm8, %v5043_v5, %v5044_v56  ;;  %v11898_v5 = vld [vmem:[%s16428_s7 + $0x5ac] ss:$16 sps:$4 sm:$0xff]  }
 0x510   :  { %7007 = vmatpush1.bf16.msra.mxu0 %v11737_v6  ;;  %7272 = vmatpush1.bf16.msra.mxu1 %v11740_v42  ;;  %v11823_v6 = vld [vmem:[%s16428_s7 + $0x424] ss:$16 sps:$4 sm:$0xff]   ;;  %v11826_v42 = vld [vmem:[%s16428_s7 + $0x42c] ss:$16 sps:$4 sm:$0xff]  }
 0x511   :  { %7008 = vmatprep.subr.bf16.mxu0 %v11745_v51  ;;  %7273 = vmatprep.subr.bf16.mxu1 %v11748_v37  ;;  %v5062_v51 = vsel %vm436_vm1, %v5059_v7, %v5061_v3  ;;  %v5039_v37 = vld [vmem:[#allocation9 + $0x10] sm:$0x1]  ;;  %vm16495_vm1 = vcmask 1044480  }
 0x512   :  { %v5046_v7 = vrot.slane %v5039_v37, 1  ;;  %v11895_v3 = vld [vmem:[%s16428_s7 + $0x5a4] ss:$16 sps:$4 sm:$0xff]  }
 0x514   :  { %7009 = vmatpush1.bf16.msra.mxu0 %v11743_v0  ;;  %7274 = vmatpush1.bf16.msra.mxu1 %v11746_v24  ;;  %v11821_v0 = vld [vmem:[%s16428_s7 + $0x420] ss:$16 sps:$4 sm:$0xff]   ;;  %v11824_v24 = vld [vmem:[%s16428_s7 + $0x428] ss:$16 sps:$4 sm:$0xff]  }
 0x515   :  { %7010 = vmatprep.subr.bf16.mxu0 %v11751_v22  ;;  %7275 = vmatprep.subr.bf16.mxu1 %v11754_v55  ;;  %v11829_v22 = vld [vmem:[%s16428_s7 + $0x444] ss:$16 sps:$4 sm:$0xff]   ;;  %v11832_v55 = vld [vmem:[%s16428_s7 + $0x44c] ss:$16 sps:$4 sm:$0xff]  }
 0x518   :  { %7011 = vmatpush1.bf16.msra.mxu0 %v11749_v53  ;;  %7276 = vmatpush1.bf16.msra.mxu1 %v11752_v59  ;;  %v5100_v53 = vld [vmem:[#allocation9] sm:$0xf8]  ;;  %v5107_v59 = vrot.slane %v14733_v17, 3 }
 0x519   :  { %7012 = vmatprep.subr.bf16.mxu0 %v11757_v41  ;;  %7277 = vmatprep.subr.bf16.mxu1 %v11760_v46  ;;  %v11827_v41 = vld [vmem:[%s16428_s7 + $0x440] ss:$16 sps:$4 sm:$0xff]   ;;  %v11830_v46 = vld [vmem:[%s16428_s7 + $0x448] ss:$16 sps:$4 sm:$0xff]  }
 0x51a   :  { %v11920_v17 = vld [vmem:[%s16428_s7 + $0x628] ss:$16 sps:$4 sm:$0xff]  }
 0x51c   :  { %7013 = vmatpush1.bf16.msra.mxu0 %v11755_v26  ;;  %7278 = vmatpush1.bf16.msra.mxu1 %v11758_v15  ;;  %v5106_v26 = vrot.slane %v5100_v53, 3  ;;  %v5047_v15 = vsel %vm1859_vm8, %v5044_v56, %v5046_v7  ;;  %v11890_v56 = vld [vmem:[%s16428_s7 + $0x588] ss:$16 sps:$4 sm:$0xff]   ;;  %v11910_v7 = vld [vmem:[%s16428_s7 + $0x5ec] ss:$16 sps:$4 sm:$0xff]   ;;  %vm16497_vm8 = vmmov %vm16495_vm1 }
 0x51d   :  { %7014 = vmatprep.subr.bf16.mxu0 %v11763_v29  ;;  %7279 = vmatprep.subr.bf16.mxu1 %v11766_v57  ;;  %v11835_v29 = vld [vmem:[%s16428_s7 + $0x464] ss:$16 sps:$4 sm:$0xff]   ;;  %v11838_v57 = vld [vmem:[%s16428_s7 + $0x46c] ss:$16 sps:$4 sm:$0xff]   ;;  %v11905_v53 = vld [vmem:[%s16428_s7 + $0x5e0] ss:$16 sps:$4 sm:$0xff]  }
 0x520   :  { %7015 = vmatpush1.bf16.msra.mxu0 %v11761_v21  ;;  %7280 = vmatpush1.bf16.msra.mxu1 %v11764_v9  ;;  %v5108_v21 = vsel %vm16495_vm1, %v5106_v26, %v5107_v59  ;;  %v11833_v9 = vld [vmem:[%s16428_s7 + $0x460] ss:$16 sps:$4 sm:$0xff]   ;;  %v5102_v26 = vld [vmem:[#allocation9 + $0x10] sm:$0x7]  ;;  %vm7656_vm1 = vmor %vm15572_vm15, %vm7654_vm3 }
 0x521   :  { %7016 = vmatprep.subr.bf16.mxu0 %v11769_v34  ;;  %7281 = vmatprep.subr.bf16.mxu1 %v11772_v16  ;;  %v11836_v34 = vld [vmem:[%s16428_s7 + $0x468] ss:$16 sps:$4 sm:$0xff]   ;;  %v11841_v16 = vld [vmem:[%s16428_s7 + $0x484] ss:$16 sps:$4 sm:$0xff]  }
 0x524   :  { %7017 = vmatpush1.bf16.msra.mxu0 %v11767_v52  ;;  %7282 = vmatpush1.bf16.msra.mxu1 %v11770_v44  ;;  %v11844_v52 = vld [vmem:[%s16428_s7 + $0x48c] ss:$16 sps:$4 sm:$0xff]   ;;  %v11839_v44 = vld [vmem:[%s16428_s7 + $0x480] ss:$16 sps:$4 sm:$0xff]  }
 0x525   :  { %7018 = vmatprep.subr.bf16.mxu0 %v11775_v19  ;;  %7283 = vmatprep.subr.bf16.mxu1 %v11778_v14  ;;  %v11842_v19 = vld [vmem:[%s16428_s7 + $0x488] ss:$16 sps:$4 sm:$0xff]   ;;  %v11847_v14 = vld [vmem:[%s16428_s7 + $0x4a4] ss:$16 sps:$4 sm:$0xff]  }
 0x528   :  { %7019 = vmatpush1.bf16.msra.mxu0 %v11773_v27  ;;  %7284 = vmatpush1.bf16.msra.mxu1 %v11776_v40  ;;  %v11850_v27 = vld [vmem:[%s16428_s7 + $0x4ac] ss:$16 sps:$4 sm:$0xff]   ;;  %v11845_v40 = vld [vmem:[%s16428_s7 + $0x4a0] ss:$16 sps:$4 sm:$0xff]  }
 0x529   :  { %7020 = vmatprep.subr.bf16.mxu0 %v11781_v38  ;;  %7285 = vmatprep.subr.bf16.mxu1 %v11784_v54  ;;  %v11848_v38 = vld [vmem:[%s16428_s7 + $0x4a8] ss:$16 sps:$4 sm:$0xff]   ;;  %v11853_v54 = vld [vmem:[%s16428_s7 + $0x4c4] ss:$16 sps:$4 sm:$0xff]  }
 0x52c   :  { %7021 = vmatpush1.bf16.msra.mxu0 %v11779_v47  ;;  %7286 = vmatpush1.bf16.msra.mxu1 %v11782_v12  ;;  %v11856_v47 = vld [vmem:[%s16428_s7 + $0x4cc] ss:$16 sps:$4 sm:$0xff]   ;;  %v11851_v12 = vld [vmem:[%s16428_s7 + $0x4c0] ss:$16 sps:$4 sm:$0xff]  }
 0x52d   :  { %7022 = vmatprep.subr.bf16.mxu0 %v11787_v8  ;;  %7287 = vmatprep.subr.bf16.mxu1 %v11790_v43  ;;  %v11854_v8 = vld [vmem:[%s16428_s7 + $0x4c8] ss:$16 sps:$4 sm:$0xff]   ;;  %v11859_v43 = vld [vmem:[%s16428_s7 + $0x4e4] ss:$16 sps:$4 sm:$0xff]  }
 0x530   :  { %7023 = vmatpush1.bf16.msra.mxu0 %v11785_v31  ;;  %7288 = vmatpush1.bf16.msra.mxu1 %v11788_v45  ;;  %v11862_v31 = vld [vmem:[%s16428_s7 + $0x4ec] ss:$16 sps:$4 sm:$0xff]   ;;  %v11857_v45 = vld [vmem:[%s16428_s7 + $0x4e0] ss:$16 sps:$4 sm:$0xff]  }
 0x531   :  { %7024 = vmatprep.subr.bf16.mxu0 %v11793_v18  ;;  %7289 = vmatprep.subr.bf16.mxu1 %v11796_v30  ;;  %v11860_v18 = vld [vmem:[%s16428_s7 + $0x4e8] ss:$16 sps:$4 sm:$0xff]   ;;  %v11865_v30 = vld [vmem:[%s16428_s7 + $0x504] ss:$16 sps:$4 sm:$0xff]  }
 0x534   :  { %7025 = vmatpush1.bf16.msra.mxu0 %v11791_v63  ;;  %7290 = vmatpush1.bf16.msra.mxu1 %v11794_v25  ;;  %v11868_v63 = vld [vmem:[%s16428_s7 + $0x50c] ss:$16 sps:$4 sm:$0xff]   ;;  %v11863_v25 = vld [vmem:[%s16428_s7 + $0x500] ss:$16 sps:$4 sm:$0xff]  }
 0x535   :  { %7026 = vmatprep.subr.bf16.mxu0 %v11799_v50  ;;  %7291 = vmatprep.subr.bf16.mxu1 %v11802_v11  ;;  %v11866_v50 = vld [vmem:[%s16428_s7 + $0x508] ss:$16 sps:$4 sm:$0xff]   ;;  %v11871_v11 = vld [vmem:[%s16428_s7 + $0x524] ss:$16 sps:$4 sm:$0xff]  }
 0x538   :  { %7027 = vmatpush1.bf16.msra.mxu0 %v11797_v48  ;;  %7292 = vmatpush1.bf16.msra.mxu1 %v11800_v62  ;;  %v11874_v48 = vld [vmem:[%s16428_s7 + $0x52c] ss:$16 sps:$4 sm:$0xff]   ;;  %v11869_v62 = vld [vmem:[%s16428_s7 + $0x520] ss:$16 sps:$4 sm:$0xff]  }
 0x539   :  { %7028 = vmatprep.subr.bf16.mxu0 %v11805_v60  ;;  %7293 = vmatprep.subr.bf16.mxu1 %v11808_v4  ;;  %v11872_v60 = vld [vmem:[%s16428_s7 + $0x528] ss:$16 sps:$4 sm:$0xff]   ;;  %v11877_v4 = vld [vmem:[%s16428_s7 + $0x544] ss:$16 sps:$4 sm:$0xff]  }
 0x53c   :  { %7029 = vmatpush1.bf16.msra.mxu0 %v11803_v61  ;;  %7294 = vmatpush1.bf16.msra.mxu1 %v11806_v13  ;;  %v11880_v61 = vld [vmem:[%s16428_s7 + $0x54c] ss:$16 sps:$4 sm:$0xff]   ;;  %v11875_v13 = vld [vmem:[%s16428_s7 + $0x540] ss:$16 sps:$4 sm:$0xff]  }
 0x53d   :  { %7030 = vmatprep.subr.bf16.mxu0 %v11811_v10  ;;  %7295 = vmatprep.subr.bf16.mxu1 %v11814_v28  ;;  %v11878_v10 = vld [vmem:[%s16428_s7 + $0x548] ss:$16 sps:$4 sm:$0xff]   ;;  %v11883_v28 = vld [vmem:[%s16428_s7 + $0x564] ss:$16 sps:$4 sm:$0xff]  }
 0x540   :  { %7031 = vmatpush1.bf16.msra.mxu0 %v11809_v2  ;;  %7296 = vmatpush1.bf16.msra.mxu1 %v11812_v58  ;;  %v11886_v2 = vld [vmem:[%s16428_s7 + $0x56c] ss:$16 sps:$4 sm:$0xff]   ;;  %v11881_v58 = vld [vmem:[%s16428_s7 + $0x560] ss:$16 sps:$4 sm:$0xff]  }
 0x541   :  { %7053 = vmatprep.subr.bf16.mxu0 %v11817_v36  ;;  %7318 = vmatprep.subr.bf16.mxu1 %v11820_v33  ;;  %v11892_v36 = vld [vmem:[%s16428_s7 + $0x58c] ss:$16 sps:$4 sm:$0xff]   ;;  %v11887_v33 = vld [vmem:[%s16428_s7 + $0x580] ss:$16 sps:$4 sm:$0xff]  }
 0x543   :  { %7033 = vmatmul.mubr.bf16.vlgmr.msra.gmra.mrb[116].mxu0 %v5045_v1  ;;  %7298 = vmatmul.mubr.bf16.vlgmr.msra.gmra.mrb[112].mxu1 %v5045_v1  ;;  %v11901_v1 = vld [vmem:[%s16428_s7 + $0x5c4] ss:$16 sps:$4 sm:$0xff]  }
 0x544   :  { %7042 = vmatprep.mubr.bf16.mxu0 %v5062_v51  ;;  %7054 = vmatpush1.bf16.msra.mxu0 %v11815_v39  ;;  %v11893_v39 = vld [vmem:[%s16428_s7 + $0x5a0] ss:$16 sps:$4 sm:$0xff]  }
 0x545   :  { %7307 = vmatprep.mubr.bf16.mxu1 %v5062_v51  ;;  %7319 = vmatpush1.bf16.msra.mxu1 %v11818_v49  ;;  %v11896_v49 = vld [vmem:[%s16428_s7 + $0x5a8] ss:$16 sps:$4 sm:$0xff]   ;;  %v11899_v51 = vld [vmem:[%s16428_s7 + $0x5c0] ss:$16 sps:$4 sm:$0xff]  }
 0x546   :  { %7055 = vmatprep.subr.bf16.mxu0 %v11823_v6  ;;  %7320 = vmatprep.subr.bf16.mxu1 %v11826_v42  ;;  %v5067_v6 = vld [vmem:[#allocation9] sm:$0xfc]  ;;  %v11904_v42 = vld [vmem:[%s16428_s7 + $0x5cc] ss:$16 sps:$4 sm:$0xff]  }
 0x547   :  { %v5071_v37 = vshrl.u32 %v5067_v6, 16 }
 0x548   :  { %7056 = vmatpush1.bf16.msra.mxu0 %v11821_v0  ;;  %v5074_v0 = vshll.u32 %v5067_v6, 16  ;;  %v11961_v6 = vld [vmem:[%s16428_s7 + $0x704] ss:$16 sps:$4 sm:$0xff]  }
 0x549   :  { %7321 = vmatpush1.bf16.msra.mxu1 %v11824_v24  ;;  %7057 = vmatprep.subr.bf16.mxu0 %v11829_v22  ;;  %v11902_v24 = vld [vmem:[%s16428_s7 + $0x5c8] ss:$16 sps:$4 sm:$0xff]   ;;  %v11907_v22 = vld [vmem:[%s16428_s7 + $0x5e4] ss:$16 sps:$4 sm:$0xff]  }
 0x54a   :  { %7322 = vmatprep.subr.bf16.mxu1 %v11832_v55  ;;  %v5069_v55 = vld [vmem:[#allocation9 + $0x10] sm:$0x7] }
 0x54b   :  { %7043 = vmatmul.mubr.bf16.gmra.mrb[120].mxu0 %v5047_v15  ;;  %7308 = vmatmul.mubr.bf16.gmra.mrb[116].mxu1 %v5047_v15  ;;  %v11908_v15 = vld [vmem:[%s16428_s7 + $0x5e8] ss:$16 sps:$4 sm:$0xff]  }
 0x54c   :  { %7058 = vmatpush1.bf16.msra.mxu0 %v11827_v41  ;;  %7085 = vmatprep.mubr.bf16.mxu0 %v5108_v21  ;;  %v5073_v41 = vrot.slane %v5071_v37, 2  ;;  %v11962_v37 = vld [vmem:[%s16428_s7 + $0x708] ss:$16 sps:$4 sm:$0xff]  }
 0x54d   :  { %7323 = vmatpush1.bf16.msra.mxu1 %v11830_v46  ;;  %7350 = vmatprep.mubr.bf16.mxu1 %v5108_v21  ;;  %v5076_v46 = vrot.slane %v5074_v0, 3  ;;  %v5088_v21 = vshrl.u32 %v5069_v55, 16  ;;  %v11967_v0 = vld [vmem:[%s16428_s7 + $0x724] ss:$16 sps:$4 sm:$0xff]  }
 0x54e   :  { %7059 = vmatprep.subr.bf16.mxu0 %v11835_v29  ;;  %7324 = vmatprep.subr.bf16.mxu1 %v11838_v57  ;;  %v11913_v29 = vld [vmem:[%s16428_s7 + $0x604] ss:$16 sps:$4 sm:$0xff]   ;;  %v11916_v57 = vld [vmem:[%s16428_s7 + $0x60c] ss:$16 sps:$4 sm:$0xff]  }
 0x550   :  { %7060 = vmatpush1.bf16.msra.mxu0 %v11833_v9  ;;  %v5091_v9 = vshll.u32 %v5069_v55, 16  ;;  %v11973_v55 = vld [vmem:[%s16428_s7 + $0x744] ss:$16 sps:$4 sm:$0xff]  }
 0x551   :  { %7325 = vmatpush1.bf16.msra.mxu1 %v11836_v34  ;;  %7061 = vmatprep.subr.bf16.mxu0 %v11841_v16  ;;  %v5130_v34 = vld [vmem:[#allocation9] sm:$0xf0]  ;;  %v5109_v16 = vrot.slane %v5102_v26, 3  ;;  %v11979_v26 = vld [vmem:[%s16428_s7 + $0x764] ss:$16 sps:$4 sm:$0xff]  }
 0x552   :  { %7326 = vmatprep.subr.bf16.mxu1 %v11844_v52  ;;  %v5077_v52 = vor.u32 %v5076_v46, %v5073_v41  ;;  %v11971_v41 = vld [vmem:[%s16428_s7 + $0x740] ss:$16 sps:$4 sm:$0xff]   ;;  %v11974_v46 = vld [vmem:[%s16428_s7 + $0x748] ss:$16 sps:$4 sm:$0xff]  }
 0x554   :  { %7062 = vmatpush1.bf16.msra.mxu0 %v11839_v44  ;;  %v11911_v44 = vld [vmem:[%s16428_s7 + $0x600] ss:$16 sps:$4 sm:$0xff]  }
 0x555   :  { %7327 = vmatpush1.bf16.msra.mxu1 %v11842_v19  ;;  %7063 = vmatprep.subr.bf16.mxu0 %v11847_v14  ;;  %v5134_v19 = vshrl.u32 %v5130_v34, 16  ;;  %v5137_v14 = vshll.u32 %v5130_v34, 16  ;;  %v11983_v34 = vld [vmem:[%s16428_s7 + $0x780] ss:$16 sps:$4 sm:$0xff]  }
 0x556   :  { %7328 = vmatprep.subr.bf16.mxu1 %v11850_v27  ;;  %v5086_v27 = vsel %vm16496_vm4, %v5077_v52, %v14750_v35  ;;  %v11991_v52 = vld [vmem:[%s16428_s7 + $0x7a4] ss:$16 sps:$4 sm:$0xff]   ;;  %vm15597_vm4 = vmor %vm7657_vm7, %vm7656_vm1 }
 0x558   :  { %7064 = vmatpush1.bf16.msra.mxu0 %v11845_v40  ;;  %v11914_v40 = vld [vmem:[%s16428_s7 + $0x608] ss:$16 sps:$4 sm:$0xff]  }
 0x559   :  { %7329 = vmatpush1.bf16.msra.mxu1 %v11848_v38  ;;  %7065 = vmatprep.subr.bf16.mxu0 %v11853_v54  ;;  %v11919_v38 = vld [vmem:[%s16428_s7 + $0x624] ss:$16 sps:$4 sm:$0xff]   ;;  %v5090_v54 = vrot.slane %v5088_v21, 2 }
 0x55a   :  { %7330 = vmatprep.subr.bf16.mxu1 %v11856_v47  ;;  %v5093_v47 = vrot.slane %v5091_v9, 3  ;;  %v11985_v21 = vld [vmem:[%s16428_s7 + $0x784] ss:$16 sps:$4 sm:$0xff]   ;;  %v11988_v9 = vld [vmem:[%s16428_s7 + $0x78c] ss:$16 sps:$4 sm:$0xff]  }
 0x55c   :  { %7066 = vmatpush1.bf16.msra.mxu0 %v11851_v12  ;;  %v5110_v12 = vsel %vm16497_vm8, %v5107_v59, %v5109_v16  ;;  %v5094_v59 = vor.u32 %v5093_v47, %v5090_v54  ;;  %v11986_v16 = vld [vmem:[%s16428_s7 + $0x788] ss:$16 sps:$4 sm:$0xff]   ;;  %vm16508_vm8 = vsmask.f32 1280 }
 0x55d   :  { %7331 = vmatpush1.bf16.msra.mxu1 %v11854_v8  ;;  %7067 = vmatprep.subr.bf16.mxu0 %v11859_v43  ;;  %v11922_v8 = vld [vmem:[%s16428_s7 + $0x62c] ss:$16 sps:$4 sm:$0xff]   ;;  %v11917_v43 = vld [vmem:[%s16428_s7 + $0x620] ss:$16 sps:$4 sm:$0xff]  }
 0x55e   :  { %7332 = vmatprep.subr.bf16.mxu1 %v11862_v31  ;;  %v5136_v31 = vrot.slane %v5134_v19, 4  ;;  %v11989_v19 = vld [vmem:[%s16428_s7 + $0x7a0] ss:$16 sps:$4 sm:$0xff]  }
 0x560   :  { %7068 = vmatpush1.bf16.msra.mxu0 %v11857_v45  ;;  %v5139_v45 = vrot.slane %v5137_v14, 5  ;;  %v5132_v14 = vld [vmem:[#allocation9 + $0x10] sm:$0x1f] }
 0x561   :  { %7333 = vmatpush1.bf16.msra.mxu1 %v11860_v18  ;;  %7069 = vmatprep.subr.bf16.mxu0 %v11865_v30  ;;  %v11925_v18 = vld [vmem:[%s16428_s7 + $0x644] ss:$16 sps:$4 sm:$0xff]   ;;  %v11928_v30 = vld [vmem:[%s16428_s7 + $0x64c] ss:$16 sps:$4 sm:$0xff]   ;;  %v5151_v54 = vshrl.u32 %v5132_v14, 16  ;;  %v5154_v47 = vshll.u32 %v5132_v14, 16 }
 0x562   :  { %7334 = vmatprep.subr.bf16.mxu1 %v11868_v63  ;;  %v11923_v63 = vld [vmem:[%s16428_s7 + $0x640] ss:$16 sps:$4 sm:$0xff]   ;;  %v12058_v14 = vld [vmem:[%s16430_s9 + $0x8] ss:$16 sps:$4 sm:$0xff]  }
 0x564   :  { %7070 = vmatpush1.bf16.msra.mxu0 %v11863_v25  ;;  %v5140_v25 = vor.u32 %v5139_v45, %v5136_v31  ;;  %v12006_v31 = vld [vmem:[%s16428_s7 + $0x7ec] ss:$16 sps:$4 sm:$0xff]  }
 0x565   :  { %7335 = vmatpush1.bf16.msra.mxu1 %v11866_v50  ;;  %7071 = vmatprep.subr.bf16.mxu0 %v11871_v11  ;;  %v5095_v50 = vsel %vm16498_vm14, %v14750_v35, %v5094_v59  ;;  %v11926_v11 = vld [vmem:[%s16428_s7 + $0x648] ss:$16 sps:$4 sm:$0xff]   ;;  %v11929_v35 = vld [vmem:[%s16428_s7 + $0x660] ss:$16 sps:$4 sm:$0xff]   ;;  %v5156_v59 = vrot.slane %v5154_v47, 5  ;;  %vm15675_vm14 = vmand %vm7574_vm6, %vm16508_vm8  ;;  %vm7580_vm6 = vcmask 1043459  }
 0x566   :  { %7336 = vmatprep.subr.bf16.mxu1 %v11874_v48  ;;  %v11931_v48 = vld [vmem:[%s16428_s7 + $0x664] ss:$16 sps:$4 sm:$0xff]   ;;  %v15332_v45 = vld [vmem:[#allocation9 + $0x8] sm:$0xff]  ;;  %vm7659_vm7 = vmand %vm7580_vm6, %vm16518_vm10 }
 0x567   :  { %vm7660_vm1 = vmor %vm7659_vm7, %vm15597_vm4  ;;  %vm9961_vm4 = vcmask 74752  }
 0x568   :  { %7072 = vmatpush1.bf16.msra.mxu0 %v11869_v62  ;;  %v5149_v62 = vsel %vm16499_vm5, %v5140_v25, %v14759_v23  ;;  %v12009_v25 = vld [vmem:[%s16428_s7 + $0x804] ss:$16 sps:$4 sm:$0xff]   ;;  %vm16511_vm5 = vsmask.f32 256 }
 0x569   :  { %7337 = vmatpush1.bf16.msra.mxu1 %v11872_v60  ;;  %7073 = vmatprep.subr.bf16.mxu0 %v11877_v4  ;;  %v11934_v60 = vld [vmem:[%s16428_s7 + $0x66c] ss:$16 sps:$4 sm:$0xff]   ;;  %v11932_v4 = vld [vmem:[%s16428_s7 + $0x668] ss:$16 sps:$4 sm:$0xff]  }
 0x56a   :  { %7338 = vmatprep.subr.bf16.mxu1 %v11880_v61  ;;  %v11937_v61 = vld [vmem:[%s16428_s7 + $0x684] ss:$16 sps:$4 sm:$0xff]  }
 0x56c   :  { %7074 = vmatpush1.bf16.msra.mxu0 %v11875_v13  ;;  %v11940_v13 = vld [vmem:[%s16428_s7 + $0x68c] ss:$16 sps:$4 sm:$0xff]  }
 0x56d   :  { %7339 = vmatpush1.bf16.msra.mxu1 %v11878_v10  ;;  %7075 = vmatprep.subr.bf16.mxu0 %v11883_v28  ;;  %v11935_v10 = vld [vmem:[%s16428_s7 + $0x680] ss:$16 sps:$4 sm:$0xff]   ;;  %v11938_v28 = vld [vmem:[%s16428_s7 + $0x688] ss:$16 sps:$4 sm:$0xff]  }
 0x56e   :  { %7340 = vmatprep.subr.bf16.mxu1 %v11886_v2  ;;  %v11943_v2 = vld [vmem:[%s16428_s7 + $0x6a4] ss:$16 sps:$4 sm:$0xff]  }
 0x570   :  { %7076 = vmatpush1.bf16.msra.mxu0 %v11881_v58  ;;  %v11946_v58 = vld [vmem:[%s16428_s7 + $0x6ac] ss:$16 sps:$4 sm:$0xff]  }
 0x571   :  { %7341 = vmatpush1.bf16.msra.mxu1 %v11884_v20  ;;  %7077 = vmatprep.subr.bf16.mxu0 %v11889_v32  ;;  %v11941_v20 = vld [vmem:[%s16428_s7 + $0x6a0] ss:$16 sps:$4 sm:$0xff]   ;;  %v11944_v32 = vld [vmem:[%s16428_s7 + $0x6a8] ss:$16 sps:$4 sm:$0xff]  }
 0x572   :  { %7342 = vmatprep.subr.bf16.mxu1 %v11892_v36  ;;  %v11949_v36 = vld [vmem:[%s16428_s7 + $0x6c4] ss:$16 sps:$4 sm:$0xff]  }
 0x574   :  { %7078 = vmatpush1.bf16.msra.mxu0 %v11887_v33  ;;  %v11952_v33 = vld [vmem:[%s16428_s7 + $0x6cc] ss:$16 sps:$4 sm:$0xff]  }
 0x575   :  { %7343 = vmatpush1.bf16.msra.mxu1 %v11890_v56  ;;  %7079 = vmatprep.subr.bf16.mxu0 %v11895_v3  ;;  %v11947_v56 = vld [vmem:[%s16428_s7 + $0x6c0] ss:$16 sps:$4 sm:$0xff]   ;;  %v11950_v3 = vld [vmem:[%s16428_s7 + $0x6c8] ss:$16 sps:$4 sm:$0xff]  }
 0x576   :  { %7344 = vmatprep.subr.bf16.mxu1 %v11898_v5  ;;  %v11955_v5 = vld [vmem:[%s16428_s7 + $0x6e4] ss:$16 sps:$4 sm:$0xff]  }
 0x578   :  { %7080 = vmatpush1.bf16.msra.mxu0 %v11893_v39  ;;  %v11958_v39 = vld [vmem:[%s16428_s7 + $0x6ec] ss:$16 sps:$4 sm:$0xff]  }
 0x579   :  { %7345 = vmatpush1.bf16.msra.mxu1 %v11896_v49  ;;  %7081 = vmatprep.subr.bf16.mxu0 %v11901_v1  ;;  %v11953_v49 = vld [vmem:[%s16428_s7 + $0x6e0] ss:$16 sps:$4 sm:$0xff]   ;;  %v11956_v1 = vld [vmem:[%s16428_s7 + $0x6e8] ss:$16 sps:$4 sm:$0xff]  }
 0x57a   :  { %7346 = vmatprep.subr.bf16.mxu1 %v11904_v42  ;;  %v11964_v42 = vld [vmem:[%s16428_s7 + $0x70c] ss:$16 sps:$4 sm:$0xff]  }
 0x57c   :  { %7082 = vmatpush1.bf16.msra.mxu0 %v11899_v51  ;;  %v11959_v51 = vld [vmem:[%s16428_s7 + $0x700] ss:$16 sps:$4 sm:$0xff]  }
 0x57d   :  { %7347 = vmatpush1.bf16.msra.mxu1 %v11902_v24  ;;  %7083 = vmatprep.subr.bf16.mxu0 %v11907_v22  ;;  %v11970_v24 = vld [vmem:[%s16428_s7 + $0x72c] ss:$16 sps:$4 sm:$0xff]   ;;  %v11965_v22 = vld [vmem:[%s16428_s7 + $0x720] ss:$16 sps:$4 sm:$0xff]  }
 0x57e   :  { %7348 = vmatprep.subr.bf16.mxu1 %v11910_v7  ;;  %v11968_v7 = vld [vmem:[%s16428_s7 + $0x728] ss:$16 sps:$4 sm:$0xff]  }
 0x580   :  { %7084 = vmatpush1.bf16.msra.mxu0 %v11905_v53  ;;  %v11976_v53 = vld [vmem:[%s16428_s7 + $0x74c] ss:$16 sps:$4 sm:$0xff]  }
 0x581   :  { %7349 = vmatpush1.bf16.msra.mxu1 %v11908_v15  ;;  %7106 = vmatprep.subr.bf16.mxu0 %v11913_v29  ;;  %v11982_v15 = vld [vmem:[%s16428_s7 + $0x76c] ss:$16 sps:$4 sm:$0xff]   ;;  %v11977_v29 = vld [vmem:[%s16428_s7 + $0x760] ss:$16 sps:$4 sm:$0xff]  }
 0x582   :  { %7371 = vmatprep.subr.bf16.mxu1 %v11916_v57  ;;  %v11980_v57 = vld [vmem:[%s16428_s7 + $0x768] ss:$16 sps:$4 sm:$0xff]  }
 0x583   :  { %7086 = vmatmul.mubr.bf16.vlgmr.msra.gmra.mrb[116].mxu0 %v5086_v27 }
 0x584   :  { %7351 = vmatmul.mubr.bf16.vlgmr.msra.gmra.mrb[112].mxu1 %v5086_v27  ;;  %7095 = vmatprep.mubr.bf16.mxu0 %v5110_v12  ;;  %v11992_v27 = vld [vmem:[%s16428_s7 + $0x7a8] ss:$16 sps:$4 sm:$0xff]  }
 0x585   :  { %7107 = vmatpush1.bf16.msra.mxu0 %v11911_v44  ;;  %7360 = vmatprep.mubr.bf16.mxu1 %v5110_v12  ;;  %v11994_v44 = vld [vmem:[%s16428_s7 + $0x7ac] ss:$16 sps:$4 sm:$0xff]   ;;  %v11995_v12 = vld [vmem:[%s16428_s7 + $0x7c0] ss:$16 sps:$4 sm:$0xff]  }
 0x586   :  { %7372 = vmatpush1.bf16.msra.mxu1 %v11914_v40  ;;  %7108 = vmatprep.subr.bf16.mxu0 %v11919_v38  ;;  %v11997_v40 = vld [vmem:[%s16428_s7 + $0x7c4] ss:$16 sps:$4 sm:$0xff]   ;;  %v12000_v38 = vld [vmem:[%s16428_s7 + $0x7cc] ss:$16 sps:$4 sm:$0xff]  }
 0x587   :  { %7373 = vmatprep.subr.bf16.mxu1 %v11922_v8  ;;  %v11998_v8 = vld [vmem:[%s16428_s7 + $0x7c8] ss:$16 sps:$4 sm:$0xff]  }
 0x589   :  { %7109 = vmatpush1.bf16.msra.mxu0 %v11917_v43  ;;  %v12003_v43 = vld [vmem:[%s16428_s7 + $0x7e4] ss:$16 sps:$4 sm:$0xff]  }
 0x58a   :  { %7374 = vmatpush1.bf16.msra.mxu1 %v11920_v17  ;;  %7110 = vmatprep.subr.bf16.mxu0 %v11925_v18  ;;  %v5153_v17 = vrot.slane %v5151_v54, 4  ;;  %v12001_v18 = vld [vmem:[%s16428_s7 + $0x7e0] ss:$16 sps:$4 sm:$0xff]  }
 0x58b   :  { %7096 = vmatmul.mubr.bf16.gmra.mrb[120].mxu0 %v5095_v50  ;;  %7375 = vmatprep.subr.bf16.mxu1 %v11928_v30  ;;  %v12004_v30 = vld [vmem:[%s16428_s7 + $0x7e8] ss:$16 sps:$4 sm:$0xff]   ;;  %v12061_v54 = vld [vmem:[%s16430_s9 + $0x20] ss:$16 sps:$4 sm:$0xff]  }
 0x58c   :  { %7361 = vmatmul.mubr.bf16.gmra.mrb[116].mxu1 %v5095_v50  ;;  %7138 = vmatprep.mubr.bf16.mxu0 %v5149_v62  ;;  %v5122_v50 = vrot.slane %v15332_v45, 4 }
 0x58d   :  { %7111 = vmatpush1.bf16.msra.mxu0 %v11923_v63  ;;  %7403 = vmatprep.mubr.bf16.mxu1 %v5149_v62  ;;  %v5115_v63 = vld [vmem:[#allocation9] sm:$0xf0] }
 0x58e   :  { %7376 = vmatpush1.bf16.msra.mxu1 %v11926_v11  ;;  %7112 = vmatprep.subr.bf16.mxu0 %v11931_v48  ;;  %v12012_v11 = vld [vmem:[%s16428_s7 + $0x80c] ss:$16 sps:$4 sm:$0xff]   ;;  %v5157_v48 = vor.u32 %v5156_v59, %v5153_v17  ;;  %v5121_v62 = vrot.slane %v5115_v63, 4  ;;  %v12070_v17 = vld [vmem:[%s16430_s9 + $0x48] ss:$16 sps:$4 sm:$0xff]  }
 0x58f   :  { %7377 = vmatprep.subr.bf16.mxu1 %v11934_v60  ;;  %v12007_v60 = vld [vmem:[%s16428_s7 + $0x800] ss:$16 sps:$4 sm:$0xff]   ;;  %v12075_v59 = vld [vmem:[%s16430_s9 + $0x64] ss:$16 sps:$4 sm:$0xff]   ;;  %v12076_v63 = vld [vmem:[%s16430_s9 + $0x68] ss:$16 sps:$4 sm:$0xff]  }
 0x591   :  { %7113 = vmatpush1.bf16.msra.mxu0 %v11929_v35  ;;  %v5123_v35 = vsel %vm4152_vm11, %v5121_v62, %v5122_v50  ;;  %v12087_v62 = vld [vmem:[%s16430_s9 + $0xa4] ss:$16 sps:$4 sm:$0xff]  }
 0x592   :  { %7378 = vmatpush1.bf16.msra.mxu1 %v11932_v4  ;;  %7114 = vmatprep.subr.bf16.mxu0 %v11937_v61  ;;  %v12010_v4 = vld [vmem:[%s16428_s7 + $0x808] ss:$16 sps:$4 sm:$0xff]   ;;  %v12015_v61 = vld [vmem:[%s16428_s7 + $0x824] ss:$16 sps:$4 sm:$0xff]  }
 0x593   :  { %7379 = vmatprep.subr.bf16.mxu1 %v11940_v13  ;;  %v5158_v13 = vsel %vm16500_vm0, %v14759_v23, %v5157_v48  ;;  %v12084_v48 = vld [vmem:[%s16430_s9 + $0x8c] ss:$16 sps:$4 sm:$0xff]   ;;  %vm15681_vm0 = vmand %vm4309_vm2, %vm16511_vm5 }
 0x594   :  { %vm7576_vm2 = vmor %vm15675_vm14, %vm15681_vm0 }
 0x595   :  { %7115 = vmatpush1.bf16.msra.mxu0 %v11935_v10  ;;  %v12018_v10 = vld [vmem:[%s16428_s7 + $0x82c] ss:$16 sps:$4 sm:$0xff]  }
 0x596   :  { %7380 = vmatpush1.bf16.msra.mxu1 %v11938_v28  ;;  %7116 = vmatprep.subr.bf16.mxu0 %v11943_v2  ;;  %v5117_v28 = vld [vmem:[#allocation9 + $0x10] sm:$0xf]  ;;  %v12013_v2 = vld [vmem:[%s16428_s7 + $0x820] ss:$16 sps:$4 sm:$0xff]  }
 0x597   :  { %7381 = vmatprep.subr.bf16.mxu1 %v11946_v58  ;;  %v12016_v58 = vld [vmem:[%s16428_s7 + $0x828] ss:$16 sps:$4 sm:$0xff]   ;;  %v5124_v23 = vrot.slane %v5117_v28, 4  ;;  %v12096_v28 = vld [vmem:[%s16430_s9 + $0xcc] ss:$16 sps:$4 sm:$0xff]  }
 0x599   :  { %7117 = vmatpush1.bf16.msra.mxu0 %v11941_v20  ;;  %v12021_v20 = vld [vmem:[%s16428_s7 + $0x844] ss:$16 sps:$4 sm:$0xff]  }
 0x59a   :  { %7382 = vmatpush1.bf16.msra.mxu1 %v11944_v32  ;;  %7118 = vmatprep.subr.bf16.mxu0 %v11949_v36  ;;  %v12024_v32 = vld [vmem:[%s16428_s7 + $0x84c] ss:$16 sps:$4 sm:$0xff]   ;;  %v12019_v36 = vld [vmem:[%s16428_s7 + $0x840] ss:$16 sps:$4 sm:$0xff]  }
 0x59b   :  { %7383 = vmatprep.subr.bf16.mxu1 %v11952_v33  ;;  %v5125_v33 = vsel %vm4152_vm11, %v5122_v50, %v5124_v23  ;;  %vm5169_vm11 = vcmask 1042432   ;;  %v12081_v50 = vld [vmem:[%s16430_s9 + $0x84] ss:$16 sps:$4 sm:$0xff]   ;;  %v12097_v23 = vld [vmem:[%s16430_s9 + $0xe0] ss:$16 sps:$4 sm:$0xff]  }
 0x59d   :  { %7119 = vmatpush1.bf16.msra.mxu0 %v11947_v56  ;;  %v12022_v56 = vld [vmem:[%s16428_s7 + $0x848] ss:$16 sps:$4 sm:$0xff]  }
 0x59e   :  { %7384 = vmatpush1.bf16.msra.mxu1 %v11950_v3  ;;  %7120 = vmatprep.subr.bf16.mxu0 %v11955_v5  ;;  %v12027_v3 = vld [vmem:[%s16428_s7 + $0x864] ss:$16 sps:$4 sm:$0xff]   ;;  %v12030_v5 = vld [vmem:[%s16428_s7 + $0x86c] ss:$16 sps:$4 sm:$0xff]  }
 0x59f   :  { %7385 = vmatprep.subr.bf16.mxu1 %v11958_v39  ;;  %v12475_v39 = vld [vmem:[#allocation9 + $0x10] sm:$0xff] }
 0x5a1   :  { %7121 = vmatpush1.bf16.msra.mxu0 %v11953_v49  ;;  %v12025_v49 = vld [vmem:[%s16428_s7 + $0x860] ss:$16 sps:$4 sm:$0xff]  }
 0x5a2   :  { %7386 = vmatpush1.bf16.msra.mxu1 %v11956_v1  ;;  %7122 = vmatprep.subr.bf16.mxu0 %v11961_v6  ;;  %v12028_v1 = vld [vmem:[%s16428_s7 + $0x868] ss:$16 sps:$4 sm:$0xff]   ;;  %v12033_v6 = vld [vmem:[%s16428_s7 + $0x884] ss:$16 sps:$4 sm:$0xff]  }
 0x5a3   :  { %7387 = vmatprep.subr.bf16.mxu1 %v11964_v42  ;;  %v12036_v42 = vld [vmem:[%s16428_s7 + $0x88c] ss:$16 sps:$4 sm:$0xff]  }
 0x5a5   :  { %7123 = vmatpush1.bf16.msra.mxu0 %v11959_v51  ;;  %v12031_v51 = vld [vmem:[%s16428_s7 + $0x880] ss:$16 sps:$4 sm:$0xff]  }
 0x5a6   :  { %7388 = vmatpush1.bf16.msra.mxu1 %v11962_v37  ;;  %7124 = vmatprep.subr.bf16.mxu0 %v11967_v0  ;;  %v12034_v37 = vld [vmem:[%s16428_s7 + $0x888] ss:$16 sps:$4 sm:$0xff]   ;;  %v12039_v0 = vld [vmem:[%s16428_s7 + $0x8a4] ss:$16 sps:$4 sm:$0xff]  }
 0x5a7   :  { %7389 = vmatprep.subr.bf16.mxu1 %v11970_v24  ;;  %v12042_v24 = vld [vmem:[%s16428_s7 + $0x8ac] ss:$16 sps:$4 sm:$0xff]  }
 0x5a9   :  { %7125 = vmatpush1.bf16.msra.mxu0 %v11965_v22  ;;  %v12037_v22 = vld [vmem:[%s16428_s7 + $0x8a0] ss:$16 sps:$4 sm:$0xff]  }
 0x5aa   :  { %7390 = vmatpush1.bf16.msra.mxu1 %v11968_v7  ;;  %7126 = vmatprep.subr.bf16.mxu0 %v11973_v55  ;;  %v12040_v7 = vld [vmem:[%s16428_s7 + $0x8a8] ss:$16 sps:$4 sm:$0xff]   ;;  %v12045_v55 = vld [vmem:[%s16428_s7 + $0x8c4] ss:$16 sps:$4 sm:$0xff]  }
 0x5ab   :  { %7391 = vmatprep.subr.bf16.mxu1 %v11976_v53  ;;  %v12048_v53 = vld [vmem:[%s16428_s7 + $0x8cc] ss:$16 sps:$4 sm:$0xff]  }
 0x5ad   :  { %7127 = vmatpush1.bf16.msra.mxu0 %v11971_v41  ;;  %v12043_v41 = vld [vmem:[%s16428_s7 + $0x8c0] ss:$16 sps:$4 sm:$0xff]  }
 0x5ae   :  { %7392 = vmatpush1.bf16.msra.mxu1 %v11974_v46  ;;  %7128 = vmatprep.subr.bf16.mxu0 %v11979_v26  ;;  %v12046_v46 = vld [vmem:[%s16428_s7 + $0x8c8] ss:$16 sps:$4 sm:$0xff]   ;;  %v12051_v26 = vld [vmem:[%s16428_s7 + $0x8e4] ss:$16 sps:$4 sm:$0xff]  }
 0x5af   :  { %7393 = vmatprep.subr.bf16.mxu1 %v11982_v15  ;;  %v12054_v15 = vld [vmem:[%s16428_s7 + $0x8ec] ss:$16 sps:$4 sm:$0xff]  }
 0x5b1   :  { %7129 = vmatpush1.bf16.msra.mxu0 %v11977_v29  ;;  %v12049_v29 = vld [vmem:[%s16428_s7 + $0x8e0] ss:$16 sps:$4 sm:$0xff]  }
 0x5b2   :  { %7394 = vmatpush1.bf16.msra.mxu1 %v11980_v57  ;;  %7130 = vmatprep.subr.bf16.mxu0 %v11985_v21  ;;  %v12052_v57 = vld [vmem:[%s16428_s7 + $0x8e8] ss:$16 sps:$4 sm:$0xff]  }
 0x5b3   :  { %7395 = vmatprep.subr.bf16.mxu1 %v11988_v9  ;;  %v5163_v21 = vld [vmem:[#allocation9] sm:$0xe0]  ;;  %v12057_v9 = vld [vmem:[%s16430_s9 + $0x4] ss:$16 sps:$4 sm:$0xff]  }
 0x5b5   :  { %7131 = vmatpush1.bf16.msra.mxu0 %v11983_v34  ;;  %v5171_v34 = vrot.slane %v15332_v45, 5 }
 0x5b6   :  { %7396 = vmatpush1.bf16.msra.mxu1 %v11986_v16  ;;  %7132 = vmatprep.subr.bf16.mxu0 %v11991_v52  ;;  %v12060_v16 = vld [vmem:[%s16430_s9 + $0xc] ss:$16 sps:$4 sm:$0xff]   ;;  %v5170_v52 = vrot.slane %v5163_v21, 5  ;;  %v12136_v21 = vld [vmem:[%s16430_s9 + $0x1a8] ss:$16 sps:$4 sm:$0xff]  }
 0x5b7   :  { %7397 = vmatprep.subr.bf16.mxu1 %v11994_v44  ;;  %v12055_v44 = vld [vmem:[%s16430_s9] ss:$16 sps:$4 sm:$0xff]  }
 0x5b9   :  { %7133 = vmatpush1.bf16.msra.mxu0 %v11989_v19  ;;  %v5172_v19 = vsel %vm5169_vm11, %v5170_v52, %v5171_v34  ;;  %v12142_v52 = vld [vmem:[%s16430_s9 + $0x1c8] ss:$16 sps:$4 sm:$0xff]  }
 0x5ba   :  { %7398 = vmatpush1.bf16.msra.mxu1 %v11992_v27  ;;  %7134 = vmatprep.subr.bf16.mxu0 %v11997_v40  ;;  %v12063_v27 = vld [vmem:[%s16430_s9 + $0x24] ss:$16 sps:$4 sm:$0xff]  }
 0x5bb   :  { %7399 = vmatprep.subr.bf16.mxu1 %v12000_v38  ;;  %v5165_v40 = vld [vmem:[#allocation9 + $0x10] sm:$0x1f]  ;;  %v12066_v38 = vld [vmem:[%s16430_s9 + $0x2c] ss:$16 sps:$4 sm:$0xff]  }
 0x5bc   :  { %v5173_v47 = vrot.slane %v5165_v40, 5  ;;  %v12153_v40 = vld [vmem:[%s16430_s9 + $0x204] ss:$16 sps:$4 sm:$0xff]  }
 0x5bd   :  { %7135 = vmatpush1.bf16.msra.mxu0 %v11995_v12  ;;  %v12064_v12 = vld [vmem:[%s16430_s9 + $0x28] ss:$16 sps:$4 sm:$0xff]  }
 0x5be   :  { %7400 = vmatpush1.bf16.msra.mxu1 %v11998_v8  ;;  %7136 = vmatprep.subr.bf16.mxu0 %v12003_v43  ;;  %v12069_v8 = vld [vmem:[%s16430_s9 + $0x44] ss:$16 sps:$4 sm:$0xff]   ;;  %v12072_v43 = vld [vmem:[%s16430_s9 + $0x4c] ss:$16 sps:$4 sm:$0xff]   ;;  %v5174_v45 = vsel %vm5169_vm11, %v5171_v34, %v5173_v47  ;;  %vm16514_vm11 = vsmask.f32 2304 }
 0x5bf   :  { %7401 = vmatprep.subr.bf16.mxu1 %v12006_v31  ;;  %v12067_v31 = vld [vmem:[%s16430_s9 + $0x40] ss:$16 sps:$4 sm:$0xff]   ;;  %v12144_v34 = vld [vmem:[%s16430_s9 + $0x1cc] ss:$16 sps:$4 sm:$0xff]   ;;  %vm15687_vm13 = vmand %vm7577_vm9, %vm16514_vm11  ;;  %vm16517_vm9 = vsmask.f32 3328 }
 0x5c0   :  { %vm7579_vm15 = vmor %vm15687_vm13, %vm7576_vm2 }
 0x5c1   :  { %7137 = vmatpush1.bf16.msra.mxu0 %v12001_v18  ;;  %v12078_v18 = vld [vmem:[%s16430_s9 + $0x6c] ss:$16 sps:$4 sm:$0xff]   ;;  %vm7581_vm12 = vmand %vm7580_vm6, %vm16517_vm9 }
 0x5c2   :  { %7402 = vmatpush1.bf16.msra.mxu1 %v12004_v30  ;;  %7159 = vmatprep.subr.bf16.mxu0 %v12009_v25  ;;  %v12073_v30 = vld [vmem:[%s16430_s9 + $0x60] ss:$16 sps:$4 sm:$0xff]   ;;  %vm7582_vm3 = vmor %vm7581_vm12, %vm7579_vm15 }
 0x5c3   :  { %7424 = vmatprep.subr.bf16.mxu1 %v12012_v11  ;;  %v12079_v25 = vld [vmem:[%s16430_s9 + $0x80] ss:$16 sps:$4 sm:$0xff]   ;;  %v12082_v11 = vld [vmem:[%s16430_s9 + $0x88] ss:$16 sps:$4 sm:$0xff]  }
 0x5c4   :  { %7139 = vmatmul.mubr.bf16.vlgmr.msra.gmra.mrb[116].mxu0 %v5123_v35 }
 0x5c5   :  { %7404 = vmatmul.mubr.bf16.vlgmr.msra.gmra.mrb[112].mxu1 %v5123_v35  ;;  %7148 = vmatprep.mubr.bf16.mxu0 %v5158_v13  ;;  %v12085_v35 = vld [vmem:[%s16430_s9 + $0xa0] ss:$16 sps:$4 sm:$0xff]  }
 0x5c6   :  { %7160 = vmatpush1.bf16.msra.mxu0 %v12007_v60  ;;  %7413 = vmatprep.mubr.bf16.mxu1 %v5158_v13  ;;  %v12090_v60 = vld [vmem:[%s16430_s9 + $0xac] ss:$16 sps:$4 sm:$0xff]   ;;  %v12093_v13 = vld [vmem:[%s16430_s9 + $0xc4] ss:$16 sps:$4 sm:$0xff]  }
 0x5c7   :  { %7425 = vmatpush1.bf16.msra.mxu1 %v12010_v4  ;;  %7161 = vmatprep.subr.bf16.mxu0 %v12015_v61  ;;  %v12088_v4 = vld [vmem:[%s16430_s9 + $0xa8] ss:$16 sps:$4 sm:$0xff]   ;;  %v12091_v61 = vld [vmem:[%s16430_s9 + $0xc0] ss:$16 sps:$4 sm:$0xff]  }
 0x5c8   :  { %7426 = vmatprep.subr.bf16.mxu1 %v12018_v10  ;;  %v12094_v10 = vld [vmem:[%s16430_s9 + $0xc8] ss:$16 sps:$4 sm:$0xff]  }
 0x5ca   :  { %7162 = vmatpush1.bf16.msra.mxu0 %v12013_v2  ;;  %v12099_v2 = vld [vmem:[%s16430_s9 + $0xe4] ss:$16 sps:$4 sm:$0xff]  }
 0x5cb   :  { %7427 = vmatpush1.bf16.msra.mxu1 %v12016_v58  ;;  %7163 = vmatprep.subr.bf16.mxu0 %v12021_v20  ;;  %v12102_v58 = vld [vmem:[%s16430_s9 + $0xec] ss:$16 sps:$4 sm:$0xff]   ;;  %v12100_v20 = vld [vmem:[%s16430_s9 + $0xe8] ss:$16 sps:$4 sm:$0xff]  }
 0x5cc   :  { %7149 = vmatmul.mubr.bf16.gmra.mrb[120].mxu0 %v5125_v33  ;;  %7428 = vmatprep.subr.bf16.mxu1 %v12024_v32  ;;  %v12105_v32 = vld [vmem:[%s16430_s9 + $0x104] ss:$16 sps:$4 sm:$0xff]  }
 0x5cd   :  { %7414 = vmatmul.mubr.bf16.gmra.mrb[116].mxu1 %v5125_v33  ;;  %7191 = vmatprep.mubr.bf16.mxu0 %v12475_v39  ;;  %v12103_v33 = vld [vmem:[%s16430_s9 + $0x100] ss:$16 sps:$4 sm:$0xff]  }
 0x5ce   :  { %7164 = vmatpush1.bf16.msra.mxu0 %v12019_v36  ;;  %7456 = vmatprep.mubr.bf16.mxu1 %v12475_v39  ;;  %v12108_v36 = vld [vmem:[%s16430_s9 + $0x10c] ss:$16 sps:$4 sm:$0xff]  }
 0x5cf   :  { %7429 = vmatpush1.bf16.msra.mxu1 %v12022_v56  ;;  %7165 = vmatprep.subr.bf16.mxu0 %v12027_v3  ;;  %v12106_v56 = vld [vmem:[%s16430_s9 + $0x108] ss:$16 sps:$4 sm:$0xff]   ;;  %v12111_v3 = vld [vmem:[%s16430_s9 + $0x124] ss:$16 sps:$4 sm:$0xff]  }
 0x5d0   :  { %7430 = vmatprep.subr.bf16.mxu1 %v12030_v5  ;;  %v12114_v5 = vld [vmem:[%s16430_s9 + $0x12c] ss:$16 sps:$4 sm:$0xff]  }
 0x5d2   :  { %7166 = vmatpush1.bf16.msra.mxu0 %v12025_v49  ;;  %v12112_v49 = vld [vmem:[%s16430_s9 + $0x128] ss:$16 sps:$4 sm:$0xff]  }
 0x5d3   :  { %7431 = vmatpush1.bf16.msra.mxu1 %v12028_v1  ;;  %7167 = vmatprep.subr.bf16.mxu0 %v12033_v6  ;;  %v12117_v1 = vld [vmem:[%s16430_s9 + $0x144] ss:$16 sps:$4 sm:$0xff]   ;;  %v12120_v6 = vld [vmem:[%s16430_s9 + $0x14c] ss:$16 sps:$4 sm:$0xff]  }
 0x5d4   :  { %7432 = vmatprep.subr.bf16.mxu1 %v12036_v42 }
 0x5d6   :  { %7168 = vmatpush1.bf16.msra.mxu0 %v12031_v51  ;;  %v12115_v51 = vld [vmem:[%s16430_s9 + $0x140] ss:$16 sps:$4 sm:$0xff]  }
 0x5d7   :  { %7433 = vmatpush1.bf16.msra.mxu1 %v12034_v37  ;;  %7169 = vmatprep.subr.bf16.mxu0 %v12039_v0  ;;  %v12118_v37 = vld [vmem:[%s16430_s9 + $0x148] ss:$16 sps:$4 sm:$0xff]   ;;  %v12123_v0 = vld [vmem:[%s16430_s9 + $0x164] ss:$16 sps:$4 sm:$0xff]  }
 0x5d8   :  { %7434 = vmatprep.subr.bf16.mxu1 %v12042_v24  ;;  %v12126_v24 = vld [vmem:[%s16430_s9 + $0x16c] ss:$16 sps:$4 sm:$0xff]  }
 0x5da   :  { %7170 = vmatpush1.bf16.msra.mxu0 %v12037_v22  ;;  %v12121_v22 = vld [vmem:[%s16430_s9 + $0x160] ss:$16 sps:$4 sm:$0xff]  }
 0x5db   :  { %7435 = vmatpush1.bf16.msra.mxu1 %v12040_v7  ;;  %7171 = vmatprep.subr.bf16.mxu0 %v12045_v55  ;;  %v12124_v55 = vld [vmem:[%s16430_s9 + $0x168] ss:$16 sps:$4 sm:$0xff]  }
 0x5dc   :  { %7436 = vmatprep.subr.bf16.mxu1 %v12048_v53  ;;  %v12129_v53 = vld [vmem:[%s16430_s9 + $0x184] ss:$16 sps:$4 sm:$0xff]  }
 0x5de   :  { %7172 = vmatpush1.bf16.msra.mxu0 %v12043_v41  ;;  %v12132_v41 = vld [vmem:[%s16430_s9 + $0x18c] ss:$16 sps:$4 sm:$0xff]  }
 0x5df   :  { %7437 = vmatpush1.bf16.msra.mxu1 %v12046_v46  ;;  %7173 = vmatprep.subr.bf16.mxu0 %v12051_v26  ;;  %v12127_v46 = vld [vmem:[%s16430_s9 + $0x180] ss:$16 sps:$4 sm:$0xff]   ;;  %v12130_v26 = vld [vmem:[%s16430_s9 + $0x188] ss:$16 sps:$4 sm:$0xff]  }
 0x5e0   :  { %7438 = vmatprep.subr.bf16.mxu1 %v12054_v15  ;;  %v12135_v15 = vld [vmem:[%s16430_s9 + $0x1a4] ss:$16 sps:$4 sm:$0xff]  }
 0x5e2   :  { %7174 = vmatpush1.bf16.msra.mxu0 %v12049_v29  ;;  %v12138_v29 = vld [vmem:[%s16430_s9 + $0x1ac] ss:$16 sps:$4 sm:$0xff]  }
 0x5e3   :  { %7439 = vmatpush1.bf16.msra.mxu1 %v12052_v57  ;;  %8484 = vmatprep.subr.bf16.mxu0 %v12057_v9  ;;  %v12133_v57 = vld [vmem:[%s16430_s9 + $0x1a0] ss:$16 sps:$4 sm:$0xff]   ;;  %v12141_v9 = vld [vmem:[%s16430_s9 + $0x1c4] ss:$16 sps:$4 sm:$0xff]  }
 0x5e4   :  { %8566 = vmatprep.subr.bf16.mxu1 %v12060_v16  ;;  %v12139_v16 = vld [vmem:[%s16430_s9 + $0x1c0] ss:$16 sps:$4 sm:$0xff]  }
 0x5e5   :  { %7192 = vmatmul.mubr.bf16.vlgmr.msra.gmra.mrb[116].mxu0 %v5172_v19 }
 0x5e6   :  { %7457 = vmatmul.mubr.bf16.vlgmr.msra.gmra.mrb[112].mxu1 %v5172_v19  ;;  %7201 = vmatprep.mubr.bf16.mxu0 %v12475_v39  ;;  %v12150_v19 = vld [vmem:[%s16430_s9 + $0x1ec] ss:$16 sps:$4 sm:$0xff]  }
 0x5e7   :  { %7466 = vmatprep.mubr.bf16.mxu1 %v12475_v39  ;;  %8485 = vmatpush1.bf16.msra.mxu0 %v12055_v44  ;;  %v12109_v39 = vld [vmem:[%s16430_s9 + $0x120] ss:$16 sps:$4 sm:$0xff]   ;;  %v12147_v44 = vld [vmem:[%s16430_s9 + $0x1e4] ss:$16 sps:$4 sm:$0xff]  }
 0x5e8   :  { %8567 = vmatpush1.bf16.msra.mxu1 %v12058_v14  ;;  %8486 = vmatprep.subr.bf16.mxu0 %v12063_v27  ;;  %v12145_v14 = vld [vmem:[%s16430_s9 + $0x1e0] ss:$16 sps:$4 sm:$0xff]   ;;  %v12148_v27 = vld [vmem:[%s16430_s9 + $0x1e8] ss:$16 sps:$4 sm:$0xff]  }
 0x5e9   :  { %8568 = vmatprep.subr.bf16.mxu1 %v12066_v38  ;;  %v12156_v38 = vld [vmem:[%s16430_s9 + $0x20c] ss:$16 sps:$4 sm:$0xff]  }
 0x5eb   :  { %8487 = vmatpush1.bf16.msra.mxu0 %v12061_v54  ;;  %v5487_v54 = vlaneseq }
 0x5ec   :  { %8569 = vmatpush1.bf16.msra.mxu1 %v12064_v12  ;;  %8488 = vmatprep.subr.bf16.mxu0 %v12069_v8  ;;  %v5485_v8 = vld [vmem:[%s16429_s8] sm:$0xf] }
 0x5ed   :  { %7202 = vmatmul.mubr.bf16.gmra.mrb[120].mxu0 %v5174_v45  ;;  %8570 = vmatprep.subr.bf16.mxu1 %v12072_v43  ;;  %v5488_v47 = vshrl.u32 %v5487_v54, 7 }
 0x5ee   :  { %7467 = vmatmul.mubr.bf16.gmra.mrb[116].mxu1 %v5174_v45 }
 0x5ef   :  { %8489 = vmatpush1.bf16.msra.mxu0 %v12067_v31  ;;  %v15658_v12 = vsub.s32 0, %v5488_v47  ;;  %v15663_v43 = vsub.s32 2, %v5488_v47  ;;  %v15665_v31 = vsub.s32 1, %v5488_v47  ;;  %v15667_v45 = vsub.s32 3, %v5488_v47 }
 0x5f0   :  { %8571 = vmatpush1.bf16.msra.mxu1 %v12070_v17  ;;  %8490 = vmatprep.subr.bf16.mxu0 %v12075_v59 }
 0x5f1   :  { %8572 = vmatprep.subr.bf16.mxu1 %v12078_v18  ;;  %v5490_v17 = vrot.slane %v5485_v8, %v15658_v12  ;;  %v5498_v59 = vrot.slane %v5485_v8, %v15663_v43  ;;  %v5494_v18 = vrot.slane %v5485_v8, %v15665_v31 }
 0x5f3   :  { %8491 = vmatpush1.bf16.msra.mxu0 %v12073_v30  ;;  %v5502_v30 = vrot.slane %v5485_v8, %v15667_v45 }
 0x5f4   :  { %8573 = vmatpush1.bf16.msra.mxu1 %v12076_v63  ;;  %8492 = vmatprep.subr.bf16.mxu0 %v12081_v50 }
 0x5f5   :  { %8574 = vmatprep.subr.bf16.mxu1 %v12084_v48 }
 0x5f7   :  { %8493 = vmatpush1.bf16.msra.mxu0 %v12079_v25 }
 0x5f8   :  { %8575 = vmatpush1.bf16.msra.mxu1 %v12082_v11  ;;  %8494 = vmatprep.subr.bf16.mxu0 %v12087_v62 }
 0x5f9   :  { %8576 = vmatprep.subr.bf16.mxu1 %v12090_v60 }
 0x5fb   :  { %8495 = vmatpush1.bf16.msra.mxu0 %v12085_v35 }
 0x5fc   :  { %8577 = vmatpush1.bf16.msra.mxu1 %v12088_v4  ;;  %8496 = vmatprep.subr.bf16.mxu0 %v12093_v13 }
 0x5fd   :  { %8578 = vmatprep.subr.bf16.mxu1 %v12096_v28 }
 0x5ff   :  { %8497 = vmatpush1.bf16.msra.mxu0 %v12091_v61 }
 0x600   :  { %8579 = vmatpush1.bf16.msra.mxu1 %v12094_v10  ;;  %8498 = vmatprep.subr.bf16.mxu0 %v12099_v2 }
 0x601   :  { %8580 = vmatprep.subr.bf16.mxu1 %v12102_v58 }
 0x603   :  { %8499 = vmatpush1.bf16.msra.mxu0 %v12097_v23 }
 0x604   :  { %8581 = vmatpush1.bf16.msra.mxu1 %v12100_v20  ;;  %8500 = vmatprep.subr.bf16.mxu0 %v12105_v32 }
 0x605   :  { %8582 = vmatprep.subr.bf16.mxu1 %v12108_v36 }
 0x607   :  { %8501 = vmatpush1.bf16.msra.mxu0 %v12103_v33 }
 0x608   :  { %8583 = vmatpush1.bf16.msra.mxu1 %v12106_v56  ;;  %8502 = vmatprep.subr.bf16.mxu0 %v12111_v3 }
 0x609   :  { %8584 = vmatprep.subr.bf16.mxu1 %v12114_v5 }
 0x60b   :  { %8503 = vmatpush1.bf16.msra.mxu0 %v12109_v39 }
 0x60c   :  { %8585 = vmatpush1.bf16.msra.mxu1 %v12112_v49  ;;  %8504 = vmatprep.subr.bf16.mxu0 %v12117_v1 }
 0x60d   :  { %8586 = vmatprep.subr.bf16.mxu1 %v12120_v6 }
 0x60f   :  { %8505 = vmatpush1.bf16.msra.mxu0 %v12115_v51  ;;  %v12507_v51 = vmov 1966171168  }
 0x610   :  { %8587 = vmatpush1.bf16.msra.mxu1 %v12118_v37  ;;  %8506 = vmatprep.subr.bf16.mxu0 %v12123_v0  ;;  %v7551_v37 = vunpack.c.l.s4 %v12507_v51  ;;  %v12160_v51 = vld [vmem:[%s16430_s9 + $0x228] ss:$16 sps:$4 sm:$0xff]  }
 0x611   :  { %8588 = vmatprep.subr.bf16.mxu1 %v12126_v24 }
 0x613   :  { %8507 = vmatpush1.bf16.msra.mxu0 %v12121_v22 }
 0x614   :  { %8589 = vmatpush1.bf16.msra.mxu1 %v12124_v55  ;;  %8508 = vmatprep.subr.bf16.mxu0 %v12129_v53 }
 0x615   :  { %8590 = vmatprep.subr.bf16.mxu1 %v12132_v41 }
 0x617   :  { %8509 = vmatpush1.bf16.msra.mxu0 %v12127_v46 }
 0x618   :  { %8591 = vmatpush1.bf16.msra.mxu1 %v12130_v26  ;;  %8510 = vmatprep.subr.bf16.mxu0 %v12135_v15 }
 0x619   :  { %8592 = vmatprep.subr.bf16.mxu1 %v12138_v29  ;;  %v7552_v29 = vunpack.c.0.s8 %v7551_v37  ;;  %v12165_v37 = vld [vmem:[%s16430_s9 + $0x244] ss:$16 sps:$4 sm:$0xff]  }
 0x61b   :  { %8511 = vmatpush1.bf16.msra.mxu0 %v12133_v57 }
 0x61c   :  { %8593 = vmatpush1.bf16.msra.mxu1 %v12136_v21  ;;  %8512 = vmatprep.subr.bf16.mxu0 %v12141_v9  ;;  %v12183_v21 = vld [vmem:[%s16430_s9 + $0x2a4] ss:$16 sps:$4 sm:$0xff]  }
 0x61d   :  { %8594 = vmatprep.subr.bf16.mxu1 %v12144_v34  ;;  %v12181_v34 = vld [vmem:[%s16430_s9 + $0x2a0] ss:$16 sps:$4 sm:$0xff]  }
 0x61f   :  { %8513 = vmatpush1.bf16.msra.mxu0 %v12139_v16  ;;  %v7555_v16 = vsub.s32 %v7552_v29, %v5488_v47  ;;  %v12175_v29 = vld [vmem:[%s16430_s9 + $0x280] ss:$16 sps:$4 sm:$0xff]  }
 0x620   :  { %8595 = vmatpush1.bf16.msra.mxu1 %v12142_v52  ;;  %8514 = vmatprep.subr.bf16.mxu0 %v12147_v44  ;;  %v12189_v52 = vld [vmem:[%s16430_s9 + $0x2c4] ss:$16 sps:$4 sm:$0xff]  }
 0x621   :  { %8596 = vmatprep.subr.bf16.mxu1 %v12150_v19 }
 0x623   :  { %8515 = vmatpush1.bf16.msra.mxu0 %v12145_v14 }
 0x624   :  { %8597 = vmatpush1.bf16.msra.mxu1 %v12148_v27  ;;  %8525 = vmatprep.subr.bf16.mxu0 %v12153_v40 }
 0x625   :  { %8607 = vmatprep.subr.bf16.mxu1 %v12156_v38 }
 0x6b8   :  { %v7193_v63 = vpop.f32.mrb[116].mxu0 }
 0x6b9   :  { %v11297_v25 = vadd.f32 %v7193_v63, %v5490_v17  ;;  %v7458_v50 = vpop.f32.mrb[112].mxu1  ;;  %v7195_v11 = vpop.f32.mrb[117].mxu0 }
 0x6ba   :  { %v11305_v48 = vadd.f32 %v7458_v50, %v5498_v59  ;;  %v11298_v62 = vadd.f32 %v7195_v11, %v5494_v18  ;;  %v7460_v60 = vpop.f32.mrb[113].mxu1  ;;  %v7197_v35 = vpop.f32.mrb[118].mxu0 }
 0x6bb   :  { %v7477_v4 = vmax.f32 %v11297_v25, 0.0  ;;  %v11306_v61 = vadd.f32 %v7460_v60, %v5502_v30  ;;  %v7462_v13 = vpop.f32.mrb[114].mxu1  ;;  %v7199_v10 = vpop.f32.mrb[119].mxu0  ;;  %v7583_v35 = vld [vmem:[#allocation12] sm:$0xf] }
 0x6bc   :  { %v7479_v28 = vmax.f32 %v11305_v48, 0.0  ;;  %v7478_v2 = vmax.f32 %v11298_v62, 0.0  ;;  %v7464_v58 = vpop.f32.mrb[115].mxu1 }
 0x6bd   :  { %7493 = vst [vmem:[#allocation11] sm:$0xff] %v7477_v4  ;;  %v7480_v23 = vmax.f32 %v11306_v61, 0.0 }
 0x6be   :  { %7495 = vst [vmem:[#allocation11 + $0x10] sm:$0xff] %v7479_v28  ;;  %7494 = vst [vmem:[#allocation11 + $0x8] sm:$0xff] %v7478_v2 }
 0x6bf   :  { %7496 = vst [vmem:[#allocation11 + $0x18] sm:$0xff] %v7480_v23 }
 0x6c0   :  { %v7203_v20 = vpop.f32.mrb[120].mxu0 }
 0x6c1   :  { %v11301_v32 = vadd.f32 %v7203_v20, %v5490_v17  ;;  %v7468_v36 = vpop.f32.mrb[116].mxu1  ;;  %v7205_v33 = vpop.f32.mrb[121].mxu0 }
 0x6c2   :  { %v11309_v56 = vadd.f32 %v7468_v36, %v5498_v59  ;;  %v11302_v3 = vadd.f32 %v7205_v33, %v5494_v18  ;;  %v7470_v5 = vpop.f32.mrb[117].mxu1  ;;  %v7207_v39 = vpop.f32.mrb[122].mxu0 }
 0x6c3   :  { %v7485_v49 = vmax.f32 %v11301_v32, 0.0  ;;  %v11310_v1 = vadd.f32 %v7470_v5, %v5502_v30  ;;  %v7472_v6 = vpop.f32.mrb[118].mxu1  ;;  %v7209_v42 = vpop.f32.mrb[123].mxu0  ;;  %v12151_v5 = vld [vmem:[%s16430_s9 + $0x200] ss:$16 sps:$4 sm:$0xff]  }
 0x6c4   :  { %v7487_v0 = vmax.f32 %v11309_v56, 0.0  ;;  %v7486_v24 = vmax.f32 %v11302_v3, 0.0  ;;  %v7474_v22 = vpop.f32.mrb[119].mxu1  ;;  %v12154_v39 = vld [vmem:[%s16430_s9 + $0x208] ss:$16 sps:$4 sm:$0xff]  }
 0x6c5   :  { %7501 = vst [vmem:[#allocation11 + $0x40] sm:$0xff] %v7485_v49  ;;  %v7488_v55 = vmax.f32 %v11310_v1, 0.0  ;;  %v12159_v1 = vld [vmem:[%s16430_s9 + $0x224] ss:$16 sps:$4 sm:$0xff]   ;;  %v12162_v6 = vld [vmem:[%s16430_s9 + $0x22c] ss:$16 sps:$4 sm:$0xff]  }
 0x6c6   :  { %v7509_v53 = vld [vmem:[#allocation11] ss:$8 sm:$0xf]  ;;  %v7511_v41 = vld [vmem:[#allocation11 + $0x1] ss:$8 sm:$0xf] }
 0x6c7   :  { %7503 = vst [vmem:[#allocation11 + $0x50] sm:$0xff] %v7487_v0  ;;  %7502 = vst [vmem:[#allocation11 + $0x48] sm:$0xff] %v7486_v24  ;;  %v7513_v46 = vld [vmem:[#allocation11 + $0x4] ss:$8 sm:$0xf]  ;;  %v7516_v15 = vmax.f32 %v7509_v53, %v7511_v41 }
 0x6c8   :  { %v7515_v26 = vld [vmem:[#allocation11 + $0x5] ss:$8 sm:$0xf]  ;;  %7504 = vst [vmem:[#allocation11 + $0x58] sm:$0xff] %v7488_v55  ;;  %v12168_v0 = vld [vmem:[%s16430_s9 + $0x24c] ss:$16 sps:$4 sm:$0xff]  }
 0x6c9   :  { %v7517_v57 = vmax.f32 %v7513_v46, %v7515_v26  ;;  %v12157_v42 = vld [vmem:[%s16430_s9 + $0x220] ss:$16 sps:$4 sm:$0xff]   ;;  %v12166_v22 = vld [vmem:[%s16430_s9 + $0x248] ss:$16 sps:$4 sm:$0xff]   ;;  %v12171_v55 = vld [vmem:[%s16430_s9 + $0x264] ss:$16 sps:$4 sm:$0xff]  }
 0x6ca   :  { %v12163_v24 = vld [vmem:[%s16430_s9 + $0x240] ss:$16 sps:$4 sm:$0xff]   ;;  %v12174_v53 = vld [vmem:[%s16430_s9 + $0x26c] ss:$16 sps:$4 sm:$0xff]   ;;  %v12172_v46 = vld [vmem:[%s16430_s9 + $0x268] ss:$16 sps:$4 sm:$0xff]  }
 0x6cb   :  { %v7518_v9 = vmax.f32 %v7516_v15, %v7517_v57  ;;  %v12169_v41 = vld [vmem:[%s16430_s9 + $0x260] ss:$16 sps:$4 sm:$0xff]   ;;  %v12177_v26 = vld [vmem:[%s16430_s9 + $0x284] ss:$16 sps:$4 sm:$0xff]   ;;  %v12180_v15 = vld [vmem:[%s16430_s9 + $0x28c] ss:$16 sps:$4 sm:$0xff]  }
 0x6cc   :  { %v12178_v57 = vld [vmem:[%s16430_s9 + $0x288] ss:$16 sps:$4 sm:$0xff]  }
 0x6cd   :  { %v7523_v44 = vrot.slane %v7518_v9, %v15658_v12  ;;  %v7527_v19 = vrot.slane %v7518_v9, %v15665_v31  ;;  %v7531_v14 = vrot.slane %v7518_v9, %v15663_v43  ;;  %v7535_v27 = vrot.slane %v7518_v9, %v15667_v45  ;;  %v12186_v9 = vld [vmem:[%s16430_s9 + $0x2ac] ss:$16 sps:$4 sm:$0xff]  }
 0x6cf   :  { %v10547_v40 = vpack.c.bf16 %v7527_v19, %v7523_v44  ;;  %v10548_v38 = vpack.c.bf16 %v7535_v27, %v7531_v14  ;;  %v7587_v54 = vld [vmem:[#allocation11 + $0x40] ss:$8 sm:$0xf]  ;;  %v7589_v47 = vld [vmem:[#allocation11 + $0x41] ss:$8 sm:$0xf] }
 0x6d0   :  { %v7591_v8 = vld [vmem:[#allocation11 + $0x44] ss:$8 sm:$0xf]  ;;  %v7593_v17 = vld [vmem:[#allocation11 + $0x45] ss:$8 sm:$0xf]  ;;  %v7594_v59 = vmax.f32 %v7587_v54, %v7589_v47 }
 0x6d1   :  { %v7595_v18 = vmax.f32 %v7591_v8, %v7593_v17  ;;  %v7556_v30 = vrot.slane %v10547_v40, %v7555_v16  ;;  %v7563_v63 = vrot.slane %v10548_v38, %v7555_v16  ;;  %v12192_v44 = vld [vmem:[%s16430_s9 + $0x2cc] ss:$16 sps:$4 sm:$0xff]   ;;  %v12187_v19 = vld [vmem:[%s16430_s9 + $0x2c0] ss:$16 sps:$4 sm:$0xff]   ;;  %v12190_v14 = vld [vmem:[%s16430_s9 + $0x2c8] ss:$16 sps:$4 sm:$0xff]  }
 0x6d2   :  { %v12195_v27 = vld [vmem:[%s16430_s9 + $0x2e4] ss:$16 sps:$4 sm:$0xff]   ;;  %v12198_v40 = vld [vmem:[%s16430_s9 + $0x2ec] ss:$16 sps:$4 sm:$0xff]   ;;  %v12193_v38 = vld [vmem:[%s16430_s9 + $0x2e0] ss:$16 sps:$4 sm:$0xff]  }
 0x6d3   :  { %v7596_v25 = vmax.f32 %v7594_v59, %v7595_v18  ;;  %v7564_v50 = vcombine.low %v7556_v30, %v7563_v63  ;;  %v12196_v54 = vld [vmem:[%s16430_s9 + $0x2e8] ss:$16 sps:$4 sm:$0xff]   ;;  %v12201_v47 = vld [vmem:[%s16430_s9 + $0x304] ss:$16 sps:$4 sm:$0xff]   ;;  %v12204_v8 = vld [vmem:[%s16430_s9 + $0x30c] ss:$16 sps:$4 sm:$0xff]  }
 0x6d4   :  { %v12199_v17 = vld [vmem:[%s16430_s9 + $0x300] ss:$16 sps:$4 sm:$0xff]   ;;  %v12202_v59 = vld [vmem:[%s16430_s9 + $0x308] ss:$16 sps:$4 sm:$0xff]   ;;  %v12207_v18 = vld [vmem:[%s16430_s9 + $0x324] ss:$16 sps:$4 sm:$0xff]  }
 0x6d5   :  { %v7601_v11 = vrot.slane %v7596_v25, %v15658_v12  ;;  %v7605_v48 = vrot.slane %v7596_v25, %v15665_v31  ;;  %v7609_v62 = vrot.slane %v7596_v25, %v15663_v43  ;;  %v7613_v60 = vrot.slane %v7596_v25, %v15667_v45  ;;  %v12210_v30 = vld [vmem:[%s16430_s9 + $0x32c] ss:$16 sps:$4 sm:$0xff]   ;;  %v12205_v63 = vld [vmem:[%s16430_s9 + $0x320] ss:$16 sps:$4 sm:$0xff]   ;;  %v12208_v25 = vld [vmem:[%s16430_s9 + $0x328] ss:$16 sps:$4 sm:$0xff]  }
 0x6d6   :  { %v7571_v4 = vrot.slane %v7564_v50, %v7555_v16  ;;  %v12213_v50 = vld [vmem:[%s16430_s9 + $0x344] ss:$16 sps:$4 sm:$0xff]  }
 0x6d7   :  { %v10549_v61 = vpack.c.bf16 %v7605_v48, %v7601_v11  ;;  %v10550_v13 = vpack.c.bf16 %v7613_v60, %v7609_v62  ;;  %v12216_v11 = vld [vmem:[%s16430_s9 + $0x34c] ss:$16 sps:$4 sm:$0xff]   ;;  %v12211_v48 = vld [vmem:[%s16430_s9 + $0x340] ss:$16 sps:$4 sm:$0xff]   ;;  %v12214_v62 = vld [vmem:[%s16430_s9 + $0x348] ss:$16 sps:$4 sm:$0xff]  }
 0x6d8   :  { %v7584_v10 = vsel %vm7582_vm3, %v7571_v4, %v7583_v35  ;;  %v12219_v60 = vld [vmem:[%s16430_s9 + $0x364] ss:$16 sps:$4 sm:$0xff]   ;;  %v12222_v35 = vld [vmem:[%s16430_s9 + $0x36c] ss:$16 sps:$4 sm:$0xff]   ;;  %v12217_v4 = vld [vmem:[%s16430_s9 + $0x360] ss:$16 sps:$4 sm:$0xff]  }
 0x6d9   :  { %7585 = vst [vmem:[#allocation12] sm:$0xf] %v7584_v10  ;;  %v7634_v28 = vrot.slane %v10549_v61, %v7555_v16  ;;  %v7641_v2 = vrot.slane %v10550_v13, %v7555_v16  ;;  %v12220_v61 = vld [vmem:[%s16430_s9 + $0x368] ss:$16 sps:$4 sm:$0xff]   ;;  %v12225_v13 = vld [vmem:[%s16430_s9 + $0x384] ss:$16 sps:$4 sm:$0xff]  }
 0x6da   :  { %v12228_v10 = vld [vmem:[%s16430_s9 + $0x38c] ss:$16 sps:$4 sm:$0xff]  }
 0x6db   :  { %v7642_v58 = vcombine.low %v7634_v28, %v7641_v2  ;;  %v12223_v28 = vld [vmem:[%s16430_s9 + $0x380] ss:$16 sps:$4 sm:$0xff]   ;;  %v12226_v2 = vld [vmem:[%s16430_s9 + $0x388] ss:$16 sps:$4 sm:$0xff]  }
 0x6dd   :  { %v7649_v23 = vrot.slane %v7642_v58, %v7555_v16  ;;  %v12231_v58 = vld [vmem:[%s16430_s9 + $0x3a4] ss:$16 sps:$4 sm:$0xff]  }
 0x6df   :  { %v7651_v20 = vshll.u32 %v7649_v23, 16  ;;  %v12234_v23 = vld [vmem:[%s16430_s9 + $0x3ac] ss:$16 sps:$4 sm:$0xff]  }
 0x6e0   :  { %v7661_v32 = vld [vmem:[#allocation12] sm:$0xf] }
 0x6e1   :  { %v7662_v36 = vsel %vm7660_vm1, %v7651_v20, %v7661_v32  ;;  %v12229_v20 = vld [vmem:[%s16430_s9 + $0x3a0] ss:$16 sps:$4 sm:$0xff]   ;;  %v12232_v32 = vld [vmem:[%s16430_s9 + $0x3a8] ss:$16 sps:$4 sm:$0xff]  }
 0x6e2   :  { %7663 = vst [vmem:[#allocation12] sm:$0xf] %v7662_v36  ;;  %v12237_v36 = vld [vmem:[%s16430_s9 + $0x3c4] ss:$16 sps:$4 sm:$0xff]  }
 0x6e9   :  { %v10551_v33 = vld.sshfl [vmem:[#allocation12] sm:$0x33 pattern:$0x75316420] }
 0x6ea   :  { %v7823_v56 = vcombine.high %v10551_v33, %v10551_v33  ;;  %v15717_v49 = vrot.slane %v10551_v33, %v7555_v16  ;;  %v12240_v33 = vld [vmem:[%s16430_s9 + $0x3cc] ss:$16 sps:$4 sm:$0xff]  }
 0x6ec   :  { %v7837_v3 = vrot.slane %v7823_v56, %v7555_v16  ;;  %v12184_v16 = vld [vmem:[%s16430_s9 + $0x2a8] ss:$16 sps:$4 sm:$0xff]   ;;  %v12235_v56 = vld [vmem:[%s16430_s9 + $0x3c0] ss:$16 sps:$4 sm:$0xff]  }
 0x6ee   :  { %8516 = vmatprep.mubr.bf16.mxu0 %v7837_v3  ;;  %8598 = vmatprep.mubr.bf16.mxu1 %v7837_v3  ;;  %v7839_v7 = vcombine.high %v7837_v3, %v7837_v3  ;;  %v12238_v3 = vld [vmem:[%s16430_s9 + $0x3c8] ss:$16 sps:$4 sm:$0xff]  }
 0x6ef   :  { %8517 = vmatmul.mubr.bf16.vlgmr.msra.gmra.mrb[124].mxu0 %v15717_v49  ;;  %8599 = vmatmul.mubr.bf16.vlgmr.msra.gmra.mrb[120].mxu1 %v15717_v49 }
 0x6f0   :  { %8526 = vmatpush1.bf16.msra.mxu0 %v12151_v5  ;;  %8608 = vmatpush1.bf16.msra.mxu1 %v12154_v39  ;;  %v12243_v5 = vld [vmem:[%s16430_s9 + $0x3e4] ss:$16 sps:$4 sm:$0xff]   ;;  %v12246_v39 = vld [vmem:[%s16430_s9 + $0x3ec] ss:$16 sps:$4 sm:$0xff]  }
 0x6f1   :  { %8557 = vmatprep.mubr.bf16.mxu0 %v7839_v7  ;;  %8639 = vmatprep.mubr.bf16.mxu1 %v7839_v7  ;;  %v12241_v7 = vld [vmem:[%s16430_s9 + $0x3e0] ss:$16 sps:$4 sm:$0xff]  }
 0x6f2   :  { %8527 = vmatprep.subr.bf16.mxu0 %v12159_v1  ;;  %8609 = vmatprep.subr.bf16.mxu1 %v12162_v6  ;;  %v12244_v1 = vld [vmem:[%s16430_s9 + $0x3e8] ss:$16 sps:$4 sm:$0xff]   ;;  %v12249_v6 = vld [vmem:[%s16432_s11 + $0x4] ss:$16 sps:$4 sm:$0xff]  }
 0x6f4   :  { %8528 = vmatpush1.bf16.msra.mxu0 %v12157_v42  ;;  %8610 = vmatpush1.bf16.msra.mxu1 %v12160_v51  ;;  %v12252_v42 = vld [vmem:[%s16432_s11 + $0xc] ss:$16 sps:$4 sm:$0xff]   ;;  %v12247_v51 = vld [vmem:[%s16432_s11] ss:$16 sps:$4 sm:$0xff]  }
 0x6f5   :  { %8529 = vmatprep.subr.bf16.mxu0 %v12165_v37  ;;  %8611 = vmatprep.subr.bf16.mxu1 %v12168_v0  ;;  %v12250_v37 = vld [vmem:[%s16432_s11 + $0x8] ss:$16 sps:$4 sm:$0xff]   ;;  %v7838_v0 = vcombine.high %v15717_v49, %v15717_v49 }
 0x6f6   :  { %v12256_v49 = vld [vmem:[%s16432_s11 + $0x28] ss:$16 sps:$4 sm:$0xff]  }
 0x6f8   :  { %8530 = vmatpush1.bf16.msra.mxu0 %v12163_v24  ;;  %8612 = vmatpush1.bf16.msra.mxu1 %v12166_v22  ;;  %v12255_v24 = vld [vmem:[%s16432_s11 + $0x24] ss:$16 sps:$4 sm:$0xff]   ;;  %v12258_v22 = vld [vmem:[%s16432_s11 + $0x2c] ss:$16 sps:$4 sm:$0xff]  }
 0x6f9   :  { %8531 = vmatprep.subr.bf16.mxu0 %v12171_v55  ;;  %8613 = vmatprep.subr.bf16.mxu1 %v12174_v53  ;;  %v12253_v55 = vld [vmem:[%s16432_s11 + $0x20] ss:$16 sps:$4 sm:$0xff]   ;;  %v12261_v53 = vld [vmem:[%s16432_s11 + $0x44] ss:$16 sps:$4 sm:$0xff]  }
 0x6fc   :  { %8532 = vmatpush1.bf16.msra.mxu0 %v12169_v41  ;;  %8614 = vmatpush1.bf16.msra.mxu1 %v12172_v46  ;;  %v12264_v41 = vld [vmem:[%s16432_s11 + $0x4c] ss:$16 sps:$4 sm:$0xff]   ;;  %v12259_v46 = vld [vmem:[%s16432_s11 + $0x40] ss:$16 sps:$4 sm:$0xff]  }
 0x6fd   :  { %8533 = vmatprep.subr.bf16.mxu0 %v12177_v26  ;;  %8615 = vmatprep.subr.bf16.mxu1 %v12180_v15  ;;  %v12262_v26 = vld [vmem:[%s16432_s11 + $0x48] ss:$16 sps:$4 sm:$0xff]   ;;  %v12267_v15 = vld [vmem:[%s16432_s11 + $0x64] ss:$16 sps:$4 sm:$0xff]  }
 0x700   :  { %8534 = vmatpush1.bf16.msra.mxu0 %v12175_v29  ;;  %8616 = vmatpush1.bf16.msra.mxu1 %v12178_v57  ;;  %v12270_v29 = vld [vmem:[%s16432_s11 + $0x6c] ss:$16 sps:$4 sm:$0xff]   ;;  %v12265_v57 = vld [vmem:[%s16432_s11 + $0x60] ss:$16 sps:$4 sm:$0xff]  }
 0x701   :  { %8535 = vmatprep.subr.bf16.mxu0 %v12183_v21  ;;  %8617 = vmatprep.subr.bf16.mxu1 %v12186_v9  ;;  %v12268_v21 = vld [vmem:[%s16432_s11 + $0x68] ss:$16 sps:$4 sm:$0xff]   ;;  %v12273_v9 = vld [vmem:[%s16432_s11 + $0x84] ss:$16 sps:$4 sm:$0xff]  }
 0x704   :  { %8536 = vmatpush1.bf16.msra.mxu0 %v12181_v34  ;;  %8618 = vmatpush1.bf16.msra.mxu1 %v12184_v16  ;;  %v12276_v34 = vld [vmem:[%s16432_s11 + $0x8c] ss:$16 sps:$4 sm:$0xff]   ;;  %v12271_v16 = vld [vmem:[%s16432_s11 + $0x80] ss:$16 sps:$4 sm:$0xff]  }
 0x705   :  { %8537 = vmatprep.subr.bf16.mxu0 %v12189_v52  ;;  %8619 = vmatprep.subr.bf16.mxu1 %v12192_v44  ;;  %v12274_v52 = vld [vmem:[%s16432_s11 + $0x88] ss:$16 sps:$4 sm:$0xff]   ;;  %v12279_v44 = vld [vmem:[%s16432_s11 + $0xa4] ss:$16 sps:$4 sm:$0xff]  }
 0x708   :  { %8538 = vmatpush1.bf16.msra.mxu0 %v12187_v19  ;;  %8620 = vmatpush1.bf16.msra.mxu1 %v12190_v14  ;;  %v12282_v19 = vld [vmem:[%s16432_s11 + $0xac] ss:$16 sps:$4 sm:$0xff]   ;;  %v12277_v14 = vld [vmem:[%s16432_s11 + $0xa0] ss:$16 sps:$4 sm:$0xff]  }
 0x709   :  { %8539 = vmatprep.subr.bf16.mxu0 %v12195_v27  ;;  %8621 = vmatprep.subr.bf16.mxu1 %v12198_v40  ;;  %v12280_v27 = vld [vmem:[%s16432_s11 + $0xa8] ss:$16 sps:$4 sm:$0xff]   ;;  %v12285_v40 = vld [vmem:[%s16432_s11 + $0xc4] ss:$16 sps:$4 sm:$0xff]  }
 0x70c   :  { %8540 = vmatpush1.bf16.msra.mxu0 %v12193_v38  ;;  %8622 = vmatpush1.bf16.msra.mxu1 %v12196_v54  ;;  %v12288_v38 = vld [vmem:[%s16432_s11 + $0xcc] ss:$16 sps:$4 sm:$0xff]   ;;  %v12283_v54 = vld [vmem:[%s16432_s11 + $0xc0] ss:$16 sps:$4 sm:$0xff]  }
 0x70d   :  { %8541 = vmatprep.subr.bf16.mxu0 %v12201_v47  ;;  %8623 = vmatprep.subr.bf16.mxu1 %v12204_v8  ;;  %v12286_v47 = vld [vmem:[%s16432_s11 + $0xc8] ss:$16 sps:$4 sm:$0xff]   ;;  %v12291_v8 = vld [vmem:[%s16432_s11 + $0xe4] ss:$16 sps:$4 sm:$0xff]  }
 0x710   :  { %8542 = vmatpush1.bf16.msra.mxu0 %v12199_v17  ;;  %8624 = vmatpush1.bf16.msra.mxu1 %v12202_v59  ;;  %v12294_v17 = vld [vmem:[%s16432_s11 + $0xec] ss:$16 sps:$4 sm:$0xff]   ;;  %v12289_v59 = vld [vmem:[%s16432_s11 + $0xe0] ss:$16 sps:$4 sm:$0xff]  }
 0x711   :  { %8543 = vmatprep.subr.bf16.mxu0 %v12207_v18  ;;  %8625 = vmatprep.subr.bf16.mxu1 %v12210_v30  ;;  %v12292_v18 = vld [vmem:[%s16432_s11 + $0xe8] ss:$16 sps:$4 sm:$0xff]   ;;  %v12297_v30 = vld [vmem:[%s16432_s11 + $0x104] ss:$16 sps:$4 sm:$0xff]  }
 0x714   :  { %8544 = vmatpush1.bf16.msra.mxu0 %v12205_v63  ;;  %8626 = vmatpush1.bf16.msra.mxu1 %v12208_v25  ;;  %v12300_v63 = vld [vmem:[%s16432_s11 + $0x10c] ss:$16 sps:$4 sm:$0xff]   ;;  %v12295_v25 = vld [vmem:[%s16432_s11 + $0x100] ss:$16 sps:$4 sm:$0xff]  }
 0x715   :  { %8545 = vmatprep.subr.bf16.mxu0 %v12213_v50  ;;  %8627 = vmatprep.subr.bf16.mxu1 %v12216_v11  ;;  %v12298_v50 = vld [vmem:[%s16432_s11 + $0x108] ss:$16 sps:$4 sm:$0xff]   ;;  %v12303_v11 = vld [vmem:[%s16432_s11 + $0x124] ss:$16 sps:$4 sm:$0xff]  }
 0x718   :  { %8546 = vmatpush1.bf16.msra.mxu0 %v12211_v48  ;;  %8628 = vmatpush1.bf16.msra.mxu1 %v12214_v62  ;;  %v12306_v48 = vld [vmem:[%s16432_s11 + $0x12c] ss:$16 sps:$4 sm:$0xff]   ;;  %v12301_v62 = vld [vmem:[%s16432_s11 + $0x120] ss:$16 sps:$4 sm:$0xff]  }
 0x719   :  { %8547 = vmatprep.subr.bf16.mxu0 %v12219_v60  ;;  %8629 = vmatprep.subr.bf16.mxu1 %v12222_v35  ;;  %v12304_v60 = vld [vmem:[%s16432_s11 + $0x128] ss:$16 sps:$4 sm:$0xff]   ;;  %v12309_v35 = vld [vmem:[%s16432_s11 + $0x144] ss:$16 sps:$4 sm:$0xff]  }
 0x71c   :  { %8548 = vmatpush1.bf16.msra.mxu0 %v12217_v4  ;;  %8630 = vmatpush1.bf16.msra.mxu1 %v12220_v61  ;;  %v12312_v4 = vld [vmem:[%s16432_s11 + $0x14c] ss:$16 sps:$4 sm:$0xff]   ;;  %v12307_v61 = vld [vmem:[%s16432_s11 + $0x140] ss:$16 sps:$4 sm:$0xff]  }
 0x71d   :  { %8549 = vmatprep.subr.bf16.mxu0 %v12225_v13  ;;  %8631 = vmatprep.subr.bf16.mxu1 %v12228_v10  ;;  %v12310_v13 = vld [vmem:[%s16432_s11 + $0x148] ss:$16 sps:$4 sm:$0xff]   ;;  %v12315_v10 = vld [vmem:[%s16432_s11 + $0x164] ss:$16 sps:$4 sm:$0xff]  }
 0x720   :  { %8550 = vmatpush1.bf16.msra.mxu0 %v12223_v28  ;;  %8632 = vmatpush1.bf16.msra.mxu1 %v12226_v2  ;;  %v12318_v28 = vld [vmem:[%s16432_s11 + $0x16c] ss:$16 sps:$4 sm:$0xff]   ;;  %v12313_v2 = vld [vmem:[%s16432_s11 + $0x160] ss:$16 sps:$4 sm:$0xff]  }
 0x721   :  { %8551 = vmatprep.subr.bf16.mxu0 %v12231_v58  ;;  %8633 = vmatprep.subr.bf16.mxu1 %v12234_v23  ;;  %v12316_v58 = vld [vmem:[%s16432_s11 + $0x168] ss:$16 sps:$4 sm:$0xff]   ;;  %v12321_v23 = vld [vmem:[%s16432_s11 + $0x184] ss:$16 sps:$4 sm:$0xff]  }
 0x724   :  { %8552 = vmatpush1.bf16.msra.mxu0 %v12229_v20  ;;  %8634 = vmatpush1.bf16.msra.mxu1 %v12232_v32  ;;  %v12324_v20 = vld [vmem:[%s16432_s11 + $0x18c] ss:$16 sps:$4 sm:$0xff]   ;;  %v12319_v32 = vld [vmem:[%s16432_s11 + $0x180] ss:$16 sps:$4 sm:$0xff]  }
 0x725   :  { %8553 = vmatprep.subr.bf16.mxu0 %v12237_v36  ;;  %8635 = vmatprep.subr.bf16.mxu1 %v12240_v33  ;;  %v12322_v36 = vld [vmem:[%s16432_s11 + $0x188] ss:$16 sps:$4 sm:$0xff]   ;;  %v12327_v33 = vld [vmem:[%s16432_s11 + $0x1a4] ss:$16 sps:$4 sm:$0xff]  }
 0x728   :  { %8554 = vmatpush1.bf16.msra.mxu0 %v12235_v56  ;;  %8636 = vmatpush1.bf16.msra.mxu1 %v12238_v3  ;;  %v12330_v56 = vld [vmem:[%s16432_s11 + $0x1ac] ss:$16 sps:$4 sm:$0xff]   ;;  %v12325_v3 = vld [vmem:[%s16432_s11 + $0x1a0] ss:$16 sps:$4 sm:$0xff]  }
 0x729   :  { %8555 = vmatprep.subr.bf16.mxu0 %v12243_v5  ;;  %8637 = vmatprep.subr.bf16.mxu1 %v12246_v39  ;;  %v12328_v5 = vld [vmem:[%s16432_s11 + $0x1a8] ss:$16 sps:$4 sm:$0xff]   ;;  %v12331_v39 = vld [vmem:[%s16432_s11 + $0x1c0] ss:$16 sps:$4 sm:$0xff]  }
 0x72c   :  { %8556 = vmatpush1.bf16.msra.mxu0 %v12241_v7  ;;  %8638 = vmatpush1.bf16.msra.mxu1 %v12244_v1  ;;  %v12333_v7 = vld [vmem:[%s16432_s11 + $0x1c4] ss:$16 sps:$4 sm:$0xff]   ;;  %v12334_v1 = vld [vmem:[%s16432_s11 + $0x1c8] ss:$16 sps:$4 sm:$0xff]  }
 0x72d   :  { %9446 = vmatprep.subr.bf16.mxu0 %v12249_v6  ;;  %9528 = vmatprep.subr.bf16.mxu1 %v12252_v42  ;;  %v12336_v6 = vld [vmem:[%s16432_s11 + $0x1cc] ss:$16 sps:$4 sm:$0xff]   ;;  %v12339_v42 = vld [vmem:[%s16432_s11 + $0x1e4] ss:$16 sps:$4 sm:$0xff]  }
 0x72f   :  { %8558 = vmatmul.mubr.bf16.vlgmr.msra.gmra.mrb[124].mxu0 %v7838_v0  ;;  %8640 = vmatmul.mubr.bf16.vlgmr.msra.gmra.mrb[120].mxu1 %v7838_v0  ;;  %v12340_v0 = vld [vmem:[%s16432_s11 + $0x1e8] ss:$16 sps:$4 sm:$0xff]  }
 0x730   :  { %9447 = vmatpush1.bf16.msra.mxu0 %v12247_v51  ;;  %9529 = vmatpush1.bf16.msra.mxu1 %v12250_v37  ;;  %v12342_v51 = vld [vmem:[%s16432_s11 + $0x1ec] ss:$16 sps:$4 sm:$0xff]   ;;  %v12337_v37 = vld [vmem:[%s16432_s11 + $0x1e0] ss:$16 sps:$4 sm:$0xff]  }
 0x731   :  { %9448 = vmatprep.subr.bf16.mxu0 %v12255_v24  ;;  %9530 = vmatprep.subr.bf16.mxu1 %v12258_v22  ;;  %v12345_v24 = vld [vmem:[%s16432_s11 + $0x204] ss:$16 sps:$4 sm:$0xff]   ;;  %v12348_v22 = vld [vmem:[%s16432_s11 + $0x20c] ss:$16 sps:$4 sm:$0xff]  }
 0x734   :  { %9449 = vmatpush1.bf16.msra.mxu0 %v12253_v55  ;;  %9531 = vmatpush1.bf16.msra.mxu1 %v12256_v49  ;;  %v16104_v55 = vld [vmem:[%s16431_s10] sm:$0xf] }
 0x735   :  { %9450 = vmatprep.subr.bf16.mxu0 %v12261_v53  ;;  %9532 = vmatprep.subr.bf16.mxu1 %v12264_v41  ;;  %v7798_v49 = vrot.slane %v16104_v55, %v15658_v12  ;;  %v7802_v53 = vrot.slane %v16104_v55, %v15665_v31  ;;  %v7810_v41 = vrot.slane %v16104_v55, %v15667_v45 }
 0x738   :  { %9451 = vmatpush1.bf16.msra.mxu0 %v12259_v46  ;;  %9533 = vmatpush1.bf16.msra.mxu1 %v12262_v26 }
 0x739   :  { %9452 = vmatprep.subr.bf16.mxu0 %v12267_v15  ;;  %9534 = vmatprep.subr.bf16.mxu1 %v12270_v29 }
 0x73c   :  { %9453 = vmatpush1.bf16.msra.mxu0 %v12265_v57  ;;  %9535 = vmatpush1.bf16.msra.mxu1 %v12268_v21 }
 0x73d   :  { %9454 = vmatprep.subr.bf16.mxu0 %v12273_v9  ;;  %9536 = vmatprep.subr.bf16.mxu1 %v12276_v34 }
 0x740   :  { %9455 = vmatpush1.bf16.msra.mxu0 %v12271_v16  ;;  %9537 = vmatpush1.bf16.msra.mxu1 %v12274_v52 }
 0x741   :  { %9456 = vmatprep.subr.bf16.mxu0 %v12279_v44  ;;  %9538 = vmatprep.subr.bf16.mxu1 %v12282_v19 }
 0x744   :  { %9457 = vmatpush1.bf16.msra.mxu0 %v12277_v14  ;;  %9539 = vmatpush1.bf16.msra.mxu1 %v12280_v27 }
 0x745   :  { %9458 = vmatprep.subr.bf16.mxu0 %v12285_v40  ;;  %9540 = vmatprep.subr.bf16.mxu1 %v12288_v38  ;;  %v12343_v38 = vld [vmem:[%s16432_s11 + $0x200] ss:$16 sps:$4 sm:$0xff]  }
 0x748   :  { %9459 = vmatpush1.bf16.msra.mxu0 %v12283_v54  ;;  %9541 = vmatpush1.bf16.msra.mxu1 %v12286_v47  ;;  %v12346_v54 = vld [vmem:[%s16432_s11 + $0x208] ss:$16 sps:$4 sm:$0xff]  }
 0x749   :  { %9460 = vmatprep.subr.bf16.mxu0 %v12291_v8  ;;  %9542 = vmatprep.subr.bf16.mxu1 %v12294_v17  ;;  %v12351_v8 = vld [vmem:[%s16432_s11 + $0x224] ss:$16 sps:$4 sm:$0xff]   ;;  %v12354_v17 = vld [vmem:[%s16432_s11 + $0x22c] ss:$16 sps:$4 sm:$0xff]  }
 0x74c   :  { %9461 = vmatpush1.bf16.msra.mxu0 %v12289_v59  ;;  %9543 = vmatpush1.bf16.msra.mxu1 %v12292_v18  ;;  %v12349_v18 = vld [vmem:[%s16432_s11 + $0x220] ss:$16 sps:$4 sm:$0xff]  }
 0x74d   :  { %9462 = vmatprep.subr.bf16.mxu0 %v12297_v30  ;;  %9544 = vmatprep.subr.bf16.mxu1 %v12300_v63  ;;  %v12352_v30 = vld [vmem:[%s16432_s11 + $0x228] ss:$16 sps:$4 sm:$0xff]   ;;  %v12357_v63 = vld [vmem:[%s16432_s11 + $0x244] ss:$16 sps:$4 sm:$0xff]  }
 0x750   :  { %9463 = vmatpush1.bf16.msra.mxu0 %v12295_v25  ;;  %9545 = vmatpush1.bf16.msra.mxu1 %v12298_v50  ;;  %v12360_v25 = vld [vmem:[%s16432_s11 + $0x24c] ss:$16 sps:$4 sm:$0xff]   ;;  %v12355_v50 = vld [vmem:[%s16432_s11 + $0x240] ss:$16 sps:$4 sm:$0xff]  }
 0x751   :  { %9464 = vmatprep.subr.bf16.mxu0 %v12303_v11  ;;  %9546 = vmatprep.subr.bf16.mxu1 %v12306_v48  ;;  %v12358_v11 = vld [vmem:[%s16432_s11 + $0x248] ss:$16 sps:$4 sm:$0xff]   ;;  %v12363_v48 = vld [vmem:[%s16432_s11 + $0x264] ss:$16 sps:$4 sm:$0xff]  }
 0x754   :  { %9465 = vmatpush1.bf16.msra.mxu0 %v12301_v62  ;;  %9547 = vmatpush1.bf16.msra.mxu1 %v12304_v60  ;;  %v12366_v62 = vld [vmem:[%s16432_s11 + $0x26c] ss:$16 sps:$4 sm:$0xff]   ;;  %v12361_v60 = vld [vmem:[%s16432_s11 + $0x260] ss:$16 sps:$4 sm:$0xff]  }
 0x755   :  { %9466 = vmatprep.subr.bf16.mxu0 %v12309_v35  ;;  %9548 = vmatprep.subr.bf16.mxu1 %v12312_v4  ;;  %v12364_v35 = vld [vmem:[%s16432_s11 + $0x268] ss:$16 sps:$4 sm:$0xff]   ;;  %v12369_v4 = vld [vmem:[%s16432_s11 + $0x284] ss:$16 sps:$4 sm:$0xff]  }
 0x758   :  { %9467 = vmatpush1.bf16.msra.mxu0 %v12307_v61  ;;  %9549 = vmatpush1.bf16.msra.mxu1 %v12310_v13  ;;  %v12372_v61 = vld [vmem:[%s16432_s11 + $0x28c] ss:$16 sps:$4 sm:$0xff]   ;;  %v12367_v13 = vld [vmem:[%s16432_s11 + $0x280] ss:$16 sps:$4 sm:$0xff]  }
 0x759   :  { %9468 = vmatprep.subr.bf16.mxu0 %v12315_v10  ;;  %9550 = vmatprep.subr.bf16.mxu1 %v12318_v28  ;;  %v12370_v10 = vld [vmem:[%s16432_s11 + $0x288] ss:$16 sps:$4 sm:$0xff]   ;;  %v12375_v28 = vld [vmem:[%s16432_s11 + $0x2a4] ss:$16 sps:$4 sm:$0xff]  }
 0x75c   :  { %9469 = vmatpush1.bf16.msra.mxu0 %v12313_v2  ;;  %9551 = vmatpush1.bf16.msra.mxu1 %v12316_v58  ;;  %v12378_v2 = vld [vmem:[%s16432_s11 + $0x2ac] ss:$16 sps:$4 sm:$0xff]   ;;  %v12373_v58 = vld [vmem:[%s16432_s11 + $0x2a0] ss:$16 sps:$4 sm:$0xff]  }
 0x75d   :  { %9470 = vmatprep.subr.bf16.mxu0 %v12321_v23  ;;  %9552 = vmatprep.subr.bf16.mxu1 %v12324_v20  ;;  %v12376_v23 = vld [vmem:[%s16432_s11 + $0x2a8] ss:$16 sps:$4 sm:$0xff]   ;;  %v12381_v20 = vld [vmem:[%s16432_s11 + $0x2c4] ss:$16 sps:$4 sm:$0xff]  }
 0x760   :  { %9471 = vmatpush1.bf16.msra.mxu0 %v12319_v32  ;;  %9553 = vmatpush1.bf16.msra.mxu1 %v12322_v36  ;;  %v12384_v32 = vld [vmem:[%s16432_s11 + $0x2cc] ss:$16 sps:$4 sm:$0xff]   ;;  %v12379_v36 = vld [vmem:[%s16432_s11 + $0x2c0] ss:$16 sps:$4 sm:$0xff]  }
 0x761   :  { %9472 = vmatprep.subr.bf16.mxu0 %v12327_v33  ;;  %9554 = vmatprep.subr.bf16.mxu1 %v12330_v56  ;;  %v12382_v33 = vld [vmem:[%s16432_s11 + $0x2c8] ss:$16 sps:$4 sm:$0xff]   ;;  %v12387_v56 = vld [vmem:[%s16432_s11 + $0x2e4] ss:$16 sps:$4 sm:$0xff]  }
 0x764   :  { %9473 = vmatpush1.bf16.msra.mxu0 %v12325_v3  ;;  %9555 = vmatpush1.bf16.msra.mxu1 %v12328_v5  ;;  %v12390_v3 = vld [vmem:[%s16432_s11 + $0x2ec] ss:$16 sps:$4 sm:$0xff]   ;;  %v12385_v5 = vld [vmem:[%s16432_s11 + $0x2e0] ss:$16 sps:$4 sm:$0xff]  }
 0x765   :  { %9474 = vmatprep.subr.bf16.mxu0 %v12333_v7  ;;  %9556 = vmatprep.subr.bf16.mxu1 %v12336_v6  ;;  %v12393_v7 = vld [vmem:[%s16432_s11 + $0x304] ss:$16 sps:$4 sm:$0xff]   ;;  %v12391_v6 = vld [vmem:[%s16432_s11 + $0x300] ss:$16 sps:$4 sm:$0xff]  }
 0x768   :  { %9475 = vmatpush1.bf16.msra.mxu0 %v12331_v39  ;;  %9557 = vmatpush1.bf16.msra.mxu1 %v12334_v1  ;;  %v12388_v39 = vld [vmem:[%s16432_s11 + $0x2e8] ss:$16 sps:$4 sm:$0xff]   ;;  %v12396_v1 = vld [vmem:[%s16432_s11 + $0x30c] ss:$16 sps:$4 sm:$0xff]  }
 0x769   :  { %9476 = vmatprep.subr.bf16.mxu0 %v12339_v42  ;;  %9558 = vmatprep.subr.bf16.mxu1 %v12342_v51  ;;  %v12394_v42 = vld [vmem:[%s16432_s11 + $0x308] ss:$16 sps:$4 sm:$0xff]   ;;  %v12399_v51 = vld [vmem:[%s16432_s11 + $0x324] ss:$16 sps:$4 sm:$0xff]  }
 0x76c   :  { %9477 = vmatpush1.bf16.msra.mxu0 %v12337_v37  ;;  %9559 = vmatpush1.bf16.msra.mxu1 %v12340_v0  ;;  %v12402_v37 = vld [vmem:[%s16432_s11 + $0x32c] ss:$16 sps:$4 sm:$0xff]   ;;  %v12397_v0 = vld [vmem:[%s16432_s11 + $0x320] ss:$16 sps:$4 sm:$0xff]  }
 0x76d   :  { %9487 = vmatprep.subr.bf16.mxu0 %v12345_v24  ;;  %9569 = vmatprep.subr.bf16.mxu1 %v12348_v22  ;;  %v12400_v24 = vld [vmem:[%s16432_s11 + $0x328] ss:$16 sps:$4 sm:$0xff]   ;;  %v12405_v22 = vld [vmem:[%s16432_s11 + $0x344] ss:$16 sps:$4 sm:$0xff]  }
 0x802   :  { %v8559_v46 = vpop.f32.mrb[124].mxu0  ;;  %v16112_v26 = vpop.f32.mrb[120].mxu1 }
 0x803   :  { %v11313_v15 = vadd.f32 %v8559_v46, %v7798_v49  ;;  %v8561_v29 = vpop.f32.mrb[125].mxu0  ;;  %v8643_v57 = vpop.f32.mrb[121].mxu1  ;;  %v12408_v49 = vld [vmem:[%s16432_s11 + $0x34c] ss:$16 sps:$4 sm:$0xff]   ;;  %v12411_v46 = vld [vmem:[%s16432_s11 + $0x364] ss:$16 sps:$4 sm:$0xff]  }
 0x804   :  { %v11314_v21 = vadd.f32 %v8561_v29, %v7802_v53  ;;  %v11316_v9 = vadd.f32 %v8643_v57, %v7810_v41  ;;  %v8563_v34 = vpop.f32.mrb[126].mxu0  ;;  %v8645_v16 = vpop.f32.mrb[122].mxu1  ;;  %v12403_v53 = vld [vmem:[%s16432_s11 + $0x340] ss:$16 sps:$4 sm:$0xff]   ;;  %v12406_v41 = vld [vmem:[%s16432_s11 + $0x348] ss:$16 sps:$4 sm:$0xff]  }
 0x805   :  { %v8648_v52 = vmax.f32 %v11313_v15, 0.0  ;;  %v8564_v44 = vpop.f32.mrb[127].mxu0  ;;  %v8646_v19 = vpop.f32.mrb[123].mxu1  ;;  %v12414_v15 = vld [vmem:[%s16432_s11 + $0x36c] ss:$16 sps:$4 sm:$0xff]  }
 0x806   :  { %v8649_v14 = vmax.f32 %v11314_v21, 0.0  ;;  %v8651_v27 = vmax.f32 %v11316_v9, 0.0  ;;  %v12409_v29 = vld [vmem:[%s16432_s11 + $0x360] ss:$16 sps:$4 sm:$0xff]   ;;  %v12412_v57 = vld [vmem:[%s16432_s11 + $0x368] ss:$16 sps:$4 sm:$0xff]  }
 0x807   :  { %v8652_v47 = vpack.c.bf16 %v8648_v52, %v8648_v52  ;;  %v12417_v21 = vld [vmem:[%s16432_s11 + $0x384] ss:$16 sps:$4 sm:$0xff]   ;;  %v12420_v9 = vld [vmem:[%s16432_s11 + $0x38c] ss:$16 sps:$4 sm:$0xff]   ;;  %v12415_v34 = vld [vmem:[%s16432_s11 + $0x380] ss:$16 sps:$4 sm:$0xff]  }
 0x808   :  { %v8653_v40 = vpack.c.bf16 %v8649_v14, %v8649_v14  ;;  %v8655_v59 = vpack.c.bf16 %v8651_v27, %v8651_v27  ;;  %v12418_v16 = vld [vmem:[%s16432_s11 + $0x388] ss:$16 sps:$4 sm:$0xff]   ;;  %v12423_v52 = vld [vmem:[%s16432_s11 + $0x3a4] ss:$16 sps:$4 sm:$0xff]   ;;  %v12426_v44 = vld [vmem:[%s16432_s11 + $0x3ac] ss:$16 sps:$4 sm:$0xff]   ;;  %v7806_v27 = vrot.slane %v16104_v55, %v15663_v43 }
 0x809   :  { %v12421_v19 = vld [vmem:[%s16432_s11 + $0x3a0] ss:$16 sps:$4 sm:$0xff]   ;;  %v12424_v14 = vld [vmem:[%s16432_s11 + $0x3a8] ss:$16 sps:$4 sm:$0xff]  }
 0x80a   :  { %9478 = vmatprep.mubr.bf16.mxu0 %v8653_v40  ;;  %9560 = vmatprep.mubr.bf16.mxu1 %v8653_v40  ;;  %v12429_v40 = vld [vmem:[%s16432_s11 + $0x3c4] ss:$16 sps:$4 sm:$0xff]   ;;  %v12430_v55 = vld [vmem:[%s16432_s11 + $0x3c8] ss:$16 sps:$4 sm:$0xff]  }
 0x80b   :  { %9479 = vmatmul.mubr.bf16.vlgmr.msra.gmra.mrb[128].mxu0 %v8652_v47  ;;  %9561 = vmatmul.mubr.bf16.vlgmr.msra.gmra.mrb[124].mxu1 %v8652_v47  ;;  %v11315_v47 = vadd.f32 %v16112_v26, %v7806_v27  ;;  %v12436_v26 = vld [vmem:[%s16432_s11 + $0x3e8] ss:$16 sps:$4 sm:$0xff]   ;;  %v12468_v27 = vld [vmem:[%s16434_s13 + $0xb0] sm:$0xff]  }
 0x80c   :  { %9488 = vmatpush1.bf16.msra.mxu0 %v12343_v38  ;;  %9570 = vmatpush1.bf16.msra.mxu1 %v12346_v54  ;;  %v12432_v38 = vld [vmem:[%s16432_s11 + $0x3cc] ss:$16 sps:$4 sm:$0xff]   ;;  %v12427_v54 = vld [vmem:[%s16432_s11 + $0x3c0] ss:$16 sps:$4 sm:$0xff]  }
 0x80d   :  { %9519 = vmatprep.mubr.bf16.mxu0 %v8655_v59  ;;  %9601 = vmatprep.mubr.bf16.mxu1 %v8655_v59  ;;  %v12433_v59 = vld [vmem:[%s16432_s11 + $0x3e0] ss:$16 sps:$4 sm:$0xff]  }
 0x80e   :  { %9489 = vmatprep.subr.bf16.mxu0 %v12351_v8  ;;  %9571 = vmatprep.subr.bf16.mxu1 %v12354_v17  ;;  %v12435_v8 = vld [vmem:[%s16432_s11 + $0x3e4] ss:$16 sps:$4 sm:$0xff]   ;;  %v12438_v17 = vld [vmem:[%s16432_s11 + $0x3ec] ss:$16 sps:$4 sm:$0xff]  }
 0x810   :  { %9490 = vmatpush1.bf16.msra.mxu0 %v12349_v18  ;;  %9572 = vmatpush1.bf16.msra.mxu1 %v12352_v30  ;;  %v8650_v18 = vmax.f32 %v11315_v47, 0.0  ;;  %v12439_v30 = vld [vmem:[%s16434_s13 + $0x40] sm:$0xff]  }
 0x811   :  { %9491 = vmatprep.subr.bf16.mxu0 %v12357_v63  ;;  %9573 = vmatprep.subr.bf16.mxu1 %v12360_v25  ;;  %v12440_v63 = vld [vmem:[%s16434_s13] sm:$0xff]  }
 0x812   :  { %v8654_v25 = vpack.c.bf16 %v8650_v18, %v8650_v18  ;;  %v10808_v18 = vld [vmem:[%s16435_s14] ss:$0 sm:$0xff] }
 0x814   :  { %9492 = vmatpush1.bf16.msra.mxu0 %v12355_v50  ;;  %9574 = vmatpush1.bf16.msra.mxu1 %v12358_v11  ;;  %v12441_v50 = vld [vmem:[%s16434_s13 + $0x48] sm:$0xff]  }
 0x815   :  { %9493 = vmatprep.subr.bf16.mxu0 %v12363_v48  ;;  %9575 = vmatprep.subr.bf16.mxu1 %v12366_v62  ;;  %v12442_v11 = vld [vmem:[%s16434_s13 + $0x8] sm:$0xff]   ;;  %v12443_v48 = vld [vmem:[%s16434_s13 + $0x50] sm:$0xff]  }
 0x816   :  { %v12444_v62 = vld [vmem:[%s16434_s13 + $0x10] sm:$0xff]  }
 0x818   :  { %9494 = vmatpush1.bf16.msra.mxu0 %v12361_v60  ;;  %9576 = vmatpush1.bf16.msra.mxu1 %v12364_v35  ;;  %v12445_v60 = vld [vmem:[%s16434_s13 + $0x58] sm:$0xff]  }
 0x819   :  { %9495 = vmatprep.subr.bf16.mxu0 %v12369_v4  ;;  %9577 = vmatprep.subr.bf16.mxu1 %v12372_v61  ;;  %v12446_v35 = vld [vmem:[%s16434_s13 + $0x18] sm:$0xff]   ;;  %v12447_v4 = vld [vmem:[%s16434_s13 + $0x60] sm:$0xff]  }
 0x81a   :  { %v12448_v61 = vld [vmem:[%s16434_s13 + $0x20] sm:$0xff]  }
 0x81c   :  { %9496 = vmatpush1.bf16.msra.mxu0 %v12367_v13  ;;  %9578 = vmatpush1.bf16.msra.mxu1 %v12370_v10  ;;  %v12449_v13 = vld [vmem:[%s16434_s13 + $0x68] sm:$0xff]  }
 0x81d   :  { %9497 = vmatprep.subr.bf16.mxu0 %v12375_v28  ;;  %9579 = vmatprep.subr.bf16.mxu1 %v12378_v2  ;;  %v12450_v10 = vld [vmem:[%s16434_s13 + $0x28] sm:$0xff]   ;;  %v12451_v28 = vld [vmem:[%s16434_s13 + $0x70] sm:$0xff]  }
 0x81e   :  { %v12452_v2 = vld [vmem:[%s16434_s13 + $0x30] sm:$0xff]  }
 0x820   :  { %9498 = vmatpush1.bf16.msra.mxu0 %v12373_v58  ;;  %9580 = vmatpush1.bf16.msra.mxu1 %v12376_v23  ;;  %v12453_v58 = vld [vmem:[%s16434_s13 + $0x78] sm:$0xff]  }
 0x821   :  { %9499 = vmatprep.subr.bf16.mxu0 %v12381_v20  ;;  %9581 = vmatprep.subr.bf16.mxu1 %v12384_v32  ;;  %v12454_v23 = vld [vmem:[%s16434_s13 + $0x38] sm:$0xff]   ;;  %v12455_v20 = vld [vmem:[%s16434_s13 + $0xc0] sm:$0xff]  }
 0x822   :  { %v8784_v32 = vld [vmem:[%s16433_s12] sm:$0xf] }
 0x824   :  { %9500 = vmatpush1.bf16.msra.mxu0 %v12379_v36  ;;  %9582 = vmatpush1.bf16.msra.mxu1 %v12382_v33  ;;  %v8789_v36 = vrot.slane %v8784_v32, %v15658_v12  ;;  %v8793_v33 = vrot.slane %v8784_v32, %v15665_v31  ;;  %v12456_v12 = vld [vmem:[%s16434_s13 + $0x80] sm:$0xff]  }
 0x825   :  { %9501 = vmatprep.subr.bf16.mxu0 %v12387_v56  ;;  %9583 = vmatprep.subr.bf16.mxu1 %v12390_v3  ;;  %v8801_v56 = vrot.slane %v8784_v32, %v15667_v45  ;;  %v12457_v45 = vld [vmem:[%s16434_s13 + $0xc8] sm:$0xff]  }
 0x828   :  { %9502 = vmatpush1.bf16.msra.mxu0 %v12385_v5  ;;  %9584 = vmatpush1.bf16.msra.mxu1 %v12388_v39 }
 0x829   :  { %9503 = vmatprep.subr.bf16.mxu0 %v12393_v7  ;;  %9585 = vmatprep.subr.bf16.mxu1 %v12396_v1 }
 0x82c   :  { %9504 = vmatpush1.bf16.msra.mxu0 %v12391_v6  ;;  %9586 = vmatpush1.bf16.msra.mxu1 %v12394_v42 }
 0x82d   :  { %9505 = vmatprep.subr.bf16.mxu0 %v12399_v51  ;;  %9587 = vmatprep.subr.bf16.mxu1 %v12402_v37 }
 0x830   :  { %9506 = vmatpush1.bf16.msra.mxu0 %v12397_v0  ;;  %9588 = vmatpush1.bf16.msra.mxu1 %v12400_v24 }
 0x831   :  { %9507 = vmatprep.subr.bf16.mxu0 %v12405_v22  ;;  %9589 = vmatprep.subr.bf16.mxu1 %v12408_v49 }
 0x834   :  { %9508 = vmatpush1.bf16.msra.mxu0 %v12403_v53  ;;  %9590 = vmatpush1.bf16.msra.mxu1 %v12406_v41 }
 0x835   :  { %9509 = vmatprep.subr.bf16.mxu0 %v12411_v46  ;;  %9591 = vmatprep.subr.bf16.mxu1 %v12414_v15  ;;  %v12458_v15 = vld [vmem:[%s16434_s13 + $0x88] sm:$0xff]  }
 0x838   :  { %9510 = vmatpush1.bf16.msra.mxu0 %v12409_v29  ;;  %9592 = vmatpush1.bf16.msra.mxu1 %v12412_v57  ;;  %v12459_v29 = vld [vmem:[%s16434_s13 + $0xd0] sm:$0xff]  }
 0x839   :  { %9511 = vmatprep.subr.bf16.mxu0 %v12417_v21  ;;  %9593 = vmatprep.subr.bf16.mxu1 %v12420_v9  ;;  %v12460_v57 = vld [vmem:[%s16434_s13 + $0x90] sm:$0xff]   ;;  %v12461_v21 = vld [vmem:[%s16434_s13 + $0xd8] sm:$0xff]  }
 0x83a   :  { %v12462_v9 = vld [vmem:[%s16434_s13 + $0x98] sm:$0xff]  }
 0x83c   :  { %9512 = vmatpush1.bf16.msra.mxu0 %v12415_v34  ;;  %9594 = vmatpush1.bf16.msra.mxu1 %v12418_v16  ;;  %v12463_v34 = vld [vmem:[%s16434_s13 + $0xe0] sm:$0xff]  }
 0x83d   :  { %9513 = vmatprep.subr.bf16.mxu0 %v12423_v52  ;;  %9595 = vmatprep.subr.bf16.mxu1 %v12426_v44  ;;  %v12464_v16 = vld [vmem:[%s16434_s13 + $0xa0] sm:$0xff]   ;;  %v12465_v52 = vld [vmem:[%s16434_s13 + $0xe8] sm:$0xff]  }
 0x83e   :  { %v12466_v44 = vld [vmem:[%s16434_s13 + $0xa8] sm:$0xff]  }
 0x840   :  { %9514 = vmatpush1.bf16.msra.mxu0 %v12421_v19  ;;  %9596 = vmatpush1.bf16.msra.mxu1 %v12424_v14  ;;  %v8797_v19 = vrot.slane %v8784_v32, %v15663_v43  ;;  %v12467_v14 = vld [vmem:[%s16434_s13 + $0xf0] sm:$0xff]   ;;  %v12470_v43 = vld [vmem:[%s16434_s13 + $0xb8] sm:$0xff]  }
 0x841   :  { %9515 = vmatprep.subr.bf16.mxu0 %v12429_v40  ;;  %9597 = vmatprep.subr.bf16.mxu1 %v12432_v38  ;;  %v12469_v38 = vld [vmem:[%s16434_s13 + $0xf8] sm:$0xff]   ;;  %s12476_s13 = scalar_lea.vmem %s9970_s26, 32 }
 0x842   :  { %p12477_p0 = scmp.ne.s32.totalorder %s9970_s26, %s12476_s13  ;;  %p12482_p2 = scmp.lt.s32.totalorder %s12476_s13, %s12476_s13 }
 0x844   :  { %9516 = vmatpush1.bf16.msra.mxu0 %v12427_v54  ;;  %9598 = vmatpush1.bf16.msra.mxu1 %v12430_v55  ;;  %p12483_p3 = por %p12482_p2, %p12481_p1 }
 0x845   :  { %9517 = vmatprep.subr.bf16.mxu0 %v12435_v8  ;;  %9599 = vmatprep.subr.bf16.mxu1 %v12438_v17 }
 0x846   :  { %p12484_p4 = pnand %p12483_p3, %p12477_p0 }
 0x848   :  { %9518 = vmatpush1.bf16.msra.mxu0 %v12433_v59  ;;  %9600 = vmatpush1.bf16.msra.mxu1 %v12436_v26 }
 0x849   :  { %11101 = vmatprep.subr.bf16.mxu0 %v12439_v30 }
 0x84b   :  { %9520 = vmatmul.mubr.bf16.vlgmr.msra.gmra.mrb[128].mxu0 %v8654_v25  ;;  %9602 = vmatmul.mubr.bf16.vlgmr.msra.gmra.mrb[124].mxu1 %v8654_v25 }
 0x84c   :  { %11102 = vmatpush3.bf16.msra.mxu0 %v12440_v63 }
 0x84d   :  { %11103 = vmatprep.subr.bf16.mxu0 %v12441_v50 }
 0x850   :  { %11104 = vmatpush3.bf16.msra.mxu0 %v12442_v11 }
 0x851   :  { %11105 = vmatprep.subr.bf16.mxu0 %v12443_v48 }
 0x854   :  { %11106 = vmatpush3.bf16.msra.mxu0 %v12444_v62 }
 0x855   :  { %11107 = vmatprep.subr.bf16.mxu0 %v12445_v60 }
 0x858   :  { %11108 = vmatpush3.bf16.msra.mxu0 %v12446_v35 }
 0x859   :  { %11109 = vmatprep.subr.bf16.mxu0 %v12447_v4 }
 0x85c   :  { %11110 = vmatpush3.bf16.msra.mxu0 %v12448_v61 }
 0x85d   :  { %11111 = vmatprep.subr.bf16.mxu0 %v12449_v13 }
 0x860   :  { %11112 = vmatpush3.bf16.msra.mxu0 %v12450_v10 }
 0x861   :  { %11113 = vmatprep.subr.bf16.mxu0 %v12451_v28 }
 0x864   :  { %11114 = vmatpush3.bf16.msra.mxu0 %v12452_v2 }
 0x865   :  { %11115 = vmatprep.subr.bf16.mxu0 %v12453_v58 }
 0x868   :  { %11116 = vmatpush3.bf16.msra.mxu0 %v12454_v23 }
 0x869   :  { %11123 = vmatprep.subr.bf16.mxu0 %v12455_v20 }
 0x91e   :  { %v9521_v3 = vpop.f32.mrb[128].mxu0  ;;  %v9603_v5 = vpop.f32.mrb[124].mxu1 }
 0x91f   :  { %v11317_v39 = vadd.f32 %v9521_v3, %v8789_v36  ;;  %v9523_v7 = vpop.f32.mrb[129].mxu0  ;;  %v9605_v1 = vpop.f32.mrb[125].mxu1  ;;  %v11319_v40 = vadd.f32 %v9603_v5, %v8797_v19 }
 0x920   :  { %v11318_v6 = vadd.f32 %v9523_v7, %v8793_v33  ;;  %v11320_v42 = vadd.f32 %v9605_v1, %v8801_v56  ;;  %v9525_v51 = vpop.f32.mrb[130].mxu0  ;;  %v9607_v37 = vpop.f32.mrb[126].mxu1 }
 0x921   :  { %v9610_v0 = vmax.f32 %v11317_v39, 0.0  ;;  %v9526_v24 = vpop.f32.mrb[131].mxu0  ;;  %v9608_v22 = vpop.f32.mrb[127].mxu1  ;;  %v9612_v54 = vmax.f32 %v11319_v40, 0.0 }
 0x922   :  { %v9611_v49 = vmax.f32 %v11318_v6, 0.0  ;;  %v9613_v53 = vmax.f32 %v11320_v42, 0.0 }
 0x923   :  { %v9614_v31 = vpack.c.bf16 %v9610_v0, %v9610_v0  ;;  %v9616_v55 = vpack.c.bf16 %v9612_v54, %v9612_v54 }
 0x924   :  { %v9615_v41 = vpack.c.bf16 %v9611_v49, %v9611_v49  ;;  %v9617_v46 = vpack.c.bf16 %v9613_v53, %v9613_v53 }
 0x926   :  { %9913 = vmatprep.mubr.bf16.mxu0 %v9615_v41 }
 0x927   :  { %9914 = vmatmul.mubr.bf16.vlgmr.msra.gmra.mrb[132].mxu0 %v9614_v31 }
 0x928   :  { %11124 = vmatpush3.bf16.msra.mxu0 %v12456_v12  ;;  %9953 = vmatprep.mubr.bf16.mxu0 %v9617_v46 }
 0x929   :  { %11125 = vmatprep.subr.bf16.mxu0 %v12457_v45 }
 0x92c   :  { %11126 = vmatpush3.bf16.msra.mxu0 %v12458_v15 }
 0x92d   :  { %11127 = vmatprep.subr.bf16.mxu0 %v12459_v29 }
 0x930   :  { %11128 = vmatpush3.bf16.msra.mxu0 %v12460_v57 }
 0x931   :  { %11129 = vmatprep.subr.bf16.mxu0 %v12461_v21 }
 0x934   :  { %11130 = vmatpush3.bf16.msra.mxu0 %v12462_v9 }
 0x935   :  { %11131 = vmatprep.subr.bf16.mxu0 %v12463_v34 }
 0x938   :  { %11132 = vmatpush3.bf16.msra.mxu0 %v12464_v16 }
 0x939   :  { %11133 = vmatprep.subr.bf16.mxu0 %v12465_v52 }
 0x93c   :  { %11134 = vmatpush3.bf16.msra.mxu0 %v12466_v44 }
 0x93d   :  { %11135 = vmatprep.subr.bf16.mxu0 %v12467_v14 }
 0x940   :  { %11136 = vmatpush3.bf16.msra.mxu0 %v12468_v27 }
 0x941   :  { %11137 = vmatprep.subr.bf16.mxu0 %v12469_v38 }
 0x944   :  { %11138 = vmatpush3.bf16.msra.mxu0 %v12470_v43 }
 0x947   :  { %9954 = vmatmul.mubr.bf16.vlgmr.msra.gmra.mrb[136].mxu0 %v9616_v55 }
 0x9fa   :  { %v11117_v47 = vpop.f32.mrb[132].mxu0 }
 0x9fb   :  { %v11118_v8 = vpop.f32.mrb[133].mxu0 }
 0x9fc   :  { %v11119_v17 = vadd.f32 %v11118_v8, %v11117_v47  ;;  %v11120_v59 = vpop.f32.mrb[134].mxu0 }
 0x9fd   :  { %v11121_v26 = vpop.f32.mrb[135].mxu0 }
 0x9fe   :  { %v9916_v25 = vadd.f32 %v11119_v17, %v10808_v18 }
 0xa1a   :  { %v11139_v30 = vpop.f32.mrb[136].mxu0 }
 0xa1b   :  { %v11140_v63 = vpop.f32.mrb[137].mxu0 }
 0xa1c   :  { %v11141_v50 = vadd.f32 %v11140_v63, %v11139_v30  ;;  %v11142_v11 = vpop.f32.mrb[138].mxu0 }
 0xa1d   :  { %v11143_v48 = vpop.f32.mrb[139].mxu0 }
 0xa1e   :  { %v9956_v62 = vadd.f32 %v11141_v50, %v9916_v25 }
 0xa20   :  { %9962 = vst.msk [vmem:[#allocation13] sm:$0x3] %vm9961_vm4, %v9956_v62 }
 0xa21   :  { %12487 = shalt.err (!%p12484_p4)
}
 0xa22   :  { %s12488_s28 = scalar_lea.hbm %s16436_s15, 32 }
 0xa23   :  { %p12489_p5 = scmp.ne.s32.totalorder %s16436_s15, %s12488_s28  ;;  %p12492_p6 = scmp.lt.u32.totalorder %s12488_s28, %s16436_s15 }
 0xa25   :  { %p12494_p7 = pnand %p12492_p6, %p12489_p5 }
 0xa27   :  { %12497 = shalt.err (!%p12494_p7)
}
 0xa28   :  { %9972 = dma.vmem_to_hbm [thread:$0]  %s9970_s26, 32, %s16436_s15, [#allocation14]  }
 0xa29   :  { %12498 = dma.done.wait [#allocation14], 32  }
 0xa2a   :  { %12499 = vsyncadd [#allocation14], 4294967264 }
 0xa2b   :  { %9976 = vsyncpa [#allocation14], 1 }

</bundles_post_ra>
